<compile_context>
chip_gen: v7x
topology: tpu7x:2x2x1
jax: 0.10.0
libtpu: 0.0.40
codegen_flags: <defaults>
</compile_context>

<pallas_src>
import functools

import jax
import jax.numpy as jnp
from jax.experimental import pallas as pl
from jax.experimental.pallas import tpu as pltpu


MXU_INPUT_DTYPE = jnp.float32     # -> jnp.bfloat16 on v6e/v7x


def _mxu(t):
    return t.astype(MXU_INPUT_DTYPE)


def _rmsnorm(x, gamma):
    # matches F.normalize(x, dim=-1) * dim**0.5 * gamma   (eps = 1e-12)
    ssq = jnp.sum(x * x, axis=-1, keepdims=True)
    inv = jax.lax.rsqrt(jnp.maximum(ssq, 1e-24))           # EUP rsqrt, no sqrt+divide
    return x * inv * (float(x.shape[-1]) ** 0.5) * gamma


# ------------------------------- Pallas kernel --------------------------------

def transformer_kernel(x_ref, gammas_ref, wqkv_ref, wo_ref, cos_ref, sin_ref,
                       fgamma_ref, pw_ref, pb_ref,
                       o_ref, x_scr, *, heads, dim_head):
    """Grid = (layers,). One step = one attention block over ALL batches (rows = B*N).

    The running activation lives in VMEM scratch across the layer axis; per-layer
    weights are the only per-step DMA. The final RMSNorm + Linear is fused into the
    last layer step.
    """
    layer = pl.program_id(0)
    n_layers = pl.num_programs(0)

    B, N, D = x_ref.shape
    HD = heads * dim_head
    half = dim_head // 2
    R = B * N                                             # batch folded into matmul rows

    @pl.when(layer == 0)
    def _():
        x_scr[...] = x_ref[...].reshape(R, D).astype(jnp.float32)

    x = x_scr[...]                                        # (R, D) f32 residual stream
    normed = _rmsnorm(x, gammas_ref[0])                   # (R, D)

    # Fused QKV: one (R, D) @ (D, 3*HD) MXU matmul; slices are 128-aligned.
    qkv = jnp.dot(_mxu(normed), _mxu(wqkv_ref[0]), preferred_element_type=jnp.float32)
    q = qkv[:, :HD]                                       # scale 1/sqrt(dh) baked in Wq
    k = qkv[:, HD:2 * HD]
    v = qkv[:, 2 * HD:]

    # Head split: static, tile-aligned slices (rows multiple of 8, lanes multiple of
    # 128 when dim_head is a multiple of 128) stacked on a leading batch*head axis.
    def to_heads(t):                                      # (R, HD) -> (B*H, N, dh)
        return jnp.stack(
            [t[b * N:(b + 1) * N, h * dim_head:(h + 1) * dim_head]
             for b in range(B) for h in range(heads)], axis=0)

    q3, k3, v3 = to_heads(q), to_heads(k), to_heads(v)

    # RoPE in per-head layout: rotate-half via static half slices + lane concat (no MXU
    # permutation matmul, no head-tiled tables). cos/sin broadcast over batch*heads.
    cos = cos_ref[...][None]                              # (1, N, dh)
    sin = sin_ref[...][None]

    def rope(t):
        rot = jnp.concatenate([-t[..., half:], t[..., :half]], axis=-1)
        return t * cos + rot * sin

    q3 = rope(q3)
    k3 = rope(k3)

    # Batched attention over batch*heads with a single vectorized softmax.
    s = jnp.einsum("hnd,hmd->hnm", _mxu(q3), _mxu(k3),
                   preferred_element_type=jnp.float32)    # (B*H, N, N)
    s = s - jnp.max(s, axis=-1, keepdims=True)
    p = jnp.exp(s)
    inv_denom = pl.reciprocal(jnp.sum(p, axis=-1, keepdims=True), approx=True)  # EUP
    o3 = jnp.einsum("hnm,hmd->hnd", _mxu(p), _mxu(v3),
                    preferred_element_type=jnp.float32)   # (B*H, N, dh)
    o3 = o3 * inv_denom                 # normalize AFTER P@V: (BH,N,dh) not (BH,N,N)

    # Merge heads (dense, 128-aligned concats) + single fused output projection.
    o_cat = jnp.concatenate(
        [jnp.concatenate([o3[b * heads + h] for h in range(heads)], axis=-1)
         for b in range(B)], axis=0)                      # (R, HD)
    attn = jnp.dot(_mxu(o_cat), _mxu(wo_ref[0]), preferred_element_type=jnp.float32)

    x_new = x + attn
    x_scr[...] = x_new

    # Fused final RMSNorm + Linear on the last layer step.
    @pl.when(layer == n_layers - 1)
    def _():
        fn = _rmsnorm(x_new, fgamma_ref[...])
        out = jnp.dot(_mxu(fn), _mxu(pw_ref[...]), preferred_element_type=jnp.float32)
        out = out + pb_ref[...]
        d_out = pw_ref.shape[-1]
        o_ref[...] = out.reshape(B, N, d_out).astype(o_ref.dtype)


# ------------------------------- wrapper (glue) --------------------------------

def transformer_forward(x, params, cos, sin, *, heads, dim_head):
    B, N, D = x.shape
    L = params["wq"].shape[0]
    HD = heads * dim_head
    Dout = params["proj_w"].shape[-1]

    # Host-side, one-time prep: fuse QKV into one (D, 3*HD) weight per layer and bake
    # the 1/sqrt(dim_head) attention scale into the Q columns (exact: RoPE is linear).
    scale = 1.0 / (float(dim_head) ** 0.5)
    wqkv = jnp.concatenate([params["wq"] * scale, params["wk"], params["wv"]], axis=-1)

    kernel = functools.partial(transformer_kernel, heads=heads, dim_head=dim_head)
    return pl.pallas_call(
        kernel,
        out_shape=jax.ShapeDtypeStruct((B, N, Dout), x.dtype),
        grid=(L,),                                         # layer axis, sequential
        in_specs=[
            pl.BlockSpec((B, N, D), lambda l: (0, 0, 0)),        # x (fetched once)
            pl.BlockSpec((1, 1, D), lambda l: (l, 0, 0)),        # per-layer gamma
            pl.BlockSpec((1, D, 3 * HD), lambda l: (l, 0, 0)),   # fused QKV weight
            pl.BlockSpec((1, HD, D), lambda l: (l, 0, 0)),       # out-proj weight
            pl.BlockSpec((N, dim_head), lambda l: (0, 0)),       # cos (not head-tiled)
            pl.BlockSpec((N, dim_head), lambda l: (0, 0)),       # sin
            pl.BlockSpec((1, D), lambda l: (0, 0)),              # final gamma
            pl.BlockSpec((D, Dout), lambda l: (0, 0)),           # proj_w
            pl.BlockSpec((1, Dout), lambda l: (0, 0)),           # proj_b
        ],
        out_specs=pl.BlockSpec((B, N, Dout), lambda l: (0, 0, 0)),
        scratch_shapes=[pltpu.VMEM((B * N, D), jnp.float32)],    # residual stream
        compiler_params=pltpu.CompilerParams(
            dimension_semantics=("arbitrary",),
            vmem_limit_bytes=64 * 1024 * 1024),
    )(x, params["gammas"], wqkv, params["wo"],
      cos, sin, params["final_gamma"], params["proj_w"], params["proj_b"])


def rotary_tables(n, dim_head, theta=32768.0, dtype=jnp.float32):
    # mirrors RotaryEmbedding.forward(arange(n)): freqs = pos x inv_freq, doubled.
    inv_freq = 1.0 / (theta ** (jnp.arange(0, dim_head, 2, dtype=jnp.float32) / dim_head))
    pos = jnp.arange(n, dtype=jnp.float32)
    freqs = pos[:, None] * inv_freq[None, :]
    freqs = jnp.concatenate([freqs, freqs], axis=-1)            # (n, dim_head)
    return jnp.cos(freqs).astype(dtype), jnp.sin(freqs).astype(dtype)


# ----------------------------- pure-JAX reference ------------------------------

def _ref_rmsnorm(x, gamma):
    norm = jnp.sqrt(jnp.sum(x * x, axis=-1, keepdims=True))
    return x / jnp.maximum(norm, 1e-12) * (x.shape[-1] ** 0.5) * gamma


def _ref_forward(x, params, cos, sin, *, heads, dim_head):
    B, N, D = x.shape
    half = dim_head // 2
    L = params["wq"].shape[0]
    for l in range(L):
        normed = _ref_rmsnorm(x, params["gammas"][l])
        q = normed @ params["wq"][l]                            # (B, N, H*dh)
        k = normed @ params["wk"][l]
        v = normed @ params["wv"][l]

        def rope(t):
            t4 = t.reshape(B, N, heads, dim_head)
            t1, t2 = t4[..., :half], t4[..., half:]
            rotated = jnp.concatenate([-t2, t1], axis=-1)
            return t4 * cos[None, :, None, :] + rotated * sin[None, :, None, :]

        q4, k4 = rope(q), rope(k)
        v4 = v.reshape(B, N, heads, dim_head)
        s = jnp.einsum("bnhd,bmhd->bhnm", q4, k4) / (dim_head ** 0.5)
        p = jax.nn.softmax(s, axis=-1)
        o = jnp.einsum("bhnm,bmhd->bnhd", p, v4).reshape(B, N, heads * dim_head)
        x = x + o @ params["wo"][l]
    normed = _ref_rmsnorm(x, params["final_gamma"])
    return normed @ params["proj_w"] + params["proj_b"]


# ------------------------------------ main --------------------------------------

if __name__ == "__main__":
    B, N, D = 2, 16, 256          # batch, sequence, model dim
    H, DH = 2, 128                # heads, dim_head (H*DH == D, all widths 128-lane dense)
    DIM_OUT = 128
    NUM_LAYERS = 2
    HD = H * DH

    key = jax.random.PRNGKey(0)
    key, kx, kg, kfg = jax.random.split(key, 4)
    x = jax.random.normal(kx, (B, N, D), dtype=jnp.float32)

    key, kq, kk, kv, ko, kp, kb = jax.random.split(key, 7)
    params = dict(
        gammas=1.0 + 0.1 * jax.random.normal(kg, (NUM_LAYERS, 1, D), jnp.float32),
        wq=jax.random.normal(kq, (NUM_LAYERS, D, HD), jnp.float32) / (D ** 0.5),
        wk=jax.random.normal(kk, (NUM_LAYERS, D, HD), jnp.float32) / (D ** 0.5),
        wv=jax.random.normal(kv, (NUM_LAYERS, D, HD), jnp.float32) / (D ** 0.5),
        wo=jax.random.normal(ko, (NUM_LAYERS, HD, D), jnp.float32) / (HD ** 0.5),
        final_gamma=1.0 + 0.1 * jax.random.normal(kfg, (1, D), jnp.float32),
        proj_w=jax.random.normal(kp, (D, DIM_OUT), jnp.float32) / (D ** 0.5),
        proj_b=jax.random.normal(kb, (1, DIM_OUT), jnp.float32) * 0.01,
    )

    cos, sin = rotary_tables(N, DH, theta=32768.0)

    with jax.default_matmul_precision("float32"):
        out = transformer_forward(x, params, cos, sin, heads=H, dim_head=DH)
        out = jax.block_until_ready(out)
        ref = _ref_forward(x, params, cos, sin, heads=H, dim_head=DH)

    assert out.shape == (B, N, DIM_OUT), out.shape
    max_err = float(jnp.max(jnp.abs(out - ref)))
    # Tolerance covers the approximate (EUP) softmax-denominator reciprocal.
    assert max_err < 5e-3, max_err

    print("KERNEL_OK")
</pallas_src>

<mosaic_0001>
module attributes {stable_mosaic.version = 11 : i64} {
  func.func @transformer_kernel(%arg0: i32, %arg1: memref<2x16x256xf32, #tpu.memory_space<vmem>>, %arg2: memref<1x1x256xf32, #tpu.memory_space<vmem>>, %arg3: memref<1x256x768xf32, #tpu.memory_space<vmem>>, %arg4: memref<1x256x256xf32, #tpu.memory_space<vmem>>, %arg5: memref<16x128xf32, #tpu.memory_space<vmem>>, %arg6: memref<16x128xf32, #tpu.memory_space<vmem>>, %arg7: memref<1x256xf32, #tpu.memory_space<vmem>>, %arg8: memref<256x128xf32, #tpu.memory_space<vmem>>, %arg9: memref<1x128xf32, #tpu.memory_space<vmem>>, %arg10: memref<2x16x128xf32, #tpu.memory_space<vmem>>, %arg11: memref<32x256xf32, #tpu.memory_space<vmem>>) attributes {dimension_semantics = [#tpu.dimension_semantics<arbitrary>], iteration_bounds = array<i64: 2>, scalar_prefetch = 0 : i64, scratch_operands = 1 : i64, tpu.core_type = #tpu.core_type<tc>, window_params = [{pipeline_mode = #tpu.pipeline_mode<synchronous>, transform_indices = @transform_0, window_bounds = array<i64: 2, 16, 256>}, {transform_indices = @transform_1, window_bounds = array<i64: 1, 1, 256>}, {transform_indices = @transform_2, window_bounds = array<i64: 1, 256, 768>}, {transform_indices = @transform_3, window_bounds = array<i64: 1, 256, 256>}, {pipeline_mode = #tpu.pipeline_mode<synchronous>, transform_indices = @transform_4, window_bounds = array<i64: 16, 128>}, {pipeline_mode = #tpu.pipeline_mode<synchronous>, transform_indices = @transform_5, window_bounds = array<i64: 16, 128>}, {pipeline_mode = #tpu.pipeline_mode<synchronous>, transform_indices = @transform_6, window_bounds = array<i64: 1, 256>}, {pipeline_mode = #tpu.pipeline_mode<synchronous>, transform_indices = @transform_7, window_bounds = array<i64: 256, 128>}, {pipeline_mode = #tpu.pipeline_mode<synchronous>, transform_indices = @transform_8, window_bounds = array<i64: 1, 128>}, {pipeline_mode = #tpu.pipeline_mode<synchronous>, transform_indices = @transform_9, window_bounds = array<i64: 2, 16, 128>}]} {
    %c0_i32 = arith.constant 0 : i32
    %0 = arith.cmpi eq, %arg0, %c0_i32 : i32
    %1 = arith.extui %0 : i1 to i32
    %c0_i32_0 = arith.constant 0 : i32
    %2 = arith.cmpi ne, %1, %c0_i32_0 : i32
    scf.if %2 {
      %c0_28 = arith.constant 0 : index
      %c0_29 = arith.constant 0 : index
      %c0_30 = arith.constant 0 : index
      %106 = vector.load %arg1[%c0_28, %c0_29, %c0_30] : memref<2x16x256xf32, #tpu.memory_space<vmem>>, vector<2x16x256xf32>
      %107 = vector.shape_cast %106 : vector<2x16x256xf32> to vector<32x256xf32>
      %c0_31 = arith.constant 0 : index
      %c0_32 = arith.constant 0 : index
      %108 = vector.load %arg11[%c0_31, %c0_32] : memref<32x256xf32, #tpu.memory_space<vmem>>, vector<32x256xf32>
      tpu.vector_store %arg11[%c0_31, %c0_32], %107 {strides = array<i32>} : memref<32x256xf32, #tpu.memory_space<vmem>>, vector<32x256xf32>,
    } else {
    }
    %c0 = arith.constant 0 : index
    %c0_1 = arith.constant 0 : index
    %3 = vector.load %arg11[%c0, %c0_1] : memref<32x256xf32, #tpu.memory_space<vmem>>, vector<32x256xf32>
    %c0_2 = arith.constant 0 : index
    %c0_3 = arith.constant 0 : index
    %c0_4 = arith.constant 0 : index
    %4 = vector.load %arg2[%c0_2, %c0_3, %c0_4] : memref<1x1x256xf32, #tpu.memory_space<vmem>>, vector<1x1x256xf32>
    %5 = vector.shape_cast %4 : vector<1x1x256xf32> to vector<1x256xf32>
    %6 = arith.mulf %3, %3 : vector<32x256xf32>
    %cst = arith.constant dense<0.000000e+00> : vector<32xf32>
    %7 = vector.multi_reduction <add>, %6, %cst [1] : vector<32x256xf32> to vector<32xf32>
    %8 = vector.shape_cast %7 : vector<32xf32> to vector<32x1xf32>
    %cst_5 = arith.constant 1.000000e-24 : f32
    %9 = vector.broadcast %cst_5 : f32 to vector<32x1xf32>
    %10 = arith.maximumf %8, %9 : vector<32x1xf32>
    %11 = math.rsqrt %10 : vector<32x1xf32>
    %12 = vector.broadcast %11 : vector<32x1xf32> to vector<32x256xf32>
    %13 = arith.mulf %3, %12 : vector<32x256xf32>
    %cst_6 = arith.constant 1.600000e+01 : f32
    %14 = vector.broadcast %cst_6 : f32 to vector<32x256xf32>
    %15 = arith.mulf %13, %14 : vector<32x256xf32>
    %16 = vector.broadcast %5 : vector<1x256xf32> to vector<32x256xf32>
    %17 = arith.mulf %15, %16 : vector<32x256xf32>
    %c0_7 = arith.constant 0 : index
    %c0_8 = arith.constant 0 : index
    %c0_9 = arith.constant 0 : index
    %18 = vector.load %arg3[%c0_7, %c0_8, %c0_9] : memref<1x256x768xf32, #tpu.memory_space<vmem>>, vector<1x256x768xf32>
    %19 = vector.shape_cast %18 : vector<1x256x768xf32> to vector<256x768xf32>
    %cst_10 = arith.constant dense<0.000000e+00> : vector<32x768xf32>
    %20 = tpu.matmul %17, %19, %cst_10 {dimension_numbers = #tpu.dot_dimension_numbers<[1], [0], [0], [1], [0, 0, 1, 1], [], []>, precision = #tpu.contract_precision<fp32>} : vector<32x256xf32>, vector<256x768xf32>, vector<32x768xf32> -> vector<32x768xf32>
    %21 = vector.extract_strided_slice %20 {offsets = [0, 0], sizes = [32, 256], strides = [1, 1]} : vector<32x768xf32> to vector<32x256xf32>
    %22 = vector.extract_strided_slice %20 {offsets = [0, 256], sizes = [32, 256], strides = [1, 1]} : vector<32x768xf32> to vector<32x256xf32>
    %23 = vector.extract_strided_slice %20 {offsets = [0, 512], sizes = [32, 256], strides = [1, 1]} : vector<32x768xf32> to vector<32x256xf32>
    %24 = vector.extract_strided_slice %21 {offsets = [0, 0], sizes = [16, 128], strides = [1, 1]} : vector<32x256xf32> to vector<16x128xf32>
    %25 = vector.extract_strided_slice %21 {offsets = [0, 128], sizes = [16, 128], strides = [1, 1]} : vector<32x256xf32> to vector<16x128xf32>
    %26 = vector.extract_strided_slice %21 {offsets = [16, 0], sizes = [16, 128], strides = [1, 1]} : vector<32x256xf32> to vector<16x128xf32>
    %27 = vector.extract_strided_slice %21 {offsets = [16, 128], sizes = [16, 128], strides = [1, 1]} : vector<32x256xf32> to vector<16x128xf32>
    %28 = vector.shape_cast %24 : vector<16x128xf32> to vector<1x16x128xf32>
    %29 = vector.shape_cast %25 : vector<16x128xf32> to vector<1x16x128xf32>
    %30 = vector.shape_cast %26 : vector<16x128xf32> to vector<1x16x128xf32>
    %31 = vector.shape_cast %27 : vector<16x128xf32> to vector<1x16x128xf32>
    %32 = tpu.concatenate %28, %29, %30, %31 in 0 : vector<1x16x128xf32>, vector<1x16x128xf32>, vector<1x16x128xf32>, vector<1x16x128xf32> -> vector<4x16x128xf32>
    %33 = vector.extract_strided_slice %22 {offsets = [0, 0], sizes = [16, 128], strides = [1, 1]} : vector<32x256xf32> to vector<16x128xf32>
    %34 = vector.extract_strided_slice %22 {offsets = [0, 128], sizes = [16, 128], strides = [1, 1]} : vector<32x256xf32> to vector<16x128xf32>
    %35 = vector.extract_strided_slice %22 {offsets = [16, 0], sizes = [16, 128], strides = [1, 1]} : vector<32x256xf32> to vector<16x128xf32>
    %36 = vector.extract_strided_slice %22 {offsets = [16, 128], sizes = [16, 128], strides = [1, 1]} : vector<32x256xf32> to vector<16x128xf32>
    %37 = vector.shape_cast %33 : vector<16x128xf32> to vector<1x16x128xf32>
    %38 = vector.shape_cast %34 : vector<16x128xf32> to vector<1x16x128xf32>
    %39 = vector.shape_cast %35 : vector<16x128xf32> to vector<1x16x128xf32>
    %40 = vector.shape_cast %36 : vector<16x128xf32> to vector<1x16x128xf32>
    %41 = tpu.concatenate %37, %38, %39, %40 in 0 : vector<1x16x128xf32>, vector<1x16x128xf32>, vector<1x16x128xf32>, vector<1x16x128xf32> -> vector<4x16x128xf32>
    %42 = vector.extract_strided_slice %23 {offsets = [0, 0], sizes = [16, 128], strides = [1, 1]} : vector<32x256xf32> to vector<16x128xf32>
    %43 = vector.extract_strided_slice %23 {offsets = [0, 128], sizes = [16, 128], strides = [1, 1]} : vector<32x256xf32> to vector<16x128xf32>
    %44 = vector.extract_strided_slice %23 {offsets = [16, 0], sizes = [16, 128], strides = [1, 1]} : vector<32x256xf32> to vector<16x128xf32>
    %45 = vector.extract_strided_slice %23 {offsets = [16, 128], sizes = [16, 128], strides = [1, 1]} : vector<32x256xf32> to vector<16x128xf32>
    %46 = vector.shape_cast %42 : vector<16x128xf32> to vector<1x16x128xf32>
    %47 = vector.shape_cast %43 : vector<16x128xf32> to vector<1x16x128xf32>
    %48 = vector.shape_cast %44 : vector<16x128xf32> to vector<1x16x128xf32>
    %49 = vector.shape_cast %45 : vector<16x128xf32> to vector<1x16x128xf32>
    %50 = tpu.concatenate %46, %47, %48, %49 in 0 : vector<1x16x128xf32>, vector<1x16x128xf32>, vector<1x16x128xf32>, vector<1x16x128xf32> -> vector<4x16x128xf32>
    %c0_11 = arith.constant 0 : index
    %c0_12 = arith.constant 0 : index
    %51 = vector.load %arg5[%c0_11, %c0_12] : memref<16x128xf32, #tpu.memory_space<vmem>>, vector<16x128xf32>
    %52 = vector.shape_cast %51 : vector<16x128xf32> to vector<1x16x128xf32>
    %c0_13 = arith.constant 0 : index
    %c0_14 = arith.constant 0 : index
    %53 = vector.load %arg6[%c0_13, %c0_14] : memref<16x128xf32, #tpu.memory_space<vmem>>, vector<16x128xf32>
    %54 = vector.shape_cast %53 : vector<16x128xf32> to vector<1x16x128xf32>
    %55 = vector.extract_strided_slice %32 {offsets = [0, 0, 64], sizes = [4, 16, 64], strides = [1, 1, 1]} : vector<4x16x128xf32> to vector<4x16x64xf32>
    %cst_15 = arith.constant 0.000000e+00 : f32
    %56 = vector.broadcast %cst_15 : f32 to vector<4x16x64xf32>
    %57 = arith.subf %56, %55 : vector<4x16x64xf32>
    %58 = vector.extract_strided_slice %32 {offsets = [0, 0, 0], sizes = [4, 16, 64], strides = [1, 1, 1]} : vector<4x16x128xf32> to vector<4x16x64xf32>
    %59 = tpu.concatenate %57, %58 in 2 : vector<4x16x64xf32>, vector<4x16x64xf32> -> vector<4x16x128xf32>
    %60 = vector.broadcast %52 : vector<1x16x128xf32> to vector<4x16x128xf32>
    %61 = arith.mulf %32, %60 : vector<4x16x128xf32>
    %62 = vector.broadcast %54 : vector<1x16x128xf32> to vector<4x16x128xf32>
    %63 = arith.mulf %59, %62 : vector<4x16x128xf32>
    %64 = arith.addf %61, %63 : vector<4x16x128xf32>
    %65 = vector.extract_strided_slice %41 {offsets = [0, 0, 64], sizes = [4, 16, 64], strides = [1, 1, 1]} : vector<4x16x128xf32> to vector<4x16x64xf32>
    %cst_16 = arith.constant 0.000000e+00 : f32
    %66 = vector.broadcast %cst_16 : f32 to vector<4x16x64xf32>
    %67 = arith.subf %66, %65 : vector<4x16x64xf32>
    %68 = vector.extract_strided_slice %41 {offsets = [0, 0, 0], sizes = [4, 16, 64], strides = [1, 1, 1]} : vector<4x16x128xf32> to vector<4x16x64xf32>
    %69 = tpu.concatenate %67, %68 in 2 : vector<4x16x64xf32>, vector<4x16x64xf32> -> vector<4x16x128xf32>
    %70 = vector.broadcast %52 : vector<1x16x128xf32> to vector<4x16x128xf32>
    %71 = arith.mulf %41, %70 : vector<4x16x128xf32>
    %72 = vector.broadcast %54 : vector<1x16x128xf32> to vector<4x16x128xf32>
    %73 = arith.mulf %69, %72 : vector<4x16x128xf32>
    %74 = arith.addf %71, %73 : vector<4x16x128xf32>
    "tpu.trace_start"() <{level = 10 : i32, message = "hnd,hmd->hnm"}> : () -> ()
    %cst_17 = arith.constant dense<0.000000e+00> : vector<4x16x16xf32>
    %75 = tpu.matmul %64, %74, %cst_17 {dimension_numbers = #tpu.dot_dimension_numbers<[2], [2], [1], [1], [0, 0, 0, 1, 1, 1], [0], [0]>, precision = #tpu.contract_precision<fp32>} : vector<4x16x128xf32>, vector<4x16x128xf32>, vector<4x16x16xf32> -> vector<4x16x16xf32>
    "tpu.trace_stop"() : () -> ()
    %cst_18 = arith.constant dense<0xFF800000> : vector<4x16xf32>
    %76 = vector.multi_reduction <maximumf>, %75, %cst_18 [2] : vector<4x16x16xf32> to vector<4x16xf32>
    %77 = vector.shape_cast %76 : vector<4x16xf32> to vector<4x16x1xf32>
    %78 = vector.broadcast %77 : vector<4x16x1xf32> to vector<4x16x16xf32>
    %79 = arith.subf %75, %78 : vector<4x16x16xf32>
    %80 = math.exp %79 : vector<4x16x16xf32>
    %cst_19 = arith.constant dense<0.000000e+00> : vector<4x16xf32>
    %81 = vector.multi_reduction <add>, %80, %cst_19 [2] : vector<4x16x16xf32> to vector<4x16xf32>
    %82 = vector.shape_cast %81 : vector<4x16xf32> to vector<4x16x1xf32>
    %83 = tpu.reciprocal %82 {approx = true} : vector<4x16x1xf32> -> vector<4x16x1xf32>
    "tpu.trace_start"() <{level = 10 : i32, message = "hnm,hmd->hnd"}> : () -> ()
    %cst_20 = arith.constant dense<0.000000e+00> : vector<4x16x128xf32>
    %84 = tpu.matmul %80, %50, %cst_20 {dimension_numbers = #tpu.dot_dimension_numbers<[2], [1], [1], [2], [0, 0, 0, 1, 1, 2], [0], [0]>, precision = #tpu.contract_precision<fp32>} : vector<4x16x16xf32>, vector<4x16x128xf32>, vector<4x16x128xf32> -> vector<4x16x128xf32>
    "tpu.trace_stop"() : () -> ()
    %85 = vector.broadcast %83 : vector<4x16x1xf32> to vector<4x16x128xf32>
    %86 = arith.mulf %84, %85 : vector<4x16x128xf32>
    %87 = vector.extract_strided_slice %86 {offsets = [0, 0, 0], sizes = [1, 16, 128], strides = [1, 1, 1]} : vector<4x16x128xf32> to vector<1x16x128xf32>
    %88 = vector.shape_cast %87 : vector<1x16x128xf32> to vector<16x128xf32>
    %89 = vector.extract_strided_slice %86 {offsets = [1, 0, 0], sizes = [1, 16, 128], strides = [1, 1, 1]} : vector<4x16x128xf32> to vector<1x16x128xf32>
    %90 = vector.shape_cast %89 : vector<1x16x128xf32> to vector<16x128xf32>
    %91 = tpu.concatenate %88, %90 in 1 : vector<16x128xf32>, vector<16x128xf32> -> vector<16x256xf32>
    %92 = vector.extract_strided_slice %86 {offsets = [2, 0, 0], sizes = [1, 16, 128], strides = [1, 1, 1]} : vector<4x16x128xf32> to vector<1x16x128xf32>
    %93 = vector.shape_cast %92 : vector<1x16x128xf32> to vector<16x128xf32>
    %94 = vector.extract_strided_slice %86 {offsets = [3, 0, 0], sizes = [1, 16, 128], strides = [1, 1, 1]} : vector<4x16x128xf32> to vector<1x16x128xf32>
    %95 = vector.shape_cast %94 : vector<1x16x128xf32> to vector<16x128xf32>
    %96 = tpu.concatenate %93, %95 in 1 : vector<16x128xf32>, vector<16x128xf32> -> vector<16x256xf32>
    %97 = tpu.concatenate %91, %96 in 0 : vector<16x256xf32>, vector<16x256xf32> -> vector<32x256xf32>
    %c0_21 = arith.constant 0 : index
    %c0_22 = arith.constant 0 : index
    %c0_23 = arith.constant 0 : index
    %98 = vector.load %arg4[%c0_21, %c0_22, %c0_23] : memref<1x256x256xf32, #tpu.memory_space<vmem>>, vector<1x256x256xf32>
    %99 = vector.shape_cast %98 : vector<1x256x256xf32> to vector<256x256xf32>
    %cst_24 = arith.constant dense<0.000000e+00> : vector<32x256xf32>
    %100 = tpu.matmul %97, %99, %cst_24 {dimension_numbers = #tpu.dot_dimension_numbers<[1], [0], [0], [1], [0, 0, 1, 1], [], []>, precision = #tpu.contract_precision<fp32>} : vector<32x256xf32>, vector<256x256xf32>, vector<32x256xf32> -> vector<32x256xf32>
    %101 = arith.addf %3, %100 : vector<32x256xf32>
    %c0_25 = arith.constant 0 : index
    %c0_26 = arith.constant 0 : index
    %102 = vector.load %arg11[%c0_25, %c0_26] : memref<32x256xf32, #tpu.memory_space<vmem>>, vector<32x256xf32>
    tpu.vector_store %arg11[%c0_25, %c0_26], %101 {strides = array<i32>} : memref<32x256xf32, #tpu.memory_space<vmem>>, vector<32x256xf32>,
    %c1_i32 = arith.constant 1 : i32
    %103 = arith.cmpi eq, %arg0, %c1_i32 : i32
    %104 = arith.extui %103 : i1 to i32
    %c0_i32_27 = arith.constant 0 : i32
    %105 = arith.cmpi ne, %104, %c0_i32_27 : i32
    scf.if %105 {
      %c0_28 = arith.constant 0 : index
      %c0_29 = arith.constant 0 : index
      %106 = vector.load %arg7[%c0_28, %c0_29] : memref<1x256xf32, #tpu.memory_space<vmem>>, vector<1x256xf32>
      %107 = arith.mulf %101, %101 : vector<32x256xf32>
      %cst_30 = arith.constant dense<0.000000e+00> : vector<32xf32>
      %108 = vector.multi_reduction <add>, %107, %cst_30 [1] : vector<32x256xf32> to vector<32xf32>
      %109 = vector.shape_cast %108 : vector<32xf32> to vector<32x1xf32>
      %cst_31 = arith.constant 1.000000e-24 : f32
      %110 = vector.broadcast %cst_31 : f32 to vector<32x1xf32>
      %111 = arith.maximumf %109, %110 : vector<32x1xf32>
      %112 = math.rsqrt %111 : vector<32x1xf32>
      %113 = vector.broadcast %112 : vector<32x1xf32> to vector<32x256xf32>
      %114 = arith.mulf %101, %113 : vector<32x256xf32>
      %cst_32 = arith.constant 1.600000e+01 : f32
      %115 = vector.broadcast %cst_32 : f32 to vector<32x256xf32>
      %116 = arith.mulf %114, %115 : vector<32x256xf32>
      %117 = vector.broadcast %106 : vector<1x256xf32> to vector<32x256xf32>
      %118 = arith.mulf %116, %117 : vector<32x256xf32>
      %c0_33 = arith.constant 0 : index
      %c0_34 = arith.constant 0 : index
      %119 = vector.load %arg8[%c0_33, %c0_34] : memref<256x128xf32, #tpu.memory_space<vmem>>, vector<256x128xf32>
      %cst_35 = arith.constant dense<0.000000e+00> : vector<32x128xf32>
      %120 = tpu.matmul %118, %119, %cst_35 {dimension_numbers = #tpu.dot_dimension_numbers<[1], [0], [0], [1], [0, 0, 1, 1], [], []>, precision = #tpu.contract_precision<fp32>} : vector<32x256xf32>, vector<256x128xf32>, vector<32x128xf32> -> vector<32x128xf32>
      %c0_36 = arith.constant 0 : index
      %c0_37 = arith.constant 0 : index
      %121 = vector.load %arg9[%c0_36, %c0_37] : memref<1x128xf32, #tpu.memory_space<vmem>>, vector<1x128xf32>
      %122 = vector.broadcast %121 : vector<1x128xf32> to vector<32x128xf32>
      %123 = arith.addf %120, %122 : vector<32x128xf32>
      %124 = vector.shape_cast %123 : vector<32x128xf32> to vector<2x16x128xf32>
      %c0_38 = arith.constant 0 : index
      %c0_39 = arith.constant 0 : index
      %c0_40 = arith.constant 0 : index
      %125 = vector.load %arg10[%c0_38, %c0_39, %c0_40] : memref<2x16x128xf32, #tpu.memory_space<vmem>>, vector<2x16x128xf32>
      tpu.vector_store %arg10[%c0_38, %c0_39, %c0_40], %124 {strides = array<i32>} : memref<2x16x128xf32, #tpu.memory_space<vmem>>, vector<2x16x128xf32>,
    } else {
    }
    return
  }
  func.func @transform_0(%arg0: i32) -> (i32, i32, i32) {
    %c0_i32 = arith.constant 0 : i32
    %c0_i32_0 = arith.constant 0 : i32
    %c0_i32_1 = arith.constant 0 : i32
    %c0_i32_2 = arith.constant 0 : i32
    return %c0_i32, %c0_i32_0, %c0_i32_1 : i32, i32, i32
  }
  func.func @transform_1(%arg0: i32) -> (i32, i32, i32) {
    %c0_i32 = arith.constant 0 : i32
    %c0_i32_0 = arith.constant 0 : i32
    %c0_i32_1 = arith.constant 0 : i32
    return %arg0, %c0_i32, %c0_i32_0 : i32, i32, i32
  }
  func.func @transform_2(%arg0: i32) -> (i32, i32, i32) {
    %c0_i32 = arith.constant 0 : i32
    %c0_i32_0 = arith.constant 0 : i32
    %c0_i32_1 = arith.constant 0 : i32
    return %arg0, %c0_i32, %c0_i32_0 : i32, i32, i32
  }
  func.func @transform_3(%arg0: i32) -> (i32, i32, i32) {
    %c0_i32 = arith.constant 0 : i32
    %c0_i32_0 = arith.constant 0 : i32
    %c0_i32_1 = arith.constant 0 : i32
    return %arg0, %c0_i32, %c0_i32_0 : i32, i32, i32
  }
  func.func @transform_4(%arg0: i32) -> (i32, i32) {
    %c0_i32 = arith.constant 0 : i32
    %c0_i32_0 = arith.constant 0 : i32
    %c0_i32_1 = arith.constant 0 : i32
    return %c0_i32, %c0_i32_0 : i32, i32
  }
  func.func @transform_5(%arg0: i32) -> (i32, i32) {
    %c0_i32 = arith.constant 0 : i32
    %c0_i32_0 = arith.constant 0 : i32
    %c0_i32_1 = arith.constant 0 : i32
    return %c0_i32, %c0_i32_0 : i32, i32
  }
  func.func @transform_6(%arg0: i32) -> (i32, i32) {
    %c0_i32 = arith.constant 0 : i32
    %c0_i32_0 = arith.constant 0 : i32
    %c0_i32_1 = arith.constant 0 : i32
    return %c0_i32, %c0_i32_0 : i32, i32
  }
  func.func @transform_7(%arg0: i32) -> (i32, i32) {
    %c0_i32 = arith.constant 0 : i32
    %c0_i32_0 = arith.constant 0 : i32
    %c0_i32_1 = arith.constant 0 : i32
    return %c0_i32, %c0_i32_0 : i32, i32
  }
  func.func @transform_8(%arg0: i32) -> (i32, i32) {
    %c0_i32 = arith.constant 0 : i32
    %c0_i32_0 = arith.constant 0 : i32
    %c0_i32_1 = arith.constant 0 : i32
    return %c0_i32, %c0_i32_0 : i32, i32
  }
  func.func @transform_9(%arg0: i32) -> (i32, i32, i32) {
    %c0_i32 = arith.constant 0 : i32
    %c0_i32_0 = arith.constant 0 : i32
    %c0_i32_1 = arith.constant 0 : i32
    %c0_i32_2 = arith.constant 0 : i32
    return %c0_i32, %c0_i32_0, %c0_i32_1 : i32, i32, i32
  }
}

</mosaic_0001>

<bundles_post_ra>
// kernel: tpu_custom_call.1
= control target key start
LH: loop header
LB: loop body
LE: loop exit
PB: predicated region body
PF: predicated region fallthrough
CT: control target
= control target key end

     0   :  { %s22832_s0 = inlined_call_operand.hbm [shape: f32[2,16,256], index: 0, kind: input, shape index: {}]   ;;  %s22833_s1 = inlined_call_operand.hbm [shape: f32[2,1,256], index: 1, kind: input, shape index: {}]   ;;  %s22834_s2 = inlined_call_operand.hbm [shape: f32[2,256,768], index: 2, kind: input, shape index: {}]   ;;  %s22835_s3 = inlined_call_operand.hbm [shape: f32[2,256,256], index: 3, kind: input, shape index: {}]   ;;  %s22836_s4 = inlined_call_operand.hbm [shape: f32[16,128], index: 4, kind: input, shape index: {}]   ;;  %s22837_s5 = inlined_call_operand.hbm [shape: f32[16,128], index: 5, kind: input, shape index: {}]   ;;  %s22838_s6 = inlined_call_operand.hbm [shape: f32[1,256], index: 6, kind: input, shape index: {}]   ;;  %s22839_s7 = inlined_call_operand.hbm [shape: f32[256,128], index: 7, kind: input, shape index: {}]   ;;  %s22840_s8 = inlined_call_operand.hbm [shape: f32[1,128], index: 8, kind: input, shape index: {}]   ;;  %s22841_s9 = inlined_call_operand.hbm [shape: f32[2,16,128], index: 9, kind: output, shape index: {}]  }
   0x1   :  { %24016 = sst [smem:[#allocation285_spill]] %s22833_s1 }
   0x2   :  { %24017 = sst [smem:[#allocation286_spill]] %s22836_s4 }
   0x3   :  { %24018 = sst [smem:[#allocation287_spill]] %s22837_s5 }
   0x4   :  { %24019 = sst [smem:[#allocation288_spill]] %s22839_s7 }
   0x5   :  { %24020 = sst [smem:[#allocation289_spill]] %s22841_s9 }
   0x6   :  { %14 = vsyncpa [#allocation4], 0 }
   0x7   :  { %15 = vsyncpa [#allocation7], 0 }
   0x8   :  { %17 = vsyncpa [#allocation7 + $0x1], 0 }
   0x9   :  { %18 = vsyncpa [#allocation10], 0 }
   0xa   :  { %20 = vsyncpa [#allocation10 + $0x1], 0 }
   0xb   :  { %21 = vsyncpa [#allocation13], 0 }
   0xc   :  { %22 = vsyncpa [#allocation16], 0 }
   0xd   :  { %23 = vsyncpa [#allocation5], 0  ;;  %s15977_s30 = smov 0   ;;  %s15979_s10 = smov 0  }
   0xe   :  { %s15981_s11 = smov 0   ;;  %s15983_s12 = smov 0  }
   0xf LB: > { %24021 = sst [smem:[#allocation26_spill]] %s15902_s11  ;;  %s15908_s13 = smov [#allocation11]   ;;  %s15906_s12 = sphi %s15983_s12, %s26186_s12   ;;  %s15902_s11 = sphi %s15981_s11, %s26188_s11   ;;  %s15898_s10 = sphi %s15979_s10, %s26190_s10   ;;  %s15894_s30 = sphi %s15977_s30, %s26189_s30  }
  0x10   : > { %s284_s14 = sshll.u32 %s15908_s13, 4  ;;  %s15998_s15 = sadd.s32 4294967295, %s15906_s12   ;;  %s16004_s14 = int_to_ptr.vmem [resolvable:$true] %s284_s14 }
  0x11   : > { %p12386_p0 = scmp.ge.s32.totalorder %s15906_s12, 1  ;;  %p22843_p1 = scmp.eq.s32.totalorder %s15998_s15, 0 }
  0x12   : > { %p259_p2 = scmp.lt.s32.totalorder %s15906_s12, 3  ;;  %s15909_s17 = smov [#allocation12]  }
  0x13   : > { %s297_s18 = sshll.u32 %s15909_s17, 4  ;;  %s15910_s20 = smov [#allocation15]   ;;  %s16018_s18 = int_to_ptr.vmem [resolvable:$true] %s297_s18 }
  0x14   : > { %p16006_p4 = pnand %p12386_p0, %p259_p2  ;;  %s321_s21 = sshll.u32 %s15910_s20, 4  ;;  %s16020_s21 = int_to_ptr.vmem [resolvable:$true] %s321_s21 }
  0x15   : > { %s24024_s4 = sld [smem:[#allocation286_spill]] }
  0x16   : > { %s24022_s16 = scalar_select %p16006_p4, 1, 0 }
  0x17   : > { %p15408_p5 = pneg %p16006_p4 }
  0x19   : > { %p16014_p6 = pnand %p15408_p5, %p22843_p1 }
  0x1b   : > { %s24023_s19 = scalar_select %p16014_p6, 1, 0 }
  0x1c   : > { %s15564_s24 = scalar_lea.hbm %s24024_s4, 256  ;;  %p16030_p8 = pneg %p16014_p6 }
  0x1d   : > { %p15565_p7 = scmp.ne.s32.totalorder %s24024_s4, %s15564_s24  ;;  %p15571_p11 = scmp.lt.u32.totalorder %s15564_s24, %s24024_s4 }
  0x1e   : > { %s24025_s27 = scalar_select %p16030_p8, 1, 0 }
  0x1f   : > { %p15567_p9 = pnand %p16030_p8, %p15565_p7 }
  0x21   : > { %p15568_p10 = pneg %p15567_p9 }
  0x23   : > { %p15573_p12 = pnand %p15571_p11, %p15568_p10 }
  0x25   : > { %15576 = shalt.err (!%p15573_p12)
}
  0x26   : > { %s15577_s13 = scalar_lea.vmem %s16004_s14, 256  ;;  %p15585_p5 = scmp.lt.s32.totalorder %s16004_s14, %s16004_s14 }
  0x27   : > { %p15578_p13 = scmp.ne.s32.totalorder %s16004_s14, %s15577_s13  ;;  %p15586_p3 = scmp.lt.s32.totalorder %s15577_s13, %s15577_s13 }
  0x29   : > { %p15580_p0 = pnand %p15578_p13, %p16030_p8  ;;  %p15587_p7 = por %p15586_p3, %p15585_p5 }
  0x2b   : > { %p15581_p2 = pneg %p15580_p0 }
  0x2d   : > { %p15588_p9 = pnand %p15587_p7, %p15581_p2 }
  0x2f   : > { %15591 = shalt.err (!%p15588_p9)
}
  0x30   : > { %s15911_s17 = smov 128   ;;  %s15912_s20 = smov 8  }
  0x31   : > { %15414 = dma.hbm_to_vmem [thread:$0]  (!%p16014_p6), %s24024_s4, 256, %s16004_s14, [#allocation10], %s15911_s17, %s15911_s17, %s15912_s20  }
  0x32   : > { %s24026_s5 = sld [smem:[#allocation287_spill]] }
  0x38   : > { %s15592_s26 = scalar_lea.hbm %s24026_s5, 256 }
  0x39   : > { %p15593_p3 = scmp.ne.s32.totalorder %s24026_s5, %s15592_s26  ;;  %p15599_p12 = scmp.lt.u32.totalorder %s15592_s26, %s24026_s5 }
  0x3b   : > { %p15595_p10 = pnand %p15593_p3, %p16030_p8 }
  0x3d   : > { %p15596_p11 = pneg %p15595_p10 }
  0x3f   : > { %p15601_p13 = pnand %p15599_p12, %p15596_p11 }
  0x41   : > { %15604 = shalt.err (!%p15601_p13)
}
  0x42   : > { %s15605_s14 = scalar_lea.vmem %s16018_s18, 256  ;;  %p15613_p7 = scmp.lt.s32.totalorder %s16018_s18, %s16018_s18 }
  0x43   : > { %p15606_p0 = scmp.ne.s32.totalorder %s16018_s18, %s15605_s14  ;;  %p15614_p9 = scmp.lt.s32.totalorder %s15605_s14, %s15605_s14 }
  0x45   : > { %p15608_p2 = pnand %p15606_p0, %p16030_p8  ;;  %p15615_p3 = por %p15614_p9, %p15613_p7 }
  0x47   : > { %p15609_p5 = pneg %p15608_p2 }
  0x49   : > { %p15616_p10 = pnand %p15615_p3, %p15609_p5 }
  0x4b   : > { %15619 = shalt.err (!%p15616_p10)
}
  0x4c   : > { %15417 = dma.hbm_to_vmem [thread:$0]  (!%p16014_p6), %s24026_s5, 256, %s16018_s18, [#allocation13], %s15911_s17, %s15911_s17, %s15912_s20  }
  0x4d   : > { %s24027_s7 = sld [smem:[#allocation288_spill]] }
  0x53   : > { %s15620_s25 = scalar_lea.hbm %s24027_s7, 4096 }
  0x54   : > { %p15621_p11 = scmp.ne.s32.totalorder %s24027_s7, %s15620_s25  ;;  %p15627_p0 = scmp.lt.u32.totalorder %s15620_s25, %s24027_s7 }
  0x56   : > { %p15623_p12 = pnand %p15621_p11, %p16030_p8 }
  0x58   : > { %p15624_p13 = pneg %p15623_p12 }
  0x5a   : > { %p15629_p2 = pnand %p15627_p0, %p15624_p13 }
  0x5c   : > { %15632 = shalt.err (!%p15629_p2)
}
  0x5d   : > { %s15633_s18 = scalar_lea.vmem %s16020_s21, 4096  ;;  %p15641_p3 = scmp.lt.s32.totalorder %s16020_s21, %s16020_s21 }
  0x5e   : > { %p15634_p5 = scmp.ne.s32.totalorder %s16020_s21, %s15633_s18  ;;  %p15642_p10 = scmp.lt.s32.totalorder %s15633_s18, %s15633_s18 }
  0x60   : > { %p15636_p7 = pnand %p15634_p5, %p16030_p8  ;;  %p15643_p11 = por %p15642_p10, %p15641_p3 }
  0x62   : > { %p15637_p9 = pneg %p15636_p7 }
  0x64   : > { %p15644_p12 = pnand %p15643_p11, %p15637_p9 }
  0x66   : > { %15647 = shalt.err (!%p15644_p12)
}
  0x67   : > { %15423 = dma.hbm_to_vmem [thread:$0]  (!%p16014_p6), %s24027_s7, 4096, %s16020_s21, [#allocation16], %s15911_s17, %s15911_s17, %s15912_s20  }
  0x68   : > { %s16107_s22 = sadd.s32 1, %s15906_s12   ;;  %s57_s24 = sadd.s32 1, %s15902_s11 }
  0x69   : > { %24028 = sst [smem:[#allocation27_spill]] %s16107_s22  ;;  %s54_s23 = ssub.s32 %s15906_s12, %s16107_s22 }
  0x6a   : > { %p55_p13 = scmp.eq.s32.totalorder %s54_s23, 0  ;;  %p64_p0 = scmp.ne.s32.totalorder %s15902_s11, %s15898_s10 }
  0x6b   : > { %p65_p2 = scmp.eq.s32.totalorder %s15906_s12, 0  ;;  %p70_p5 = scmp.ne.s32.totalorder %s15898_s10, %s15894_s30 }
  0x6c   : > { %s16118_s25 = scalar_select %p55_p13, %s15902_s11, %s57_s24  }
  0x6d   : > { %p66_p7 = por %p65_p2, %p64_p0  ;;  %p16122_p9 = por %p22843_p1, %p70_p5 }
  0x6e   : > { %24029 = sst [smem:[#allocation28_spill]] %s16118_s25  ;;  %p15443_p3 = scmp.lt.s32.totalorder %s15906_s12, 2 }
  0x6f   : > { %s24030_s26 = scalar_select %p16122_p9, 1, 0 }
  0x70   : > { %s22845_s21 = sand.u32 1, %s15906_s12   ;;  %s16129_s17 = sand.u32 1, %s15902_s11  }
  0x71   : > { %s12394_s20 = sshll.u32 %s16129_s17, 1  ;;  %s12417_s28 = sshll.u32 %s15906_s12, 5 }
  0x72   : > { %s24031_s1 = sld [smem:[#allocation285_spill]]  ;;  %s350_s18 = scalar_lea.vmem [#allocation6], %s12394_s20 }
  0x73   : > { %s358_s14 = sshll.u32 %s350_s18, 4  ;;  %p16138_p10 = pnand %p15443_p3, %p66_p7  ;;  %s16142_s14 = int_to_ptr.vmem [resolvable:$true] %s358_s14 }
  0x74   : > { %s16147_s24 = scalar_lea.sflag [#allocation7], %s22845_s21 }
  0x75   : > { %s24032_s9 = scalar_select %p16138_p10, 1, 0 }
  0x76   : > { %p16153_p12 = pneg %p16138_p10 }
  0x78   : > { %s16136_s30 = scalar_lea.hbm %s24031_s1, %s12417_s28  ;;  %s15653_s18 = scalar_lea.hbm %s24031_s1, 64 }
  0x79   : > { %s15648_s29 = scalar_lea.hbm %s16136_s30, 32  ;;  %p15654_p2 = scmp.lt.u32.totalorder %s16136_s30, %s24031_s1 }
  0x7a   : > { %p15649_p11 = scmp.ne.s32.totalorder %s16136_s30, %s15648_s29  ;;  %p15655_p5 = scmp.lt.u32.totalorder %s15653_s18, %s15648_s29 }
  0x7b   : > { %s24033_s28 = scalar_select %p16153_p12, 1, 0 }
  0x7c   : > { %p15651_p13 = pnand %p16153_p12, %p15649_p11  ;;  %p15656_p7 = por %p15655_p5, %p15654_p2 }
  0x7d   : > { %p15657_p3 = scmp.lt.u32.totalorder %s15648_s29, %s16136_s30 }
  0x7e   : > { %p15652_p0 = pneg %p15651_p13 }
  0x7f   : > { %p15658_p1 = por %p15657_p3, %p15656_p7 }
  0x81   : > { %p15659_p9 = pnand %p15658_p1, %p15652_p0 }
  0x83   : > { %15662 = shalt.err (!%p15659_p9)
}
  0x84   : > { %s15663_s21 = scalar_lea.vmem %s16142_s14, 32  ;;  %s15913_s20 = smov [#allocation6]  }
  0x85   : > { %p15664_p11 = scmp.ne.s32.totalorder %s16142_s14, %s15663_s21  ;;  %s15668_s13 = sshll.u32 %s15913_s20, 4  ;;  %s15669_s13 = int_to_ptr.vmem [resolvable:$false] %s15668_s13 }
  0x86   : > { %s15670_s4 = scalar_lea.vmem %s15669_s13, 64  ;;  %p15671_p6 = scmp.lt.s32.totalorder %s16142_s14, %s15669_s13 }
  0x87   : > { %p15666_p13 = pnand %p15664_p11, %p16153_p12  ;;  %p15672_p8 = scmp.lt.s32.totalorder %s15670_s4, %s15663_s21 }
  0x89   : > { %p15667_p4 = pneg %p15666_p13  ;;  %p15673_p2 = por %p15672_p8, %p15671_p6 }
  0x8b   : > { %p15674_p5 = pnand %p15673_p2, %p15667_p4 }
  0x8d   : > { %15677 = shalt.err (!%p15674_p5)
}
  0x8e   : > { %15430 = dma.hbm_to_vmem [thread:$0]  (!%p16138_p10), %s16136_s30, 32, %s16142_s14, %s16147_s24  }
  0x8f   : > { %s12398_s23 = sshll.u32 %s16129_s17, 9  ;;  %s24034_s29 = smul.u32 1536, %s16129_s17 }
  0x90   : > { %s390_s13 = scalar_lea.vmem [#allocation9], %s12398_s23  ;;  %s15914_s4 = smov [#allocation3]  }
  0x91   : > { %s369_s18 = scalar_lea.vmem [#allocation8], %s24034_s29  ;;  %s397_s21 = sshll.u32 %s390_s13, 4  ;;  %s16182_s21 = int_to_ptr.vmem [resolvable:$true] %s397_s21 }
  0x92   : > { %s376_s20 = sshll.u32 %s369_s18, 4  ;;  %s271_s1 = sshll.u32 %s15914_s4, 4  ;;  %s16180_s20 = int_to_ptr.vmem [resolvable:$true] %s376_s20  ;;  %s272_s1 = int_to_ptr.vmem [resolvable:$true] %s271_s1 }
  0x93   : > { %s15678_s25 = scalar_lea.hbm %s22832_s0, 1024  ;;  %p24035_p4 = scmp.ne.s32.totalorder %s24025_s27, 0 }
  0x94   : > { %p15679_p1 = scmp.ne.s32.totalorder %s22832_s0, %s15678_s25  ;;  %p15685_p9 = scmp.lt.u32.totalorder %s15678_s25, %s22832_s0 }
  0x96   : > { %p15681_p6 = pnand %p15679_p1, %p24035_p4 }
  0x98   : > { %p15682_p8 = pneg %p15681_p6 }
  0x9a   : > { %p15687_p0 = pnand %p15685_p9, %p15682_p8 }
  0x9c   : > { %15690 = shalt.err (!%p15687_p0)
}
  0x9d   : > { %s15691_s14 = scalar_lea.vmem %s272_s1, 1024  ;;  %p15699_p13 = scmp.lt.s32.totalorder %s272_s1, %s272_s1 }
  0x9e   : > { %p15692_p7 = scmp.ne.s32.totalorder %s272_s1, %s15691_s14  ;;  %p15700_p2 = scmp.lt.s32.totalorder %s15691_s14, %s15691_s14 }
  0xa0   : > { %p15694_p3 = pnand %p15692_p7, %p24035_p4  ;;  %p15701_p5 = por %p15700_p2, %p15699_p13 }
  0xa2   : > { %p15695_p11 = pneg %p15694_p3 }
  0xa4   : > { %p15702_p10 = pnand %p15701_p5, %p15695_p11 }
  0xa6   : > { %15705 = shalt.err (!%p15702_p10)
}
  0xa7   : > { %s15915_s5 = smov 256   ;;  %s15916_s7 = smov 16  }
  0xa8   : > { %p24036_p1 = scmp.ne.s32.totalorder %s24023_s19, 0  ;;  %s15917_s25 = smov [#allocation14]  }
  0xa9   : > { %s311_s23 = sshll.u32 %s15917_s25, 4  ;;  %s15918_s29 = smov [#allocation17]   ;;  %s312_s23 = int_to_ptr.vmem [resolvable:$true] %s311_s23 }
  0xaa   : > { %15411 = dma.hbm_to_vmem [thread:$0]  (!%p24036_p1), %s22832_s0, 1024, %s272_s1, [#allocation4], %s15915_s5, %s15915_s5, %s15916_s7  }
  0xab   : > { %s335_s18 = sshll.u32 %s15918_s29, 4  ;;  %s15706_s17 = scalar_lea.hbm %s22838_s6, 32  ;;  %s16205_s18 = int_to_ptr.vmem [resolvable:$true] %s335_s18 }
  0xac   : > { %p15707_p10 = scmp.ne.s32.totalorder %s22838_s6, %s15706_s17  ;;  %p15713_p9 = scmp.lt.u32.totalorder %s15706_s17, %s22838_s6 }
  0xae   : > { %p15709_p6 = pnand %p15707_p10, %p24035_p4 }
  0xb0   : > { %p15710_p8 = pneg %p15709_p6 }
  0xb2   : > { %p15715_p0 = pnand %p15713_p9, %p15710_p8 }
  0xb4   : > { %15718 = shalt.err (!%p15715_p0)
}
  0xb5   : > { %s15719_s22 = scalar_lea.vmem %s312_s23, 32  ;;  %p15727_p13 = scmp.lt.s32.totalorder %s312_s23, %s312_s23 }
  0xb6   : > { %p15720_p7 = scmp.ne.s32.totalorder %s312_s23, %s15719_s22  ;;  %p15728_p2 = scmp.lt.s32.totalorder %s15719_s22, %s15719_s22 }
  0xb8   : > { %p15722_p3 = pnand %p15720_p7, %p24035_p4  ;;  %p15729_p5 = por %p15728_p2, %p15727_p13 }
  0xba   : > { %p15723_p11 = pneg %p15722_p3 }
  0xbc   : > { %p15730_p12 = pnand %p15729_p5, %p15723_p11 }
  0xbe   : > { %15733 = shalt.err (!%p15730_p12)
}
  0xbf   : > { %15420 = dma.hbm_to_vmem [thread:$0]  (!%p24036_p1), %s22838_s6, 32, %s312_s23, [#allocation13]  }
  0xc0   : > { %s15734_s17 = scalar_lea.hbm %s22840_s8, 16 }
  0xc1   : > { %p15735_p10 = scmp.ne.s32.totalorder %s22840_s8, %s15734_s17  ;;  %p15741_p12 = scmp.lt.u32.totalorder %s15734_s17, %s22840_s8 }
  0xc3   : > { %p15737_p6 = pnand %p15735_p10, %p24035_p4 }
  0xc5   : > { %p15738_p8 = pneg %p15737_p6 }
  0xc7   : > { %p15743_p9 = pnand %p15741_p12, %p15738_p8 }
  0xc9   : > { %15746 = shalt.err (!%p15743_p9)
}
  0xca   : > { %s15747_s23 = scalar_lea.vmem %s16205_s18, 16  ;;  %s15754_s22 = scalar_lea.vmem %s16205_s18, 32 }
  0xcb   : > { %p15748_p0 = scmp.ne.s32.totalorder %s16205_s18, %s15747_s23  ;;  %p15755_p11 = scmp.lt.s32.totalorder %s16205_s18, %s16205_s18 }
  0xcc   : > { %p15756_p13 = scmp.lt.s32.totalorder %s15754_s22, %s15747_s23 }
  0xcd   : > { %p15750_p7 = pnand %p15748_p0, %p24035_p4 }
  0xce   : > { %p15757_p2 = por %p15756_p13, %p15755_p11 }
  0xcf   : > { %p15751_p3 = pneg %p15750_p7 }
  0xd1   : > { %p15758_p5 = pnand %p15757_p2, %p15751_p3 }
  0xd3   : > { %15761 = shalt.err (!%p15758_p5)
}
  0xd4   : > { %15426 = dma.hbm_to_vmem [thread:$0]  (!%p24036_p1), %s22840_s8, 16, %s16205_s18, [#allocation16]  }
  0xd5   : > { %s15372_s27 = smul.u32 24576, %s15906_s12  ;;  %s12418_s13 = sshll.u32 %s15906_s12, 13 }
  0xd6   : > { %s16259_s19 = scalar_lea.hbm %s22835_s3, %s12418_s13  ;;  %p24037_p10 = scmp.ne.s32.totalorder %s24033_s28, 0 }
  0xd7   : > { %s16254_s30 = scalar_lea.hbm %s22834_s2, %s15372_s27  ;;  %s15767_s22 = scalar_lea.hbm %s22834_s2, 49152 }
  0xd8   : > { %s15762_s1 = scalar_lea.hbm %s16254_s30, 24576  ;;  %p15768_p8 = scmp.lt.u32.totalorder %s16254_s30, %s22834_s2 }
  0xd9   : > { %p15763_p4 = scmp.ne.s32.totalorder %s16254_s30, %s15762_s1  ;;  %p15769_p12 = scmp.lt.u32.totalorder %s15767_s22, %s15762_s1 }
  0xda   : > { %p15771_p0 = scmp.lt.u32.totalorder %s15762_s1, %s16254_s30 }
  0xdb   : > { %p15765_p1 = pnand %p15763_p4, %p24037_p10  ;;  %p15770_p9 = por %p15769_p12, %p15768_p8 }
  0xdd   : > { %p15766_p6 = pneg %p15765_p1  ;;  %p15772_p7 = por %p15771_p0, %p15770_p9 }
  0xdf   : > { %p15773_p3 = pnand %p15772_p7, %p15766_p6 }
  0xe1   : > { %15776 = shalt.err (!%p15773_p3)
}
  0xe2   : > { %s15777_s27 = scalar_lea.vmem %s16180_s20, 24576  ;;  %s15919_s13 = smov [#allocation8]  }
  0xe3   : > { %p15778_p11 = scmp.ne.s32.totalorder %s16180_s20, %s15777_s27  ;;  %s15782_s4 = sshll.u32 %s15919_s13, 4  ;;  %s15783_s4 = int_to_ptr.vmem [resolvable:$false] %s15782_s4 }
  0xe4   : > { %s15784_s17 = scalar_lea.vmem %s15783_s4, 49152  ;;  %p15785_p5 = scmp.lt.s32.totalorder %s16180_s20, %s15783_s4 }
  0xe5   : > { %p15780_p13 = pnand %p15778_p11, %p24037_p10  ;;  %p15786_p4 = scmp.lt.s32.totalorder %s15784_s17, %s15777_s27 }
  0xe7   : > { %p15781_p2 = pneg %p15780_p13  ;;  %p15787_p1 = por %p15786_p4, %p15785_p5 }
  0xe9   : > { %p15788_p8 = pnand %p15787_p1, %p15781_p2 }
  0xeb   : > { %15791 = shalt.err (!%p15788_p8)
}
  0xec   : > { %s15920_s14 = smov 768   ;;  %s15921_s11 = smov 48  }
  0xed   : > { %p24038_p6 = scmp.ne.s32.totalorder %s24032_s9, 0  ;;  %s24039_s1 = sand.u32 1, %s15906_s12  }
  0xee   : > { %s16285_s18 = scalar_lea.sflag [#allocation10], %s24039_s1  ;;  %s15792_s23 = scalar_lea.hbm %s16259_s19, 8192 }
  0xef   : > { %15433 = dma.hbm_to_vmem [thread:$0]  (!%p24038_p6), %s16254_s30, 24576, %s16180_s20, %s16147_s24, %s15920_s14, %s15920_s14, %s15921_s11  }
  0xf0   : > { %p15793_p12 = scmp.ne.s32.totalorder %s16259_s19, %s15792_s23  ;;  %s15797_s29 = scalar_lea.hbm %s22835_s3, 16384 }
  0xf1   : > { %p15798_p7 = scmp.lt.u32.totalorder %s16259_s19, %s22835_s3  ;;  %p15799_p3 = scmp.lt.u32.totalorder %s15797_s29, %s15792_s23 }
  0xf2   : > { %p15795_p9 = pnand %p15793_p12, %p24037_p10  ;;  %p15801_p13 = scmp.lt.u32.totalorder %s15792_s23, %s16259_s19 }
  0xf3   : > { %p15800_p11 = por %p15799_p3, %p15798_p7 }
  0xf4   : > { %p15796_p0 = pneg %p15795_p9 }
  0xf5   : > { %p15802_p2 = por %p15801_p13, %p15800_p11 }
  0xf7   : > { %p15803_p5 = pnand %p15802_p2, %p15796_p0 }
  0xf9   : > { %15806 = shalt.err (!%p15803_p5)
}
  0xfa   : > { %s15807_s12 = scalar_lea.vmem %s16182_s21, 8192  ;;  %s15922_s24 = smov [#allocation9]  }
  0xfb   : > { %p15808_p4 = scmp.ne.s32.totalorder %s16182_s21, %s15807_s12  ;;  %s15812_s20 = sshll.u32 %s15922_s24, 4  ;;  %s15813_s20 = int_to_ptr.vmem [resolvable:$false] %s15812_s20 }
  0xfc   : > { %s15814_s30 = scalar_lea.vmem %s15813_s20, 16384  ;;  %p15815_p12 = scmp.lt.s32.totalorder %s16182_s21, %s15813_s20 }
  0xfd   : > { %p15810_p1 = pnand %p15808_p4, %p24037_p10  ;;  %p15816_p9 = scmp.lt.s32.totalorder %s15814_s30, %s15807_s12 }
  0xff   : > { %p15811_p8 = pneg %p15810_p1  ;;  %p15817_p7 = por %p15816_p9, %p15815_p12 }
 0x101   : > { %p15818_p3 = pnand %p15817_p7, %p15811_p8 }
 0x103   : > { %15821 = shalt.err (!%p15818_p3)
}
 0x104   : > { %15436 = dma.hbm_to_vmem [thread:$0]  (!%p24038_p6), %s16259_s19, 8192, %s16182_s21, %s16285_s18, %s15915_s5, %s15915_s5, %s15916_s7  }
 0x105   : > { %p24040_p10 = scmp.ne.s32.totalorder %s24022_s16, 0 }
 0x107   : > { %409 = sbr.rel (%p24040_p10) target bundleno = 3134 (0xc3e), region = 56 }
 0x10e   : > { %p24041_p0 = scmp.eq.s32.totalorder %s15998_s15, 0 }
 0x110   : > { %15865 = dma.done.wait (%p24041_p0), [#allocation4], 1024   ;;  %p24042_p11 = pmov %p24041_p0 }
 0x111   : > { %s415_s9 = sand.u32 1, %s15998_s15   ;;  %s417_s28 = sand.u32 1, %s15898_s10  }
 0x112   : > { %15867 = vsyncadd (%p24042_p11), [#allocation4], 4294966272  ;;  %s12403_s4 = sshll.u32 %s417_s28, 1  ;;  %s416_s17 = scalar_lea.sflag [#allocation7], %s415_s9 }
 0x113   : > { %s16320_s14 = scalar_lea.vmem [#allocation6], %s12403_s4  ;;  %p24043_p13 = scmp.ne.s32.totalorder %s24030_s26, 0 }
 0x115   : > { %15869 = dma.done.wait (%p24043_p13), %s416_s17, 24608  }
 0x116   : > { %15871 = vsyncadd (%p24043_p13), %s416_s17, 4294942688  ;;  %s15373_s16 = smul.u32 1536, %s417_s28  ;;  %s12404_s21 = sshll.u32 %s417_s28, 9 }
 0x117   : > { %s434_s7 = scalar_lea.sflag [#allocation10], %s415_s9  ;;  %s16328_s19 = scalar_lea.vmem [#allocation9], %s12404_s21 }
 0x118   : > { %s16326_s5 = scalar_lea.vmem [#allocation8], %s15373_s16 }
 0x119   : > { %15873 = dma.done.wait (%p24043_p13), %s434_s7, 8192  }
 0x11a   : > { %15875 = vsyncadd (%p24043_p13), %s434_s7, 4294959104  ;;  %p24044_p6 = pmov %p24041_p0 }
 0x11b   : > { %p24045_p2 = pmov %p24041_p0 }
 0x11c   : > { %15877 = dma.done.wait (%p24044_p6), [#allocation10], 256  }
 0x11d   : > { %15879 = vsyncadd (%p24045_p2), [#allocation10], 4294967040  ;;  %p24046_p5 = pmov %p24041_p0 }
 0x11e   : > { %p24047_p4 = pmov %p24041_p0 }
 0x11f   : > { %15881 = dma.done.wait (%p24046_p5), [#allocation13], 288  }
 0x120   : > { %15883 = vsyncadd (%p24047_p4), [#allocation13], 4294967008  ;;  %p24048_p1 = pmov %p24041_p0 }
 0x121   : > { %p24049_p8 = pmov %p24041_p0 }
 0x122   : > { %15885 = dma.done.wait (%p24048_p1), [#allocation16], 4112  }
 0x123   : > { %15887 = vsyncadd (%p24049_p8), [#allocation16], 4294963184  ;;  %p24050_p12 = scmp.ne.s32.totalorder %s15998_s15, 0 }
 0x124   : > { %v501_v0 = vld [vmem:[#allocation3] sm:$0xff] (!%p24050_p12)  ;;  %v502_v1 = vld [vmem:[#allocation3 + $0x8] sm:$0xff] (!%p24050_p12)  ;;  %v503_v2 = vld [vmem:[#allocation3 + $0x10] sm:$0xff] (!%p24050_p12) }
 0x125   : > { %500 = sbr.rel (%p24050_p12) target bundleno = 300 (0x12c), region = 96  ;;  %509 = vst [vmem:[#allocation2] sm:$0xff] (!%p24050_p12), %v501_v0  ;;  %510 = vst [vmem:[#allocation2 + $0x8] sm:$0xff] (!%p24050_p12), %v502_v1  ;;  %v504_v3 = vld [vmem:[#allocation3 + $0x18] sm:$0xff] (!%p24050_p12)  ;;  %v505_v4 = vld [vmem:[#allocation3 + $0x20] sm:$0xff] (!%p24050_p12) }
 0x126   : > { %511 = vst [vmem:[#allocation2 + $0x10] sm:$0xff] (!%p24050_p12), %v503_v2  ;;  %v506_v5 = vld [vmem:[#allocation3 + $0x28] sm:$0xff] (!%p24050_p12)  ;;  %512 = vst [vmem:[#allocation2 + $0x18] sm:$0xff] (!%p24050_p12), %v504_v3  ;;  %v507_v6 = vld [vmem:[#allocation3 + $0x30] sm:$0xff] (!%p24050_p12) }
 0x127   : > { %513 = vst [vmem:[#allocation2 + $0x20] sm:$0xff] (!%p24050_p12), %v505_v4  ;;  %514 = vst [vmem:[#allocation2 + $0x28] sm:$0xff] (!%p24050_p12), %v506_v5  ;;  %v508_v7 = vld [vmem:[#allocation3 + $0x38] sm:$0xff] (!%p24050_p12) }
 0x128   : > { %515 = vst [vmem:[#allocation2 + $0x30] sm:$0xff] (!%p24050_p12), %v507_v6  ;;  %516 = vst [vmem:[#allocation2 + $0x38] sm:$0xff] (!%p24050_p12), %v508_v7 }
 0x12c PF: > { %v517_v8 = vld [vmem:[#allocation2] sm:$0xff]  ;;  %v518_v9 = vld [vmem:[#allocation2 + $0x8] sm:$0xff]  ;;  %v16356_v28 = vld [vmem:[%s16326_s5 + $0x10] sm:$0xff]  ;;  %s15923_s26 = smov 64   ;;  %vm5267_vm0 = vcmask 523264   ;;  %vm7412_vm1 = vcmask 130048  }
 0x12d   : > { %v519_v10 = vld [vmem:[#allocation2 + $0x10] sm:$0xff]  ;;  %v526_v11 = vmul.f32 %v517_v8, %v517_v8  ;;  %v527_v12 = vmul.f32 %v518_v9, %v518_v9  ;;  %v520_v13 = vld [vmem:[#allocation2 + $0x18] sm:$0xff]  ;;  %v16359_v29 = vld [vmem:[%s16326_s5 + $0x40] sm:$0xff]  ;;  %v22868_v33 = vand.u32 4294901760, %v16356_v28  ;;  %p12411_p9 = scmp.ne.s32.totalorder %s15998_s15, 1 }
 0x12e   : > { %v528_v14 = vmul.f32 %v519_v10, %v519_v10  ;;  %v521_v15 = vld [vmem:[#allocation2 + $0x20] sm:$0xff]  ;;  %v522_v16 = vld [vmem:[#allocation2 + $0x28] sm:$0xff]  ;;  %v529_v17 = vmul.f32 %v520_v13, %v520_v13  ;;  %v16370_v36 = vld [vmem:[%s16326_s5 + $0x70] sm:$0xff]  ;;  %v22867_v39 = vand.u32 4294901760, %v16359_v29 }
 0x12f   : > { %v530_v18 = vmul.f32 %v521_v15, %v521_v15  ;;  %v531_v19 = vmul.f32 %v522_v16, %v522_v16  ;;  %v523_v20 = vld [vmem:[#allocation2 + $0x30] sm:$0xff]  ;;  %v524_v21 = vld [vmem:[#allocation2 + $0x38] sm:$0xff]  ;;  %v534_v23 = vadd.f32 %v527_v12, %v526_v11  ;;  %24051 = vst [vmem:[#allocation29_spill] sm:$0xff] %v16370_v36  ;;  %v16380_v41 = vld [vmem:[%s16326_s5 + $0xa0] sm:$0xff]  ;;  %v16392_v45 = vsub.f32 %v16356_v28, %v22868_v33 }
 0x130   : > { %v16349_v22 = vld [vmem:[%s16326_s5 + $0x18] sm:$0xff]  ;;  %v532_v24 = vmul.f32 %v523_v20, %v523_v20  ;;  %v533_v25 = vmul.f32 %v524_v21, %v524_v21  ;;  %v16352_v26 = vld [vmem:[%s16326_s5 + $0x48] sm:$0xff]  ;;  %v537_v30 = vadd.f32 %v529_v17, %v528_v14  ;;  %24053 = vst [vmem:[#allocation31_spill] sm:$0xff] %v16380_v41  ;;  %v22863_v47 = vand.u32 4294901760, %v16370_v36  ;;  %v589_v48 = vld [vmem:[%s16326_s5] sm:$0xff] }
 0x131   : > { %v22872_v27 = vand.u32 4294901760, %v16349_v22  ;;  %v540_v31 = vadd.f32 %v531_v19, %v530_v18  ;;  %v22870_v32 = vand.u32 4294901760, %v16352_v26  ;;  %v16364_v34 = vld [vmem:[%s16326_s5 + $0x78] sm:$0xff]  ;;  %v16367_v35 = vld [vmem:[%s16326_s5 + $0xa8] sm:$0xff]  ;;  %535 = vadd.xlane.f32.xlu0 %v534_v23  ;;  %24055 = vst [vmem:[#allocation33_spill] sm:$0xff] %v16392_v45  ;;  %v16400_v49 = vsub.f32 %v16359_v29, %v22867_v39  ;;  %v595_v53 = vld [vmem:[%s16326_s5 + $0x30] sm:$0xff] }
 0x132   : > { %v543_v37 = vadd.f32 %v533_v25, %v532_v24  ;;  %v22865_v40 = vand.u32 4294901760, %v16364_v34  ;;  %v590_v42 = vld [vmem:[%s16326_s5 + $0x8] sm:$0xff]  ;;  %v596_v43 = vld [vmem:[%s16326_s5 + $0x38] sm:$0xff]  ;;  %v22864_v46 = vand.u32 4294901760, %v16367_v35  ;;  %v22862_v51 = vand.u32 4294901760, %v16380_v41  ;;  %v16437_v0 = vld [vmem:[%s16326_s5 + $0xd0] sm:$0xff] }
 0x133   : > { %v16375_v38 = vsub.f32 %v16349_v22, %v22872_v27  ;;  %541 = vadd.xlane.f32.xlu1 %v540_v31  ;;  %v16387_v44 = vsub.f32 %v16352_v26, %v22870_v32  ;;  %24056 = vst [vmem:[#allocation34_spill] sm:$0xff] %v16400_v49  ;;  %v781_v52 = vand.u32 4294901760, %v590_v42  ;;  %v16419_v56 = vsub.f32 %v16370_v36, %v22863_v47  ;;  %v16422_v58 = vld [vmem:[%s16326_s5 + $0xd8] sm:$0xff]  ;;  %v16425_v59 = vld [vmem:[%s16326_s5 + $0x108] sm:$0xff]  ;;  %v16440_v1 = vld [vmem:[%s16326_s5 + $0x100] sm:$0xff] }
 0x134   : > { %v16405_v50 = vsub.f32 %v16364_v34, %v22865_v40  ;;  %v16414_v55 = vsub.f32 %v16367_v35, %v22864_v46  ;;  %v785_v57 = vand.u32 4294901760, %v596_v43  ;;  %24060 = vst [vmem:[#allocation38_spill] sm:$0xff] %v16422_v58  ;;  %24061 = vst [vmem:[#allocation39_spill] sm:$0xff] %v16425_v59  ;;  %v13725_v60 = vpack.c.bf16 %v16400_v49, %v16392_v45  ;;  %v602_v6 = vld [vmem:[%s16326_s5 + $0x68] sm:$0xff]  ;;  %v608_v7 = vld [vmem:[%s16326_s5 + $0x98] sm:$0xff] }
 0x135   : > { %24052 = vst [vmem:[#allocation30_spill] sm:$0xff] %v16375_v38  ;;  %24054 = vst [vmem:[#allocation32_spill] sm:$0xff] %v16387_v44  ;;  %v13723_v54 = vpack.c.bf16 %v16387_v44, %v16375_v38  ;;  %538 = vadd.xlane.f32.xlu0 %v537_v30  ;;  %v16432_v61 = vsub.f32 %v16380_v41, %v22862_v51  ;;  %v16434_v62 = vsub.f32 %v590_v42, %v781_v52  ;;  %v601_v12 = vld [vmem:[%s16326_s5 + $0x60] sm:$0xff]  ;;  %v607_v13 = vld [vmem:[%s16326_s5 + $0x90] sm:$0xff] }
 0x136   : > { %24057 = vst [vmem:[#allocation35_spill] sm:$0xff] %v16405_v50  ;;  %24058 = vst [vmem:[#allocation36_spill] sm:$0xff] %v16414_v55  ;;  %v783_v63 = vand.u32 4294901760, %v589_v48  ;;  %v13727_v2 = vpack.c.bf16 %v16414_v55, %v16405_v50  ;;  %v16444_v3 = vpack.c.bf16 %v785_v57, %v781_v52  ;;  %v16446_v4 = vsub.f32 %v596_v43, %v785_v57  ;;  %v16476_v23 = vld [vmem:[%s16326_s5 + $0x138] sm:$0xff]  ;;  %v16479_v24 = vld [vmem:[%s16326_s5 + $0x168] sm:$0xff] }
 0x137   : > { %24059 = vst [vmem:[#allocation37_spill] sm:$0xff] %v16419_v56  ;;  %24062 = vst [vmem:[#allocation40_spill] sm:$0xff] %v16432_v61  ;;  %544 = vadd.xlane.f32.xlu1 %v543_v37  ;;  %13724 = vmatprep.subr.bf16.mxu1 %v13723_v54  ;;  %v787_v5 = vand.u32 4294901760, %v595_v53  ;;  %v13729_v8 = vpack.c.bf16 %v16432_v61, %v16419_v56  ;;  %v22861_v10 = vand.u32 4294901760, %v16422_v58  ;;  %v22860_v11 = vand.u32 4294901760, %v16425_v59  ;;  %v16493_v42 = vld [vmem:[%s16326_s5 + $0x130] sm:$0xff] }
 0x138   : > { %24063 = vst [vmem:[#allocation41_spill] sm:$0xff] %v16434_v62  ;;  %24064 = vst [vmem:[#allocation42_spill] sm:$0xff] %v16437_v0  ;;  %13726 = vmatpush1.bf16.msra.mxu1 %v13725_v60  ;;  %v16452_v9 = vsub.f32 %v589_v48, %v783_v63  ;;  %13212 = vmatprep.subr.bf16.mxu0 %v16444_v3  ;;  %v22859_v16 = vand.u32 4294901760, %v16437_v0  ;;  %v22858_v17 = vand.u32 4294901760, %v16440_v1  ;;  %v789_v20 = vand.u32 4294901760, %v602_v6  ;;  %v16496_v43 = vld [vmem:[%s16326_s5 + $0x160] sm:$0xff] }
 0x139   : > { %24065 = vst [vmem:[#allocation43_spill] sm:$0xff] %v16440_v1  ;;  %24066 = vst [vmem:[#allocation44_spill] sm:$0xff] %v16444_v3  ;;  %13728 = vmatprep.subr.bf16.mxu1 %v13727_v2  ;;  %v16459_v14 = vpack.c.bf16 %v787_v5, %v783_v63  ;;  %v16461_v15 = vsub.f32 %v595_v53, %v787_v5  ;;  %v16468_v18 = vsub.f32 %v16422_v58, %v22861_v10  ;;  %v614_v48 = vld [vmem:[%s16326_s5 + $0xc8] sm:$0xff]  ;;  %v620_v60 = vld [vmem:[%s16326_s5 + $0xf8] sm:$0xff] }
 0x13a   : > { %24067 = vst [vmem:[#allocation45_spill] sm:$0xff] %v16446_v4  ;;  %24068 = vst [vmem:[#allocation46_spill] sm:$0xff] %v16452_v9  ;;  %v16473_v19 = vsub.f32 %v16425_v59, %v22860_v11  ;;  %v793_v21 = vand.u32 4294901760, %v608_v7  ;;  %v16485_v25 = vsub.f32 %v16437_v0, %v22859_v16  ;;  %v16490_v30 = vsub.f32 %v16440_v1, %v22858_v17  ;;  %v613_v63 = vld [vmem:[%s16326_s5 + $0xc0] sm:$0xff]  ;;  %v619_v2 = vld [vmem:[%s16326_s5 + $0xf0] sm:$0xff] }
 0x13b   : > { %24069 = vst [vmem:[#allocation47_spill] sm:$0xff] %v16459_v14  ;;  %24070 = vst [vmem:[#allocation48_spill] sm:$0xff] %v16461_v15  ;;  %13214 = vmatpush1.bf16.msra.mxu0 %v16459_v14  ;;  %v791_v31 = vand.u32 4294901760, %v601_v12  ;;  %v795_v37 = vand.u32 4294901760, %v607_v13  ;;  %v16503_v54 = vsub.f32 %v602_v6, %v789_v20  ;;  %v22866_v6 = vand.u32 4294901760, %v16476_v23  ;;  %v16528_v11 = vld [vmem:[%s16326_s5 + $0x1c8] sm:$0xff] }
 0x13c   : > { %24071 = vst [vmem:[#allocation49_spill] sm:$0xff] %v16468_v18  ;;  %24072 = vst [vmem:[#allocation50_spill] sm:$0xff] %v16473_v19  ;;  %13730 = vmatpush1.bf16.msra.mxu1 %v13729_v8  ;;  %v13731_v52 = vpack.c.bf16 %v16473_v19, %v16468_v18  ;;  %v16501_v53 = vpack.c.bf16 %v793_v21, %v789_v20  ;;  %v16505_v57 = vsub.f32 %v608_v7, %v793_v21  ;;  %v16554_v40 = vld [vmem:[%s16326_s5 + $0x1c0] sm:$0xff]  ;;  %v643_v61 = vld [vmem:[%s16326_s5 + $0x1b0] sm:$0xff] }
 0x13d   : > { %24073 = vst [vmem:[#allocation51_spill] sm:$0xff] %v16476_v23  ;;  %24074 = vst [vmem:[#allocation52_spill] sm:$0xff] %v16479_v24  ;;  %v13733_v5 = vpack.c.bf16 %v16490_v30, %v16485_v25  ;;  %v16512_v17 = vpack.c.bf16 %v795_v37, %v791_v31  ;;  %v16514_v8 = vsub.f32 %v601_v12, %v791_v31  ;;  %v22869_v7 = vand.u32 4294901760, %v16479_v24  ;;  %v625_v27 = vld [vmem:[%s16326_s5 + $0x120] sm:$0xff]  ;;  %v751_v41 = vld [vmem:[%s16326_s5 + $0x510] sm:$0xff] }
 0x13e   : > { %24075 = vst [vmem:[#allocation53_spill] sm:$0xff] %v16485_v25  ;;  %24076 = vst [vmem:[#allocation54_spill] sm:$0xff] %v16490_v30  ;;  %v16516_v16 = vsub.f32 %v607_v13, %v795_v37  ;;  %13732 = vmatprep.subr.bf16.mxu1 %v13731_v52  ;;  %13216 = vmatprep.subr.bf16.mxu0 %v16501_v53  ;;  %v22871_v20 = vand.u32 4294901760, %v16493_v42  ;;  %v22875_v21 = vand.u32 4294901760, %v16496_v43  ;;  %v797_v12 = vand.u32 4294901760, %v614_v48  ;;  %v16525_v52 = vld [vmem:[%s16326_s5 + $0x198] sm:$0xff] }
 0x13f   : > { %24077 = vst [vmem:[#allocation55_spill] sm:$0xff] %v16493_v42  ;;  %24078 = vst [vmem:[#allocation56_spill] sm:$0xff] %v16496_v43  ;;  %13218 = vmatpush1.bf16.msra.mxu0 %v16512_v17  ;;  %v801_v31 = vand.u32 4294901760, %v620_v60  ;;  %v799_v13 = vand.u32 4294901760, %v613_v63  ;;  %v803_v37 = vand.u32 4294901760, %v619_v2  ;;  %v16533_v10 = vsub.f32 %v16476_v23, %v22866_v6  ;;  %v626_v6 = vld [vmem:[%s16326_s5 + $0x128] sm:$0xff] }
 0x140   : > { %24079 = vst [vmem:[#allocation57_spill] sm:$0xff] %v16501_v53  ;;  %24080 = vst [vmem:[#allocation58_spill] sm:$0xff] %v16503_v54  ;;  %13734 = vmatpush1.bf16.msra.mxu1 %v13733_v5  ;;  %v16538_v51 = vsub.f32 %v16479_v24, %v22869_v7  ;;  %v16543_v47 = vsub.f32 %v16493_v42, %v22871_v20  ;;  %v16548_v46 = vsub.f32 %v16496_v43, %v22875_v21  ;;  %v16551_v5 = vld [vmem:[%s16326_s5 + $0x190] sm:$0xff]  ;;  %v632_v20 = vld [vmem:[%s16326_s5 + $0x158] sm:$0xff] }
 0x141   : > { %24081 = vst [vmem:[#allocation59_spill] sm:$0xff] %v16505_v57  ;;  %24082 = vst [vmem:[#allocation60_spill] sm:$0xff] %v16512_v17  ;;  %v16557_v39 = vpack.c.bf16 %v801_v31, %v797_v12  ;;  %v16559_v33 = vsub.f32 %v614_v48, %v797_v12  ;;  %v16561_v7 = vsub.f32 %v620_v60, %v801_v31  ;;  %v631_v17 = vld [vmem:[%s16326_s5 + $0x150] sm:$0xff]  ;;  %v22894_v48 = vand.u32 4294901760, %v16525_v52  ;;  %v16586_v60 = vld [vmem:[%s16326_s5 + $0x228] sm:$0xff] }
 0x142   : > { %24083 = vst [vmem:[#allocation61_spill] sm:$0xff] %v16514_v8  ;;  %24084 = vst [vmem:[#allocation62_spill] sm:$0xff] %v16516_v16  ;;  %v16563_v32 = vpack.c.bf16 %v803_v37, %v799_v13  ;;  %v13735_v21 = vpack.c.bf16 %v16538_v51, %v16533_v10  ;;  %v13737_v53 = vpack.c.bf16 %v16548_v46, %v16543_v47  ;;  %v637_v18 = vld [vmem:[%s16326_s5 + $0x180] sm:$0xff]  ;;  %v739_v43 = vld [vmem:[%s16326_s5 + $0x4b0] sm:$0xff] }
 0x143   : > { %24085 = vst [vmem:[#allocation63_spill] sm:$0xff] %v16525_v52  ;;  %24086 = vst [vmem:[#allocation64_spill] sm:$0xff] %v16528_v11  ;;  %v16572_v14 = vsub.f32 %v613_v63, %v799_v13  ;;  %v16574_v3 = vsub.f32 %v619_v2, %v803_v37  ;;  %13220 = vmatprep.subr.bf16.mxu0 %v16557_v39  ;;  %v805_v63 = vand.u32 4294901760, %v626_v6  ;;  %v809_v13 = vand.u32 4294901760, %v632_v20  ;;  %v649_v38 = vld [vmem:[%s16326_s5 + $0x1e0] sm:$0xff] }
 0x144   : > { %24087 = vst [vmem:[#allocation65_spill] sm:$0xff] %v16533_v10  ;;  %24088 = vst [vmem:[#allocation66_spill] sm:$0xff] %v16538_v51  ;;  %13736 = vmatprep.subr.bf16.mxu1 %v13735_v21  ;;  %13222 = vmatpush1.bf16.msra.mxu0 %v16563_v32  ;;  %v807_v2 = vand.u32 4294901760, %v625_v27  ;;  %v811_v37 = vand.u32 4294901760, %v631_v17  ;;  %v16591_v31 = vsub.f32 %v16525_v52, %v22894_v48  ;;  %v24102_v21 = vand.u32 4294901760, %v16528_v11  ;;  %v16612_v10 = vld [vmem:[%s16326_s5 + $0x220] sm:$0xff] }
 0x145   : > { %24089 = vst [vmem:[#allocation67_spill] sm:$0xff] %v16543_v47  ;;  %24090 = vst [vmem:[#allocation68_spill] sm:$0xff] %v16548_v46  ;;  %13738 = vmatpush1.bf16.msra.mxu1 %v13737_v53  ;;  %v24106_v47 = vand.u32 4294901760, %v16554_v40  ;;  %v16609_v53 = vld [vmem:[%s16326_s5 + $0x1f0] sm:$0xff]  ;;  %v638_v48 = vld [vmem:[%s16326_s5 + $0x188] sm:$0xff]  ;;  %v16615_v30 = vpack.c.bf16 %v809_v13, %v805_v63  ;;  %v16617_v25 = vsub.f32 %v626_v6, %v805_v63 }
 0x146   : > { %24091 = vst [vmem:[#allocation69_spill] sm:$0xff] %v16551_v5  ;;  %24092 = vst [vmem:[#allocation70_spill] sm:$0xff] %v16554_v40  ;;  %v16596_v12 = vsub.f32 %v16528_v11, %v24102_v21  ;;  %v16619_v21 = vsub.f32 %v632_v20, %v809_v13  ;;  %v16621_v19 = vpack.c.bf16 %v811_v37, %v807_v2  ;;  %v16644_v20 = vld [vmem:[%s16326_s5 + $0x288] sm:$0xff]  ;;  %v733_v52 = vld [vmem:[%s16326_s5 + $0x480] sm:$0xff] }
 0x147   : > { %24093 = vst [vmem:[#allocation71_spill] sm:$0xff] %v16557_v39  ;;  %24094 = vst [vmem:[#allocation72_spill] sm:$0xff] %v16559_v33  ;;  %v16583_v39 = vld [vmem:[%s16326_s5 + $0x1f8] sm:$0xff]  ;;  %v16606_v51 = vsub.f32 %v16554_v40, %v24106_v47  ;;  %v16630_v55 = vsub.f32 %v625_v27, %v807_v2  ;;  %v16632_v50 = vsub.f32 %v631_v17, %v811_v37  ;;  %13224 = vmatprep.subr.bf16.mxu0 %v16615_v30  ;;  %v745_v58 = vld [vmem:[%s16326_s5 + $0x4e0] sm:$0xff] }
 0x148   : > { %24095 = vst [vmem:[#allocation73_spill] sm:$0xff] %v16561_v7  ;;  %24096 = vst [vmem:[#allocation74_spill] sm:$0xff] %v16563_v32  ;;  %v24104_v32 = vand.u32 4294901760, %v16551_v5  ;;  %v13739_v47 = vpack.c.bf16 %v16596_v12, %v16591_v31  ;;  %v22923_v6 = vand.u32 4294901760, %v16583_v39  ;;  %13226 = vmatpush1.bf16.msra.mxu0 %v16621_v19  ;;  %v813_v27 = vand.u32 4294901760, %v638_v48 }
 0x149   : > { %24097 = vst [vmem:[#allocation75_spill] sm:$0xff] %v16572_v14  ;;  %24098 = vst [vmem:[#allocation76_spill] sm:$0xff] %v16574_v3  ;;  %v815_v17 = vand.u32 4294901760, %v637_v18  ;;  %v819_v37 = vand.u32 4294901760, %v643_v61 }
 0x14a   : > { %24099 = vst [vmem:[#allocation77_spill] sm:$0xff] %v16583_v39  ;;  %24100 = vst [vmem:[#allocation78_spill] sm:$0xff] %v16586_v60  ;;  %v16601_v46 = vsub.f32 %v16551_v5, %v24104_v32  ;;  %v644_v32 = vld [vmem:[%s16326_s5 + $0x1b8] sm:$0xff]  ;;  %13740 = vmatprep.subr.bf16.mxu1 %v13739_v47  ;;  %v16649_v13 = vsub.f32 %v16583_v39, %v22923_v6  ;;  %v24119_v47 = vand.u32 4294901760, %v16586_v60  ;;  %v650_v6 = vld [vmem:[%s16326_s5 + $0x1e8] sm:$0xff] }
 0x14b   : > { %24101 = vst [vmem:[#allocation79_spill] sm:$0xff] %v16591_v31  ;;  %24103 = vst [vmem:[#allocation80_spill] sm:$0xff] %v16596_v12  ;;  %v817_v2 = vand.u32 4294901760, %v644_v32  ;;  %v16670_v31 = vld [vmem:[%s16326_s5 + $0x280] sm:$0xff]  ;;  %v16675_v45 = vsub.f32 %v638_v48, %v813_v27  ;;  %v16679_v44 = vpack.c.bf16 %v819_v37, %v815_v17  ;;  %v16690_v39 = vsub.f32 %v643_v61, %v819_v37 }
 0x14c   : > { %24105 = vst [vmem:[#allocation81_spill] sm:$0xff] %v16601_v46  ;;  %24107 = vst [vmem:[#allocation82_spill] sm:$0xff] %v16606_v51  ;;  %v13741_v56 = vpack.c.bf16 %v16606_v51, %v16601_v46  ;;  %v16654_v63 = vsub.f32 %v16586_v60, %v24119_v47  ;;  %v24123_v46 = vand.u32 4294901760, %v16612_v10  ;;  %v16688_v60 = vsub.f32 %v637_v18, %v815_v17 }
 0x14d   : > { %24108 = vst [vmem:[#allocation83_spill] sm:$0xff] %v16609_v53  ;;  %24109 = vst [vmem:[#allocation84_spill] sm:$0xff] %v16612_v10  ;;  %v16673_v49 = vpack.c.bf16 %v817_v2, %v813_v27  ;;  %v16677_v47 = vsub.f32 %v644_v32, %v817_v2  ;;  %v821_v18 = vand.u32 4294901760, %v650_v6  ;;  %v823_v61 = vand.u32 4294901760, %v649_v38  ;;  %v16702_v32 = vld [vmem:[%s16326_s5 + $0x2e8] sm:$0xff] }
 0x14e   : > { %24110 = vst [vmem:[#allocation85_spill] sm:$0xff] %v16615_v30  ;;  %24111 = vst [vmem:[#allocation86_spill] sm:$0xff] %v16617_v25  ;;  %v16641_v30 = vld [vmem:[%s16326_s5 + $0x258] sm:$0xff]  ;;  %13742 = vmatpush1.bf16.msra.mxu1 %v13741_v56  ;;  %v16664_v12 = vsub.f32 %v16612_v10, %v24123_v46  ;;  %v16667_v56 = vld [vmem:[%s16326_s5 + $0x250] sm:$0xff]  ;;  %v13743_v46 = vpack.c.bf16 %v16654_v63, %v16649_v13 }
 0x14f   : > { %24112 = vst [vmem:[#allocation87_spill] sm:$0xff] %v16619_v21  ;;  %24113 = vst [vmem:[#allocation88_spill] sm:$0xff] %v16621_v19  ;;  %v24121_v19 = vand.u32 4294901760, %v16609_v53  ;;  %13228 = vmatprep.subr.bf16.mxu0 %v16673_v49  ;;  %v22948_v48 = vand.u32 4294901760, %v16641_v30 }
 0x150   : > { %24114 = vst [vmem:[#allocation89_spill] sm:$0xff] %v16630_v55  ;;  %24115 = vst [vmem:[#allocation90_spill] sm:$0xff] %v16632_v50  ;;  %13744 = vmatprep.subr.bf16.mxu1 %v13743_v46  ;;  %13230 = vmatpush1.bf16.msra.mxu0 %v16679_v44  ;;  %v24136_v46 = vand.u32 4294901760, %v16644_v20 }
 0x151   : > { %24116 = vst [vmem:[#allocation91_spill] sm:$0xff] %v16641_v30  ;;  %24117 = vst [vmem:[#allocation92_spill] sm:$0xff] %v16644_v20  ;;  %v16659_v51 = vsub.f32 %v16609_v53, %v24121_v19  ;;  %v656_v19 = vld [vmem:[%s16326_s5 + $0x218] sm:$0xff]  ;;  %v655_v53 = vld [vmem:[%s16326_s5 + $0x210] sm:$0xff]  ;;  %v16707_v2 = vsub.f32 %v16641_v30, %v22948_v48 }
 0x152   : > { %24118 = vst [vmem:[#allocation93_spill] sm:$0xff] %v16649_v13  ;;  %24120 = vst [vmem:[#allocation94_spill] sm:$0xff] %v16654_v63  ;;  %v825_v17 = vand.u32 4294901760, %v656_v19  ;;  %v827_v37 = vand.u32 4294901760, %v655_v53  ;;  %v16712_v27 = vsub.f32 %v16644_v20, %v24136_v46  ;;  %v16728_v13 = vld [vmem:[%s16326_s5 + $0x2e0] sm:$0xff]  ;;  %v662_v48 = vld [vmem:[%s16326_s5 + $0x248] sm:$0xff] }
 0x153   : > { %24122 = vst [vmem:[#allocation95_spill] sm:$0xff] %v16659_v51  ;;  %24124 = vst [vmem:[#allocation96_spill] sm:$0xff] %v16664_v12  ;;  %v13745_v10 = vpack.c.bf16 %v16664_v12, %v16659_v51  ;;  %v24140_v51 = vand.u32 4294901760, %v16670_v31 }
 0x154   : > { %24125 = vst [vmem:[#allocation97_spill] sm:$0xff] %v16667_v56  ;;  %24126 = vst [vmem:[#allocation98_spill] sm:$0xff] %v16670_v31  ;;  %v16731_v30 = vpack.c.bf16 %v825_v17, %v821_v18  ;;  %v16735_v46 = vsub.f32 %v656_v19, %v825_v17  ;;  %v16737_v20 = vpack.c.bf16 %v827_v37, %v823_v61  ;;  %v16760_v19 = vld [vmem:[%s16326_s5 + $0x348] sm:$0xff] }
 0x155   : > { %24127 = vst [vmem:[#allocation99_spill] sm:$0xff] %v16673_v49  ;;  %24128 = vst [vmem:[#allocation100_spill] sm:$0xff] %v16675_v45  ;;  %v16699_v49 = vld [vmem:[%s16326_s5 + $0x2b8] sm:$0xff]  ;;  %13746 = vmatpush1.bf16.msra.mxu1 %v13745_v10  ;;  %v16722_v63 = vsub.f32 %v16670_v31, %v24140_v51  ;;  %v16725_v10 = vld [vmem:[%s16326_s5 + $0x2b0] sm:$0xff]  ;;  %v13747_v51 = vpack.c.bf16 %v16712_v27, %v16707_v2  ;;  %v16748_v45 = vsub.f32 %v655_v53, %v827_v37 }
 0x156   : > { %24129 = vst [vmem:[#allocation101_spill] sm:$0xff] %v16677_v47  ;;  %24130 = vst [vmem:[#allocation102_spill] sm:$0xff] %v16679_v44  ;;  %v24138_v44 = vand.u32 4294901760, %v16667_v56  ;;  %v16746_v47 = vsub.f32 %v649_v38, %v823_v61  ;;  %13232 = vmatprep.subr.bf16.mxu0 %v16731_v30  ;;  %v829_v38 = vand.u32 4294901760, %v662_v48 }
 0x157   : > { %24131 = vst [vmem:[#allocation103_spill] sm:$0xff] %v16688_v60  ;;  %24132 = vst [vmem:[#allocation104_spill] sm:$0xff] %v16690_v39  ;;  %v16733_v39 = vsub.f32 %v650_v6, %v821_v18  ;;  %v667_v60 = vld [vmem:[%s16326_s5 + $0x270] sm:$0xff]  ;;  %v22969_v6 = vand.u32 4294901760, %v16699_v49  ;;  %13748 = vmatprep.subr.bf16.mxu1 %v13747_v51  ;;  %13234 = vmatpush1.bf16.msra.mxu0 %v16737_v20  ;;  %v24153_v51 = vand.u32 4294901760, %v16702_v32 }
 0x158   : > { %24133 = vst [vmem:[#allocation105_spill] sm:$0xff] %v16699_v49  ;;  %24134 = vst [vmem:[#allocation106_spill] sm:$0xff] %v16702_v32  ;;  %v16717_v12 = vsub.f32 %v16667_v56, %v24138_v44  ;;  %v668_v44 = vld [vmem:[%s16326_s5 + $0x278] sm:$0xff]  ;;  %v661_v56 = vld [vmem:[%s16326_s5 + $0x240] sm:$0xff]  ;;  %v835_v37 = vand.u32 4294901760, %v667_v60 }
 0x159   : > { %24135 = vst [vmem:[#allocation107_spill] sm:$0xff] %v16707_v2  ;;  %24137 = vst [vmem:[#allocation108_spill] sm:$0xff] %v16712_v27  ;;  %v833_v61 = vand.u32 4294901760, %v668_v44  ;;  %v831_v53 = vand.u32 4294901760, %v661_v56  ;;  %v16765_v17 = vsub.f32 %v16699_v49, %v22969_v6  ;;  %v16770_v18 = vsub.f32 %v16702_v32, %v24153_v51  ;;  %v16786_v2 = vld [vmem:[%s16326_s5 + $0x340] sm:$0xff]  ;;  %v674_v6 = vld [vmem:[%s16326_s5 + $0x2a8] sm:$0xff] }
 0x15a   : > { %24139 = vst [vmem:[#allocation109_spill] sm:$0xff] %v16717_v12  ;;  %24141 = vst [vmem:[#allocation110_spill] sm:$0xff] %v16722_v63  ;;  %v13749_v31 = vpack.c.bf16 %v16722_v63, %v16717_v12  ;;  %v24157_v12 = vand.u32 4294901760, %v16728_v13 }
 0x15b   : > { %24142 = vst [vmem:[#allocation111_spill] sm:$0xff] %v16725_v10  ;;  %24143 = vst [vmem:[#allocation112_spill] sm:$0xff] %v16728_v13  ;;  %v16789_v49 = vpack.c.bf16 %v833_v61, %v829_v38  ;;  %v16793_v51 = vsub.f32 %v668_v44, %v833_v61  ;;  %v16795_v32 = vpack.c.bf16 %v835_v37, %v831_v53  ;;  %v16818_v44 = vld [vmem:[%s16326_s5 + $0x3a8] sm:$0xff] }
 0x15c   : > { %24144 = vst [vmem:[#allocation113_spill] sm:$0xff] %v16731_v30  ;;  %24145 = vst [vmem:[#allocation114_spill] sm:$0xff] %v16733_v39  ;;  %v16757_v30 = vld [vmem:[%s16326_s5 + $0x318] sm:$0xff]  ;;  %13750 = vmatpush1.bf16.msra.mxu1 %v13749_v31  ;;  %v16780_v27 = vsub.f32 %v16728_v13, %v24157_v12  ;;  %v16783_v31 = vld [vmem:[%s16326_s5 + $0x310] sm:$0xff]  ;;  %v13751_v12 = vpack.c.bf16 %v16770_v18, %v16765_v17  ;;  %v16806_v39 = vsub.f32 %v667_v60, %v835_v37 }
 0x15d   : > { %24146 = vst [vmem:[#allocation115_spill] sm:$0xff] %v16735_v46  ;;  %24147 = vst [vmem:[#allocation116_spill] sm:$0xff] %v16737_v20  ;;  %v24155_v20 = vand.u32 4294901760, %v16725_v10  ;;  %v16804_v46 = vsub.f32 %v661_v56, %v831_v53  ;;  %13236 = vmatprep.subr.bf16.mxu0 %v16789_v49  ;;  %v837_v56 = vand.u32 4294901760, %v674_v6 }
 0x15e   : > { %24148 = vst [vmem:[#allocation117_spill] sm:$0xff] %v16746_v47  ;;  %24149 = vst [vmem:[#allocation118_spill] sm:$0xff] %v16748_v45  ;;  %v16791_v45 = vsub.f32 %v662_v48, %v829_v38  ;;  %v679_v47 = vld [vmem:[%s16326_s5 + $0x2d0] sm:$0xff]  ;;  %v22990_v48 = vand.u32 4294901760, %v16757_v30  ;;  %13752 = vmatprep.subr.bf16.mxu1 %v13751_v12  ;;  %13238 = vmatpush1.bf16.msra.mxu0 %v16795_v32  ;;  %v24170_v12 = vand.u32 4294901760, %v16760_v19 }
 0x15f   : > { %24150 = vst [vmem:[#allocation119_spill] sm:$0xff] %v16757_v30  ;;  %24151 = vst [vmem:[#allocation120_spill] sm:$0xff] %v16760_v19  ;;  %v16775_v63 = vsub.f32 %v16725_v10, %v24155_v20  ;;  %v680_v20 = vld [vmem:[%s16326_s5 + $0x2d8] sm:$0xff]  ;;  %v673_v10 = vld [vmem:[%s16326_s5 + $0x2a0] sm:$0xff]  ;;  %v843_v37 = vand.u32 4294901760, %v679_v47 }
 0x160   : > { %24152 = vst [vmem:[#allocation121_spill] sm:$0xff] %v16765_v17  ;;  %24154 = vst [vmem:[#allocation122_spill] sm:$0xff] %v16770_v18  ;;  %v841_v53 = vand.u32 4294901760, %v680_v20  ;;  %v839_v60 = vand.u32 4294901760, %v673_v10  ;;  %v16823_v61 = vsub.f32 %v16757_v30, %v22990_v48  ;;  %v16828_v38 = vsub.f32 %v16760_v19, %v24170_v12  ;;  %v16844_v17 = vld [vmem:[%s16326_s5 + $0x3a0] sm:$0xff]  ;;  %v686_v48 = vld [vmem:[%s16326_s5 + $0x308] sm:$0xff] }
 0x161   : > { %24156 = vst [vmem:[#allocation123_spill] sm:$0xff] %v16775_v63  ;;  %24158 = vst [vmem:[#allocation124_spill] sm:$0xff] %v16780_v27  ;;  %v13753_v13 = vpack.c.bf16 %v16780_v27, %v16775_v63  ;;  %v24174_v63 = vand.u32 4294901760, %v16786_v2 }
 0x162   : > { %24159 = vst [vmem:[#allocation125_spill] sm:$0xff] %v16783_v31  ;;  %24160 = vst [vmem:[#allocation126_spill] sm:$0xff] %v16786_v2  ;;  %v16847_v30 = vpack.c.bf16 %v841_v53, %v837_v56  ;;  %v16851_v12 = vsub.f32 %v680_v20, %v841_v53  ;;  %v16853_v19 = vpack.c.bf16 %v843_v37, %v839_v60  ;;  %v16876_v20 = vld [vmem:[%s16326_s5 + $0x408] sm:$0xff] }
 0x163   : > { %24161 = vst [vmem:[#allocation127_spill] sm:$0xff] %v16789_v49  ;;  %24162 = vst [vmem:[#allocation128_spill] sm:$0xff] %v16791_v45  ;;  %v16815_v49 = vld [vmem:[%s16326_s5 + $0x378] sm:$0xff]  ;;  %13754 = vmatpush1.bf16.msra.mxu1 %v13753_v13  ;;  %v16838_v18 = vsub.f32 %v16786_v2, %v24174_v63  ;;  %v16841_v13 = vld [vmem:[%s16326_s5 + $0x370] sm:$0xff]  ;;  %v13755_v63 = vpack.c.bf16 %v16828_v38, %v16823_v61  ;;  %v16864_v45 = vsub.f32 %v679_v47, %v843_v37 }
 0x164   : > { %24163 = vst [vmem:[#allocation129_spill] sm:$0xff] %v16793_v51  ;;  %24164 = vst [vmem:[#allocation130_spill] sm:$0xff] %v16795_v32  ;;  %v24172_v32 = vand.u32 4294901760, %v16783_v31  ;;  %v16862_v51 = vsub.f32 %v673_v10, %v839_v60  ;;  %13240 = vmatprep.subr.bf16.mxu0 %v16847_v30  ;;  %v845_v10 = vand.u32 4294901760, %v686_v48 }
 0x165   : > { %24165 = vst [vmem:[#allocation131_spill] sm:$0xff] %v16804_v46  ;;  %24166 = vst [vmem:[#allocation132_spill] sm:$0xff] %v16806_v39  ;;  %v16849_v39 = vsub.f32 %v674_v6, %v837_v56  ;;  %v691_v46 = vld [vmem:[%s16326_s5 + $0x330] sm:$0xff]  ;;  %v23011_v6 = vand.u32 4294901760, %v16815_v49  ;;  %13756 = vmatprep.subr.bf16.mxu1 %v13755_v63  ;;  %13242 = vmatpush1.bf16.msra.mxu0 %v16853_v19  ;;  %v24187_v63 = vand.u32 4294901760, %v16818_v44 }
 0x166   : > { %24167 = vst [vmem:[#allocation133_spill] sm:$0xff] %v16815_v49  ;;  %24168 = vst [vmem:[#allocation134_spill] sm:$0xff] %v16818_v44  ;;  %v16833_v27 = vsub.f32 %v16783_v31, %v24172_v32  ;;  %v692_v32 = vld [vmem:[%s16326_s5 + $0x338] sm:$0xff]  ;;  %v685_v31 = vld [vmem:[%s16326_s5 + $0x300] sm:$0xff]  ;;  %v851_v37 = vand.u32 4294901760, %v691_v46 }
 0x167   : > { %24169 = vst [vmem:[#allocation135_spill] sm:$0xff] %v16823_v61  ;;  %24171 = vst [vmem:[#allocation136_spill] sm:$0xff] %v16828_v38  ;;  %v849_v60 = vand.u32 4294901760, %v692_v32  ;;  %v847_v47 = vand.u32 4294901760, %v685_v31  ;;  %v16881_v53 = vsub.f32 %v16815_v49, %v23011_v6  ;;  %v16886_v56 = vsub.f32 %v16818_v44, %v24187_v63  ;;  %v16902_v61 = vld [vmem:[%s16326_s5 + $0x400] sm:$0xff]  ;;  %v698_v6 = vld [vmem:[%s16326_s5 + $0x368] sm:$0xff] }
 0x168   : > { %24173 = vst [vmem:[#allocation137_spill] sm:$0xff] %v16833_v27  ;;  %24175 = vst [vmem:[#allocation138_spill] sm:$0xff] %v16838_v18  ;;  %v13757_v2 = vpack.c.bf16 %v16838_v18, %v16833_v27  ;;  %v24191_v27 = vand.u32 4294901760, %v16844_v17 }
 0x169   : > { %24176 = vst [vmem:[#allocation139_spill] sm:$0xff] %v16841_v13  ;;  %24177 = vst [vmem:[#allocation140_spill] sm:$0xff] %v16844_v17  ;;  %v16905_v49 = vpack.c.bf16 %v849_v60, %v845_v10  ;;  %v16909_v63 = vsub.f32 %v692_v32, %v849_v60  ;;  %v16911_v44 = vpack.c.bf16 %v851_v37, %v847_v47  ;;  %v16934_v32 = vld [vmem:[%s16326_s5 + $0x468] sm:$0xff] }
 0x16a   : > { %24178 = vst [vmem:[#allocation141_spill] sm:$0xff] %v16847_v30  ;;  %24179 = vst [vmem:[#allocation142_spill] sm:$0xff] %v16849_v39  ;;  %v16873_v30 = vld [vmem:[%s16326_s5 + $0x3d8] sm:$0xff]  ;;  %13758 = vmatpush1.bf16.msra.mxu1 %v13757_v2  ;;  %v16896_v38 = vsub.f32 %v16844_v17, %v24191_v27  ;;  %v16899_v2 = vld [vmem:[%s16326_s5 + $0x3d0] sm:$0xff]  ;;  %v13759_v27 = vpack.c.bf16 %v16886_v56, %v16881_v53  ;;  %v16922_v39 = vsub.f32 %v691_v46, %v851_v37 }
 0x16b   : > { %24180 = vst [vmem:[#allocation143_spill] sm:$0xff] %v16851_v12  ;;  %24181 = vst [vmem:[#allocation144_spill] sm:$0xff] %v16853_v19  ;;  %v24189_v19 = vand.u32 4294901760, %v16841_v13  ;;  %v16920_v12 = vsub.f32 %v685_v31, %v847_v47  ;;  %13244 = vmatprep.subr.bf16.mxu0 %v16905_v49  ;;  %v853_v31 = vand.u32 4294901760, %v698_v6 }
 0x16c   : > { %24182 = vst [vmem:[#allocation145_spill] sm:$0xff] %v16862_v51  ;;  %24183 = vst [vmem:[#allocation146_spill] sm:$0xff] %v16864_v45  ;;  %v16907_v45 = vsub.f32 %v686_v48, %v845_v10  ;;  %v703_v51 = vld [vmem:[%s16326_s5 + $0x390] sm:$0xff]  ;;  %v23032_v48 = vand.u32 4294901760, %v16873_v30  ;;  %13760 = vmatprep.subr.bf16.mxu1 %v13759_v27  ;;  %13246 = vmatpush1.bf16.msra.mxu0 %v16911_v44  ;;  %v24202_v27 = vand.u32 4294901760, %v16876_v20 }
 0x16d   : > { %24184 = vst [vmem:[#allocation147_spill] sm:$0xff] %v16873_v30  ;;  %24185 = vst [vmem:[#allocation148_spill] sm:$0xff] %v16876_v20  ;;  %v16891_v18 = vsub.f32 %v16841_v13, %v24189_v19  ;;  %v704_v19 = vld [vmem:[%s16326_s5 + $0x398] sm:$0xff]  ;;  %v697_v13 = vld [vmem:[%s16326_s5 + $0x360] sm:$0xff]  ;;  %v859_v37 = vand.u32 4294901760, %v703_v51 }
 0x16e   : > { %24186 = vst [vmem:[#allocation149_spill] sm:$0xff] %v16881_v53  ;;  %24188 = vst [vmem:[#allocation150_spill] sm:$0xff] %v16886_v56  ;;  %v857_v47 = vand.u32 4294901760, %v704_v19  ;;  %v855_v46 = vand.u32 4294901760, %v697_v13  ;;  %v16939_v60 = vsub.f32 %v16873_v30, %v23032_v48  ;;  %v16944_v10 = vsub.f32 %v16876_v20, %v24202_v27  ;;  %v16960_v53 = vld [vmem:[%s16326_s5 + $0x460] sm:$0xff]  ;;  %v710_v48 = vld [vmem:[%s16326_s5 + $0x3c8] sm:$0xff] }
 0x16f   : > { %24190 = vst [vmem:[#allocation151_spill] sm:$0xff] %v16891_v18  ;;  %24192 = vst [vmem:[#allocation152_spill] sm:$0xff] %v16896_v38  ;;  %v13761_v17 = vpack.c.bf16 %v16896_v38, %v16891_v18  ;;  %v24206_v18 = vand.u32 4294901760, %v16902_v61 }
 0x170   : > { %24193 = vst [vmem:[#allocation153_spill] sm:$0xff] %v16899_v2  ;;  %24194 = vst [vmem:[#allocation154_spill] sm:$0xff] %v16902_v61  ;;  %v16963_v30 = vpack.c.bf16 %v857_v47, %v853_v31  ;;  %v16967_v27 = vsub.f32 %v704_v19, %v857_v47  ;;  %v16969_v20 = vpack.c.bf16 %v859_v37, %v855_v46  ;;  %v16992_v19 = vld [vmem:[%s16326_s5 + $0x4c8] sm:$0xff] }
 0x171   : > { %24195 = vst [vmem:[#allocation155_spill] sm:$0xff] %v16905_v49  ;;  %24196 = vst [vmem:[#allocation156_spill] sm:$0xff] %v16907_v45  ;;  %v16931_v49 = vld [vmem:[%s16326_s5 + $0x438] sm:$0xff]  ;;  %13762 = vmatpush1.bf16.msra.mxu1 %v13761_v17  ;;  %v16954_v56 = vsub.f32 %v16902_v61, %v24206_v18  ;;  %v16957_v17 = vld [vmem:[%s16326_s5 + $0x430] sm:$0xff]  ;;  %v13763_v18 = vpack.c.bf16 %v16944_v10, %v16939_v60  ;;  %v16980_v45 = vsub.f32 %v703_v51, %v859_v37 }
 0x172   : > { %24197 = vst [vmem:[#allocation157_spill] sm:$0xff] %v16909_v63  ;;  %24198 = vst [vmem:[#allocation158_spill] sm:$0xff] %v16911_v44  ;;  %v24204_v44 = vand.u32 4294901760, %v16899_v2  ;;  %v16978_v63 = vsub.f32 %v697_v13, %v855_v46  ;;  %13248 = vmatprep.subr.bf16.mxu0 %v16963_v30  ;;  %v861_v13 = vand.u32 4294901760, %v710_v48 }
 0x173   : > { %24199 = vst [vmem:[#allocation159_spill] sm:$0xff] %v16920_v12  ;;  %24200 = vst [vmem:[#allocation160_spill] sm:$0xff] %v16922_v39  ;;  %v16965_v39 = vsub.f32 %v698_v6, %v853_v31  ;;  %v715_v12 = vld [vmem:[%s16326_s5 + $0x3f0] sm:$0xff]  ;;  %v23053_v6 = vand.u32 4294901760, %v16931_v49  ;;  %13764 = vmatprep.subr.bf16.mxu1 %v13763_v18  ;;  %13250 = vmatpush1.bf16.msra.mxu0 %v16969_v20  ;;  %v24217_v18 = vand.u32 4294901760, %v16934_v32 }
 0x174   : > { %24201 = vst [vmem:[#allocation161_spill] sm:$0xff] %v16939_v60  ;;  %24203 = vst [vmem:[#allocation162_spill] sm:$0xff] %v16944_v10  ;;  %v16949_v38 = vsub.f32 %v16899_v2, %v24204_v44  ;;  %v716_v44 = vld [vmem:[%s16326_s5 + $0x3f8] sm:$0xff]  ;;  %v709_v2 = vld [vmem:[%s16326_s5 + $0x3c0] sm:$0xff]  ;;  %v867_v37 = vand.u32 4294901760, %v715_v12 }
 0x175   : > { %24207 = vst [vmem:[#allocation164_spill] sm:$0xff] %v16954_v56  ;;  %24208 = vst [vmem:[#allocation165_spill] sm:$0xff] %v16957_v17  ;;  %v865_v46 = vand.u32 4294901760, %v716_v44  ;;  %v863_v51 = vand.u32 4294901760, %v709_v2  ;;  %v16997_v47 = vsub.f32 %v16931_v49, %v23053_v6  ;;  %v17002_v31 = vsub.f32 %v16934_v32, %v24217_v18  ;;  %v17018_v60 = vld [vmem:[%s16326_s5 + $0x4c0] sm:$0xff]  ;;  %v722_v6 = vld [vmem:[%s16326_s5 + $0x428] sm:$0xff] }
 0x176   : > { %24205 = vst [vmem:[#allocation163_spill] sm:$0xff] %v16949_v38  ;;  %24209 = vst [vmem:[#allocation166_spill] sm:$0xff] %v16960_v53  ;;  %v13765_v61 = vpack.c.bf16 %v16954_v56, %v16949_v38  ;;  %v24221_v38 = vand.u32 4294901760, %v16960_v53  ;;  %v17038_v5 = vsub.f32 %v715_v12, %v867_v37 }
 0x177   : > { %24210 = vst [vmem:[#allocation167_spill] sm:$0xff] %v16963_v30  ;;  %24211 = vst [vmem:[#allocation168_spill] sm:$0xff] %v16965_v39  ;;  %v16989_v30 = vld [vmem:[%s16326_s5 + $0x498] sm:$0xff]  ;;  %v17025_v18 = vsub.f32 %v716_v44, %v865_v46  ;;  %v727_v39 = vld [vmem:[%s16326_s5 + $0x450] sm:$0xff]  ;;  %v17036_v40 = vsub.f32 %v709_v2, %v863_v51  ;;  %v869_v2 = vand.u32 4294901760, %v722_v6 }
 0x178   : > { %24212 = vst [vmem:[#allocation169_spill] sm:$0xff] %v16967_v27  ;;  %24213 = vst [vmem:[#allocation170_spill] sm:$0xff] %v16969_v20  ;;  %13766 = vmatpush1.bf16.msra.mxu1 %v13765_v61  ;;  %v24219_v20 = vand.u32 4294901760, %v16957_v17  ;;  %v17012_v10 = vsub.f32 %v16960_v53, %v24221_v38  ;;  %v17015_v61 = vld [vmem:[%s16326_s5 + $0x490] sm:$0xff]  ;;  %v17027_v27 = vpack.c.bf16 %v867_v37, %v863_v51  ;;  %v875_v37 = vand.u32 4294901760, %v727_v39  ;;  %v17050_v44 = vld [vmem:[%s16326_s5 + $0x528] sm:$0xff] }
 0x179   : > { %24214 = vst [vmem:[#allocation171_spill] sm:$0xff] %v16978_v63  ;;  %24215 = vst [vmem:[#allocation172_spill] sm:$0xff] %v16980_v45  ;;  %v17021_v45 = vpack.c.bf16 %v865_v46, %v861_v13  ;;  %v17023_v63 = vsub.f32 %v710_v48, %v861_v13  ;;  %v13767_v38 = vpack.c.bf16 %v17002_v31, %v16997_v47  ;;  %v23074_v48 = vand.u32 4294901760, %v16989_v30 }
 0x17a   : > { %24216 = vst [vmem:[#allocation173_spill] sm:$0xff] %v16997_v47  ;;  %24218 = vst [vmem:[#allocation174_spill] sm:$0xff] %v17002_v31  ;;  %v17007_v56 = vsub.f32 %v16957_v17, %v24219_v20  ;;  %v728_v20 = vld [vmem:[%s16326_s5 + $0x458] sm:$0xff]  ;;  %v721_v17 = vld [vmem:[%s16326_s5 + $0x420] sm:$0xff]  ;;  %v17096_v23 = vsub.f32 %v727_v39, %v875_v37  ;;  %v879_v39 = vand.u32 4294901760, %v733_v52 }
 0x17b   : > { %24222 = vst [vmem:[#allocation176_spill] sm:$0xff] %v17012_v10  ;;  %24223 = vst [vmem:[#allocation177_spill] sm:$0xff] %v17021_v45  ;;  %13252 = vmatprep.subr.bf16.mxu0 %v17021_v45  ;;  %13768 = vmatprep.subr.bf16.mxu1 %v13767_v38  ;;  %v873_v51 = vand.u32 4294901760, %v728_v20  ;;  %v871_v12 = vand.u32 4294901760, %v721_v17  ;;  %v17047_v45 = vld [vmem:[%s16326_s5 + $0x4f8] sm:$0xff]  ;;  %v17055_v46 = vsub.f32 %v16989_v30, %v23074_v48  ;;  %v24228_v38 = vand.u32 4294901760, %v16992_v19 }
 0x17c   : > { %24220 = vst [vmem:[#allocation175_spill] sm:$0xff] %v17007_v56  ;;  %24224 = vst [vmem:[#allocation178_spill] sm:$0xff] %v17023_v63  ;;  %v13769_v53 = vpack.c.bf16 %v17012_v10, %v17007_v56  ;;  %13254 = vmatpush1.bf16.msra.mxu0 %v17027_v27  ;;  %v24232_v56 = vand.u32 4294901760, %v17018_v60  ;;  %v17076_v47 = vld [vmem:[%s16326_s5 + $0x520] sm:$0xff]  ;;  %v734_v48 = vld [vmem:[%s16326_s5 + $0x488] sm:$0xff]  ;;  %v17081_v63 = vsub.f32 %v722_v6, %v869_v2  ;;  %v23095_v6 = vand.u32 4294901760, %v17047_v45 }
 0x17d   : > { %24225 = vst [vmem:[#allocation179_spill] sm:$0xff] %v17025_v18  ;;  %24226 = vst [vmem:[#allocation180_spill] sm:$0xff] %v17027_v27  ;;  %v17060_v13 = vsub.f32 %v16992_v19, %v24228_v38  ;;  %v24230_v27 = vand.u32 4294901760, %v17015_v61  ;;  %v17079_v18 = vpack.c.bf16 %v873_v51, %v869_v2  ;;  %v17083_v38 = vsub.f32 %v728_v20, %v873_v51  ;;  %v17108_v20 = vld [vmem:[%s16326_s5 + $0x588] sm:$0xff] }
 0x17e   : > { %13770 = vmatpush1.bf16.msra.mxu1 %v13769_v53  ;;  %24227 = vst [vmem:[#allocation181_spill] sm:$0xff] %v17055_v46  ;;  %v17070_v31 = vsub.f32 %v17018_v60, %v24232_v56  ;;  %v17073_v53 = vld [vmem:[%s16326_s5 + $0x4f0] sm:$0xff]  ;;  %v17085_v11 = vpack.c.bf16 %v875_v37, %v871_v12  ;;  %v17094_v24 = vsub.f32 %v721_v17, %v871_v12  ;;  %v877_v17 = vand.u32 4294901760, %v734_v48 }
 0x17f   : > { %24229 = vst [vmem:[#allocation182_spill] sm:$0xff] %v17060_v13  ;;  %v17065_v10 = vsub.f32 %v17015_v61, %v24230_v27  ;;  %24234 = vst [vmem:[#allocation185_spill] sm:$0xff] %v17079_v18  ;;  %v740_v27 = vld [vmem:[%s16326_s5 + $0x4b8] sm:$0xff]  ;;  %v13771_v56 = vpack.c.bf16 %v17060_v13, %v17055_v46  ;;  %13256 = vmatprep.subr.bf16.mxu0 %v17079_v18  ;;  %v883_v37 = vand.u32 4294901760, %v739_v43  ;;  %v17134_v46 = vld [vmem:[%s16326_s5 + $0x580] sm:$0xff] }
 0x180   : > { %24233 = vst [vmem:[#allocation184_spill] sm:$0xff] %v17070_v31  ;;  %24235 = vst [vmem:[#allocation186_spill] sm:$0xff] %v17085_v11  ;;  %13258 = vmatpush1.bf16.msra.mxu0 %v17085_v11  ;;  %v881_v12 = vand.u32 4294901760, %v740_v27  ;;  %v17105_v18 = vld [vmem:[%s16326_s5 + $0x558] sm:$0xff]  ;;  %v17113_v51 = vsub.f32 %v17047_v45, %v23095_v6  ;;  %v24241_v11 = vand.u32 4294901760, %v17073_v53  ;;  %v746_v6 = vld [vmem:[%s16326_s5 + $0x4e8] sm:$0xff]  ;;  %v17139_v0 = vsub.f32 %v734_v48, %v877_v17 }
 0x181   : > { %24231 = vst [vmem:[#allocation183_spill] sm:$0xff] %v17065_v10  ;;  %v13773_v42 = vpack.c.bf16 %v17070_v31, %v17065_v10  ;;  %13772 = vmatprep.subr.bf16.mxu1 %v13771_v56  ;;  %24236 = vst [vmem:[#allocation187_spill] sm:$0xff] %v17105_v18  ;;  %v24239_v56 = vand.u32 4294901760, %v17050_v44  ;;  %v24243_v10 = vand.u32 4294901760, %v17076_v47  ;;  %v17143_v59 = vpack.c.bf16 %v883_v37, %v879_v39 }
 0x182   : > { %24237 = vst [vmem:[#allocation188_spill] sm:$0xff] %v17108_v20  ;;  %24238 = vst [vmem:[#allocation189_spill] sm:$0xff] %v17113_v51  ;;  %v17123_v31 = vsub.f32 %v17073_v53, %v24241_v11  ;;  %v17137_v1 = vpack.c.bf16 %v881_v12, %v877_v17  ;;  %v752_v11 = vld [vmem:[%s16326_s5 + $0x518] sm:$0xff]  ;;  %v17152_v7 = vsub.f32 %v733_v52, %v879_v39  ;;  %v23116_v48 = vand.u32 4294901760, %v17105_v18 }
 0x183   : > { %13774 = vmatpush1.bf16.msra.mxu1 %v13773_v42  ;;  %v17118_v2 = vsub.f32 %v17050_v44, %v24239_v56  ;;  %v17128_v13 = vsub.f32 %v17076_v47, %v24243_v10  ;;  %v17131_v42 = vld [vmem:[%s16326_s5 + $0x550] sm:$0xff]  ;;  %24246 = vst [vmem:[#allocation194_spill] sm:$0xff] %v17134_v46  ;;  %v17141_v56 = vsub.f32 %v740_v27, %v881_v12  ;;  %24248 = vst [vmem:[#allocation196_spill] sm:$0xff] %v17143_v59  ;;  %v17166_v27 = vld [vmem:[%s16326_s5 + $0x5e8] sm:$0xff] }
 0x184   : > { %24242 = vst [vmem:[#allocation191_spill] sm:$0xff] %v17123_v31  ;;  %24245 = vst [vmem:[#allocation193_spill] sm:$0xff] %v17131_v42  ;;  %v17154_v33 = vsub.f32 %v739_v43, %v883_v37  ;;  %13260 = vmatprep.subr.bf16.mxu0 %v17137_v1  ;;  %v885_v52 = vand.u32 4294901760, %v746_v6  ;;  %v889_v39 = vand.u32 4294901760, %v752_v11  ;;  %v887_v43 = vand.u32 4294901760, %v745_v58 }
 0x185   : > { %24240 = vst [vmem:[#allocation190_spill] sm:$0xff] %v17118_v2  ;;  %24244 = vst [vmem:[#allocation192_spill] sm:$0xff] %v17128_v13  ;;  %v13775_v10 = vpack.c.bf16 %v17118_v2, %v17113_v51  ;;  %v13777_v36 = vpack.c.bf16 %v17128_v13, %v17123_v31  ;;  %13262 = vmatpush1.bf16.msra.mxu0 %v17143_v59  ;;  %v891_v37 = vand.u32 4294901760, %v751_v41  ;;  %v24256_v59 = vand.u32 4294901760, %v17131_v42  ;;  %v17192_v51 = vld [vmem:[%s16326_s5 + $0x5e0] sm:$0xff] }
 0x186   : > { %24247 = vst [vmem:[#allocation195_spill] sm:$0xff] %v17137_v1  ;;  %24249 = vst [vmem:[#allocation197_spill] sm:$0xff] %v17152_v7  ;;  %v17163_v1 = vld [vmem:[%s16326_s5 + $0x5b8] sm:$0xff]  ;;  %v17171_v12 = vsub.f32 %v17105_v18, %v23116_v48  ;;  %v24258_v31 = vand.u32 4294901760, %v17134_v46  ;;  %v758_v48 = vld [vmem:[%s16326_s5 + $0x548] sm:$0xff]  ;;  %v17195_v16 = vpack.c.bf16 %v889_v39, %v885_v52  ;;  %v17197_v8 = vsub.f32 %v746_v6, %v885_v52 }
 0x187   : > { %24250 = vst [vmem:[#allocation198_spill] sm:$0xff] %v17154_v33  ;;  %13776 = vmatprep.subr.bf16.mxu1 %v13775_v10  ;;  %24251 = vst [vmem:[#allocation199_spill] sm:$0xff] %v17163_v1  ;;  %v24254_v10 = vand.u32 4294901760, %v17108_v20  ;;  %v17181_v13 = vsub.f32 %v17131_v42, %v24256_v59  ;;  %v764_v59 = vld [vmem:[%s16326_s5 + $0x578] sm:$0xff]  ;;  %v757_v42 = vld [vmem:[%s16326_s5 + $0x540] sm:$0xff]  ;;  %v17210_v33 = vsub.f32 %v745_v58, %v887_v43  ;;  %v23133_v6 = vand.u32 4294901760, %v17163_v1 }
 0x188   : > { %24252 = vst [vmem:[#allocation200_spill] sm:$0xff] %v17166_v27  ;;  %13778 = vmatpush1.bf16.msra.mxu1 %v13777_v36  ;;  %24253 = vst [vmem:[#allocation201_spill] sm:$0xff] %v17171_v12  ;;  %v17186_v2 = vsub.f32 %v17134_v46, %v24258_v31  ;;  %v17189_v36 = vld [vmem:[%s16326_s5 + $0x5b0] sm:$0xff]  ;;  %v17212_v7 = vsub.f32 %v751_v41, %v891_v37  ;;  %13264 = vmatprep.subr.bf16.mxu0 %v17195_v16  ;;  %v893_v58 = vand.u32 4294901760, %v758_v48 }
 0x189   : > { %v17176_v17 = vsub.f32 %v17108_v20, %v24254_v10  ;;  %24257 = vst [vmem:[#allocation203_spill] sm:$0xff] %v17181_v13  ;;  %24260 = vst [vmem:[#allocation205_spill] sm:$0xff] %v17189_v36  ;;  %v17199_v10 = vsub.f32 %v752_v11, %v889_v39  ;;  %v17201_v20 = vpack.c.bf16 %v891_v37, %v887_v43  ;;  %v763_v18 = vld [vmem:[%s16326_s5 + $0x570] sm:$0xff]  ;;  %v23138_v11 = vand.u32 4294901760, %v17166_v27 }
 0x18a   : > { %24259 = vst [vmem:[#allocation204_spill] sm:$0xff] %v17186_v2  ;;  %24261 = vst [vmem:[#allocation206_spill] sm:$0xff] %v17192_v51  ;;  %v13781_v46 = vpack.c.bf16 %v17186_v2, %v17181_v13  ;;  %v23141_v52 = vand.u32 4294901760, %v17189_v36  ;;  %v897_v41 = vand.u32 4294901760, %v764_v59  ;;  %v895_v43 = vand.u32 4294901760, %v757_v42 }
 0x18b   : > { %24255 = vst [vmem:[#allocation202_spill] sm:$0xff] %v17176_v17  ;;  %24262 = vst [vmem:[#allocation207_spill] sm:$0xff] %v17195_v16  ;;  %v13779_v31 = vpack.c.bf16 %v17176_v17, %v17171_v12  ;;  %13266 = vmatpush1.bf16.msra.mxu0 %v17201_v20  ;;  %v899_v37 = vand.u32 4294901760, %v763_v18  ;;  %v17223_v16 = vsub.f32 %v17163_v1, %v23133_v6  ;;  %v775_v1 = vld [vmem:[%s16326_s5 + $0x5d0] sm:$0xff] }
 0x18c   : > { %24263 = vst [vmem:[#allocation208_spill] sm:$0xff] %v17197_v8  ;;  %24264 = vst [vmem:[#allocation209_spill] sm:$0xff] %v17199_v10  ;;  %v17228_v39 = vsub.f32 %v17166_v27, %v23138_v11  ;;  %v17241_v13 = vpack.c.bf16 %v897_v41, %v893_v58  ;;  %v17243_v6 = vsub.f32 %v758_v48, %v893_v58  ;;  %v776_v11 = vld [vmem:[%s16326_s5 + $0x5d8] sm:$0xff]  ;;  %v769_v27 = vld [vmem:[%s16326_s5 + $0x5a0] sm:$0xff]  ;;  %v24279_v48 = vand.u32 4294901760, %v16349_v22 }
 0x18d   : > { %24265 = vst [vmem:[#allocation210_spill] sm:$0xff] %v17201_v20  ;;  %24266 = vst [vmem:[#allocation211_spill] sm:$0xff] %v17210_v33  ;;  %13780 = vmatprep.subr.bf16.mxu1 %v13779_v31  ;;  %v17233_v31 = vsub.f32 %v17189_v36, %v23141_v52  ;;  %v24271_v20 = vand.u32 4294901760, %v17192_v51  ;;  %v17245_v17 = vsub.f32 %v764_v59, %v897_v41  ;;  %v24280_v59 = vand.u32 4294901760, %v16352_v26 }
 0x18e   : > { %24267 = vst [vmem:[#allocation212_spill] sm:$0xff] %v17212_v7  ;;  %13782 = vmatpush1.bf16.msra.mxu1 %v13781_v46  ;;  %24268 = vst [vmem:[#allocation213_spill] sm:$0xff] %v17223_v16  ;;  %v770_v46 = vld [vmem:[%s16326_s5 + $0x5a8] sm:$0xff]  ;;  %v17247_v12 = vpack.c.bf16 %v899_v37, %v895_v43  ;;  %v13783_v52 = vpack.c.bf16 %v17228_v39, %v17223_v16  ;;  %13268 = vmatprep.subr.bf16.mxu0 %v17241_v13  ;;  %v903_v16 = vand.u32 4294901760, %v769_v27 }
 0x18f   : > { %24269 = vst [vmem:[#allocation214_spill] sm:$0xff] %v17228_v39  ;;  %24270 = vst [vmem:[#allocation215_spill] sm:$0xff] %v17233_v31  ;;  %v17238_v2 = vsub.f32 %v17192_v51, %v24271_v20  ;;  %v17256_v20 = vsub.f32 %v757_v42, %v895_v43  ;;  %v17258_v51 = vsub.f32 %v763_v18, %v899_v37  ;;  %v901_v41 = vand.u32 4294901760, %v770_v46 }
 0x190   : > { %24273 = vst [vmem:[#allocation217_spill] sm:$0xff] %v17241_v13  ;;  %24274 = vst [vmem:[#allocation218_spill] sm:$0xff] %v17243_v6  ;;  %v17265_v58 = vpack.c.bf16 %v24280_v59, %v24279_v48  ;;  %13784 = vmatprep.subr.bf16.mxu1 %v13783_v52  ;;  %13270 = vmatpush1.bf16.msra.mxu0 %v17247_v12  ;;  %v905_v39 = vand.u32 4294901760, %v776_v11  ;;  %v23152_v18 = vand.u32 4294901760, %v16434_v62 }
 0x191   : > { %24272 = vst [vmem:[#allocation216_spill] sm:$0xff] %v17238_v2  ;;  %24275 = vst [vmem:[#allocation219_spill] sm:$0xff] %v17245_v17  ;;  %v13785_v36 = vpack.c.bf16 %v17238_v2, %v17233_v31  ;;  %v907_v17 = vand.u32 4294901760, %v775_v1  ;;  %v17268_v42 = vsub.f32 %v770_v46, %v901_v41  ;;  %v17278_v37 = vsub.f32 %v769_v27, %v903_v16 }
 0x192   : > { %24276 = vst [vmem:[#allocation220_spill] sm:$0xff] %v17247_v12  ;;  %24277 = vst [vmem:[#allocation221_spill] sm:$0xff] %v17256_v20  ;;  %v17272_v43 = vpack.c.bf16 %v905_v39, %v901_v41  ;;  %v17274_v22 = vsub.f32 %v776_v11, %v905_v39  ;;  %v23149_v46 = vand.u32 4294901760, %v16446_v4  ;;  %v23151_v27 = vand.u32 4294901760, %v16574_v3 }
 0x193   : > { %24278 = vst [vmem:[#allocation222_spill] sm:$0xff] %v17258_v51  ;;  %24281 = vst [vmem:[#allocation223_spill] sm:$0xff] %v17265_v58  ;;  %13786 = vmatpush1.bf16.msra.mxu1 %v13785_v36  ;;  %v17276_v26 = vpack.c.bf16 %v907_v17, %v903_v16  ;;  %v17280_v52 = vsub.f32 %v775_v1, %v907_v17  ;;  %v977_v36 = vsub.f32 %v16434_v62, %v23152_v18 }
 0x194   : > { %24282 = vst [vmem:[#allocation224_spill] sm:$0xff] %v17268_v42  ;;  %13788 = vmatprep.subr.bf16.mxu1 %v17265_v58  ;;  %24283 = vst [vmem:[#allocation225_spill] sm:$0xff] %v17272_v43  ;;  %13272 = vmatprep.subr.bf16.mxu0 %v17272_v43  ;;  %v989_v11 = vsub.f32 %v16446_v4, %v23149_v46  ;;  %v23150_v1 = vand.u32 4294901760, %v16572_v14  ;;  %v1043_v59 = vsub.f32 %v16574_v3, %v23151_v27  ;;  %v571_v58 = vlaneseq }
 0x195   : > { %24284 = vst [vmem:[#allocation226_spill] sm:$0xff] %v17274_v22  ;;  %24285 = vst [vmem:[#allocation227_spill] sm:$0xff] %v17276_v26  ;;  %13274 = vmatpush1.bf16.msra.mxu0 %v17276_v26  ;;  %v978_v48 = vand.u32 4294901760, %v977_v36  ;;  %v23161_v41 = vand.u32 4294901760, %v16617_v25  ;;  %v23164_v36 = vand.u32 4294901760, %v16619_v21  ;;  %v24289_v2 = vand.u32 4294901760, %v16934_v32 }
 0x196   : > { %24286 = vst [vmem:[#allocation228_spill] sm:$0xff] %v17278_v37  ;;  %24287 = vst [vmem:[#allocation229_spill] sm:$0xff] %v17280_v52  ;;  %v990_v39 = vand.u32 4294901760, %v989_v11  ;;  %v1031_v17 = vsub.f32 %v16572_v14, %v23150_v1  ;;  %v23167_v11 = vand.u32 4294901760, %v16630_v55  ;;  %v17327_v31 = vshrl.u32 %v571_v58, 7  ;;  %v15541_v14 = vld [vmem:[#allocation2 + $0x8] sm:$0xff] }
 0x197   : > { %v1049_v46 = vsub.f32 %v16617_v25, %v23161_v41  ;;  %v1061_v1 = vsub.f32 %v16619_v21, %v23164_v36  ;;  %v24288_v36 = vand.u32 4294901760, %v16931_v49  ;;  %v23170_v49 = vand.u32 4294901760, %v17038_v5 }
 0x198   : > { %v13275_v16 = vpack.c.bf16 %v990_v39, %v978_v48  ;;  %v23172_v48 = vand.u32 4294901760, %v16632_v50  ;;  %v1032_v39 = vand.u32 4294901760, %v1031_v17  ;;  %v1055_v27 = vsub.f32 %v16630_v55, %v23167_v11  ;;  %24291 = vst [vmem:[#allocation231_spill] sm:$0xff] %v17327_v31 }
 0x199   : > { %v1050_v17 = vand.u32 4294901760, %v1049_v46  ;;  %v17325_v11 = vpack.c.bf16 %v24289_v2, %v24288_v36  ;;  %v23174_v46 = vand.u32 4294901760, %v16461_v15  ;;  %v24295_v32 = vand.u32 4294901760, %v16989_v30 }
 0x19a   : > { %13276 = vmatprep.subr.bf16.mxu0 %v13275_v16  ;;  %v1044_v16 = vand.u32 4294901760, %v1043_v59  ;;  %v1067_v18 = vsub.f32 %v16632_v50, %v23172_v48  ;;  %v1062_v59 = vand.u32 4294901760, %v1061_v1  ;;  %v1056_v43 = vand.u32 4294901760, %v1055_v27 }
 0x19b   : > { %24290 = vst [vmem:[#allocation230_spill] sm:$0xff] %v17325_v11  ;;  %v24292_v1 = vand.u32 4294901760, %v16356_v28  ;;  %v24296_v2 = vand.u32 4294901760, %v16992_v19  ;;  %v24298_v36 = vand.u32 4294901760, %v16364_v34  ;;  %v24299_v28 = vand.u32 4294901760, %v16367_v35 }
 0x19c   : > { %v17315_v26 = vpack.c.bf16 %v1044_v16, %v1032_v39  ;;  %v1068_v12 = vand.u32 4294901760, %v1067_v18  ;;  %v17317_v13 = vpack.c.bf16 %v1062_v59, %v1050_v17  ;;  %v23176_v39 = vand.u32 4294901760, %v16452_v9 }
 0x19d   : > { %v24293_v18 = vand.u32 4294901760, %v16359_v29  ;;  %v17343_v58 = vpack.c.bf16 %v24296_v2, %v24295_v32  ;;  %v17350_v16 = vpack.c.bf16 %v24299_v28, %v24298_v36  ;;  %v24301_v17 = vand.u32 4294901760, %v17015_v61 }
 0x19e   : > { %v17319_v41 = vpack.c.bf16 %v1068_v12, %v1056_v43  ;;  %v23171_v12 = vand.u32 4294901760, %v17036_v40  ;;  %v17355_v29 = vsub.f32 %v16452_v9, %v23176_v39  ;;  %v24302_v30 = vand.u32 4294901760, %v17018_v60  ;;  %v24322_v9 = vld [vmem:[#allocation194_spill] sm:$0xff] }
 0x19f   : > { %v17335_v27 = vpack.c.bf16 %v24293_v18, %v24292_v1  ;;  %24297 = vst [vmem:[#allocation233_spill] sm:$0xff] %v17343_v58  ;;  %24300 = vst [vmem:[#allocation234_spill] sm:$0xff] %v17350_v16  ;;  %v17366_v59 = vsub.f32 %v16461_v15, %v23174_v46  ;;  %v1235_v35 = vsub.f32 %v17038_v5, %v23170_v49  ;;  %v23173_v1 = vand.u32 4294901760, %v17081_v63  ;;  %v15540_v58 = vld [vmem:[#allocation2] sm:$0xff] }
 0x1a0   : > { %v17361_v19 = vpack.c.bf16 %v24302_v30, %v24301_v17  ;;  %v1223_v34 = vsub.f32 %v17036_v40, %v23171_v12  ;;  %v23175_v60 = vand.u32 4294901760, %v17083_v38  ;;  %v23177_v18 = vand.u32 4294901760, %v17094_v24 }
 0x1a1   : > { %24294 = vst [vmem:[#allocation232_spill] sm:$0xff] %v17335_v27  ;;  %v23178_v32 = vand.u32 4294901760, %v17096_v23  ;;  %v1236_v36 = vand.u32 4294901760, %v1235_v35  ;;  %v1241_v28 = vsub.f32 %v17081_v63, %v23173_v1  ;;  %v24304_v17 = vand.u32 4294901760, %v17047_v45 }
 0x1a2   : > { %24303 = vst [vmem:[#allocation235_spill] sm:$0xff] %v17361_v19  ;;  %v1224_v2 = vand.u32 4294901760, %v1223_v34  ;;  %v24305_v30 = vand.u32 4294901760, %v17050_v44  ;;  %v1253_v48 = vsub.f32 %v17083_v38, %v23175_v60  ;;  %v1247_v34 = vsub.f32 %v17094_v24, %v23177_v18 }
 0x1a3   : > { %v1259_v35 = vsub.f32 %v17096_v23, %v23178_v32  ;;  %v1242_v45 = vand.u32 4294901760, %v1241_v28  ;;  %v24308_v44 = vand.u32 4294901760, %v17073_v53  ;;  %v23181_v46 = vand.u32 4294901760, %v17139_v0  ;;  %v24312_v28 = vld [vmem:[#allocation198_spill] sm:$0xff]  ;;  %v24313_v53 = vld [vmem:[#allocation187_spill] sm:$0xff] }
 0x1a4   : > { %v17386_v49 = vpack.c.bf16 %v24305_v30, %v24304_v17  ;;  %v17398_v1 = vpack.c.bf16 %v1236_v36, %v1224_v2  ;;  %v24309_v17 = vand.u32 4294901760, %v17076_v47  ;;  %v1254_v60 = vand.u32 4294901760, %v1253_v48  ;;  %v24311_v2 = vld [vmem:[#allocation197_spill] sm:$0xff]  ;;  %v24315_v47 = vld [vmem:[#allocation188_spill] sm:$0xff] }
 0x1a5   : > { %v1248_v39 = vand.u32 4294901760, %v1247_v34  ;;  %v1260_v43 = vand.u32 4294901760, %v1259_v35  ;;  %v23186_v18 = vand.u32 4294901760, %v17141_v56  ;;  %v1265_v32 = vsub.f32 %v17139_v0, %v23181_v46  ;;  %v24320_v35 = vld [vmem:[#allocation193_spill] sm:$0xff] }
 0x1a6   : > { %24306 = vst [vmem:[#allocation236_spill] sm:$0xff] %v17386_v49  ;;  %24307 = vst [vmem:[#allocation237_spill] sm:$0xff] %v17398_v1  ;;  %v17404_v30 = vpack.c.bf16 %v24309_v17, %v24308_v44  ;;  %v24314_v61 = vand.u32 4294901760, %v24313_v53  ;;  %v24316_v44 = vand.u32 4294901760, %v24315_v47  ;;  %v17419_v15 = vpack.c.bf16 %v1254_v60, %v1242_v45 }
 0x1a7   : > { %v17421_v48 = vpack.c.bf16 %v1260_v43, %v1248_v39  ;;  %v1277_v34 = vsub.f32 %v17141_v56, %v23186_v18  ;;  %v24321_v46 = vand.u32 4294901760, %v24320_v35  ;;  %v24323_v36 = vand.u32 4294901760, %v24322_v9  ;;  %v24327_v35 = vld [vmem:[#allocation199_spill] sm:$0xff]  ;;  %v24329_v18 = vld [vmem:[#allocation200_spill] sm:$0xff] }
 0x1a8   : > { %24310 = vst [vmem:[#allocation238_spill] sm:$0xff] %v17404_v30  ;;  %v17417_v17 = vpack.c.bf16 %v24316_v44, %v24314_v61  ;;  %24318 = vst [vmem:[#allocation198_spill] sm:$0xff] %v17419_v15  ;;  %v1266_v12 = vand.u32 4294901760, %v1265_v32  ;;  %v24325_v53 = vand.u32 4294901760, %v24311_v2  ;;  %v24326_v60 = vand.u32 4294901760, %v24312_v28  ;;  %v24356_v15 = vld [vmem:[#allocation29_spill] sm:$0xff] }
 0x1a9   : > { %24319 = vst [vmem:[#allocation187_spill] sm:$0xff] %v17421_v48  ;;  %v17430_v4 = vpack.c.bf16 %v24323_v36, %v24321_v46  ;;  %v23190_v43 = vand.u32 4294901760, %v17197_v8  ;;  %v1278_v45 = vand.u32 4294901760, %v1277_v34  ;;  %v23192_v47 = vand.u32 4294901760, %v17199_v10  ;;  %v24340_v48 = vld [vmem:[#allocation61_spill] sm:$0xff] }
 0x1aa   : > { %24317 = vst [vmem:[#allocation197_spill] sm:$0xff] %v17417_v17  ;;  %v1271_v61 = vsub.f32 %v24311_v2, %v24325_v53  ;;  %v1283_v39 = vsub.f32 %v24312_v28, %v24326_v60  ;;  %v23195_v44 = vand.u32 4294901760, %v17210_v33  ;;  %v23198_v9 = vand.u32 4294901760, %v17212_v7 }
 0x1ab   : > { %24324 = vst [vmem:[#allocation188_spill] sm:$0xff] %v17430_v4  ;;  %v1289_v32 = vsub.f32 %v17197_v8, %v23190_v43  ;;  %v24328_v53 = vand.u32 4294901760, %v24327_v35  ;;  %v24330_v62 = vand.u32 4294901760, %v24329_v18  ;;  %v17451_v4 = vpack.c.bf16 %v1278_v45, %v1266_v12  ;;  %v24334_v18 = vld [vmem:[#allocation205_spill] sm:$0xff] }
 0x1ac   : > { %v1272_v46 = vand.u32 4294901760, %v1271_v61  ;;  %v1284_v36 = vand.u32 4294901760, %v1283_v39  ;;  %v1301_v34 = vsub.f32 %v17199_v10, %v23192_v47  ;;  %v1295_v61 = vsub.f32 %v17210_v33, %v23195_v44  ;;  %v24514_v10 = vld [vmem:[#allocation126_spill] sm:$0xff] }
 0x1ad   : > { %v17449_v60 = vpack.c.bf16 %v24330_v62, %v24328_v53  ;;  %24332 = vst [vmem:[#allocation194_spill] sm:$0xff] %v17451_v4  ;;  %v1307_v39 = vsub.f32 %v17212_v7, %v23198_v9  ;;  %v1290_v35 = vand.u32 4294901760, %v1289_v32  ;;  %v24335_v62 = vand.u32 4294901760, %v24334_v18  ;;  %v24336_v53 = vld [vmem:[#allocation206_spill] sm:$0xff]  ;;  %v24339_v4 = vld [vmem:[#allocation219_spill] sm:$0xff] }
 0x1ae   : > { %v17462_v43 = vpack.c.bf16 %v1284_v36, %v1272_v46  ;;  %v24337_v12 = vand.u32 4294901760, %v24336_v53  ;;  %v1302_v47 = vand.u32 4294901760, %v1301_v34  ;;  %v1296_v17 = vand.u32 4294901760, %v1295_v61  ;;  %v24341_v18 = vld [vmem:[#allocation62_spill] sm:$0xff] }
 0x1af   : > { %24331 = vst [vmem:[#allocation193_spill] sm:$0xff] %v17449_v60  ;;  %v23197_v60 = vand.u32 4294901760, %v17243_v6  ;;  %v1308_v30 = vand.u32 4294901760, %v1307_v39  ;;  %v23199_v44 = vand.u32 4294901760, %v24339_v4  ;;  %v23203_v36 = vand.u32 4294901760, %v17256_v20 }
 0x1b0   : > { %24333 = vst [vmem:[#allocation199_spill] sm:$0xff] %v17462_v43  ;;  %v17468_v45 = vpack.c.bf16 %v24337_v12, %v24335_v62  ;;  %v23205_v32 = vand.u32 4294901760, %v17258_v51  ;;  %v17479_v53 = vpack.c.bf16 %v1302_v47, %v1290_v35  ;;  %v24344_v61 = vand.u32 4294901760, %v16503_v54  ;;  %v24347_v43 = vld [vmem:[#allocation73_spill] sm:$0xff] }
 0x1b1   : > { %v1313_v46 = vsub.f32 %v17243_v6, %v23197_v60  ;;  %v17481_v12 = vpack.c.bf16 %v1308_v30, %v1296_v17  ;;  %v1325_v34 = vsub.f32 %v24339_v4, %v23199_v44  ;;  %v1319_v9 = vsub.f32 %v17256_v20, %v23203_v36  ;;  %v24346_v44 = vld [vmem:[#allocation72_spill] sm:$0xff] }
 0x1b2   : > { %24338 = vst [vmem:[#allocation200_spill] sm:$0xff] %v17468_v45  ;;  %24342 = vst [vmem:[#allocation205_spill] sm:$0xff] %v17479_v53  ;;  %v17489_v39 = vsub.f32 %v16503_v54, %v24344_v61  ;;  %v1331_v47 = vsub.f32 %v17258_v51, %v23205_v32  ;;  %v24345_v17 = vand.u32 4294901760, %v16505_v57  ;;  %v23206_v61 = vand.u32 4294901760, %v17268_v42 }
 0x1b3   : > { %24343 = vst [vmem:[#allocation206_spill] sm:$0xff] %v17481_v12  ;;  %v1314_v60 = vand.u32 4294901760, %v1313_v46  ;;  %v1326_v49 = vand.u32 4294901760, %v1325_v34  ;;  %v1320_v45 = vand.u32 4294901760, %v1319_v9  ;;  %v23207_v36 = vand.u32 4294901760, %v17274_v22 }
 0x1b4   : > { %v1013_v35 = vsub.f32 %v16505_v57, %v24345_v17  ;;  %v1332_v12 = vand.u32 4294901760, %v1331_v47  ;;  %v1337_v17 = vsub.f32 %v17268_v42, %v23206_v61  ;;  %v23212_v9 = vand.u32 4294901760, %v17278_v37 }
 0x1b5   : > { %v17504_v32 = vpack.c.bf16 %v1326_v49, %v1314_v60  ;;  %v1349_v34 = vsub.f32 %v17274_v22, %v23207_v36  ;;  %v24352_v57 = vand.u32 4294901760, %v24346_v44  ;;  %v15545_v22 = vld [vmem:[#allocation2 + $0x18] sm:$0xff] }
 0x1b6   : > { %v17509_v62 = vpack.c.bf16 %v1332_v12, %v1320_v45  ;;  %v1338_v60 = vand.u32 4294901760, %v1337_v17  ;;  %v24351_v45 = vand.u32 4294901760, %v24341_v18  ;;  %v1343_v36 = vsub.f32 %v17278_v37, %v23212_v9 }
 0x1b7   : > { %24348 = vst [vmem:[#allocation219_spill] sm:$0xff] %v17504_v32  ;;  %v1350_v19 = vand.u32 4294901760, %v1349_v34  ;;  %v24353_v17 = vand.u32 4294901760, %v24347_v43  ;;  %v984_v9 = vand.u32 4294901760, %v17355_v29  ;;  %v24362_v29 = vsub.s32 1, %v17327_v31 }
 0x1b8   : > { %24349 = vst [vmem:[#allocation239_spill] sm:$0xff] %v17509_v62  ;;  %v1019_v12 = vsub.f32 %v24341_v18, %v24351_v45  ;;  %v1344_v18 = vand.u32 4294901760, %v1343_v36  ;;  %v1002_v62 = vand.u32 4294901760, %v17489_v39  ;;  %v24364_v39 = vld [vmem:[#allocation38_spill] sm:$0xff] }
 0x1b9   : > { %v17535_v45 = vpack.c.bf16 %v1350_v19, %v1338_v60 }
 0x1ba   : > { %v1020_v32 = vand.u32 4294901760, %v1019_v12 }
 0x1bb   : > { %24355 = vst [vmem:[#allocation240_spill] sm:$0xff] %v17535_v45 }
 0x1be   : > { %v536_v30 = vpop.xlane.xlu0 %535 }
 0x1bf   : > { %v546_v54 = vmax.f32 %v536_v30, 1e-24  ;;  %v24350_v30 = vand.u32 4294901760, %v24340_v48 }
 0x1c0   : > { %v542_v46 = vpop.xlane.xlu1 %541 }
 0x1c1   : > { %v548_v53 = vmax.f32 %v542_v46, 1e-24  ;;  %15500 = vrsqrt.f32 %v546_v54  ;;  %v1007_v49 = vsub.f32 %v24340_v48, %v24350_v30  ;;  %v1025_v30 = vsub.f32 %v24346_v44, %v24352_v57 }
 0x1c2   : > { %v539_v47 = vpop.xlane.xlu0 %538  ;;  %v1037_v46 = vsub.f32 %v24347_v43, %v24353_v17  ;;  %v996_v57 = vand.u32 4294901760, %v17366_v59  ;;  %v1014_v17 = vand.u32 4294901760, %v1013_v35  ;;  %v24363_v59 = vsub.s32 0, %v17327_v31 }
 0x1c3   : > { %15502 = vrsqrt.f32 %v548_v53  ;;  %v547_v61 = vmax.f32 %v539_v47, 1e-24  ;;  %v24354_v47 = vand.u32 4294901760, %v17280_v52  ;;  %v1008_v43 = vand.u32 4294901760, %v1007_v49  ;;  %v24366_v49 = vld [vmem:[#allocation39_spill] sm:$0xff] }
 0x1c4   : > { %v545_v54 = vpop.xlane.xlu1 %544  ;;  %v1026_v19 = vand.u32 4294901760, %v1025_v30  ;;  %v1038_v36 = vand.u32 4294901760, %v1037_v46  ;;  %v24365_v35 = vand.u32 4294901760, %v24364_v39  ;;  %v24367_v12 = vand.u32 4294901760, %v24366_v49  ;;  %v24381_v39 = vld [vmem:[#allocation56_spill] sm:$0xff] }
 0x1c5   : > { %v549_v53 = vmax.f32 %v545_v54, 1e-24  ;;  %v1355_v48 = vsub.f32 %v17280_v52, %v24354_v47  ;;  %15504 = vrsqrt.f32 %v547_v61  ;;  %v525_v54 = vld [vmem:[%s16320_s14] sm:$0x3]  ;;  %v24357_v47 = vand.u32 4294901760, %v24356_v15  ;;  %v24358_v61 = vld [vmem:[#allocation31_spill] sm:$0xff] }
 0x1c6   : > { %v24359_v1 = vand.u32 4294901760, %v24358_v61  ;;  %v17557_v45 = vpack.c.bf16 %v24367_v12, %v24365_v35  ;;  %v24369_v15 = vld [vmem:[#allocation42_spill] sm:$0xff]  ;;  %v24382_v49 = vand.u32 4294901760, %v24381_v39 }
 0x1c7   : > { %15506 = vrsqrt.f32 %v549_v53  ;;  %v1356_v44 = vand.u32 4294901760, %v1355_v48  ;;  %v578_v53 = vrot.slane %v525_v54, %v24362_v29  ;;  %v574_v48 = vrot.slane %v525_v54, %v24363_v59  ;;  %v24376_v29 = vld [vmem:[#allocation52_spill] sm:$0xff]  ;;  %v24379_v54 = vld [vmem:[#allocation55_spill] sm:$0xff] }
 0x1c8   : > { %v17545_v34 = vpack.c.bf16 %v24359_v1, %v24357_v47  ;;  %24368 = vst [vmem:[#allocation38_spill] sm:$0xff] %v17557_v45  ;;  %v24370_v61 = vand.u32 4294901760, %v24369_v15  ;;  %v24371_v1 = vld [vmem:[#allocation43_spill] sm:$0xff]  ;;  %v24380_v59 = vand.u32 4294901760, %v24379_v54  ;;  %v24391_v54 = vld [vmem:[#allocation70_spill] sm:$0xff] }
 0x1c9   : > { %v17547_v60 = vpack.c.bf16 %v1356_v44, %v1344_v18  ;;  %v24372_v47 = vand.u32 4294901760, %v24371_v1  ;;  %v17565_v44 = vpack.c.bf16 %v996_v57, %v984_v9  ;;  %v24374_v18 = vld [vmem:[#allocation51_spill] sm:$0xff]  ;;  %v17583_v9 = vpack.c.bf16 %v1020_v32, %v1008_v43  ;;  %v24394_v43 = vld [vmem:[#allocation77_spill] sm:$0xff] }
 0x1ca   : > { %24360 = vst [vmem:[#allocation29_spill] sm:$0xff] %v17545_v34  ;;  %v24375_v46 = vand.u32 4294901760, %v24374_v18  ;;  %v17577_v35 = vpack.c.bf16 %v24382_v49, %v24380_v59  ;;  %v24384_v57 = vld [vmem:[#allocation63_spill] sm:$0xff]  ;;  %v24392_v39 = vand.u32 4294901760, %v24391_v54  ;;  %v24395_v32 = vand.u32 4294901760, %v24394_v43 }
 0x1cb   : > { %24361 = vst [vmem:[#allocation31_spill] sm:$0xff] %v17547_v60  ;;  %v17563_v30 = vpack.c.bf16 %v24372_v47, %v24370_v61  ;;  %v24377_v60 = vand.u32 4294901760, %v24376_v29  ;;  %v15501_v15 = vpop.eup %15500  ;;  %v17581_v61 = vpack.c.bf16 %v1014_v17, %v1002_v62  ;;  %v24385_v1 = vand.u32 4294901760, %v24384_v57  ;;  %v24386_v47 = vld [vmem:[#allocation64_spill] sm:$0xff]  ;;  %v24396_v57 = vld [vmem:[#allocation78_spill] sm:$0xff]  ;;  %v24399_v54 = vld [vmem:[#allocation83_spill] sm:$0xff] }
 0x1cc   : > { %24383 = vst [vmem:[#allocation43_spill] sm:$0xff] %v17577_v35  ;;  %v24387_v18 = vand.u32 4294901760, %v24386_v47  ;;  %v554_v12 = vmul.f32 %v15540_v58, %v15501_v15  ;;  %v555_v62 = vmul.f32 %v15541_v14, %v15501_v15  ;;  %v17597_v17 = vpack.c.bf16 %v1038_v36, %v1026_v19  ;;  %v24404_v36 = vld [vmem:[#allocation100_spill] sm:$0xff]  ;;  %v15547_v15 = vld [vmem:[#allocation2 + $0x38] sm:$0xff] }
 0x1cd   : > { %24373 = vst [vmem:[#allocation39_spill] sm:$0xff] %v17563_v30  ;;  %v17571_v31 = vpack.c.bf16 %v24377_v60, %v24375_v46  ;;  %v24389_v46 = vld [vmem:[#allocation69_spill] sm:$0xff]  ;;  %v15503_v49 = vpop.eup %15502  ;;  %v24397_v3 = vand.u32 4294901760, %v24396_v57 }
 0x1ce   : > { %v17589_v60 = vpack.c.bf16 %v24387_v18, %v24385_v1  ;;  %v24390_v29 = vand.u32 4294901760, %v24389_v46  ;;  %v15542_v1 = vld [vmem:[#allocation2 + $0x20] sm:$0xff]  ;;  %v15543_v46 = vld [vmem:[#allocation2 + $0x28] sm:$0xff]  ;;  %v562_v58 = vmul.f32 16.0, %v554_v12  ;;  %v563_v19 = vmul.f32 16.0, %v555_v62  ;;  %v15546_v62 = vld [vmem:[#allocation2 + $0x30] sm:$0xff] }
 0x1cf   : > { %24378 = vst [vmem:[#allocation42_spill] sm:$0xff] %v17571_v31  ;;  %v17603_v47 = vpack.c.bf16 %v24397_v3, %v24395_v32  ;;  %v558_v18 = vmul.f32 %v15542_v1, %v15503_v49  ;;  %v559_v11 = vmul.f32 %v15543_v46, %v15503_v49  ;;  %v15505_v43 = vpop.eup %15504  ;;  %v24405_v49 = vld [vmem:[#allocation101_spill] sm:$0xff]  ;;  %v24406_v46 = vld [vmem:[#allocation103_spill] sm:$0xff] }
 0x1d0   : > { %24388 = vst [vmem:[#allocation51_spill] sm:$0xff] %v17589_v60  ;;  %v17595_v59 = vpack.c.bf16 %v24392_v39, %v24390_v29  ;;  %v24400_v29 = vand.u32 4294901760, %v24399_v54  ;;  %v24401_v39 = vld [vmem:[#allocation84_spill] sm:$0xff]  ;;  %v557_v42 = vmul.f32 %v15545_v22, %v15505_v43  ;;  %v582_v14 = vmul.f32 %v578_v53, %v563_v19 }
 0x1d1   : > { %24398 = vst [vmem:[#allocation55_spill] sm:$0xff] %v17603_v47  ;;  %v24402_v52 = vand.u32 4294901760, %v24401_v39  ;;  %v566_v32 = vmul.f32 16.0, %v558_v18  ;;  %v567_v57 = vmul.f32 16.0, %v559_v11  ;;  %v15507_v39 = vpop.eup %15506  ;;  %v581_v12 = vmul.f32 %v574_v48, %v562_v58 }
 0x1d2   : > { %24393 = vst [vmem:[#allocation52_spill] sm:$0xff] %v17595_v59  ;;  %v560_v25 = vmul.f32 %v15546_v62, %v15507_v39  ;;  %v561_v21 = vmul.f32 %v15547_v15, %v15507_v39  ;;  %v565_v18 = vmul.f32 16.0, %v557_v42  ;;  %v17618_v11 = vand.u32 4294901760, %v582_v14 }
 0x1d3   : > { %v17609_v37 = vpack.c.bf16 %v24402_v52, %v24400_v29  ;;  %v15544_v52 = vld [vmem:[#allocation2 + $0x10] sm:$0xff]  ;;  %v586_v51 = vmul.f32 %v578_v53, %v567_v57  ;;  %v585_v3 = vmul.f32 %v574_v48, %v566_v32  ;;  %v17620_v1 = vand.u32 4294901760, %v581_v12 }
 0x1d4   : > { %v556_v29 = vmul.f32 %v15544_v52, %v15505_v43  ;;  %24407 = vst [vmem:[#allocation63_spill] sm:$0xff] %v17618_v11  ;;  %v568_v54 = vmul.f32 16.0, %v560_v25  ;;  %v569_v50 = vmul.f32 16.0, %v561_v21  ;;  %v17627_v22 = vsub.f32 %v582_v14, %v17618_v11 }
 0x1d5   : > { %24403 = vst [vmem:[#allocation56_spill] sm:$0xff] %v17609_v37  ;;  %24408 = vst [vmem:[#allocation64_spill] sm:$0xff] %v17620_v1  ;;  %v17622_v20 = vand.u32 4294901760, %v586_v51  ;;  %v17624_v52 = vand.u32 4294901760, %v585_v3  ;;  %v17630_v58 = vsub.f32 %v581_v12, %v17620_v1  ;;  %v584_v19 = vmul.f32 %v578_v53, %v565_v18  ;;  %v24451_v1 = vld [vmem:[#allocation115_spill] sm:$0xff] }
 0x1d6   : > { %v564_v55 = vmul.f32 16.0, %v556_v29  ;;  %24411 = vst [vmem:[#allocation77_spill] sm:$0xff] %v17627_v22  ;;  %v588_v25 = vmul.f32 %v578_v53, %v569_v50  ;;  %v587_v21 = vmul.f32 %v574_v48, %v568_v54  ;;  %3055 = vmatprep.mubr.f32.mxu1 %v17627_v22  ;;  %v17644_v14 = vand.u32 4294901760, %v17627_v22  ;;  %v24422_v53 = vld [vmem:[#allocation104_spill] sm:$0xff] }
 0x1d7   : > { %24409 = vst [vmem:[#allocation69_spill] sm:$0xff] %v17622_v20  ;;  %24410 = vst [vmem:[#allocation70_spill] sm:$0xff] %v17624_v52  ;;  %v17633_v42 = vsub.f32 %v586_v51, %v17622_v20  ;;  %v17636_v43 = vsub.f32 %v585_v3, %v17624_v52  ;;  %v17639_v32 = vand.u32 4294901760, %v584_v19  ;;  %v17647_v39 = vand.u32 4294901760, %v17630_v58  ;;  %3058 = vmatmul.mubr.f32.vlgmr.msra.gmra.mrb[0].mxu1 %v17630_v58 }
 0x1d8   : > { %24412 = vst [vmem:[#allocation78_spill] sm:$0xff] %v17630_v58  ;;  %v583_v15 = vmul.f32 %v574_v48, %v564_v55  ;;  %24417 = vst [vmem:[#allocation243_spill] sm:$0xff] %v17644_v14  ;;  %v17650_v55 = vand.u32 4294901760, %v588_v25  ;;  %v17652_v51 = vand.u32 4294901760, %v587_v21  ;;  %13790 = vmatpush1.bf16.msra.mxu1 %v17335_v27  ;;  %v912_v29 = vsub.f32 %v17627_v22, %v17644_v14 }
 0x1d9   : > { %24413 = vst [vmem:[#allocation83_spill] sm:$0xff] %v17633_v42  ;;  %24414 = vst [vmem:[#allocation84_spill] sm:$0xff] %v17636_v43  ;;  %v17655_v50 = vand.u32 4294901760, %v17633_v42  ;;  %v17660_v3 = vsub.f32 %v584_v19, %v17639_v32  ;;  %v918_v12 = vsub.f32 %v17630_v58, %v17647_v39  ;;  %13792 = vmatprep.subr.bf16.mxu1 %v17350_v16  ;;  %v17677_v19 = vand.u32 4294901760, %v17636_v43 }
 0x1da   : > { %24415 = vst [vmem:[#allocation241_spill] sm:$0xff] %v17639_v32  ;;  %v17641_v57 = vand.u32 4294901760, %v583_v15  ;;  %24418 = vst [vmem:[#allocation244_spill] sm:$0xff] %v17647_v39  ;;  %v17671_v62 = vsub.f32 %v588_v25, %v17650_v55  ;;  %v17674_v18 = vsub.f32 %v587_v21, %v17652_v51  ;;  %v17683_v27 = vand.u32 4294901760, %v912_v29  ;;  %v24445_v32 = vld [vmem:[#allocation98_spill] sm:$0xff] }
 0x1db   : > { %24419 = vst [vmem:[#allocation245_spill] sm:$0xff] %v17650_v55  ;;  %24420 = vst [vmem:[#allocation246_spill] sm:$0xff] %v17652_v51  ;;  %3065 = vmatprep.mubr.f32.mxu1 %v17660_v3  ;;  %v17685_v58 = vand.u32 4294901760, %v918_v12  ;;  %v17688_v16 = vand.u32 4294901760, %v17660_v3  ;;  %v944_v21 = vsub.f32 %v17633_v42, %v17655_v50  ;;  %v24435_v12 = vand.u32 4294901760, %v24406_v46 }
 0x1dc   : > { %24416 = vst [vmem:[#allocation242_spill] sm:$0xff] %v17641_v57  ;;  %24421 = vst [vmem:[#allocation247_spill] sm:$0xff] %v17655_v50  ;;  %v17663_v54 = vsub.f32 %v583_v15, %v17641_v57  ;;  %v24428_v15 = vand.u32 4294901760, %v24404_v36  ;;  %v17697_v22 = vand.u32 4294901760, %v17671_v62  ;;  %13794 = vmatpush1.bf16.msra.mxu1 %v17545_v34  ;;  %914 = vmatprep.mubr.f32.mxu0 %v17683_v27  ;;  %v24436_v52 = vand.u32 4294901760, %v24422_v53 }
 0x1dd   : > { %24423 = vst [vmem:[#allocation248_spill] sm:$0xff] %v17660_v3  ;;  %24425 = vst [vmem:[#allocation250_spill] sm:$0xff] %v17671_v62  ;;  %v1079_v51 = vsub.f32 %v24406_v46, %v24435_v12  ;;  %920 = vmatmul.mubr.f32.vlgmr.msra.gmra.mrb[0].mxu0 %v17685_v58  ;;  %v17719_v12 = vand.u32 4294901760, %v17674_v18  ;;  %13796 = vmatprep.subr.bf16.mxu1 %v17557_v45 }
 0x1de   : > { %24424 = vst [vmem:[#allocation249_spill] sm:$0xff] %v17663_v54  ;;  %24426 = vst [vmem:[#allocation251_spill] sm:$0xff] %v17674_v18  ;;  %v1073_v48 = vsub.f32 %v24404_v36, %v24428_v15  ;;  %v17691_v25 = vand.u32 4294901760, %v17663_v54  ;;  %3068 = vmatmul.mubr.f32.gmra.mrb[2].mxu1 %v17663_v54  ;;  %v24434_v15 = vand.u32 4294901760, %v24405_v49  ;;  %v928_v36 = vsub.f32 %v17660_v3, %v17688_v16  ;;  %v24440_v3 = vld [vmem:[#allocation92_spill] sm:$0xff] }
 0x1df   : > { %24427 = vst [vmem:[#allocation252_spill] sm:$0xff] %v17677_v19  ;;  %24429 = vst [vmem:[#allocation253_spill] sm:$0xff] %v17683_v27  ;;  %v1091_v20 = vsub.f32 %v24422_v53, %v24436_v52  ;;  %3075 = vmatprep.mubr.f32.mxu1 %v17633_v42  ;;  %v24438_v27 = vld [vmem:[#allocation91_spill] sm:$0xff]  ;;  %v24441_v46 = vand.u32 4294901760, %v24440_v3  ;;  %v24446_v52 = vand.u32 4294901760, %v24445_v32  ;;  %13278 = vmatpush1.bf16.msra.mxu0 %v17565_v44  ;;  %v24459_v3 = vand.u32 4294901760, %v24451_v1 }
 0x1e0   : > { %24430 = vst [vmem:[#allocation254_spill] sm:$0xff] %v17685_v58  ;;  %24431 = vst [vmem:[#allocation255_spill] sm:$0xff] %v17688_v16  ;;  %v1085_v29 = vsub.f32 %v24405_v49, %v24434_v15  ;;  %v934_v55 = vsub.f32 %v17663_v54, %v17691_v25  ;;  %v950_v15 = vsub.f32 %v17636_v43, %v17677_v19  ;;  %v24439_v34 = vand.u32 4294901760, %v24438_v27  ;;  %v24443_v54 = vld [vmem:[#allocation97_spill] sm:$0xff]  ;;  %v24450_v19 = vld [vmem:[#allocation114_spill] sm:$0xff] }
 0x1e1   : > { %24432 = vst [vmem:[#allocation256_spill] sm:$0xff] %v17691_v25  ;;  %24433 = vst [vmem:[#allocation257_spill] sm:$0xff] %v17697_v22  ;;  %v24444_v57 = vand.u32 4294901760, %v24443_v54  ;;  %v17735_v58 = vand.u32 4294901760, %v928_v36  ;;  %13280 = vmatprep.subr.bf16.mxu0 %v17581_v61  ;;  %v1074_v44 = vand.u32 4294901760, %v1073_v48  ;;  %13798 = vmatpush1.bf16.msra.mxu1 %v17563_v30  ;;  %v1080_v36 = vand.u32 4294901760, %v1079_v51 }
 0x1e2   : > { %24437 = vst [vmem:[#allocation258_spill] sm:$0xff] %v17719_v12  ;;  %v17725_v49 = vpack.c.bf16 %v24441_v46, %v24439_v34  ;;  %v17737_v42 = vand.u32 4294901760, %v934_v55  ;;  %3078 = vmatmul.mubr.f32.gmra.mrb[4].mxu1 %v17636_v43  ;;  %v17743_v34 = vand.u32 4294901760, %v944_v21  ;;  %v960_v46 = vsub.f32 %v17671_v62, %v17697_v22  ;;  %v24453_v55 = vld [vmem:[#allocation117_spill] sm:$0xff]  ;;  %v24456_v21 = vld [vmem:[#allocation128_spill] sm:$0xff]  ;;  %13800 = vmatprep.subr.bf16.mxu1 %v17571_v31  ;;  %v24460_v54 = vld [vmem:[#allocation131_spill] sm:$0xff] }
 0x1e3   : > { %v17731_v53 = vpack.c.bf16 %v24446_v52, %v24444_v57  ;;  %24448 = vst [vmem:[#allocation97_spill] sm:$0xff] %v17735_v58  ;;  %v1086_v32 = vand.u32 4294901760, %v1085_v29  ;;  %930 = vmatprep.mubr.f32.mxu0 %v17735_v58  ;;  %v1092_v57 = vand.u32 4294901760, %v1091_v20  ;;  %v24454_v52 = vld [vmem:[#allocation118_spill] sm:$0xff]  ;;  %3085 = vmatprep.mubr.f32.mxu1 %v17671_v62  ;;  %v17753_v61 = vand.u32 4294901760, %v950_v15  ;;  %v24457_v27 = vld [vmem:[#allocation129_spill] sm:$0xff] }
 0x1e4   : > { %24442 = vst [vmem:[#allocation91_spill] sm:$0xff] %v17725_v49  ;;  %24449 = vst [vmem:[#allocation98_spill] sm:$0xff] %v17737_v42  ;;  %936 = vmatmul.mubr.f32.gmra.mrb[2].mxu0 %v17737_v42  ;;  %v966_v48 = vsub.f32 %v17674_v18, %v17719_v12  ;;  %v24458_v20 = vand.u32 4294901760, %v24450_v19  ;;  %v1109_v15 = vsub.f32 %v24451_v1, %v24459_v3  ;;  %v24461_v58 = vld [vmem:[#allocation132_spill] sm:$0xff]  ;;  %v17771_v43 = vand.u32 4294901760, %v960_v46  ;;  %v24465_v31 = vld [vmem:[#allocation106_spill] sm:$0xff] }
 0x1e5   : > { %24447 = vst [vmem:[#allocation92_spill] sm:$0xff] %v17731_v53  ;;  %24452 = vst [vmem:[#allocation259_spill] sm:$0xff] %v17743_v34  ;;  %13282 = vmatpush1.bf16.msra.mxu0 %v17583_v9  ;;  %946 = vmatprep.mubr.f32.mxu0 %v17743_v34  ;;  %v24463_v9 = vld [vmem:[#allocation105_spill] sm:$0xff]  ;;  %v24466_v30 = vand.u32 4294901760, %v24465_v31  ;;  %v24469_v12 = vld [vmem:[#allocation143_spill] sm:$0xff]  ;;  %v13291_v62 = vpack.c.bf16 %v1086_v32, %v1074_v44  ;;  %v24470_v42 = vand.u32 4294901760, %v24453_v55 }
 0x1e6   : > { %24455 = vst [vmem:[#allocation117_spill] sm:$0xff] %v17753_v61  ;;  %v1097_v51 = vsub.f32 %v24450_v19, %v24458_v20  ;;  %3088 = vmatmul.mubr.f32.gmra.mrb[6].mxu1 %v17674_v18  ;;  %24462 = vst [vmem:[#allocation118_spill] sm:$0xff] %v17771_v43  ;;  %v24464_v29 = vand.u32 4294901760, %v24463_v9  ;;  %v24468_v20 = vld [vmem:[#allocation142_spill] sm:$0xff]  ;;  %13284 = vmatprep.subr.bf16.mxu0 %v17597_v17  ;;  %v24471_v34 = vand.u32 4294901760, %v24454_v52  ;;  %v17791_v31 = vand.u32 4294901760, %v966_v48 }
 0x1e7   : > { %v23315_v19 = vand.u32 4294901760, %v24468_v20  ;;  %13802 = vmatpush1.bf16.msra.mxu1 %v17577_v35  ;;  %v1103_v46 = vsub.f32 %v24453_v55, %v24470_v42  ;;  %3225 = vmatprep.mubr.f32.mxu1 %v17644_v14  ;;  %v24474_v44 = vand.u32 4294901760, %v24457_v27  ;;  %v24475_v3 = vand.u32 4294901760, %v24460_v54  ;;  %v24480_v18 = vld [vmem:[#allocation111_spill] sm:$0xff] }
 0x1e8   : > { %v17777_v45 = vpack.c.bf16 %v24466_v30, %v24464_v29  ;;  %v1115_v9 = vsub.f32 %v24454_v52, %v24471_v34  ;;  %952 = vmatmul.mubr.f32.gmra.mrb[4].mxu0 %v17753_v61  ;;  %24472 = vst [vmem:[#allocation129_spill] sm:$0xff] %v17791_v31  ;;  %v13293_v30 = vpack.c.bf16 %v1092_v57, %v1080_v36  ;;  %v24473_v29 = vand.u32 4294901760, %v24456_v21  ;;  %v24479_v61 = vld [vmem:[#allocation146_spill] sm:$0xff] }
 0x1e9   : > { %v1133_v32 = vsub.f32 %v24457_v27, %v24474_v44  ;;  %13286 = vmatpush1.bf16.msra.mxu0 %v17315_v26  ;;  %13804 = vmatprep.subr.bf16.mxu1 %v17589_v60  ;;  %v1098_v42 = vand.u32 4294901760, %v1097_v51  ;;  %v1110_v34 = vand.u32 4294901760, %v1109_v15  ;;  %v1127_v48 = vsub.f32 %v24460_v54, %v24475_v3  ;;  %v24478_v15 = vld [vmem:[#allocation145_spill] sm:$0xff]  ;;  %v24482_v60 = vld [vmem:[#allocation112_spill] sm:$0xff] }
 0x1ea   : > { %24467 = vst [vmem:[#allocation128_spill] sm:$0xff] %v17777_v45  ;;  %v1121_v17 = vsub.f32 %v24456_v21, %v24473_v29  ;;  %v24476_v36 = vand.u32 4294901760, %v24461_v58  ;;  %962 = vmatprep.mubr.f32.mxu0 %v17771_v43  ;;  %13288 = vmatprep.subr.bf16.mxu0 %v17317_v13  ;;  %v1145_v26 = vsub.f32 %v24468_v20, %v23315_v19  ;;  %v24477_v29 = vand.u32 4294901760, %v24469_v12  ;;  %v24488_v20 = vld [vmem:[#allocation120_spill] sm:$0xff] }
 0x1eb   : > { %13806 = vmatpush1.bf16.msra.mxu1 %v17595_v59  ;;  %v1104_v14 = vand.u32 4294901760, %v1103_v46  ;;  %v24481_v43 = vand.u32 4294901760, %v24480_v18  ;;  %v24483_v13 = vand.u32 4294901760, %v24482_v60  ;;  %v1134_v44 = vand.u32 4294901760, %v1133_v32 }
 0x1ec   : > { %v1139_v57 = vsub.f32 %v24461_v58, %v24476_v36  ;;  %v1157_v51 = vsub.f32 %v24469_v12, %v24477_v29  ;;  %v1116_v36 = vand.u32 4294901760, %v1115_v9  ;;  %v24485_v58 = vld [vmem:[#allocation156_spill] sm:$0xff]  ;;  %968 = vmatmul.mubr.f32.gmra.mrb[6].mxu0 %v17791_v31  ;;  %13808 = vmatprep.subr.bf16.mxu1 %v17603_v47  ;;  %v1122_v29 = vand.u32 4294901760, %v1121_v17  ;;  %v24486_v12 = vld [vmem:[#allocation119_spill] sm:$0xff]  ;;  %v24491_v9 = vld [vmem:[#allocation157_spill] sm:$0xff] }
 0x1ed   : > { %v17822_v35 = vpack.c.bf16 %v24483_v13, %v24481_v43  ;;  %v24487_v3 = vand.u32 4294901760, %v24486_v12  ;;  %v24489_v59 = vand.u32 4294901760, %v24488_v20  ;;  %v23324_v18 = vand.u32 4294901760, %v24491_v9  ;;  %13290 = vmatpush1.bf16.msra.mxu0 %v17319_v41  ;;  %1359 = vmatprep.mubr.f32.mxu0 %v17618_v11 }
 0x1ee   : > { %v13295_v60 = vpack.c.bf16 %v1110_v34, %v1098_v42  ;;  %v1128_v43 = vand.u32 4294901760, %v1127_v48  ;;  %v1140_v13 = vand.u32 4294901760, %v1139_v57  ;;  %13292 = vmatprep.subr.bf16.mxu0 %v13291_v62  ;;  %v1146_v17 = vand.u32 4294901760, %v1145_v26  ;;  %v24495_v34 = vld [vmem:[#allocation159_spill] sm:$0xff]  ;;  %v24498_v48 = vld [vmem:[#allocation169_spill] sm:$0xff] }
 0x1ef   : > { %24484 = vst [vmem:[#allocation105_spill] sm:$0xff] %v17822_v35  ;;  %v17831_v46 = vpack.c.bf16 %v24489_v59, %v24487_v3  ;;  %v1158_v32 = vand.u32 4294901760, %v1157_v51  ;;  %v24492_v12 = vand.u32 4294901760, %v24478_v15  ;;  %v24493_v20 = vand.u32 4294901760, %v24479_v61  ;;  %13810 = vmatpush1.bf16.msra.mxu1 %v17609_v37 }
 0x1f0   : > { %v24494_v41 = vand.u32 4294901760, %v24485_v58  ;;  %13812 = vmatprep.subr.bf16.mxu1 %v17725_v49  ;;  %v13297_v26 = vpack.c.bf16 %v1116_v36, %v1104_v14  ;;  %v13299_v51 = vpack.c.bf16 %v1134_v44, %v1122_v29  ;;  %v13301_v14 = vpack.c.bf16 %v1140_v13, %v1128_v43  ;;  %v24500_v13 = vld [vmem:[#allocation171_spill] sm:$0xff]  ;;  %v24509_v49 = vld [vmem:[#allocation226_spill] sm:$0xff] }
 0x1f1   : > { %24490 = vst [vmem:[#allocation106_spill] sm:$0xff] %v17831_v46  ;;  %v1151_v59 = vsub.f32 %v24478_v15, %v24492_v12  ;;  %v1163_v3 = vsub.f32 %v24479_v61, %v24493_v20  ;;  %v1181_v12 = vsub.f32 %v24491_v9, %v23324_v18  ;;  %v24496_v20 = vld [vmem:[#allocation160_spill] sm:$0xff]  ;;  %13294 = vmatpush1.bf16.msra.mxu0 %v13293_v30  ;;  %v24499_v30 = vand.u32 4294901760, %v24495_v34 }
 0x1f2   : > { %v1169_v42 = vsub.f32 %v24485_v58, %v24494_v41  ;;  %v23327_v19 = vand.u32 4294901760, %v24496_v20  ;;  %v24497_v41 = vld [vmem:[#allocation168_spill] sm:$0xff]  ;;  %13296 = vmatprep.subr.bf16.mxu0 %v13295_v60  ;;  %v13303_v44 = vpack.c.bf16 %v1158_v32, %v1146_v17 }
 0x1f3   : > { %v1152_v36 = vand.u32 4294901760, %v1151_v59  ;;  %v1164_v29 = vand.u32 4294901760, %v1163_v3  ;;  %13814 = vmatpush1.bf16.msra.mxu1 %v17731_v53  ;;  %v1175_v31 = vsub.f32 %v24495_v34, %v24499_v30  ;;  %v1182_v60 = vand.u32 4294901760, %v1181_v12  ;;  %v24501_v32 = vld [vmem:[#allocation172_spill] sm:$0xff]  ;;  %v24507_v53 = vld [vmem:[#allocation179_spill] sm:$0xff]  ;;  %v24519_v59 = vld [vmem:[#allocation134_spill] sm:$0xff] }
 0x1f4   : > { %v1170_v18 = vand.u32 4294901760, %v1169_v42  ;;  %13816 = vmatprep.subr.bf16.mxu1 %v17777_v45  ;;  %v1187_v43 = vsub.f32 %v24496_v20, %v23327_v19  ;;  %v24502_v3 = vand.u32 4294901760, %v24497_v41  ;;  %v24503_v30 = vand.u32 4294901760, %v24498_v48  ;;  %v24506_v19 = vld [vmem:[#allocation178_spill] sm:$0xff]  ;;  %v24517_v45 = vld [vmem:[#allocation133_spill] sm:$0xff] }
 0x1f5   : > { %13298 = vmatpush1.bf16.msra.mxu0 %v13297_v26  ;;  %v24508_v26 = vld [vmem:[#allocation224_spill] sm:$0xff]  ;;  %v24515_v12 = vand.u32 4294901760, %v24514_v10  ;;  %v24518_v17 = vand.u32 4294901760, %v24517_v45  ;;  %v24520_v37 = vand.u32 4294901760, %v24519_v59  ;;  %v1176_v47 = vand.u32 4294901760, %v1175_v31 }
 0x1f6   : > { %v1193_v42 = vsub.f32 %v24497_v41, %v24502_v3  ;;  %v1205_v62 = vsub.f32 %v24498_v48, %v24503_v30  ;;  %13300 = vmatprep.subr.bf16.mxu0 %v13299_v51  ;;  %v24512_v30 = vld [vmem:[#allocation125_spill] sm:$0xff]  ;;  %v13305_v51 = vpack.c.bf16 %v1164_v29, %v1152_v36  ;;  %v13307_v7 = vpack.c.bf16 %v1182_v60, %v1170_v18  ;;  %v24533_v59 = vld [vmem:[#allocation148_spill] sm:$0xff] }
 0x1f7   : > { %13818 = vmatpush1.bf16.msra.mxu1 %v17822_v35  ;;  %v24513_v8 = vand.u32 4294901760, %v24512_v30  ;;  %v17906_v57 = vpack.c.bf16 %v24520_v37, %v24518_v17  ;;  %v1188_v33 = vand.u32 4294901760, %v1187_v43  ;;  %v24522_v35 = vand.u32 4294901760, %v24500_v13 }
 0x1f8   : > { %13820 = vmatprep.subr.bf16.mxu1 %v17831_v46  ;;  %v1194_v36 = vand.u32 4294901760, %v1193_v42  ;;  %v1206_v29 = vand.u32 4294901760, %v1205_v62  ;;  %v24524_v45 = vand.u32 4294901760, %v24506_v19  ;;  %v24525_v31 = vand.u32 4294901760, %v24507_v53 }
 0x1f9   : > { %v17899_v6 = vpack.c.bf16 %v24515_v12, %v24513_v8  ;;  %24521 = vst [vmem:[#allocation146_spill] sm:$0xff] %v17906_v57  ;;  %13302 = vmatpush1.bf16.msra.mxu0 %v13301_v14  ;;  %v1199_v30 = vsub.f32 %v24500_v13, %v24522_v35  ;;  %v24523_v8 = vand.u32 4294901760, %v24501_v32  ;;  %v24526_v14 = vld [vmem:[#allocation139_spill] sm:$0xff]  ;;  %v24528_v35 = vld [vmem:[#allocation140_spill] sm:$0xff]  ;;  %v24534_v42 = vand.u32 4294901760, %v24533_v59  ;;  %v24554_v59 = vld [vmem:[#allocation238_spill] sm:$0xff] }
 0x1fa   : > { %13304 = vmatprep.subr.bf16.mxu0 %v13303_v44  ;;  %v1217_v37 = vsub.f32 %v24506_v19, %v24524_v45  ;;  %v1229_v18 = vsub.f32 %v24507_v53, %v24525_v31  ;;  %v24527_v60 = vand.u32 4294901760, %v24526_v14  ;;  %v24529_v43 = vand.u32 4294901760, %v24528_v35  ;;  %v24531_v44 = vld [vmem:[#allocation147_spill] sm:$0xff] }
 0x1fb   : > { %24516 = vst [vmem:[#allocation145_spill] sm:$0xff] %v17899_v6  ;;  %v1211_v10 = vsub.f32 %v24501_v32, %v24523_v8  ;;  %13822 = vmatpush1.bf16.msra.mxu1 %v17899_v6  ;;  %v24532_v62 = vand.u32 4294901760, %v24531_v44  ;;  %v13309_v8 = vpack.c.bf16 %v1188_v33, %v1176_v47  ;;  %v1200_v45 = vand.u32 4294901760, %v1199_v30 }
 0x1fc   : > { %v17925_v17 = vpack.c.bf16 %v24529_v43, %v24527_v60  ;;  %13824 = vmatprep.subr.bf16.mxu1 %v17906_v57  ;;  %v13311_v6 = vpack.c.bf16 %v1206_v29, %v1194_v36  ;;  %v1218_v46 = vand.u32 4294901760, %v1217_v37  ;;  %v1230_v14 = vand.u32 4294901760, %v1229_v18  ;;  %v24536_v60 = vld [vmem:[#allocation153_spill] sm:$0xff]  ;;  %v24538_v43 = vld [vmem:[#allocation154_spill] sm:$0xff]  ;;  %v24551_v37 = vld [vmem:[#allocation236_spill] sm:$0xff] }
 0x1fd   : > { %v17932_v12 = vpack.c.bf16 %v24534_v42, %v24532_v62  ;;  %13306 = vmatpush1.bf16.msra.mxu0 %v13305_v51  ;;  %v1212_v31 = vand.u32 4294901760, %v1211_v10  ;;  %v24537_v35 = vand.u32 4294901760, %v24536_v60  ;;  %v24539_v57 = vand.u32 4294901760, %v24538_v43  ;;  %v24543_v51 = vld [vmem:[#allocation166_spill] sm:$0xff]  ;;  %v24548_v29 = vld [vmem:[#allocation237_spill] sm:$0xff]  ;;  %v24552_v18 = vld [vmem:[#allocation187_spill] sm:$0xff] }
 0x1fe   : > { %24530 = vst [vmem:[#allocation111_spill] sm:$0xff] %v17925_v17  ;;  %13308 = vmatprep.subr.bf16.mxu0 %v13307_v7  ;;  %v13315_v33 = vpack.c.bf16 %v1230_v14, %v1218_v46  ;;  %v24541_v7 = vld [vmem:[#allocation165_spill] sm:$0xff]  ;;  %v24544_v30 = vand.u32 4294901760, %v24543_v51  ;;  %v24546_v36 = vld [vmem:[#allocation230_spill] sm:$0xff]  ;;  %v24550_v46 = vld [vmem:[#allocation235_spill] sm:$0xff] }
 0x1ff   : > { %24535 = vst [vmem:[#allocation112_spill] sm:$0xff] %v17932_v12  ;;  %13826 = vmatpush1.bf16.msra.mxu1 %v17925_v17  ;;  %v17939_v3 = vpack.c.bf16 %v24539_v57, %v24537_v35  ;;  %v13313_v44 = vpack.c.bf16 %v1212_v31, %v1200_v45  ;;  %v24542_v47 = vand.u32 4294901760, %v24541_v7  ;;  %v24547_v57 = vld [vmem:[#allocation233_spill] sm:$0xff]  ;;  %v24553_v62 = vld [vmem:[#allocation194_spill] sm:$0xff]  ;;  %v24557_v31 = vld [vmem:[#allocation32_spill] sm:$0xff] }
 0x200   : > { %13828 = vmatprep.subr.bf16.mxu1 %v17932_v12  ;;  %v24555_v42 = vld [vmem:[#allocation197_spill] sm:$0xff]  ;;  %v23354_v14 = vand.u32 4294901760, %v24557_v31  ;;  %v24558_v60 = vld [vmem:[#allocation199_spill] sm:$0xff]  ;;  %v24560_v43 = vld [vmem:[#allocation188_spill] sm:$0xff] }
 0x201   : > { %24540 = vst [vmem:[#allocation156_spill] sm:$0xff] %v17939_v3  ;;  %13310 = vmatpush1.bf16.msra.mxu0 %v13309_v8  ;;  %v17947_v10 = vpack.c.bf16 %v24544_v30, %v24542_v47  ;;  %v24556_v8 = vld [vmem:[#allocation30_spill] sm:$0xff]  ;;  %v24559_v35 = vld [vmem:[#allocation205_spill] sm:$0xff] }
 0x202   : > { %13312 = vmatprep.subr.bf16.mxu0 %v13311_v6  ;;  %v24549_v6 = vld [vmem:[#allocation198_spill] sm:$0xff]  ;;  %v23355_v45 = vand.u32 4294901760, %v24556_v8  ;;  %v24563_v51 = vld [vmem:[#allocation193_spill] sm:$0xff] }
 0x203   : > { %13830 = vmatpush1.bf16.msra.mxu1 %v17939_v3  ;;  %24545 = vst [vmem:[#allocation119_spill] sm:$0xff] %v17947_v10  ;;  %v24562_v7 = vld [vmem:[#allocation34_spill] sm:$0xff] }
 0x204   : > { %13832 = vmatprep.subr.bf16.mxu1 %v24546_v36  ;;  %v23357_v47 = vand.u32 4294901760, %v24562_v7  ;;  %v13851_v30 = vpack.c.bf16 %v23354_v14, %v23355_v45  ;;  %v24574_v7 = vld [vmem:[#allocation240_spill] sm:$0xff]  ;;  %v24632_v36 = vld [vmem:[#allocation246_spill] sm:$0xff] }
 0x205   : > { %13314 = vmatpush1.bf16.msra.mxu0 %v13313_v44  ;;  %v24561_v44 = vld [vmem:[#allocation33_spill] sm:$0xff] }
 0x206   : > { %13316 = vmatprep.subr.bf16.mxu0 %v13315_v33  ;;  %v23358_v33 = vand.u32 4294901760, %v24561_v44  ;;  %v24582_v44 = vld [vmem:[#allocation65_spill] sm:$0xff] }
 0x207   : > { %13834 = vmatpush1.bf16.msra.mxu1 %v17947_v10  ;;  %v24642_v10 = vld [vmem:[#allocation104_spill] sm:$0xff] }
 0x208   : > { %13836 = vmatprep.subr.bf16.mxu1 %v24547_v57  ;;  %v24631_v57 = vld [vmem:[#allocation110_spill] sm:$0xff] }
 0x209   : > { %13318 = vmatpush1.bf16.msra.mxu0 %v24548_v29  ;;  %v24564_v29 = vld [vmem:[#allocation35_spill] sm:$0xff] }
 0x20a   : > { %13320 = vmatprep.subr.bf16.mxu0 %v24549_v6  ;;  %v23360_v6 = vand.u32 4294901760, %v24564_v29 }
 0x20b   : > { %13838 = vmatpush1.bf16.msra.mxu1 %v24550_v46  ;;  %v24627_v46 = vld [vmem:[#allocation101_spill] sm:$0xff] }
 0x20c   : > { %13840 = vmatprep.subr.bf16.mxu1 %v24551_v37  ;;  %v24579_v37 = vld [vmem:[#allocation54_spill] sm:$0xff] }
 0x20d   : > { %13322 = vmatpush1.bf16.msra.mxu0 %v24552_v18  ;;  %v24565_v18 = vld [vmem:[#allocation36_spill] sm:$0xff] }
 0x20e   : > { %13324 = vmatprep.subr.bf16.mxu0 %v24553_v62  ;;  %v23359_v62 = vand.u32 4294901760, %v24565_v18  ;;  %v23378_v18 = vand.u32 4294901760, %v24579_v37  ;;  %v24599_v37 = vld [vmem:[#allocation252_spill] sm:$0xff] }
 0x20f   : > { %13842 = vmatpush1.bf16.msra.mxu1 %v24554_v59  ;;  %v24570_v59 = vld [vmem:[#allocation40_spill] sm:$0xff] }
 0x210   : > { %13844 = vmatprep.subr.bf16.mxu1 %v24555_v42  ;;  %v24569_v42 = vld [vmem:[#allocation37_spill] sm:$0xff]  ;;  %v23370_v31 = vand.u32 4294901760, %v24570_v59  ;;  %v13855_v14 = vpack.c.bf16 %v23359_v62, %v23360_v6 }
 0x211   : > { %13326 = vmatpush1.bf16.msra.mxu0 %v24558_v60  ;;  %v24566_v60 = vld [vmem:[#allocation206_spill] sm:$0xff]  ;;  %v24578_v6 = vld [vmem:[#allocation53_spill] sm:$0xff] }
 0x212   : > { %13328 = vmatprep.subr.bf16.mxu0 %v24559_v35  ;;  %v24567_v35 = vld [vmem:[#allocation219_spill] sm:$0xff]  ;;  %v23379_v45 = vand.u32 4294901760, %v24578_v6  ;;  %v24596_v6 = vld [vmem:[#allocation241_spill] sm:$0xff] }
 0x213   : > { %13846 = vmatpush1.bf16.msra.mxu1 %v24560_v43  ;;  %v24568_v43 = vld [vmem:[#allocation200_spill] sm:$0xff] }
 0x214   : > { %13848 = vmatprep.subr.bf16.mxu1 %v24563_v51  ;;  %v13853_v51 = vpack.c.bf16 %v23357_v47, %v23358_v33  ;;  %v24575_v47 = vld [vmem:[#allocation41_spill] sm:$0xff] }
 0x215   : > { %13330 = vmatpush1.bf16.msra.mxu0 %v24566_v60  ;;  %v24571_v60 = vld [vmem:[#allocation49_spill] sm:$0xff] }
 0x216   : > { %13332 = vmatprep.subr.bf16.mxu0 %v24567_v35  ;;  %v24572_v35 = vld [vmem:[#allocation50_spill] sm:$0xff]  ;;  %v24576_v33 = vld [vmem:[#allocation45_spill] sm:$0xff] }
 0x217   : > { %13850 = vmatpush1.bf16.msra.mxu1 %v24568_v43  ;;  %v24573_v43 = vld [vmem:[#allocation239_spill] sm:$0xff]  ;;  %v13339_v8 = vpack.c.bf16 %v24576_v33, %v24575_v47  ;;  %v24583_v33 = vld [vmem:[#allocation66_spill] sm:$0xff]  ;;  %v24586_v47 = vld [vmem:[#allocation48_spill] sm:$0xff] }
 0x218   : > { %13852 = vmatprep.subr.bf16.mxu1 %v13851_v30  ;;  %v24577_v30 = vand.u32 4294901760, %v24569_v42  ;;  %v24585_v42 = vld [vmem:[#allocation46_spill] sm:$0xff] }
 0x219   : > { %13334 = vmatpush1.bf16.msra.mxu0 %v24573_v43  ;;  %v24580_v43 = vand.u32 4294901760, %v24571_v60  ;;  %v13341_v59 = vpack.c.bf16 %v24586_v47, %v24585_v42  ;;  %v24593_v60 = vand.u32 4294901760, %v24583_v33  ;;  %v24606_v42 = vld [vmem:[#allocation242_spill] sm:$0xff] }
 0x21a   : > { %3229 = vmatmul.mubr.f32.vlgmr.msra.gmra.mrb[0].mxu1 %v17647_v39  ;;  %13336 = vmatprep.subr.bf16.mxu0 %v24574_v7  ;;  %v13857_v62 = vpack.c.bf16 %v23370_v31, %v24577_v30  ;;  %v24581_v7 = vand.u32 4294901760, %v24572_v35  ;;  %v24587_v30 = vld [vmem:[#allocation58_spill] sm:$0xff]  ;;  %v24588_v31 = vld [vmem:[#allocation59_spill] sm:$0xff]  ;;  %v24591_v35 = vld [vmem:[#allocation64_spill] sm:$0xff] }
 0x21b   : > { %3237 = vmatprep.mubr.f32.mxu1 %v17688_v16  ;;  %13854 = vmatpush1.bf16.msra.mxu1 %v13853_v51  ;;  %v24584_v51 = vld [vmem:[#allocation31_spill] sm:$0xff]  ;;  %v24600_v39 = vld [vmem:[#allocation72_spill] sm:$0xff] }
 0x21c   : > { %13856 = vmatprep.subr.bf16.mxu1 %v13855_v14  ;;  %v13859_v29 = vpack.c.bf16 %v24581_v7, %v24580_v43  ;;  %v13343_v14 = vpack.c.bf16 %v24588_v31, %v24587_v30  ;;  %v13861_v43 = vpack.c.bf16 %v23378_v18, %v23379_v45  ;;  %v24589_v7 = vld [vmem:[#allocation67_spill] sm:$0xff]  ;;  %v24597_v18 = vld [vmem:[#allocation61_spill] sm:$0xff]  ;;  %v24598_v45 = vld [vmem:[#allocation62_spill] sm:$0xff] }
 0x21d   : > { %13338 = vmatpush1.bf16.msra.mxu0 %v24584_v51  ;;  %v24590_v51 = vld [vmem:[#allocation68_spill] sm:$0xff]  ;;  %v24594_v31 = vld [vmem:[#allocation79_spill] sm:$0xff]  ;;  %v13345_v16 = vpack.c.bf16 %v24598_v45, %v24597_v18 }
 0x21e   : > { %3241 = vmatmul.mubr.f32.gmra.mrb[2].mxu1 %v17691_v25  ;;  %13340 = vmatprep.subr.bf16.mxu0 %v13339_v8  ;;  %v24592_v8 = vand.u32 4294901760, %v24582_v44 }
 0x21f   : > { %3249 = vmatprep.mubr.f32.mxu1 %v17655_v50  ;;  %13858 = vmatpush1.bf16.msra.mxu1 %v13857_v62  ;;  %v24595_v62 = vld [vmem:[#allocation80_spill] sm:$0xff]  ;;  %v24604_v50 = vld [vmem:[#allocation81_spill] sm:$0xff] }
 0x220   : > { %1361 = vmatmul.mubr.f32.vlgmr.msra.gmra.mrb[0].mxu0 %v24591_v35  ;;  %13860 = vmatprep.subr.bf16.mxu1 %v13859_v29  ;;  %v13863_v25 = vpack.c.bf16 %v24593_v60, %v24592_v8  ;;  %v24601_v29 = vld [vmem:[#allocation73_spill] sm:$0xff]  ;;  %v24602_v60 = vand.u32 4294901760, %v24589_v7  ;;  %v24603_v8 = vand.u32 4294901760, %v24590_v51  ;;  %v23392_v33 = vand.u32 4294901760, %v24604_v50  ;;  %v24618_v51 = vld [vmem:[#allocation108_spill] sm:$0xff] }
 0x221   : > { %1367 = vmatprep.mubr.f32.mxu0 %v24596_v6  ;;  %13342 = vmatpush1.bf16.msra.mxu0 %v13341_v59  ;;  %v13347_v47 = vpack.c.bf16 %v24601_v29, %v24600_v39  ;;  %v24605_v59 = vld [vmem:[#allocation82_spill] sm:$0xff]  ;;  %v24609_v39 = vld [vmem:[#allocation93_spill] sm:$0xff] }
 0x222   : > { %3253 = vmatmul.mubr.f32.gmra.mrb[4].mxu1 %v24599_v37  ;;  %13344 = vmatprep.subr.bf16.mxu0 %v13343_v14  ;;  %v13865_v30 = vpack.c.bf16 %v24603_v8, %v24602_v60  ;;  %v23391_v44 = vand.u32 4294901760, %v24605_v59  ;;  %v24607_v14 = vand.u32 4294901760, %v24594_v31  ;;  %v24608_v37 = vand.u32 4294901760, %v24595_v62  ;;  %v24611_v7 = vld [vmem:[#allocation69_spill] sm:$0xff]  ;;  %v24612_v60 = vld [vmem:[#allocation258_spill] sm:$0xff]  ;;  %v24613_v8 = vld [vmem:[#allocation95_spill] sm:$0xff] }
 0x223   : > { %3261 = vmatprep.mubr.f32.mxu1 %v17697_v22  ;;  %13862 = vmatpush1.bf16.msra.mxu1 %v13861_v43  ;;  %v24610_v43 = vld [vmem:[#allocation94_spill] sm:$0xff]  ;;  %v24619_v50 = vld [vmem:[#allocation245_spill] sm:$0xff]  ;;  %v24620_v59 = vld [vmem:[#allocation76_spill] sm:$0xff] }
 0x224   : > { %1369 = vmatmul.mubr.f32.gmra.mrb[2].mxu0 %v24606_v42  ;;  %13864 = vmatprep.subr.bf16.mxu1 %v13863_v25  ;;  %v13867_v29 = vpack.c.bf16 %v24608_v37, %v24607_v14  ;;  %v23394_v45 = vand.u32 4294901760, %v24610_v43  ;;  %v13869_v25 = vpack.c.bf16 %v23391_v44, %v23392_v33  ;;  %v24614_v14 = vld [vmem:[#allocation96_spill] sm:$0xff]  ;;  %v24615_v62 = vld [vmem:[#allocation70_spill] sm:$0xff]  ;;  %v24621_v44 = vld [vmem:[#allocation75_spill] sm:$0xff] }
 0x225   : > { %1375 = vmatprep.mubr.f32.mxu0 %v24611_v7  ;;  %13346 = vmatpush1.bf16.msra.mxu0 %v13345_v16  ;;  %v24616_v16 = vand.u32 4294901760, %v24609_v39  ;;  %v24622_v33 = vpack.c.bf16 %v24620_v59, %v24621_v44  ;;  %v24623_v37 = vld [vmem:[#allocation87_spill] sm:$0xff]  ;;  %v24624_v22 = vld [vmem:[#allocation86_spill] sm:$0xff]  ;;  %v24638_v59 = vld [vmem:[#allocation89_spill] sm:$0xff] }
 0x226   : > { %3265 = vmatmul.mubr.f32.gmra.mrb[6].mxu1 %v24612_v60  ;;  %13348 = vmatprep.subr.bf16.mxu0 %v13347_v47  ;;  %v24625_v18 = vpack.c.bf16 %v24623_v37, %v24624_v22  ;;  %v24630_v60 = vld [vmem:[#allocation109_spill] sm:$0xff]  ;;  %v24647_v44 = vld [vmem:[#allocation124_spill] sm:$0xff] }
 0x227   : > { %13866 = vmatpush1.bf16.msra.mxu1 %v13865_v30  ;;  %3528 = vmatprep.mubr.f32.mxu1 %v17618_v11  ;;  %v13871_v47 = vpack.c.bf16 %v23394_v45, %v24616_v16  ;;  %v24617_v30 = vld [vmem:[#allocation107_spill] sm:$0xff]  ;;  %v24628_v16 = vand.u32 4294901760, %v24613_v8  ;;  %v24629_v45 = vand.u32 4294901760, %v24614_v14  ;;  %v24635_v22 = vld [vmem:[#allocation121_spill] sm:$0xff]  ;;  %v24637_v8 = vld [vmem:[#allocation90_spill] sm:$0xff] }
 0x228   : > { %1377 = vmatmul.mubr.f32.gmra.mrb[4].mxu0 %v24615_v62  ;;  %13868 = vmatprep.subr.bf16.mxu1 %v13867_v29  ;;  %v24626_v29 = vld [vmem:[#allocation100_spill] sm:$0xff]  ;;  %v24639_v14 = vpack.c.bf16 %v24637_v8, %v24638_v59  ;;  %v23408_v8 = vand.u32 4294901760, %v24647_v44 }
 0x229   : > { %1383 = vmatprep.mubr.f32.mxu0 %v24619_v50  ;;  %13350 = vmatpush1.bf16.msra.mxu0 %v24622_v33  ;;  %v13355_v39 = vpack.c.bf16 %v24627_v46, %v24626_v29  ;;  %v13873_v31 = vpack.c.bf16 %v24629_v45, %v24628_v16  ;;  %v24633_v33 = vand.u32 4294901760, %v24617_v30  ;;  %v24640_v45 = vld [vmem:[#allocation77_spill] sm:$0xff]  ;;  %v24641_v16 = vld [vmem:[#allocation103_spill] sm:$0xff]  ;;  %v24651_v59 = vld [vmem:[#allocation136_spill] sm:$0xff] }
 0x22a   : > { %13352 = vmatprep.subr.bf16.mxu0 %v24625_v18  ;;  %v24634_v18 = vand.u32 4294901760, %v24618_v51  ;;  %v13357_v43 = vpack.c.bf16 %v24642_v10, %v24641_v16  ;;  %v24646_v29 = vld [vmem:[#allocation123_spill] sm:$0xff] }
 0x22b   : > { %13870 = vmatpush1.bf16.msra.mxu1 %v13869_v25  ;;  %v24636_v25 = vld [vmem:[#allocation122_spill] sm:$0xff]  ;;  %v23409_v51 = vand.u32 4294901760, %v24646_v29 }
 0x22c   : > { %1385 = vmatmul.mubr.f32.gmra.mrb[6].mxu0 %v24632_v36  ;;  %13872 = vmatprep.subr.bf16.mxu1 %v13871_v47  ;;  %v13875_v37 = vpack.c.bf16 %v24634_v18, %v24633_v33  ;;  %v24643_v47 = vld [vmem:[#allocation114_spill] sm:$0xff]  ;;  %v24644_v33 = vand.u32 4294901760, %v24630_v60  ;;  %v24645_v18 = vand.u32 4294901760, %v24631_v57 }
 0x22d   : > { %13354 = vmatpush1.bf16.msra.mxu0 %v24639_v14  ;;  %1585 = vmatprep.mubr.f32.mxu0 %v24640_v45  ;;  %v13359_v30 = vpack.c.bf16 %v24451_v1, %v24643_v47  ;;  %v24648_v14 = vand.u32 4294901760, %v24635_v22  ;;  %v24649_v45 = vand.u32 4294901760, %v24636_v25  ;;  %v23412_v1 = vand.u32 4294901760, %v24651_v59  ;;  %v24656_v57 = vld [vmem:[#allocation150_spill] sm:$0xff]  ;;  %v24661_v59 = vld [vmem:[#allocation151_spill] sm:$0xff] }
 0x22e   : > { %13356 = vmatprep.subr.bf16.mxu0 %v13355_v39  ;;  %v13877_v46 = vpack.c.bf16 %v24645_v18, %v24644_v33  ;;  %v24650_v39 = vld [vmem:[#allocation135_spill] sm:$0xff]  ;;  %v13363_v33 = vpack.c.bf16 %v24457_v27, %v24456_v21  ;;  %v24652_v18 = vld [vmem:[#allocation137_spill] sm:$0xff]  ;;  %v23416_v60 = vand.u32 4294901760, %v24656_v57 }
 0x22f   : > { %13874 = vmatpush1.bf16.msra.mxu1 %v13873_v31  ;;  %v13879_v10 = vpack.c.bf16 %v24649_v45, %v24648_v14  ;;  %v13361_v31 = vpack.c.bf16 %v24454_v52, %v24453_v55  ;;  %v24653_v14 = vld [vmem:[#allocation138_spill] sm:$0xff] }
 0x230   : > { %13876 = vmatprep.subr.bf16.mxu1 %v13875_v37  ;;  %v13881_v37 = vpack.c.bf16 %v23408_v8, %v23409_v51  ;;  %v23415_v16 = vand.u32 4294901760, %v24653_v14  ;;  %v24658_v8 = vld [vmem:[#allocation142_spill] sm:$0xff]  ;;  %v24659_v51 = vld [vmem:[#allocation143_spill] sm:$0xff] }
 0x231   : > { %13358 = vmatpush1.bf16.msra.mxu0 %v13357_v43  ;;  %v24654_v43 = vand.u32 4294901760, %v24650_v39  ;;  %v13367_v45 = vpack.c.bf16 %v24659_v51, %v24658_v8  ;;  %v24670_v14 = vld [vmem:[#allocation174_spill] sm:$0xff] }
 0x232   : > { %13360 = vmatprep.subr.bf16.mxu0 %v13359_v30  ;;  %v24655_v30 = vld [vmem:[#allocation149_spill] sm:$0xff] }
 0x233   : > { %13878 = vmatpush1.bf16.msra.mxu1 %v13877_v46  ;;  %v13883_v25 = vpack.c.bf16 %v23412_v1, %v24654_v43  ;;  %v24657_v46 = vld [vmem:[#allocation132_spill] sm:$0xff]  ;;  %v23422_v43 = vand.u32 4294901760, %v24661_v59 }
 0x234   : > { %13880 = vmatprep.subr.bf16.mxu1 %v13879_v10  ;;  %v13365_v29 = vpack.c.bf16 %v24657_v46, %v24460_v54  ;;  %v24660_v10 = vand.u32 4294901760, %v24652_v18  ;;  %v24662_v1 = vld [vmem:[#allocation152_spill] sm:$0xff]  ;;  %v24665_v54 = vld [vmem:[#allocation162_spill] sm:$0xff]  ;;  %v23430_v18 = vand.u32 4294901760, %v24670_v14 }
 0x235   : > { %13362 = vmatpush1.bf16.msra.mxu0 %v13361_v31  ;;  %v23421_v22 = vand.u32 4294901760, %v24662_v1  ;;  %v24663_v31 = vand.u32 4294901760, %v24655_v30  ;;  %v23423_v51 = vand.u32 4294901760, %v24665_v54  ;;  %v24675_v1 = vld [vmem:[#allocation182_spill] sm:$0xff] }
 0x236   : > { %13364 = vmatprep.subr.bf16.mxu0 %v13363_v33  ;;  %v13885_v39 = vpack.c.bf16 %v23415_v16, %v24660_v10  ;;  %v24664_v33 = vld [vmem:[#allocation161_spill] sm:$0xff]  ;;  %v13371_v10 = vpack.c.bf16 %v24491_v9, %v24485_v58  ;;  %v24666_v16 = vld [vmem:[#allocation163_spill] sm:$0xff]  ;;  %v23438_v59 = vand.u32 4294901760, %v24675_v1 }
 0x237   : > { %13882 = vmatpush1.bf16.msra.mxu1 %v13881_v37  ;;  %v13887_v44 = vpack.c.bf16 %v23416_v60, %v24663_v31  ;;  %v13369_v37 = vpack.c.bf16 %v24479_v61, %v24478_v15  ;;  %v23429_v31 = vand.u32 4294901760, %v24666_v16  ;;  %v24667_v60 = vld [vmem:[#allocation164_spill] sm:$0xff] }
 0x238   : > { %13884 = vmatprep.subr.bf16.mxu1 %v13883_v25  ;;  %v13889_v25 = vpack.c.bf16 %v23421_v22, %v23422_v43  ;;  %v23428_v46 = vand.u32 4294901760, %v24667_v60  ;;  %v13375_v22 = vpack.c.bf16 %v24498_v48, %v24497_v41  ;;  %v24671_v43 = vld [vmem:[#allocation175_spill] sm:$0xff]  ;;  %v24680_v60 = vld [vmem:[#allocation190_spill] sm:$0xff] }
 0x239   : > { %13366 = vmatpush1.bf16.msra.mxu0 %v13365_v29  ;;  %v24668_v29 = vand.u32 4294901760, %v24664_v33  ;;  %v23442_v16 = vand.u32 4294901760, %v24680_v60 }
 0x23a   : > { %13368 = vmatprep.subr.bf16.mxu0 %v13367_v45  ;;  %v24669_v45 = vld [vmem:[#allocation173_spill] sm:$0xff] }
 0x23b   : > { %13886 = vmatpush1.bf16.msra.mxu1 %v13885_v39  ;;  %v13891_v57 = vpack.c.bf16 %v23423_v51, %v24668_v29  ;;  %v13373_v39 = vpack.c.bf16 %v24496_v20, %v24495_v34  ;;  %v23436_v29 = vand.u32 4294901760, %v24671_v43  ;;  %v24672_v51 = vld [vmem:[#allocation176_spill] sm:$0xff]  ;;  %v24727_v43 = vld [vmem:[#allocation42_spill] sm:$0xff] }
 0x23c   : > { %13888 = vmatprep.subr.bf16.mxu1 %v13887_v44  ;;  %v13893_v44 = vpack.c.bf16 %v23428_v46, %v23429_v31  ;;  %v23435_v30 = vand.u32 4294901760, %v24672_v51  ;;  %v13379_v46 = vpack.c.bf16 %v24507_v53, %v24506_v19  ;;  %v24676_v31 = vld [vmem:[#allocation183_spill] sm:$0xff] }
 0x23d   : > { %13370 = vmatpush1.bf16.msra.mxu0 %v13369_v37  ;;  %v24673_v37 = vand.u32 4294901760, %v24669_v45 }
 0x23e   : > { %13372 = vmatprep.subr.bf16.mxu0 %v13371_v10  ;;  %v24674_v10 = vld [vmem:[#allocation181_spill] sm:$0xff] }
 0x23f   : > { %13890 = vmatpush1.bf16.msra.mxu1 %v13889_v25  ;;  %v13895_v54 = vpack.c.bf16 %v23430_v18, %v24673_v37  ;;  %v13377_v25 = vpack.c.bf16 %v24501_v32, %v24500_v13  ;;  %v23441_v37 = vand.u32 4294901760, %v24676_v31  ;;  %v24677_v18 = vld [vmem:[#allocation184_spill] sm:$0xff]  ;;  %v24692_v31 = vld [vmem:[#allocation214_spill] sm:$0xff] }
 0x240   : > { %13892 = vmatprep.subr.bf16.mxu1 %v13891_v57  ;;  %v13897_v57 = vpack.c.bf16 %v23435_v30, %v23436_v29  ;;  %v23440_v33 = vand.u32 4294901760, %v24677_v18  ;;  %v24681_v30 = vld [vmem:[#allocation191_spill] sm:$0xff] }
 0x241   : > { %13374 = vmatpush1.bf16.msra.mxu0 %v13373_v39  ;;  %v24678_v39 = vand.u32 4294901760, %v24674_v10  ;;  %v23449_v29 = vand.u32 4294901760, %v24681_v30  ;;  %v24724_v30 = vld [vmem:[#allocation57_spill] sm:$0xff] }
 0x242   : > { %13376 = vmatprep.subr.bf16.mxu0 %v13375_v22  ;;  %v24679_v22 = vld [vmem:[#allocation189_spill] sm:$0xff] }
 0x243   : > { %13894 = vmatpush1.bf16.msra.mxu1 %v13893_v44  ;;  %v13899_v14 = vpack.c.bf16 %v23438_v59, %v24678_v39  ;;  %v23443_v45 = vand.u32 4294901760, %v24679_v22  ;;  %v13901_v44 = vpack.c.bf16 %v23440_v33, %v23441_v37  ;;  %v24683_v59 = vld [vmem:[#allocation201_spill] sm:$0xff]  ;;  %v24686_v33 = vpack.c.bf16 %v17083_v38, %v17081_v63  ;;  %v24687_v37 = vld [vmem:[#allocation203_spill] sm:$0xff] }
 0x244   : > { %13896 = vmatprep.subr.bf16.mxu1 %v13895_v54  ;;  %v24682_v54 = vld [vmem:[#allocation192_spill] sm:$0xff]  ;;  %v24691_v22 = vld [vmem:[#allocation213_spill] sm:$0xff] }
 0x245   : > { %13378 = vmatpush1.bf16.msra.mxu0 %v13377_v25  ;;  %v23448_v51 = vand.u32 4294901760, %v24682_v54  ;;  %v13903_v39 = vpack.c.bf16 %v23442_v16, %v23443_v45  ;;  %v24684_v25 = vld [vmem:[#allocation202_spill] sm:$0xff]  ;;  %v23454_v16 = vand.u32 4294901760, %v24687_v37  ;;  %v24688_v45 = vld [vmem:[#allocation204_spill] sm:$0xff]  ;;  %v24723_v54 = vld [vmem:[#allocation47_spill] sm:$0xff] }
 0x246   : > { %13380 = vmatprep.subr.bf16.mxu0 %v13379_v46  ;;  %v23453_v1 = vand.u32 4294901760, %v24688_v45  ;;  %v24689_v46 = vand.u32 4294901760, %v24683_v59  ;;  %v24690_v60 = vand.u32 4294901760, %v24684_v25  ;;  %v24698_v25 = vand.u32 4294901760, %v24692_v31  ;;  %v24709_v31 = vld [vmem:[#allocation222_spill] sm:$0xff]  ;;  %v24722_v45 = vld [vmem:[#allocation248_spill] sm:$0xff] }
 0x247   : > { %13898 = vmatpush1.bf16.msra.mxu1 %v13897_v57  ;;  %v24685_v57 = vpack.c.bf16 %v17038_v5, %v17036_v40  ;;  %v24699_v59 = vpack.c.bf16 %v24312_v28, %v24311_v2  ;;  %v24726_v10 = vld [vmem:[#allocation249_spill] sm:$0xff] }
 0x248   : > { %13900 = vmatprep.subr.bf16.mxu1 %v13899_v14  ;;  %v13905_v14 = vpack.c.bf16 %v23448_v51, %v23449_v29  ;;  %v24694_v51 = vpack.c.bf16 %v17141_v56, %v17139_v0  ;;  %v24695_v29 = vld [vmem:[#allocation215_spill] sm:$0xff] }
 0x249   : > { %13382 = vmatpush1.bf16.msra.mxu0 %v24685_v57  ;;  %v13907_v57 = vpack.c.bf16 %v24690_v60, %v24689_v46  ;;  %v23458_v60 = vand.u32 4294901760, %v24695_v29  ;;  %v24696_v46 = vld [vmem:[#allocation216_spill] sm:$0xff]  ;;  %v24720_v29 = vld [vmem:[#allocation78_spill] sm:$0xff] }
 0x24a   : > { %13384 = vmatprep.subr.bf16.mxu0 %v24686_v33  ;;  %v23457_v18 = vand.u32 4294901760, %v24696_v46  ;;  %v24697_v33 = vand.u32 4294901760, %v24691_v22  ;;  %v24718_v46 = vld [vmem:[#allocation44_spill] sm:$0xff] }
 0x24b   : > { %13902 = vmatpush1.bf16.msra.mxu1 %v13901_v44  ;;  %v24693_v44 = vpack.c.bf16 %v17096_v23, %v17094_v24 }
 0x24c   : > { %13904 = vmatprep.subr.bf16.mxu1 %v13903_v39  ;;  %v13909_v39 = vpack.c.bf16 %v23453_v1, %v23454_v16  ;;  %v13913_v1 = vpack.c.bf16 %v23457_v18, %v23458_v60  ;;  %v24704_v16 = vld [vmem:[#allocation211_spill] sm:$0xff]  ;;  %v24714_v18 = vld [vmem:[#allocation234_spill] sm:$0xff] }
 0x24d   : > { %13386 = vmatpush1.bf16.msra.mxu0 %v24693_v44  ;;  %v13911_v44 = vpack.c.bf16 %v24698_v25, %v24697_v33  ;;  %v24706_v25 = vld [vmem:[#allocation218_spill] sm:$0xff] }
 0x24e   : > { %13388 = vmatprep.subr.bf16.mxu0 %v24694_v51  ;;  %v24700_v51 = vld [vmem:[#allocation209_spill] sm:$0xff]  ;;  %v24707_v33 = vpack.c.bf16 %v24339_v4, %v24706_v25 }
 0x24f   : > { %13906 = vmatpush1.bf16.msra.mxu1 %v13905_v14  ;;  %v24701_v14 = vld [vmem:[#allocation208_spill] sm:$0xff] }
 0x250   : > { %13908 = vmatprep.subr.bf16.mxu1 %v13907_v57  ;;  %v24702_v37 = vpack.c.bf16 %v24700_v51, %v24701_v14  ;;  %v24703_v57 = vld [vmem:[#allocation212_spill] sm:$0xff] }
 0x251   : > { %13390 = vmatpush1.bf16.msra.mxu0 %v24699_v59  ;;  %v24705_v22 = vpack.c.bf16 %v24703_v57, %v24704_v16  ;;  %v24708_v59 = vld [vmem:[#allocation223_spill] sm:$0xff] }
 0x252   : > { %13392 = vmatprep.subr.bf16.mxu0 %v24702_v37  ;;  %v24710_v37 = vld [vmem:[#allocation221_spill] sm:$0xff] }
 0x253   : > { %13910 = vmatpush1.bf16.msra.mxu1 %v13909_v39  ;;  %v24711_v39 = vpack.c.bf16 %v24709_v31, %v24710_v37 }
 0x254   : > { %13912 = vmatprep.subr.bf16.mxu1 %v13911_v44  ;;  %v24712_v44 = vpack.c.bf16 %v24509_v49, %v24508_v26 }
 0x255   : > { %13394 = vmatpush1.bf16.msra.mxu0 %v24705_v22  ;;  %v24713_v22 = vld [vmem:[#allocation232_spill] sm:$0xff] }
 0x256   : > { %13396 = vmatprep.subr.bf16.mxu0 %v24707_v33  ;;  %v24715_v33 = vld [vmem:[#allocation229_spill] sm:$0xff] }
 0x257   : > { %13914 = vmatpush1.bf16.msra.mxu1 %v13913_v1  ;;  %v24716_v1 = vld [vmem:[#allocation228_spill] sm:$0xff] }
 0x258   : > { %13916 = vmatprep.subr.bf16.mxu1 %v24708_v59  ;;  %v24717_v60 = vpack.c.bf16 %v24715_v33, %v24716_v1  ;;  %v24738_v59 = vld [vmem:[#allocation251_spill] sm:$0xff] }
 0x259   : > { %13398 = vmatpush1.bf16.msra.mxu0 %v24711_v39  ;;  %v24719_v39 = vld [vmem:[#allocation29_spill] sm:$0xff] }
 0x25a   : > { %3530 = vmatmul.mubr.f32.vlgmr.msra.gmra.mrb[0].mxu1 %v24591_v35  ;;  %13400 = vmatprep.subr.bf16.mxu0 %v24712_v44  ;;  %v24721_v44 = vld [vmem:[#allocation38_spill] sm:$0xff] }
 0x25b   : > { %3536 = vmatprep.mubr.f32.mxu1 %v24596_v6  ;;  %13918 = vmatpush1.bf16.msra.mxu1 %v24713_v22  ;;  %v24733_v22 = vld [vmem:[#allocation51_spill] sm:$0xff] }
 0x25c   : > { %13920 = vmatprep.subr.bf16.mxu1 %v24714_v18  ;;  %v24732_v18 = vld [vmem:[#allocation84_spill] sm:$0xff] }
 0x25d   : > { %13402 = vmatpush1.bf16.msra.mxu0 %v24717_v60  ;;  %v24725_v60 = vld [vmem:[#allocation39_spill] sm:$0xff] }
 0x25e   : > { %3538 = vmatmul.mubr.f32.gmra.mrb[2].mxu1 %v24606_v42  ;;  %13404 = vmatprep.subr.bf16.mxu0 %v24718_v46 }
 0x25f   : > { %3544 = vmatprep.mubr.f32.mxu1 %v24611_v7  ;;  %13922 = vmatpush1.bf16.msra.mxu1 %v24719_v39  ;;  %v24728_v39 = vld [vmem:[#allocation83_spill] sm:$0xff] }
 0x260   : > { %1588 = vmatmul.mubr.f32.vlgmr.msra.gmra.mrb[0].mxu0 %v24720_v29  ;;  %13924 = vmatprep.subr.bf16.mxu1 %v24721_v44  ;;  %v24729_v29 = vld [vmem:[#allocation60_spill] sm:$0xff]  ;;  %v24731_v44 = vld [vmem:[#allocation43_spill] sm:$0xff] }
 0x261   : > { %1595 = vmatprep.mubr.f32.mxu0 %v24722_v45  ;;  %13406 = vmatpush1.bf16.msra.mxu0 %v24723_v54  ;;  %v24730_v45 = vld [vmem:[#allocation71_spill] sm:$0xff] }
 0x262   : > { %3546 = vmatmul.mubr.f32.gmra.mrb[4].mxu1 %v24615_v62  ;;  %13408 = vmatprep.subr.bf16.mxu0 %v24724_v30  ;;  %v24742_v30 = vld [vmem:[#allocation99_spill] sm:$0xff] }
 0x263   : > { %3552 = vmatprep.mubr.f32.mxu1 %v24619_v50  ;;  %13926 = vmatpush1.bf16.msra.mxu1 %v24725_v60  ;;  %v24734_v60 = vld [vmem:[#allocation250_spill] sm:$0xff] }
 0x264   : > { %1598 = vmatmul.mubr.f32.gmra.mrb[2].mxu0 %v24726_v10  ;;  %13928 = vmatprep.subr.bf16.mxu1 %v24727_v43  ;;  %v24735_v10 = vld [vmem:[#allocation74_spill] sm:$0xff]  ;;  %v24736_v43 = vld [vmem:[#allocation85_spill] sm:$0xff] }
 0x265   : > { %1605 = vmatprep.mubr.f32.mxu0 %v24728_v39  ;;  %13410 = vmatpush1.bf16.msra.mxu0 %v24729_v29  ;;  %v24737_v39 = vld [vmem:[#allocation52_spill] sm:$0xff]  ;;  %v24739_v29 = vld [vmem:[#allocation55_spill] sm:$0xff] }
 0x266   : > { %3554 = vmatmul.mubr.f32.gmra.mrb[6].mxu1 %v24632_v36  ;;  %13412 = vmatprep.subr.bf16.mxu0 %v24730_v45  ;;  %v24740_v45 = vld [vmem:[#allocation88_spill] sm:$0xff] }
 0x267   : > { %13930 = vmatpush1.bf16.msra.mxu1 %v24731_v44  ;;  %3689 = vmatprep.mubr.f32.mxu1 %v17618_v11  ;;  %v24741_v44 = vld [vmem:[#allocation243_spill] sm:$0xff] }
 0x268   : > { %1608 = vmatmul.mubr.f32.gmra.mrb[4].mxu0 %v24732_v18  ;;  %13932 = vmatprep.subr.bf16.mxu1 %v24733_v22  ;;  %v24743_v18 = vld [vmem:[#allocation56_spill] sm:$0xff]  ;;  %v24744_v22 = vld [vmem:[#allocation91_spill] sm:$0xff] }
 0x269   : > { %1615 = vmatprep.mubr.f32.mxu0 %v24734_v60  ;;  %13414 = vmatpush1.bf16.msra.mxu0 %v24735_v10  ;;  %v24745_v60 = vld [vmem:[#allocation102_spill] sm:$0xff]  ;;  %v24746_v10 = vld [vmem:[#allocation113_spill] sm:$0xff] }
 0x26a   : > { %13416 = vmatprep.subr.bf16.mxu0 %v24736_v43  ;;  %v24747_v43 = vld [vmem:[#allocation92_spill] sm:$0xff] }
 0x26b   : > { %13934 = vmatpush1.bf16.msra.mxu1 %v24737_v39  ;;  %v24748_v39 = vld [vmem:[#allocation128_spill] sm:$0xff] }
 0x26c   : > { %1618 = vmatmul.mubr.f32.gmra.mrb[6].mxu0 %v24738_v59  ;;  %13936 = vmatprep.subr.bf16.mxu1 %v24739_v29  ;;  %v24749_v59 = vld [vmem:[#allocation116_spill] sm:$0xff]  ;;  %v24750_v29 = vld [vmem:[#allocation127_spill] sm:$0xff] }
 0x26d   : > { %13418 = vmatpush1.bf16.msra.mxu0 %v24740_v45  ;;  %1755 = vmatprep.mubr.f32.mxu0 %v24741_v44  ;;  %v24751_v45 = vld [vmem:[#allocation105_spill] sm:$0xff]  ;;  %v24752_v44 = vld [vmem:[#allocation106_spill] sm:$0xff] }
 0x26e   : > { %13420 = vmatprep.subr.bf16.mxu0 %v24742_v30  ;;  %v24753_v30 = vld [vmem:[#allocation130_spill] sm:$0xff] }
 0x26f   : > { %13938 = vmatpush1.bf16.msra.mxu1 %v24743_v18  ;;  %v24754_v18 = vld [vmem:[#allocation141_spill] sm:$0xff] }
 0x270   : > { %13940 = vmatprep.subr.bf16.mxu1 %v24744_v22  ;;  %v24755_v22 = vld [vmem:[#allocation145_spill] sm:$0xff] }
 0x271   : > { %13422 = vmatpush1.bf16.msra.mxu0 %v24745_v60  ;;  %v24756_v60 = vld [vmem:[#allocation146_spill] sm:$0xff] }
 0x272   : > { %13424 = vmatprep.subr.bf16.mxu0 %v24746_v10  ;;  %v24757_v10 = vld [vmem:[#allocation144_spill] sm:$0xff] }
 0x273   : > { %13942 = vmatpush1.bf16.msra.mxu1 %v24747_v43  ;;  %v24758_v43 = vld [vmem:[#allocation155_spill] sm:$0xff] }
 0x274   : > { %13944 = vmatprep.subr.bf16.mxu1 %v24748_v39  ;;  %v24759_v39 = vld [vmem:[#allocation158_spill] sm:$0xff] }
 0x275   : > { %13426 = vmatpush1.bf16.msra.mxu0 %v24749_v59 }
 0x276   : > { %13428 = vmatprep.subr.bf16.mxu0 %v24750_v29 }
 0x277   : > { %13946 = vmatpush1.bf16.msra.mxu1 %v24751_v45  ;;  %v24760_v45 = vld [vmem:[#allocation167_spill] sm:$0xff] }
 0x278   : > { %13948 = vmatprep.subr.bf16.mxu1 %v24752_v44  ;;  %v24761_v44 = vld [vmem:[#allocation230_spill] sm:$0xff] }
 0x279   : > { %13430 = vmatpush1.bf16.msra.mxu0 %v24753_v30 }
 0x27a   : > { %13432 = vmatprep.subr.bf16.mxu0 %v24754_v18  ;;  %v24762_v18 = vld [vmem:[#allocation170_spill] sm:$0xff] }
 0x27b   : > { %13950 = vmatpush1.bf16.msra.mxu1 %v24755_v22  ;;  %v24763_v22 = vld [vmem:[#allocation177_spill] sm:$0xff] }
 0x27c   : > { %13952 = vmatprep.subr.bf16.mxu1 %v24756_v60  ;;  %v24764_v60 = vld [vmem:[#allocation119_spill] sm:$0xff] }
 0x27d   : > { %13434 = vmatpush1.bf16.msra.mxu0 %v24757_v10  ;;  %v24765_v10 = vld [vmem:[#allocation233_spill] sm:$0xff] }
 0x27e   : > { %13436 = vmatprep.subr.bf16.mxu0 %v24758_v43  ;;  %v24766_v43 = vld [vmem:[#allocation180_spill] sm:$0xff] }
 0x27f   : > { %13954 = vmatpush1.bf16.msra.mxu1 %v17925_v17  ;;  %v24767_v17 = vld [vmem:[#allocation185_spill] sm:$0xff] }
 0x280   : > { %13956 = vmatprep.subr.bf16.mxu1 %v17932_v12  ;;  %v24768_v12 = vld [vmem:[#allocation235_spill] sm:$0xff] }
 0x281   : > { %13438 = vmatpush1.bf16.msra.mxu0 %v24759_v39  ;;  %v24769_v39 = vld [vmem:[#allocation236_spill] sm:$0xff] }
 0x282   : > { %13440 = vmatprep.subr.bf16.mxu0 %v24760_v45  ;;  %v24770_v45 = vld [vmem:[#allocation186_spill] sm:$0xff] }
 0x283   : > { %13958 = vmatpush1.bf16.msra.mxu1 %v17939_v3  ;;  %v24771_v3 = vld [vmem:[#allocation195_spill] sm:$0xff] }
 0x284   : > { %13960 = vmatprep.subr.bf16.mxu1 %v24761_v44  ;;  %v24772_v44 = vld [vmem:[#allocation238_spill] sm:$0xff] }
 0x285   : > { %13442 = vmatpush1.bf16.msra.mxu0 %v24762_v18  ;;  %v24773_v18 = vld [vmem:[#allocation197_spill] sm:$0xff] }
 0x286   : > { %13444 = vmatprep.subr.bf16.mxu0 %v24763_v22  ;;  %v24774_v22 = vld [vmem:[#allocation196_spill] sm:$0xff] }
 0x287   : > { %13962 = vmatpush1.bf16.msra.mxu1 %v24764_v60  ;;  %v24775_v60 = vld [vmem:[#allocation207_spill] sm:$0xff] }
 0x288   : > { %13964 = vmatprep.subr.bf16.mxu1 %v24765_v10  ;;  %v24776_v10 = vld [vmem:[#allocation188_spill] sm:$0xff] }
 0x289   : > { %13446 = vmatpush1.bf16.msra.mxu0 %v24766_v43  ;;  %v24777_v43 = vld [vmem:[#allocation193_spill] sm:$0xff] }
 0x28a   : > { %13448 = vmatprep.subr.bf16.mxu0 %v24767_v17  ;;  %v24778_v17 = vld [vmem:[#allocation210_spill] sm:$0xff] }
 0x28b   : > { %13966 = vmatpush1.bf16.msra.mxu1 %v24768_v12  ;;  %v24779_v12 = vld [vmem:[#allocation217_spill] sm:$0xff] }
 0x28c   : > { %13968 = vmatprep.subr.bf16.mxu1 %v24769_v39  ;;  %v24780_v39 = vld [vmem:[#allocation200_spill] sm:$0xff] }
 0x28d   : > { %13450 = vmatpush1.bf16.msra.mxu0 %v24770_v45  ;;  %v24781_v45 = vld [vmem:[#allocation220_spill] sm:$0xff] }
 0x28e   : > { %13452 = vmatprep.subr.bf16.mxu0 %v24771_v3  ;;  %v24785_v3 = vld [vmem:[#allocation45_spill] sm:$0xff] }
 0x28f   : > { %13970 = vmatpush1.bf16.msra.mxu1 %v24772_v44  ;;  %v24782_v44 = vld [vmem:[#allocation225_spill] sm:$0xff] }
 0x290   : > { %13972 = vmatprep.subr.bf16.mxu1 %v24773_v18  ;;  %v24783_v18 = vld [vmem:[#allocation41_spill] sm:$0xff] }
 0x291   : > { %13454 = vmatpush1.bf16.msra.mxu0 %v24774_v22  ;;  %v24784_v22 = vand.u32 4294901760, %v24783_v18 }
 0x292   : > { %13456 = vmatprep.subr.bf16.mxu0 %v24775_v60  ;;  %v24786_v60 = vand.u32 4294901760, %v24785_v3  ;;  %v24796_v3 = vld [vmem:[#allocation244_spill] sm:$0xff] }
 0x293   : > { %13974 = vmatpush1.bf16.msra.mxu1 %v24776_v10  ;;  %v24788_v10 = vld [vmem:[#allocation46_spill] sm:$0xff] }
 0x294   : > { %13976 = vmatprep.subr.bf16.mxu1 %v24777_v43  ;;  %v13467_v30 = vpack.c.bf16 %v24786_v60, %v24784_v22  ;;  %v24787_v43 = vld [vmem:[#allocation227_spill] sm:$0xff]  ;;  %v24798_v60 = vld [vmem:[#allocation61_spill] sm:$0xff] }
 0x295   : > { %13458 = vmatpush1.bf16.msra.mxu0 %v24778_v17  ;;  %v24789_v17 = vand.u32 4294901760, %v24788_v10  ;;  %v24797_v22 = vld [vmem:[#allocation255_spill] sm:$0xff]  ;;  %v24799_v10 = vand.u32 4294901760, %v24798_v60 }
 0x296   : > { %13460 = vmatprep.subr.bf16.mxu0 %v24779_v12  ;;  %v24790_v12 = vld [vmem:[#allocation48_spill] sm:$0xff] }
 0x297   : > { %13978 = vmatpush1.bf16.msra.mxu1 %v24780_v39  ;;  %v24791_v29 = vand.u32 4294901760, %v24790_v12 }
 0x299   : > { %13462 = vmatpush1.bf16.msra.mxu0 %v24781_v45  ;;  %v13469_v39 = vpack.c.bf16 %v24791_v29, %v24789_v17  ;;  %v24792_v45 = vld [vmem:[#allocation58_spill] sm:$0xff]  ;;  %v24804_v29 = vld [vmem:[#allocation73_spill] sm:$0xff] }
 0x29a   : > { %3691 = vmatmul.mubr.f32.vlgmr.msra.gmra.mrb[0].mxu1 %v24591_v35  ;;  %13464 = vmatprep.subr.bf16.mxu0 %v24782_v44  ;;  %v24793_v59 = vand.u32 4294901760, %v24792_v45  ;;  %v24794_v44 = vld [vmem:[#allocation59_spill] sm:$0xff] }
 0x29b   : > { %3697 = vmatprep.mubr.f32.mxu1 %v24596_v6  ;;  %v24795_v54 = vand.u32 4294901760, %v24794_v44  ;;  %v24805_v44 = vand.u32 4294901760, %v24804_v29 }
 0x29d   : > { %13466 = vmatpush1.bf16.msra.mxu0 %v24787_v43  ;;  %v13471_v18 = vpack.c.bf16 %v24795_v54, %v24793_v59  ;;  %v24800_v43 = vld [vmem:[#allocation62_spill] sm:$0xff]  ;;  %v24806_v59 = vld [vmem:[#allocation256_spill] sm:$0xff] }
 0x29e   : > { %3699 = vmatmul.mubr.f32.gmra.mrb[2].mxu1 %v24606_v42  ;;  %13468 = vmatprep.subr.bf16.mxu0 %v13467_v30  ;;  %v24801_v12 = vand.u32 4294901760, %v24800_v43  ;;  %v24802_v30 = vld [vmem:[#allocation72_spill] sm:$0xff] }
 0x29f   : > { %3705 = vmatprep.mubr.f32.mxu1 %v24611_v7  ;;  %v24803_v45 = vand.u32 4294901760, %v24802_v30  ;;  %v24814_v30 = vld [vmem:[#allocation87_spill] sm:$0xff] }
 0x2a0   : > { %1759 = vmatmul.mubr.f32.vlgmr.msra.gmra.mrb[0].mxu0 %v24796_v3  ;;  %v13473_v17 = vpack.c.bf16 %v24801_v12, %v24799_v10  ;;  %v24807_v3 = vld [vmem:[#allocation247_spill] sm:$0xff]  ;;  %v24815_v29 = vand.u32 4294901760, %v24814_v30 }
 0x2a1   : > { %1767 = vmatprep.mubr.f32.mxu0 %v24797_v22  ;;  %13470 = vmatpush1.bf16.msra.mxu0 %v13469_v39  ;;  %v13475_v54 = vpack.c.bf16 %v24805_v44, %v24803_v45  ;;  %v24808_v39 = vld [vmem:[#allocation75_spill] sm:$0xff]  ;;  %v24810_v22 = vld [vmem:[#allocation76_spill] sm:$0xff] }
 0x2a2   : > { %3707 = vmatmul.mubr.f32.gmra.mrb[4].mxu1 %v24615_v62  ;;  %13472 = vmatprep.subr.bf16.mxu0 %v13471_v18  ;;  %v24809_v60 = vand.u32 4294901760, %v24808_v39  ;;  %v24811_v43 = vand.u32 4294901760, %v24810_v22  ;;  %v24812_v18 = vld [vmem:[#allocation86_spill] sm:$0xff]  ;;  %v24816_v44 = vld [vmem:[#allocation252_spill] sm:$0xff] }
 0x2a3   : > { %3713 = vmatprep.mubr.f32.mxu1 %v24619_v50  ;;  %v24813_v12 = vand.u32 4294901760, %v24812_v18  ;;  %v24817_v50 = vld [vmem:[#allocation257_spill] sm:$0xff]  ;;  %v24822_v22 = vld [vmem:[#allocation100_spill] sm:$0xff]  ;;  %v24826_v18 = vld [vmem:[#allocation258_spill] sm:$0xff] }
 0x2a4   : > { %1771 = vmatmul.mubr.f32.gmra.mrb[2].mxu0 %v24806_v59  ;;  %v13477_v10 = vpack.c.bf16 %v24811_v43, %v24809_v60  ;;  %v24820_v59 = vld [vmem:[#allocation90_spill] sm:$0xff]  ;;  %v24823_v60 = vand.u32 4294901760, %v24822_v22  ;;  %v24824_v43 = vld [vmem:[#allocation101_spill] sm:$0xff]  ;;  %v24835_v22 = vand.u32 4294901760, %v24454_v52  ;;  %v24845_v52 = vand.u32 4294901760, %v24478_v15 }
 0x2a5   : > { %1779 = vmatprep.mubr.f32.mxu0 %v24807_v3  ;;  %13474 = vmatpush1.bf16.msra.mxu0 %v13473_v17  ;;  %v13479_v45 = vpack.c.bf16 %v24815_v29, %v24813_v12  ;;  %v24818_v3 = vld [vmem:[#allocation89_spill] sm:$0xff]  ;;  %v24821_v39 = vand.u32 4294901760, %v24820_v59  ;;  %v24827_v12 = vld [vmem:[#allocation103_spill] sm:$0xff]  ;;  %v24829_v29 = vld [vmem:[#allocation104_spill] sm:$0xff]  ;;  %v24852_v15 = vand.u32 4294901760, %v24498_v48  ;;  %v24859_v48 = vand.u32 4294901760, %v17081_v63 }
 0x2a6   : > { %3715 = vmatmul.mubr.f32.gmra.mrb[6].mxu1 %v24632_v36  ;;  %13476 = vmatprep.subr.bf16.mxu0 %v13475_v54  ;;  %v24819_v17 = vand.u32 4294901760, %v24818_v3  ;;  %v24825_v54 = vand.u32 4294901760, %v24824_v43  ;;  %v24828_v30 = vand.u32 4294901760, %v24827_v12  ;;  %v24831_v3 = vand.u32 4294901760, %v24643_v47  ;;  %v24832_v59 = vld [vmem:[#allocation115_spill] sm:$0xff] }
 0x2a7   : > { %v24837_v43 = vand.u32 4294901760, %v24457_v27  ;;  %v24838_v12 = vld [vmem:[#allocation131_spill] sm:$0xff]  ;;  %v24847_v27 = vand.u32 4294901760, %v24485_v58  ;;  %v24854_v58 = vand.u32 4294901760, %v24501_v32  ;;  %v24861_v32 = vand.u32 4294901760, %v17094_v24 }
 0x2a8   : > { %1783 = vmatmul.mubr.f32.gmra.mrb[4].mxu0 %v24816_v44  ;;  %v13481_v62 = vpack.c.bf16 %v24821_v39, %v24819_v17  ;;  %v13483_v36 = vpack.c.bf16 %v24825_v54, %v24823_v60  ;;  %v24834_v39 = vand.u32 4294901760, %v24453_v55  ;;  %v24866_v63 = vand.u32 4294901760, %v24312_v28  ;;  %v18969_v44 = vld [vmem:[%s16326_s5 + $0x2c8] sm:$0xff] }
 0x2a9   : > { %1791 = vmatprep.mubr.f32.mxu0 %v24817_v50  ;;  %13478 = vmatpush1.bf16.msra.mxu0 %v13477_v10  ;;  %v24830_v10 = vand.u32 4294901760, %v24829_v29  ;;  %v24868_v24 = vand.u32 4294901760, %v24700_v51  ;;  %v24873_v28 = vand.u32 4294901760, %v24710_v37  ;;  %v24875_v51 = vand.u32 4294901760, %v24508_v26  ;;  %v24880_v26 = vld [vmem:[#allocation57_spill] sm:$0xff]  ;;  %v24883_v37 = vld [vmem:[#allocation70_spill] sm:$0xff] }
 0x2aa   : > { %13480 = vmatprep.subr.bf16.mxu0 %v13479_v45  ;;  %v24833_v45 = vand.u32 4294901760, %v24832_v59  ;;  %v13489_v60 = vpack.c.bf16 %v24835_v22, %v24834_v39  ;;  %v24849_v39 = vand.u32 4294901760, %v24495_v34  ;;  %v24856_v34 = vand.u32 4294901760, %v24507_v53 }
 0x2ab   : > { %v13485_v50 = vpack.c.bf16 %v24830_v10, %v24828_v30  ;;  %v24840_v30 = vld [vmem:[#allocation132_spill] sm:$0xff]  ;;  %v24843_v10 = vld [vmem:[#allocation143_spill] sm:$0xff]  ;;  %v24863_v53 = vand.u32 4294901760, %v17139_v0  ;;  %v24870_v0 = vand.u32 4294901760, %v24703_v57  ;;  %v24877_v57 = vand.u32 4294901760, %v24716_v1  ;;  %v24886_v1 = vld [vmem:[#allocation85_spill] sm:$0xff] }
 0x2ac   : > { %1795 = vmatmul.mubr.f32.gmra.mrb[6].mxu0 %v24826_v18  ;;  %v13487_v17 = vpack.c.bf16 %v24833_v45, %v24831_v3  ;;  %v24841_v47 = vand.u32 4294901760, %v24840_v30  ;;  %v24844_v55 = vand.u32 4294901760, %v24843_v10  ;;  %v24848_v45 = vand.u32 4294901760, %v24491_v9 }
 0x2ad   : > { %13482 = vmatpush1.bf16.msra.mxu0 %v13481_v62  ;;  %2058 = vmatprep.mubr.f32.mxu0 %v17618_v11  ;;  %v24836_v62 = vand.u32 4294901760, %v24456_v21  ;;  %v24846_v21 = vand.u32 4294901760, %v24479_v61  ;;  %v24853_v61 = vand.u32 4294901760, %v24500_v13  ;;  %v24855_v9 = vand.u32 4294901760, %v24506_v19 }
 0x2ae   : > { %13484 = vmatprep.subr.bf16.mxu0 %v13483_v36  ;;  %v24839_v36 = vand.u32 4294901760, %v24838_v12  ;;  %v24860_v13 = vand.u32 4294901760, %v17083_v38  ;;  %v24862_v19 = vand.u32 4294901760, %v17096_v23  ;;  %v24867_v38 = vand.u32 4294901760, %v24701_v14 }
 0x2af   : > { %v13491_v54 = vpack.c.bf16 %v24837_v43, %v24836_v62  ;;  %v13497_v59 = vpack.c.bf16 %v24846_v21, %v24845_v52  ;;  %v13505_v43 = vpack.c.bf16 %v24854_v58, %v24853_v61  ;;  %v24869_v23 = vand.u32 4294901760, %v24704_v16  ;;  %v24897_v61 = vld [vmem:[#allocation155_spill] sm:$0xff]  ;;  %v24898_v58 = vld [vmem:[#allocation158_spill] sm:$0xff] }
 0x2b0   : > { %v13493_v29 = vpack.c.bf16 %v24841_v47, %v24839_v36  ;;  %v13511_v36 = vpack.c.bf16 %v24860_v13, %v24859_v48  ;;  %v13513_v30 = vpack.c.bf16 %v24862_v19, %v24861_v32  ;;  %v24874_v14 = vand.u32 4294901760, %v24709_v31  ;;  %v24882_v31 = vld [vmem:[#allocation71_spill] sm:$0xff]  ;;  %v24906_v48 = vld [vmem:[#allocation196_spill] sm:$0xff]  ;;  %v24909_v32 = vld [vmem:[#allocation217_spill] sm:$0xff] }
 0x2b1   : > { %13486 = vmatpush1.bf16.msra.mxu0 %v13485_v50  ;;  %v24842_v50 = vand.u32 4294901760, %v24658_v8  ;;  %v24850_v8 = vand.u32 4294901760, %v24496_v20  ;;  %v24857_v20 = vand.u32 4294901760, %v17036_v40  ;;  %v24864_v40 = vand.u32 4294901760, %v17141_v56  ;;  %v24907_v13 = vld [vmem:[#allocation207_spill] sm:$0xff]  ;;  %v24910_v19 = vld [vmem:[#allocation220_spill] sm:$0xff] }
 0x2b2   : > { %13488 = vmatprep.subr.bf16.mxu0 %v13487_v17  ;;  %v13499_v17 = vpack.c.bf16 %v24848_v45, %v24847_v27  ;;  %v13521_v10 = vpack.c.bf16 %v24870_v0, %v24869_v23  ;;  %v24871_v56 = vand.u32 4294901760, %v24706_v25  ;;  %v24876_v16 = vand.u32 4294901760, %v24509_v49  ;;  %v24881_v49 = vld [vmem:[#allocation60_spill] sm:$0xff]  ;;  %v24889_v45 = vld [vmem:[#allocation99_spill] sm:$0xff]  ;;  %v24921_v23 = vld [vmem:[#allocation253_spill] sm:$0xff] }
 0x2b3   : > { %v13495_v3 = vpack.c.bf16 %v24844_v55, %v24842_v50  ;;  %v13501_v22 = vpack.c.bf16 %v24850_v8, %v24849_v39  ;;  %v13515_v47 = vpack.c.bf16 %v24864_v40, %v24863_v53  ;;  %v13519_v50 = vpack.c.bf16 %v24868_v24, %v24867_v38  ;;  %v24888_v27 = vld [vmem:[#allocation88_spill] sm:$0xff]  ;;  %v24891_v39 = vld [vmem:[#allocation113_spill] sm:$0xff]  ;;  %v24912_v53 = vld [vmem:[#allocation227_spill] sm:$0xff] }
 0x2b4   : > { %v13527_v52 = vpack.c.bf16 %v24876_v16, %v24875_v51  ;;  %v24878_v25 = vand.u32 4294901760, %v24715_v33  ;;  %v24884_v33 = vld [vmem:[#allocation245_spill] sm:$0xff]  ;;  %v24892_v8 = vld [vmem:[#allocation116_spill] sm:$0xff]  ;;  %v24913_v40 = vld [vmem:[#allocation223_spill] sm:$0xff] }
 0x2b5   : > { %13490 = vmatpush1.bf16.msra.mxu0 %v13489_v60  ;;  %v24851_v60 = vand.u32 4294901760, %v24497_v41  ;;  %v24858_v41 = vand.u32 4294901760, %v17038_v5  ;;  %v24865_v5 = vand.u32 4294901760, %v24311_v2  ;;  %v24872_v2 = vand.u32 4294901760, %v24339_v4  ;;  %v24879_v4 = vld [vmem:[#allocation47_spill] sm:$0xff]  ;;  %v24919_v24 = vld [vmem:[#allocation42_spill] sm:$0xff] }
 0x2b6   : > { %13492 = vmatprep.subr.bf16.mxu0 %v13491_v54  ;;  %v13507_v54 = vpack.c.bf16 %v24856_v34, %v24855_v9  ;;  %v13529_v21 = vpack.c.bf16 %v24878_v25, %v24877_v57  ;;  %v24900_v9 = vld [vmem:[#allocation170_spill] sm:$0xff]  ;;  %v24901_v34 = vld [vmem:[#allocation177_spill] sm:$0xff]  ;;  %v24918_v38 = vld [vmem:[#allocation39_spill] sm:$0xff] }
 0x2b7   : > { %v13503_v62 = vpack.c.bf16 %v24852_v15, %v24851_v60  ;;  %v13509_v12 = vpack.c.bf16 %v24858_v41, %v24857_v20  ;;  %v13523_v55 = vpack.c.bf16 %v24872_v2, %v24871_v56  ;;  %v24894_v60 = vld [vmem:[#allocation130_spill] sm:$0xff]  ;;  %v24895_v15 = vld [vmem:[#allocation141_spill] sm:$0xff]  ;;  %v24922_v0 = vld [vmem:[#allocation51_spill] sm:$0xff] }
 0x2b8   : > { %v24903_v20 = vld [vmem:[#allocation185_spill] sm:$0xff]  ;;  %v24904_v41 = vld [vmem:[#allocation186_spill] sm:$0xff]  ;;  %v24924_v56 = vld [vmem:[#allocation55_spill] sm:$0xff] }
 0x2b9   : > { %13494 = vmatpush1.bf16.msra.mxu0 %v13493_v29  ;;  %v13517_v29 = vpack.c.bf16 %v24866_v63, %v24865_v5  ;;  %v24915_v5 = vld [vmem:[#allocation234_spill] sm:$0xff]  ;;  %v24916_v63 = vld [vmem:[#allocation29_spill] sm:$0xff]  ;;  %v24925_v2 = vld [vmem:[#allocation56_spill] sm:$0xff] }
 0x2ba   : > { %13496 = vmatprep.subr.bf16.mxu0 %v13495_v3  ;;  %v13525_v3 = vpack.c.bf16 %v24874_v14, %v24873_v28  ;;  %v24927_v28 = vld [vmem:[#allocation92_spill] sm:$0xff]  ;;  %v24930_v51 = vld [vmem:[#allocation106_spill] sm:$0xff]  ;;  %v24931_v16 = vld [vmem:[#allocation145_spill] sm:$0xff] }
 0x2bb   : > { %v24928_v14 = vld [vmem:[#allocation128_spill] sm:$0xff]  ;;  %v24933_v57 = vld [vmem:[#allocation111_spill] sm:$0xff] }
 0x2bc   : > { %v24934_v25 = vld [vmem:[#allocation112_spill] sm:$0xff] }
 0x2bd   : > { %13498 = vmatpush1.bf16.msra.mxu0 %v13497_v59  ;;  %v24887_v59 = vld [vmem:[#allocation246_spill] sm:$0xff] }
 0x2be   : > { %13500 = vmatprep.subr.bf16.mxu0 %v13499_v17  ;;  %v24890_v17 = vld [vmem:[#allocation102_spill] sm:$0xff] }
 0x2c1   : > { %13502 = vmatpush1.bf16.msra.mxu0 %v13501_v22  ;;  %v24893_v22 = vld [vmem:[#allocation127_spill] sm:$0xff] }
 0x2c2   : > { %13504 = vmatprep.subr.bf16.mxu0 %v13503_v62  ;;  %v24896_v62 = vld [vmem:[#allocation144_spill] sm:$0xff] }
 0x2c5   : > { %13506 = vmatpush1.bf16.msra.mxu0 %v13505_v43  ;;  %v24899_v43 = vld [vmem:[#allocation167_spill] sm:$0xff] }
 0x2c6   : > { %13508 = vmatprep.subr.bf16.mxu0 %v13507_v54  ;;  %v24902_v54 = vld [vmem:[#allocation180_spill] sm:$0xff] }
 0x2c9   : > { %13510 = vmatpush1.bf16.msra.mxu0 %v13509_v12  ;;  %v24905_v12 = vld [vmem:[#allocation195_spill] sm:$0xff] }
 0x2ca   : > { %13512 = vmatprep.subr.bf16.mxu0 %v13511_v36  ;;  %v24908_v36 = vld [vmem:[#allocation210_spill] sm:$0xff] }
 0x2cd   : > { %13514 = vmatpush1.bf16.msra.mxu0 %v13513_v30  ;;  %v24911_v30 = vld [vmem:[#allocation225_spill] sm:$0xff] }
 0x2ce   : > { %13516 = vmatprep.subr.bf16.mxu0 %v13515_v47  ;;  %v24914_v47 = vld [vmem:[#allocation232_spill] sm:$0xff] }
 0x2d1   : > { %13518 = vmatpush1.bf16.msra.mxu0 %v13517_v29  ;;  %v24917_v29 = vld [vmem:[#allocation38_spill] sm:$0xff] }
 0x2d2   : > { %13520 = vmatprep.subr.bf16.mxu0 %v13519_v50  ;;  %v24920_v50 = vld [vmem:[#allocation43_spill] sm:$0xff] }
 0x2d5   : > { %13522 = vmatpush1.bf16.msra.mxu0 %v13521_v10  ;;  %v24923_v10 = vld [vmem:[#allocation52_spill] sm:$0xff] }
 0x2d6   : > { %13524 = vmatprep.subr.bf16.mxu0 %v13523_v55  ;;  %v24926_v55 = vld [vmem:[#allocation91_spill] sm:$0xff] }
 0x2d9   : > { %13526 = vmatpush1.bf16.msra.mxu0 %v13525_v3  ;;  %v24929_v3 = vld [vmem:[#allocation105_spill] sm:$0xff] }
 0x2da   : > { %13528 = vmatprep.subr.bf16.mxu0 %v13527_v52  ;;  %v24932_v52 = vld [vmem:[#allocation146_spill] sm:$0xff] }
 0x2dd   : > { %13530 = vmatpush1.bf16.msra.mxu0 %v13529_v21  ;;  %v24935_v21 = vld [vmem:[#allocation156_spill] sm:$0xff] }
 0x2de   : > { %13532 = vmatprep.subr.bf16.mxu0 %v24718_v46  ;;  %v24885_v46 = vld [vmem:[#allocation74_spill] sm:$0xff] }
 0x2e0   : > { %2060 = vmatmul.mubr.f32.vlgmr.msra.gmra.mrb[0].mxu0 %v24591_v35 }
 0x2e1   : > { %2066 = vmatprep.mubr.f32.mxu0 %v24596_v6  ;;  %13534 = vmatpush1.bf16.msra.mxu0 %v24879_v4  ;;  %v24936_v4 = vld [vmem:[#allocation230_spill] sm:$0xff] }
 0x2e2   : > { %13536 = vmatprep.subr.bf16.mxu0 %v24880_v26  ;;  %v24937_v26 = vld [vmem:[#allocation119_spill] sm:$0xff] }
 0x2e4   : > { %2068 = vmatmul.mubr.f32.gmra.mrb[2].mxu0 %v24606_v42 }
 0x2e5   : > { %2074 = vmatprep.mubr.f32.mxu0 %v24611_v7  ;;  %13538 = vmatpush1.bf16.msra.mxu0 %v24881_v49  ;;  %v24938_v49 = vld [vmem:[#allocation233_spill] sm:$0xff] }
 0x2e6   : > { %13540 = vmatprep.subr.bf16.mxu0 %v24882_v31  ;;  %v24939_v31 = vld [vmem:[#allocation235_spill] sm:$0xff] }
 0x2e8   : > { %2076 = vmatmul.mubr.f32.gmra.mrb[4].mxu0 %v24883_v37 }
 0x2e9   : > { %2082 = vmatprep.mubr.f32.mxu0 %v24884_v33  ;;  %13542 = vmatpush1.bf16.msra.mxu0 %v24885_v46  ;;  %v24940_v46 = vld [vmem:[#allocation236_spill] sm:$0xff] }
 0x2ea   : > { %13544 = vmatprep.subr.bf16.mxu0 %v24886_v1  ;;  %v24941_v1 = vld [vmem:[#allocation30_spill] sm:$0xff] }
 0x2ec   : > { %2084 = vmatmul.mubr.f32.gmra.mrb[6].mxu0 %v24887_v59 }
 0x2ed   : > { %13546 = vmatpush1.bf16.msra.mxu0 %v24888_v27  ;;  %2219 = vmatprep.mubr.f32.mxu0 %v17618_v11  ;;  %v24942_v27 = vand.u32 4294901760, %v24941_v1 }
 0x2ee   : > { %13548 = vmatprep.subr.bf16.mxu0 %v24889_v45 }
 0x2ef   : > { %v2447_v45 = vsub.f32 %v24941_v1, %v24942_v27  ;;  %v24970_v27 = vld [vmem:[#allocation65_spill] sm:$0xff] }
 0x2f1   : > { %13550 = vmatpush1.bf16.msra.mxu0 %v24890_v17  ;;  %v24943_v17 = vld [vmem:[#allocation32_spill] sm:$0xff] }
 0x2f2   : > { %13552 = vmatprep.subr.bf16.mxu0 %v24891_v39  ;;  %v24944_v39 = vand.u32 4294901760, %v24943_v17 }
 0x2f5   : > { %13554 = vmatpush1.bf16.msra.mxu0 %v24892_v8  ;;  %v2459_v8 = vsub.f32 %v24943_v17, %v24944_v39  ;;  %v24972_v39 = vld [vmem:[#allocation66_spill] sm:$0xff] }
 0x2f6   : > { %13556 = vmatprep.subr.bf16.mxu0 %v24893_v22  ;;  %v24945_v22 = vld [vmem:[#allocation238_spill] sm:$0xff] }
 0x2f9   : > { %13558 = vmatpush1.bf16.msra.mxu0 %v24894_v60  ;;  %v24946_v60 = vld [vmem:[#allocation33_spill] sm:$0xff] }
 0x2fa   : > { %13560 = vmatprep.subr.bf16.mxu0 %v24895_v15  ;;  %v24947_v15 = vand.u32 4294901760, %v24946_v60 }
 0x2fd   : > { %13562 = vmatpush1.bf16.msra.mxu0 %v24896_v62  ;;  %v2453_v62 = vsub.f32 %v24946_v60, %v24947_v15  ;;  %v24974_v60 = vld [vmem:[#allocation254_spill] sm:$0xff] }
 0x2fe   : > { %13564 = vmatprep.subr.bf16.mxu0 %v24897_v61  ;;  %v24948_v61 = vld [vmem:[#allocation34_spill] sm:$0xff] }
 0x301   : > { %13566 = vmatpush1.bf16.msra.mxu0 %v24898_v58  ;;  %v24949_v58 = vand.u32 4294901760, %v24948_v61 }
 0x302   : > { %13568 = vmatprep.subr.bf16.mxu0 %v24899_v43 }
 0x303   : > { %v2465_v43 = vsub.f32 %v24948_v61, %v24949_v58  ;;  %v24975_v58 = vld [vmem:[#allocation67_spill] sm:$0xff] }
 0x305   : > { %13570 = vmatpush1.bf16.msra.mxu0 %v24900_v9  ;;  %v24950_v9 = vld [vmem:[#allocation35_spill] sm:$0xff] }
 0x306   : > { %13572 = vmatprep.subr.bf16.mxu0 %v24901_v34  ;;  %v24951_v34 = vand.u32 4294901760, %v24950_v9 }
 0x309   : > { %13574 = vmatpush1.bf16.msra.mxu0 %v24902_v54  ;;  %v2471_v54 = vsub.f32 %v24950_v9, %v24951_v34  ;;  %v24977_v34 = vld [vmem:[#allocation97_spill] sm:$0xff] }
 0x30a   : > { %13576 = vmatprep.subr.bf16.mxu0 %v24903_v20  ;;  %v24952_v20 = vld [vmem:[#allocation36_spill] sm:$0xff] }
 0x30d   : > { %13578 = vmatpush1.bf16.msra.mxu0 %v24904_v41  ;;  %v24953_v41 = vand.u32 4294901760, %v24952_v20 }
 0x30e   : > { %13580 = vmatprep.subr.bf16.mxu0 %v24905_v12 }
 0x30f   : > { %v2483_v12 = vsub.f32 %v24952_v20, %v24953_v41 }
 0x311   : > { %13582 = vmatpush1.bf16.msra.mxu0 %v24906_v48  ;;  %v24954_v48 = vld [vmem:[#allocation197_spill] sm:$0xff] }
 0x312   : > { %13584 = vmatprep.subr.bf16.mxu0 %v24907_v13  ;;  %v2448_v13 = vand.u32 4294901760, %v2447_v45  ;;  %v24971_v45 = vand.u32 4294901760, %v24970_v27 }
 0x314   : > { %v2519_v17 = vsub.f32 %v24970_v27, %v24971_v45 }
 0x315   : > { %13586 = vmatpush1.bf16.msra.mxu0 %v24908_v36  ;;  %v2460_v36 = vand.u32 4294901760, %v2459_v8  ;;  %v24973_v8 = vand.u32 4294901760, %v24972_v39 }
 0x316   : > { %13588 = vmatprep.subr.bf16.mxu0 %v24909_v32  ;;  %v24955_v32 = vld [vmem:[#allocation37_spill] sm:$0xff] }
 0x319   : > { %13590 = vmatpush1.bf16.msra.mxu0 %v24910_v19  ;;  %v24956_v19 = vand.u32 4294901760, %v24955_v32 }
 0x31a   : > { %13592 = vmatprep.subr.bf16.mxu0 %v24911_v30 }
 0x31b   : > { %v2477_v30 = vsub.f32 %v24955_v32, %v24956_v19 }
 0x31d   : > { %13594 = vmatpush1.bf16.msra.mxu0 %v24912_v53  ;;  %v24957_v53 = vld [vmem:[#allocation40_spill] sm:$0xff] }
 0x31e   : > { %13596 = vmatprep.subr.bf16.mxu0 %v24913_v40  ;;  %v24958_v40 = vand.u32 4294901760, %v24957_v53 }
 0x320   : > { %2221 = vmatmul.mubr.f32.vlgmr.msra.gmra.mrb[0].mxu0 %v24591_v35 }
 0x321   : > { %2227 = vmatprep.mubr.f32.mxu0 %v24596_v6  ;;  %13598 = vmatpush1.bf16.msra.mxu0 %v24914_v47  ;;  %v2489_v47 = vsub.f32 %v24957_v53, %v24958_v40  ;;  %v2520_v53 = vand.u32 4294901760, %v2519_v17  ;;  %v24999_v17 = vld [vmem:[#allocation118_spill] sm:$0xff] }
 0x322   : > { %13600 = vmatprep.subr.bf16.mxu0 %v24915_v5  ;;  %v24959_v5 = vld [vmem:[#allocation188_spill] sm:$0xff] }
 0x324   : > { %2229 = vmatmul.mubr.f32.gmra.mrb[2].mxu0 %v24606_v42 }
 0x325   : > { %2235 = vmatprep.mubr.f32.mxu0 %v24611_v7  ;;  %13602 = vmatpush1.bf16.msra.mxu0 %v24916_v63  ;;  %v2454_v63 = vand.u32 4294901760, %v2453_v62 }
 0x326   : > { %13604 = vmatprep.subr.bf16.mxu0 %v24917_v29  ;;  %v2466_v29 = vand.u32 4294901760, %v2465_v43  ;;  %v24976_v43 = vand.u32 4294901760, %v24975_v58 }
 0x328   : > { %2237 = vmatmul.mubr.f32.gmra.mrb[4].mxu0 %v24883_v37  ;;  %v2525_v9 = vsub.f32 %v24975_v58, %v24976_v43  ;;  %v25002_v43 = vld [vmem:[#allocation108_spill] sm:$0xff] }
 0x329   : > { %2243 = vmatprep.mubr.f32.mxu0 %v24884_v33  ;;  %13606 = vmatpush1.bf16.msra.mxu0 %v24918_v38  ;;  %v2472_v38 = vand.u32 4294901760, %v2471_v54  ;;  %v24978_v54 = vld [vmem:[#allocation68_spill] sm:$0xff] }
 0x32a   : > { %13608 = vmatprep.subr.bf16.mxu0 %v24919_v24  ;;  %v2484_v24 = vand.u32 4294901760, %v2483_v12  ;;  %v24979_v20 = vand.u32 4294901760, %v24978_v54  ;;  %v24980_v12 = vld [vmem:[#allocation79_spill] sm:$0xff] }
 0x32c   : > { %2245 = vmatmul.mubr.f32.gmra.mrb[6].mxu0 %v24887_v59  ;;  %v2537_v41 = vsub.f32 %v24978_v54, %v24979_v20  ;;  %v25004_v20 = vld [vmem:[#allocation129_spill] sm:$0xff] }
 0x32d   : > { %13610 = vmatpush1.bf16.msra.mxu0 %v24920_v50  ;;  %2384 = vmatprep.mubr.f32.mxu0 %v24921_v23  ;;  %v24960_v50 = vld [vmem:[#allocation193_spill] sm:$0xff] }
 0x32e   : > { %13612 = vmatprep.subr.bf16.mxu0 %v24922_v0  ;;  %v13659_v0 = vpack.c.bf16 %v2460_v36, %v2448_v13  ;;  %v24982_v36 = vld [vmem:[#allocation80_spill] sm:$0xff] }
 0x32f   : > { %v24983_v32 = vand.u32 4294901760, %v24982_v36 }
 0x331   : > { %13614 = vmatpush1.bf16.msra.mxu0 %v24923_v10  ;;  %v24961_v10 = vld [vmem:[#allocation49_spill] sm:$0xff]  ;;  %v2555_v19 = vsub.f32 %v24982_v36, %v24983_v32 }
 0x332   : > { %13616 = vmatprep.subr.bf16.mxu0 %v24924_v56  ;;  %v24962_v56 = vand.u32 4294901760, %v24961_v10 }
 0x335   : > { %13618 = vmatpush1.bf16.msra.mxu0 %v24925_v2  ;;  %v2495_v2 = vsub.f32 %v24961_v10, %v24962_v56  ;;  %v24989_v10 = vld [vmem:[#allocation259_spill] sm:$0xff]  ;;  %v2526_v56 = vand.u32 4294901760, %v2525_v9  ;;  %v25003_v9 = vand.u32 4294901760, %v25002_v43 }
 0x336   : > { %13620 = vmatprep.subr.bf16.mxu0 %v24926_v55  ;;  %v24963_v55 = vld [vmem:[#allocation50_spill] sm:$0xff] }
 0x337   : > { %v2603_v54 = vsub.f32 %v25002_v43, %v25003_v9 }
 0x339   : > { %13622 = vmatpush1.bf16.msra.mxu0 %v24927_v28  ;;  %v24964_v28 = vand.u32 4294901760, %v24963_v55 }
 0x33a   : > { %13624 = vmatprep.subr.bf16.mxu0 %v24928_v14 }
 0x33b   : > { %v2507_v14 = vsub.f32 %v24963_v55, %v24964_v28  ;;  %v2556_v28 = vand.u32 4294901760, %v2555_v19 }
 0x33d   : > { %13626 = vmatpush1.bf16.msra.mxu0 %v24929_v3  ;;  %v2478_v3 = vand.u32 4294901760, %v2477_v30  ;;  %v2508_v1 = vand.u32 4294901760, %v2507_v14 }
 0x33e   : > { %13628 = vmatprep.subr.bf16.mxu0 %v24930_v51  ;;  %v2490_v51 = vand.u32 4294901760, %v2489_v47  ;;  %v24984_v47 = vld [vmem:[#allocation98_spill] sm:$0xff] }
 0x340   : > { %v13665_v15 = vpack.c.bf16 %v2490_v51, %v2478_v3  ;;  %v24990_v3 = vld [vmem:[#allocation93_spill] sm:$0xff] }
 0x341   : > { %13630 = vmatpush1.bf16.msra.mxu0 %v24931_v16  ;;  %v24965_v16 = vld [vmem:[#allocation53_spill] sm:$0xff]  ;;  %v24991_v51 = vand.u32 4294901760, %v24990_v3 }
 0x342   : > { %13632 = vmatprep.subr.bf16.mxu0 %v24932_v52  ;;  %v24966_v52 = vand.u32 4294901760, %v24965_v16 }
 0x345   : > { %13634 = vmatpush1.bf16.msra.mxu0 %v24933_v57  ;;  %v2501_v57 = vsub.f32 %v24965_v16, %v24966_v52  ;;  %v2567_v16 = vsub.f32 %v24990_v3, %v24991_v51  ;;  %v24992_v52 = vld [vmem:[#allocation94_spill] sm:$0xff] }
 0x346   : > { %13636 = vmatprep.subr.bf16.mxu0 %v24934_v25  ;;  %v24967_v25 = vld [vmem:[#allocation54_spill] sm:$0xff] }
 0x347   : > { %v2502_v62 = vand.u32 4294901760, %v2501_v57  ;;  %v24993_v57 = vand.u32 4294901760, %v24992_v52 }
 0x349   : > { %13638 = vmatpush1.bf16.msra.mxu0 %v24935_v21  ;;  %v24968_v21 = vand.u32 4294901760, %v24967_v25 }
 0x34a   : > { %13640 = vmatprep.subr.bf16.mxu0 %v24936_v4 }
 0x34b   : > { %v2513_v4 = vsub.f32 %v24967_v25, %v24968_v21  ;;  %v2579_v25 = vsub.f32 %v24992_v52, %v24993_v57  ;;  %v24994_v21 = vld [vmem:[#allocation117_spill] sm:$0xff] }
 0x34d   : > { %13642 = vmatpush1.bf16.msra.mxu0 %v24937_v26  ;;  %v24969_v26 = vld [vmem:[#allocation200_spill] sm:$0xff]  ;;  %v2514_v61 = vand.u32 4294901760, %v2513_v4 }
 0x34e   : > { %13644 = vmatprep.subr.bf16.mxu0 %v24938_v49  ;;  %v13661_v49 = vpack.c.bf16 %v2466_v29, %v2454_v63  ;;  %v24985_v63 = vld [vmem:[#allocation81_spill] sm:$0xff] }
 0x34f   : > { %v24986_v29 = vand.u32 4294901760, %v24985_v63 }
 0x351   : > { %13646 = vmatpush1.bf16.msra.mxu0 %v24939_v31  ;;  %v13663_v31 = vpack.c.bf16 %v2484_v24, %v2472_v38  ;;  %v2549_v38 = vsub.f32 %v24985_v63, %v24986_v29  ;;  %v24987_v24 = vld [vmem:[#allocation82_spill] sm:$0xff] }
 0x352   : > { %13648 = vmatprep.subr.bf16.mxu0 %v24940_v46  ;;  %v2496_v46 = vand.u32 4294901760, %v2495_v2  ;;  %v2538_v2 = vand.u32 4294901760, %v2537_v41 }
 0x353   : > { %v2550_v4 = vand.u32 4294901760, %v2549_v38  ;;  %v25012_v38 = vld [vmem:[#allocation122_spill] sm:$0xff] }
 0x354   : > { %v13667_v30 = vpack.c.bf16 %v2508_v1, %v2496_v46  ;;  %v24997_v1 = vld [vmem:[#allocation96_spill] sm:$0xff] }
 0x355   : > { %13650 = vmatpush1.bf16.msra.mxu0 %v24945_v22  ;;  %v2531_v22 = vsub.f32 %v24972_v39, %v24973_v8  ;;  %v24998_v27 = vand.u32 4294901760, %v24997_v1  ;;  %v13673_v39 = vpack.c.bf16 %v2538_v2, %v2526_v56 }
 0x356   : > { %13652 = vmatprep.subr.bf16.mxu0 %v24954_v48  ;;  %v24981_v48 = vand.u32 4294901760, %v24980_v12 }
 0x357   : > { %v2532_v40 = vand.u32 4294901760, %v2531_v22  ;;  %v2585_v45 = vsub.f32 %v24997_v1, %v24998_v27  ;;  %v2568_v22 = vand.u32 4294901760, %v2567_v16  ;;  %v25017_v16 = vld [vmem:[#allocation124_spill] sm:$0xff]  ;;  %v25021_v27 = vld [vmem:[#allocation135_spill] sm:$0xff] }
 0x358   : > { %v2543_v13 = vsub.f32 %v24980_v12, %v24981_v48  ;;  %v25018_v52 = vand.u32 4294901760, %v25017_v16 }
 0x359   : > { %13654 = vmatpush1.bf16.msra.mxu0 %v24959_v5  ;;  %v13669_v5 = vpack.c.bf16 %v2514_v61, %v2502_v62  ;;  %v13671_v14 = vpack.c.bf16 %v2532_v40, %v2520_v53  ;;  %v25000_v62 = vld [vmem:[#allocation107_spill] sm:$0xff]  ;;  %v2586_v48 = vand.u32 4294901760, %v2585_v45  ;;  %v25022_v45 = vand.u32 4294901760, %v25021_v27 }
 0x35a   : > { %13656 = vmatprep.subr.bf16.mxu0 %v24960_v50  ;;  %v24988_v50 = vand.u32 4294901760, %v24987_v24  ;;  %v2544_v55 = vand.u32 4294901760, %v2543_v13  ;;  %v25001_v61 = vand.u32 4294901760, %v25000_v62  ;;  %v25005_v13 = vld [vmem:[#allocation109_spill] sm:$0xff]  ;;  %v2633_v57 = vsub.f32 %v25017_v16, %v25018_v52 }
 0x35b   : > { %v25006_v36 = vand.u32 4294901760, %v25005_v13 }
 0x35c   : > { %v13675_v8 = vpack.c.bf16 %v2556_v28, %v2544_v55  ;;  %v2591_v58 = vsub.f32 %v25000_v62, %v25001_v61  ;;  %v2604_v55 = vand.u32 4294901760, %v2603_v54  ;;  %v2634_v61 = vand.u32 4294901760, %v2633_v57  ;;  %v25027_v54 = vld [vmem:[#allocation138_spill] sm:$0xff]  ;;  %v25040_v57 = vld [vmem:[#allocation161_spill] sm:$0xff] }
 0x35d   : > { %13658 = vmatpush1.bf16.msra.mxu0 %v24969_v26  ;;  %v2597_v32 = vsub.f32 %v25005_v13, %v25006_v36 }
 0x35e   : > { %13660 = vmatprep.subr.bf16.mxu0 %v13659_v0  ;;  %v2561_v0 = vsub.f32 %v24987_v24, %v24988_v50  ;;  %v25013_v24 = vand.u32 4294901760, %v25012_v38  ;;  %v2592_v2 = vand.u32 4294901760, %v2591_v58  ;;  %v25025_v58 = vld [vmem:[#allocation137_spill] sm:$0xff] }
 0x35f   : > { %v25026_v43 = vand.u32 4294901760, %v25025_v58 }
 0x360   : > { %2390 = vmatmul.mubr.f32.vlgmr.msra.gmra.mrb[8].mxu0 %v24974_v60  ;;  %v2562_v26 = vand.u32 4294901760, %v2561_v0  ;;  %v2627_v50 = vsub.f32 %v25012_v38, %v25013_v24  ;;  %v13683_v1 = vpack.c.bf16 %v2604_v55, %v2592_v2 }
 0x361   : > { %2400 = vmatprep.mubr.f32.mxu0 %v24977_v34  ;;  %13662 = vmatpush1.bf16.msra.mxu0 %v13661_v49  ;;  %v24995_v49 = vld [vmem:[#allocation95_spill] sm:$0xff]  ;;  %v2645_v9 = vsub.f32 %v25025_v58, %v25026_v43  ;;  %v25047_v58 = vld [vmem:[#allocation164_spill] sm:$0xff] }
 0x362   : > { %13664 = vmatprep.subr.bf16.mxu0 %v13663_v31  ;;  %v24996_v31 = vand.u32 4294901760, %v24995_v49  ;;  %v13677_v41 = vpack.c.bf16 %v2562_v26, %v2550_v4  ;;  %v2598_v4 = vand.u32 4294901760, %v2597_v32  ;;  %v25048_v43 = vand.u32 4294901760, %v25047_v58 }
 0x364   : > { %2406 = vmatmul.mubr.f32.gmra.mrb[10].mxu0 %v24984_v47  ;;  %v2573_v46 = vsub.f32 %v24995_v49, %v24996_v31  ;;  %v2628_v31 = vand.u32 4294901760, %v2627_v50 }
 0x365   : > { %2416 = vmatprep.mubr.f32.mxu0 %v24989_v10  ;;  %13666 = vmatpush1.bf16.msra.mxu0 %v13665_v15  ;;  %v2580_v15 = vand.u32 4294901760, %v2579_v25 }
 0x366   : > { %13668 = vmatprep.subr.bf16.mxu0 %v13667_v30  ;;  %v2574_v12 = vand.u32 4294901760, %v2573_v46  ;;  %v25008_v30 = vld [vmem:[#allocation110_spill] sm:$0xff] }
 0x367   : > { %v25009_v53 = vand.u32 4294901760, %v25008_v30  ;;  %v13679_v56 = vpack.c.bf16 %v2580_v15, %v2568_v22 }
 0x368   : > { %2422 = vmatmul.mubr.f32.gmra.mrb[12].mxu0 %v24994_v21  ;;  %v13681_v28 = vpack.c.bf16 %v2586_v48, %v2574_v12 }
 0x369   : > { %2432 = vmatprep.mubr.f32.mxu0 %v24999_v17  ;;  %13670 = vmatpush1.bf16.msra.mxu0 %v13669_v5  ;;  %v2609_v40 = vsub.f32 %v25008_v30, %v25009_v53  ;;  %v25010_v5 = vld [vmem:[#allocation121_spill] sm:$0xff] }
 0x36a   : > { %13672 = vmatprep.subr.bf16.mxu0 %v13671_v14  ;;  %v25011_v63 = vand.u32 4294901760, %v25010_v5  ;;  %v25015_v14 = vld [vmem:[#allocation123_spill] sm:$0xff]  ;;  %v19169_v17 = vld [vmem:[%s16326_s5 + $0x4a8] sm:$0xff] }
 0x36b   : > { %v25016_v3 = vand.u32 4294901760, %v25015_v14  ;;  %v2610_v26 = vand.u32 4294901760, %v2609_v40  ;;  %v25031_v40 = vld [vmem:[#allocation149_spill] sm:$0xff]  ;;  %25156 = vst [vmem:[#allocation218_spill] sm:$0xff] %v19169_v17 }
 0x36c   : > { %2438 = vmatmul.mubr.f32.gmra.mrb[14].mxu0 %v25004_v20  ;;  %v2615_v29 = vsub.f32 %v25010_v5, %v25011_v63  ;;  %v25032_v5 = vand.u32 4294901760, %v25031_v40 }
 0x36d   : > { %13674 = vmatpush1.bf16.msra.mxu0 %v13673_v39  ;;  %2829 = vmatprep.mubr.f32.mxu0 %v17618_v11  ;;  %v18648_v19 = vpop.f32.mrb[0].mxu1  ;;  %v2621_v51 = vsub.f32 %v25015_v14, %v25016_v3  ;;  %v2639_v39 = vsub.f32 %v25021_v27, %v25022_v45  ;;  %v13685_v13 = vpack.c.bf16 %v2610_v26, %v2598_v4  ;;  %v25041_v4 = vand.u32 4294901760, %v25040_v57 }
 0x36e   : > { %25007 = vst [vmem:[#allocation120_spill] sm:$0xff] %v18648_v19  ;;  %v18659_v0 = vpop.f32.mrb[1].mxu1  ;;  %13676 = vmatprep.subr.bf16.mxu0 %v13675_v8  ;;  %v2616_v49 = vand.u32 4294901760, %v2615_v29  ;;  %v25023_v8 = vld [vmem:[#allocation136_spill] sm:$0xff]  ;;  %v2663_v63 = vsub.f32 %v25031_v40, %v25032_v5  ;;  %v25033_v29 = vld [vmem:[#allocation150_spill] sm:$0xff] }
 0x36f   : > { %25014 = vst [vmem:[#allocation157_spill] sm:$0xff] %v18659_v0  ;;  %v25024_v22 = vand.u32 4294901760, %v25023_v8  ;;  %v2622_v62 = vand.u32 4294901760, %v2621_v51  ;;  %v2640_v30 = vand.u32 4294901760, %v2639_v39  ;;  %v25034_v38 = vand.u32 4294901760, %v25033_v29  ;;  %v25038_v51 = vld [vmem:[#allocation152_spill] sm:$0xff] }
 0x370   : > { %v13687_v36 = vpack.c.bf16 %v2628_v31, %v2616_v49  ;;  %v25039_v16 = vand.u32 4294901760, %v25038_v51  ;;  %v2687_v26 = vsub.f32 %v25040_v57, %v25041_v4  ;;  %v25042_v49 = vld [vmem:[#allocation162_spill] sm:$0xff]  ;;  %v2664_v39 = vand.u32 4294901760, %v2663_v63  ;;  %v25057_v4 = vld [vmem:[#allocation181_spill] sm:$0xff] }
 0x371   : > { %13678 = vmatpush1.bf16.msra.mxu0 %v13677_v41  ;;  %v18667_v25 = vpop.f32.mrb[2].mxu1  ;;  %v2651_v15 = vsub.f32 %v25023_v8, %v25024_v22  ;;  %v25028_v41 = vand.u32 4294901760, %v25027_v54  ;;  %v2675_v24 = vsub.f32 %v25033_v29, %v25034_v38  ;;  %v13689_v50 = vpack.c.bf16 %v2634_v61, %v2622_v62  ;;  %v25051_v5 = vld [vmem:[#allocation174_spill] sm:$0xff] }
 0x372   : > { %25019 = vst [vmem:[#allocation159_spill] sm:$0xff] %v18667_v25  ;;  %v18669_v46 = vpop.f32.mrb[3].mxu1  ;;  %13680 = vmatprep.subr.bf16.mxu0 %v13679_v56  ;;  %v2646_v56 = vand.u32 4294901760, %v2645_v9  ;;  %v2681_v52 = vsub.f32 %v25038_v51, %v25039_v16  ;;  %v25043_v31 = vand.u32 4294901760, %v25042_v49  ;;  %v2705_v9 = vsub.f32 %v25047_v58, %v25048_v43  ;;  %v25063_v58 = vld [vmem:[#allocation184_spill] sm:$0xff] }
 0x373   : > { %25020 = vst [vmem:[#allocation160_spill] sm:$0xff] %v18669_v46  ;;  %v2657_v12 = vsub.f32 %v25027_v54, %v25028_v41  ;;  %v2652_v53 = vand.u32 4294901760, %v2651_v15  ;;  %v2676_v8 = vand.u32 4294901760, %v2675_v24  ;;  %v25045_v15 = vld [vmem:[#allocation163_spill] sm:$0xff]  ;;  %v25052_v63 = vand.u32 4294901760, %v25051_v5 }
 0x374   : > { %v25046_v62 = vand.u32 4294901760, %v25045_v15  ;;  %v2682_v41 = vand.u32 4294901760, %v2681_v52  ;;  %v2706_v24 = vand.u32 4294901760, %v2705_v9  ;;  %v25064_v43 = vand.u32 4294901760, %v25063_v58 }
 0x375   : > { %13682 = vmatpush1.bf16.msra.mxu0 %v13681_v28  ;;  %v18683_v48 = vpop.f32.mrb[4].mxu1  ;;  %v2658_v2 = vand.u32 4294901760, %v2657_v12  ;;  %v25036_v28 = vld [vmem:[#allocation151_spill] sm:$0xff]  ;;  %v13691_v45 = vpack.c.bf16 %v2652_v53, %v2640_v30  ;;  %v2688_v12 = vand.u32 4294901760, %v2687_v26  ;;  %v13695_v40 = vpack.c.bf16 %v2676_v8, %v2664_v39 }
 0x376   : > { %25029 = vst [vmem:[#allocation168_spill] sm:$0xff] %v18683_v48  ;;  %v18685_v32 = vpop.f32.mrb[5].mxu1  ;;  %13684 = vmatprep.subr.bf16.mxu0 %v13683_v1  ;;  %v25037_v14 = vand.u32 4294901760, %v25036_v28  ;;  %v2699_v1 = vsub.f32 %v25042_v49, %v25043_v31  ;;  %v2693_v61 = vsub.f32 %v25045_v15, %v25046_v62  ;;  %v2723_v29 = vsub.f32 %v25051_v5, %v25052_v63  ;;  %v25059_v31 = vld [vmem:[#allocation182_spill] sm:$0xff]  ;;  %v25061_v62 = vld [vmem:[#allocation183_spill] sm:$0xff] }
 0x377   : > { %25030 = vst [vmem:[#allocation169_spill] sm:$0xff] %v18685_v32  ;;  %v13693_v22 = vpack.c.bf16 %v2658_v2, %v2646_v56  ;;  %v25053_v56 = vld [vmem:[#allocation175_spill] sm:$0xff]  ;;  %v25058_v26 = vand.u32 4294901760, %v25057_v4  ;;  %v2753_v9 = vsub.f32 %v25063_v58, %v25064_v43 }
 0x378   : > { %v2669_v3 = vsub.f32 %v25036_v28, %v25037_v14  ;;  %v2694_v38 = vand.u32 4294901760, %v2693_v61  ;;  %v25054_v2 = vand.u32 4294901760, %v25053_v56  ;;  %v25055_v28 = vld [vmem:[#allocation176_spill] sm:$0xff]  ;;  %v2724_v57 = vand.u32 4294901760, %v2723_v29  ;;  %v25069_v29 = vld [vmem:[#allocation191_spill] sm:$0xff] }
 0x379   : > { %13686 = vmatpush1.bf16.msra.mxu0 %v13685_v13  ;;  %v18693_v55 = vpop.f32.mrb[6].mxu1  ;;  %v2700_v13 = vand.u32 4294901760, %v2699_v1  ;;  %v25056_v14 = vand.u32 4294901760, %v25055_v28  ;;  %v2735_v49 = vsub.f32 %v25057_v4, %v25058_v26  ;;  %v25060_v1 = vand.u32 4294901760, %v25059_v31  ;;  %v25075_v26 = vld [vmem:[#allocation202_spill] sm:$0xff]  ;;  %v18972_v48 = vld [vmem:[%s16326_s5 + $0x2f8] sm:$0xff] }
 0x37a   : > { %25035 = vst [vmem:[#allocation171_spill] sm:$0xff] %v18693_v55  ;;  %v18707_v27 = vpop.f32.mrb[7].mxu1  ;;  %13688 = vmatprep.subr.bf16.mxu0 %v13687_v36  ;;  %v2670_v54 = vand.u32 4294901760, %v2669_v3  ;;  %v25049_v36 = vld [vmem:[#allocation173_spill] sm:$0xff]  ;;  %v13701_v39 = vpack.c.bf16 %v2706_v24, %v2694_v38  ;;  %v25062_v61 = vand.u32 4294901760, %v25061_v62  ;;  %v25070_v38 = vand.u32 4294901760, %v25069_v29 }
 0x37b   : > { %25044 = vst [vmem:[#allocation172_spill] sm:$0xff] %v18707_v27  ;;  %v25050_v30 = vand.u32 4294901760, %v25049_v36  ;;  %v2729_v3 = vsub.f32 %v25055_v28, %v25056_v14  ;;  %v13699_v16 = vpack.c.bf16 %v2700_v13, %v2688_v12  ;;  %v25067_v13 = vld [vmem:[#allocation190_spill] sm:$0xff]  ;;  %v2754_v14 = vand.u32 4294901760, %v2753_v9 }
 0x37c   : > { %v13697_v51 = vpack.c.bf16 %v2682_v41, %v2670_v54  ;;  %v25065_v54 = vld [vmem:[#allocation189_spill] sm:$0xff]  ;;  %v2765_v24 = vsub.f32 %v25069_v29, %v25070_v38  ;;  %v25085_v29 = vld [vmem:[#allocation215_spill] sm:$0xff] }
 0x37d   : > { %13690 = vmatpush1.bf16.msra.mxu0 %v13689_v50  ;;  %v2711_v53 = vsub.f32 %v25049_v36, %v25050_v30  ;;  %v2717_v50 = vsub.f32 %v25053_v56, %v25054_v2  ;;  %v2730_v15 = vand.u32 4294901760, %v2729_v3  ;;  %v25066_v41 = vand.u32 4294901760, %v25065_v54  ;;  %v25071_v56 = vld [vmem:[#allocation192_spill] sm:$0xff] }
 0x37e   : > { %13692 = vmatprep.subr.bf16.mxu0 %v13691_v45  ;;  %v2747_v45 = vsub.f32 %v25059_v31, %v25060_v1  ;;  %v25072_v2 = vand.u32 4294901760, %v25071_v56  ;;  %v2766_v1 = vand.u32 4294901760, %v2765_v24  ;;  %v25086_v38 = vand.u32 4294901760, %v25085_v29 }
 0x37f   : > { %v2712_v52 = vand.u32 4294901760, %v2711_v53  ;;  %v2718_v8 = vand.u32 4294901760, %v2717_v50  ;;  %v2759_v12 = vsub.f32 %v25065_v54, %v25066_v41  ;;  %v2736_v53 = vand.u32 4294901760, %v2735_v49  ;;  %v25081_v41 = vld [vmem:[#allocation213_spill] sm:$0xff] }
 0x380   : > { %v2748_v5 = vand.u32 4294901760, %v2747_v45  ;;  %v2777_v50 = vsub.f32 %v25071_v56, %v25072_v2  ;;  %v25076_v49 = vand.u32 4294901760, %v25075_v26  ;;  %v2813_v24 = vsub.f32 %v25085_v29, %v25086_v38  ;;  %v25087_v56 = vld [vmem:[#allocation216_spill] sm:$0xff]  ;;  %v18838_v29 = vld [vmem:[%s16326_s5 + $0x110] sm:$0xff]  ;;  %v18841_v38 = vld [vmem:[%s16326_s5 + $0x148] sm:$0xff] }
 0x381   : > { %13694 = vmatpush1.bf16.msra.mxu0 %v13693_v22  ;;  %v2741_v22 = vsub.f32 %v25061_v62, %v25062_v61  ;;  %v13703_v30 = vpack.c.bf16 %v2724_v57, %v2712_v52  ;;  %v13705_v63 = vpack.c.bf16 %v2730_v15, %v2718_v8  ;;  %v2760_v3 = vand.u32 4294901760, %v2759_v12 }
 0x382   : > { %13696 = vmatprep.subr.bf16.mxu0 %v13695_v40  ;;  %v25068_v40 = vand.u32 4294901760, %v25067_v13  ;;  %v13707_v4 = vpack.c.bf16 %v2748_v5, %v2736_v53  ;;  %v2795_v31 = vsub.f32 %v25075_v26, %v25076_v49  ;;  %v2778_v45 = vand.u32 4294901760, %v2777_v50 }
 0x383   : > { %v2742_v28 = vand.u32 4294901760, %v2741_v22  ;;  %v25079_v22 = vld [vmem:[#allocation204_spill] sm:$0xff]  ;;  %v25082_v12 = vand.u32 4294901760, %v25081_v41  ;;  %v25088_v2 = vand.u32 4294901760, %v25087_v56 }
 0x384   : > { %v2771_v36 = vsub.f32 %v25067_v13, %v25068_v40  ;;  %v25080_v58 = vand.u32 4294901760, %v25079_v22  ;;  %v2796_v54 = vand.u32 4294901760, %v2795_v31  ;;  %v25083_v40 = vld [vmem:[#allocation214_spill] sm:$0xff]  ;;  %v13713_v53 = vpack.c.bf16 %v2778_v45, %v2766_v1  ;;  %v18784_v1 = vld [vmem:[%s16326_s5 + $0x20] sm:$0xff] }
 0x385   : > { %13698 = vmatpush1.bf16.msra.mxu0 %v13697_v51  ;;  %v13709_v8 = vpack.c.bf16 %v2754_v14, %v2742_v28  ;;  %v2807_v13 = vsub.f32 %v25081_v41, %v25082_v12  ;;  %v2825_v50 = vsub.f32 %v25087_v56, %v25088_v2  ;;  %v18787_v45 = vld [vmem:[%s16326_s5 + $0x50] sm:$0xff]  ;;  %v18812_v41 = vld [vmem:[%s16326_s5 + $0xe8] sm:$0xff]  ;;  %v18815_v12 = vld [vmem:[%s16326_s5 + $0x118] sm:$0xff] }
 0x386   : > { %13700 = vmatprep.subr.bf16.mxu0 %v13699_v16  ;;  %v2772_v51 = vand.u32 4294901760, %v2771_v36  ;;  %v25073_v16 = vld [vmem:[#allocation201_spill] sm:$0xff]  ;;  %v2801_v43 = vsub.f32 %v25079_v22, %v25080_v58  ;;  %v25084_v36 = vand.u32 4294901760, %v25083_v40 }
 0x387   : > { %v25074_v52 = vand.u32 4294901760, %v25073_v16  ;;  %v2808_v14 = vand.u32 4294901760, %v2807_v13 }
 0x388   : > { %v13711_v15 = vpack.c.bf16 %v2772_v51, %v2760_v3  ;;  %v18776_v51 = vld [vmem:[%s16326_s5 + $0x28] sm:$0xff] }
 0x389   : > { %13702 = vmatpush1.bf16.msra.mxu0 %v13701_v39  ;;  %v2783_v57 = vsub.f32 %v25073_v16, %v25074_v52  ;;  %v25077_v39 = vld [vmem:[#allocation203_spill] sm:$0xff]  ;;  %v2814_v52 = vand.u32 4294901760, %v2813_v24  ;;  %v23485_v49 = vand.u32 4294901760, %v18776_v51 }
 0x38a   : > { %13704 = vmatprep.subr.bf16.mxu0 %v13703_v30  ;;  %v25078_v62 = vand.u32 4294901760, %v25077_v39  ;;  %v2819_v30 = vsub.f32 %v25083_v40, %v25084_v36  ;;  %v18844_v24 = vld [vmem:[%s16326_s5 + $0x178] sm:$0xff] }
 0x38b   : > { %v2784_v9 = vand.u32 4294901760, %v2783_v57  ;;  %v2826_v57 = vand.u32 4294901760, %v2825_v50  ;;  %v23477_v50 = vand.u32 4294901760, %v18838_v29 }
 0x38c   : > { %v2789_v61 = vsub.f32 %v25077_v39, %v25078_v62  ;;  %v2820_v3 = vand.u32 4294901760, %v2819_v30  ;;  %v23483_v62 = vand.u32 4294901760, %v18784_v1 }
 0x38d   : > { %13706 = vmatpush1.bf16.msra.mxu0 %v13705_v63  ;;  %v2802_v63 = vand.u32 4294901760, %v2801_v43  ;;  %v13715_v28 = vpack.c.bf16 %v2796_v54, %v2784_v9  ;;  %v13721_v39 = vpack.c.bf16 %v2826_v57, %v2814_v52  ;;  %v18806_v9 = vld [vmem:[%s16326_s5 + $0x80] sm:$0xff]  ;;  %v18809_v54 = vld [vmem:[%s16326_s5 + $0xb0] sm:$0xff]  ;;  %v18873_v57 = vld [vmem:[%s16326_s5 + $0x1a8] sm:$0xff] }
 0x38e   : > { %13708 = vmatprep.subr.bf16.mxu0 %v13707_v4  ;;  %v2790_v5 = vand.u32 4294901760, %v2789_v61  ;;  %v18779_v4 = vld [vmem:[%s16326_s5 + $0x58] sm:$0xff]  ;;  %v13719_v26 = vpack.c.bf16 %v2820_v3, %v2808_v14  ;;  %v23480_v61 = vand.u32 4294901760, %v18787_v45  ;;  %v23475_v40 = vand.u32 4294901760, %v18806_v9  ;;  %v18870_v52 = vld [vmem:[%s16326_s5 + $0x170] sm:$0xff] }
 0x38f   : > { %v23484_v31 = vand.u32 4294901760, %v18779_v4  ;;  %v23474_v36 = vand.u32 4294901760, %v18809_v54  ;;  %v23482_v14 = vand.u32 4294901760, %v18841_v38  ;;  %v23481_v3 = vand.u32 4294901760, %v18844_v24 }
 0x390   : > { %v13717_v16 = vpack.c.bf16 %v2802_v63, %v2790_v5  ;;  %v18821_v13 = vpack.c.bf16 %v23480_v61, %v23483_v62  ;;  %v23472_v5 = vand.u32 4294901760, %v18815_v12  ;;  %v18835_v63 = vld [vmem:[%s16326_s5 + $0xe0] sm:$0xff]  ;;  %v18908_v61 = vld [vmem:[%s16326_s5 + $0x238] sm:$0xff]  ;;  %v18937_v62 = vld [vmem:[%s16326_s5 + $0x268] sm:$0xff]  ;;  %v25148_v20 = vand.u32 4294901760, %v18806_v9 }
 0x391   : > { %13710 = vmatpush1.bf16.msra.mxu0 %v13709_v8  ;;  %v18790_v8 = vld [vmem:[%s16326_s5 + $0x88] sm:$0xff]  ;;  %v18801_v22 = vpack.c.bf16 %v23484_v31, %v23485_v49  ;;  %v18853_v56 = vpack.c.bf16 %v23474_v36, %v23475_v40  ;;  %v23478_v2 = vand.u32 4294901760, %v18835_v63  ;;  %v18894_v36 = vpack.c.bf16 %v23481_v3, %v23482_v14  ;;  %v18940_v14 = vld [vmem:[%s16326_s5 + $0x298] sm:$0xff]  ;;  %v18966_v49 = vld [vmem:[%s16326_s5 + $0x290] sm:$0xff] }
 0x392   : > { %13712 = vmatprep.subr.bf16.mxu0 %v13711_v15  ;;  %v18793_v15 = vld [vmem:[%s16326_s5 + $0xb8] sm:$0xff]  ;;  %v23479_v58 = vand.u32 4294901760, %v18790_v8  ;;  %25090 = vst [vmem:[#allocation179_spill] sm:$0xff] %v18821_v13  ;;  %v23489_v40 = vand.u32 4294901760, %v18873_v57  ;;  %v25102_v55 = vand.u32 4294901760, %v18908_v61  ;;  %v25107_v25 = vand.u32 4294901760, %v18937_v62 }
 0x393   : > { %25089 = vst [vmem:[#allocation178_spill] sm:$0xff] %v18801_v22  ;;  %v23476_v43 = vand.u32 4294901760, %v18793_v15  ;;  %25092 = vst [vmem:[#allocation226_spill] sm:$0xff] %v18853_v56  ;;  %v25108_v0 = vand.u32 4294901760, %v18940_v14  ;;  %v25137_v11 = vand.u32 4294901760, %v18790_v8  ;;  %v25172_v47 = vand.u32 4294901760, %v18873_v57 }
 0x394   : > { %25095 = vst [vmem:[#allocation133_spill] sm:$0xff] %v18894_v36  ;;  %v25186_v34 = vand.u32 4294901760, %v18937_v62 }
 0x395   : > { %13714 = vmatpush1.bf16.msra.mxu0 %v13713_v53  ;;  %v18830_v30 = vpack.c.bf16 %v23476_v43, %v23479_v58  ;;  %v23473_v53 = vand.u32 4294901760, %v18812_v41  ;;  %v18905_v58 = vld [vmem:[%s16326_s5 + $0x208] sm:$0xff]  ;;  %v18988_v19 = vpack.c.bf16 %v25108_v0, %v25107_v25  ;;  %v25111_v25 = vand.u32 4294901760, %v18966_v49 }
 0x396   : > { %13716 = vmatprep.subr.bf16.mxu0 %v13715_v28  ;;  %v25101_v27 = vand.u32 4294901760, %v18905_v58 }
 0x397   : > { %25091 = vst [vmem:[#allocation224_spill] sm:$0xff] %v18830_v30  ;;  %v18862_v28 = vpack.c.bf16 %v23472_v5, %v23473_v53  ;;  %v23486_v53 = vand.u32 4294901760, %v18870_v52  ;;  %25109 = vst [vmem:[#allocation153_spill] sm:$0xff] %v18988_v19 }
 0x398   : > { %v18958_v32 = vpack.c.bf16 %v25102_v55, %v25101_v27 }
 0x399   : > { %13718 = vmatpush1.bf16.msra.mxu0 %v13717_v16  ;;  %25093 = vst [vmem:[#allocation125_spill] sm:$0xff] %v18862_v28  ;;  %v18867_v16 = vld [vmem:[%s16326_s5 + $0x140] sm:$0xff] }
 0x39a   : > { %13720 = vmatprep.subr.bf16.mxu0 %v13719_v26  ;;  %v18876_v26 = vld [vmem:[%s16326_s5 + $0x1d8] sm:$0xff]  ;;  %v23487_v5 = vand.u32 4294901760, %v18867_v16  ;;  %25103 = vst [vmem:[#allocation147_spill] sm:$0xff] %v18958_v32  ;;  %v25163_v10 = vand.u32 4294901760, %v18867_v16 }
 0x39b   : > { %v23488_v43 = vand.u32 4294901760, %v18876_v26 }
 0x39c   : > { %v18917_v3 = vpack.c.bf16 %v23486_v53, %v23487_v5  ;;  %v18931_v53 = vld [vmem:[%s16326_s5 + $0x200] sm:$0xff]  ;;  %v18934_v5 = vld [vmem:[%s16326_s5 + $0x230] sm:$0xff] }
 0x39d   : > { %13722 = vmatpush1.bf16.msra.mxu0 %v13721_v39  ;;  %v18885_v39 = vpack.c.bf16 %v23477_v50, %v23478_v2  ;;  %v18899_v50 = vld [vmem:[%s16326_s5 + $0x1a0] sm:$0xff]  ;;  %v18902_v2 = vld [vmem:[%s16326_s5 + $0x1d0] sm:$0xff]  ;;  %v18926_v31 = vpack.c.bf16 %v23488_v43, %v23489_v40  ;;  %v25104_v55 = vand.u32 4294901760, %v18931_v53  ;;  %v25105_v27 = vand.u32 4294901760, %v18934_v5 }
 0x39e   : > { %13980 = vmatprep.subr.bf16.mxu0 %v18801_v22  ;;  %25096 = vst [vmem:[#allocation134_spill] sm:$0xff] %v18917_v3  ;;  %v25098_v43 = vand.u32 4294901760, %v18899_v50  ;;  %v25099_v40 = vand.u32 4294901760, %v18902_v2 }
 0x39f   : > { %25094 = vst [vmem:[#allocation126_spill] sm:$0xff] %v18885_v39  ;;  %25097 = vst [vmem:[#allocation139_spill] sm:$0xff] %v18926_v31  ;;  %v18979_v46 = vpack.c.bf16 %v25105_v27, %v25104_v55  ;;  %v18993_v27 = vld [vmem:[%s16326_s5 + $0x2c0] sm:$0xff]  ;;  %v19029_v55 = vld [vmem:[%s16326_s5 + $0x388] sm:$0xff] }
 0x3a0   : > { %2831 = vmatmul.mubr.f32.vlgmr.msra.gmra.mrb[8].mxu0 %v24591_v35  ;;  %v18949_v18 = vpack.c.bf16 %v25099_v40, %v25098_v43  ;;  %v18963_v40 = vld [vmem:[%s16326_s5 + $0x260] sm:$0xff]  ;;  %v18999_v43 = vld [vmem:[%s16326_s5 + $0x328] sm:$0xff] }
 0x3a1   : > { %2837 = vmatprep.mubr.f32.mxu0 %v24596_v6  ;;  %13982 = vmatpush1.bf16.msra.mxu0 %v18821_v13  ;;  %25106 = vst [vmem:[#allocation148_spill] sm:$0xff] %v18979_v46  ;;  %v25110_v0 = vand.u32 4294901760, %v18963_v40  ;;  %v25136_v6 = vand.u32 4294901760, %v18787_v45 }
 0x3a2   : > { %13984 = vmatprep.subr.bf16.mxu0 %v18830_v30  ;;  %25100 = vst [vmem:[#allocation140_spill] sm:$0xff] %v18949_v18 }
 0x3a3   : > { %v19112_v35 = vsub.f32 %v18787_v45, %v25136_v6  ;;  %v25142_v45 = vand.u32 4294901760, %v18793_v15  ;;  %v19146_v6 = vld [vmem:[%s16326_s5 + $0x470] sm:$0xff] }
 0x3a4   : > { %2839 = vmatmul.mubr.f32.gmra.mrb[10].mxu0 %v24606_v42  ;;  %v19083_v42 = vld [vmem:[%s16326_s5 + $0x3e0] sm:$0xff]  ;;  %25147 = vst [vmem:[#allocation142_spill] sm:$0xff] %v19146_v6 }
 0x3a5   : > { %2845 = vmatprep.mubr.f32.mxu0 %v24611_v7  ;;  %13986 = vmatpush1.bf16.msra.mxu0 %v18853_v56  ;;  %v25119_v56 = vand.u32 4294901760, %v18999_v43  ;;  %v25134_v7 = vand.u32 4294901760, %v18784_v1 }
 0x3a6   : > { %13988 = vmatprep.subr.bf16.mxu0 %v18862_v28 }
 0x3a8   : > { %2847 = vmatmul.mubr.f32.gmra.mrb[12].mxu0 %v24883_v37 }
 0x3a9   : > { %2853 = vmatprep.mubr.f32.mxu0 %v24884_v33  ;;  %13990 = vmatpush1.bf16.msra.mxu0 %v18885_v39 }
 0x3aa   : > { %13992 = vmatprep.subr.bf16.mxu0 %v18894_v36  ;;  %v25114_v36 = vand.u32 4294901760, %v18972_v48 }
 0x3ac   : > { %2855 = vmatmul.mubr.f32.gmra.mrb[14].mxu0 %v24887_v59  ;;  %v25125_v59 = vand.u32 4294901760, %v19029_v55 }
 0x3ad   : > { %13994 = vmatpush1.bf16.msra.mxu0 %v18917_v3  ;;  %3854 = vmatprep.mubr.f32.mxu0 %v24921_v23  ;;  %v18996_v23 = vld [vmem:[%s16326_s5 + $0x2f0] sm:$0xff]  ;;  %v25113_v3 = vand.u32 4294901760, %v18969_v44 }
 0x3ae   : > { %13996 = vmatprep.subr.bf16.mxu0 %v18926_v31  ;;  %v19009_v31 = vpack.c.bf16 %v25111_v25, %v25110_v0  ;;  %v19023_v25 = vld [vmem:[%s16326_s5 + $0x320] sm:$0xff]  ;;  %v19059_v0 = vld [vmem:[%s16326_s5 + $0x3e8] sm:$0xff] }
 0x3af   : > { %v19018_v39 = vpack.c.bf16 %v25114_v36, %v25113_v3  ;;  %v25116_v36 = vand.u32 4294901760, %v18993_v27  ;;  %v25117_v3 = vand.u32 4294901760, %v18996_v23 }
 0x3b0   : > { %25112 = vst [vmem:[#allocation154_spill] sm:$0xff] %v19009_v31 }
 0x3b1   : > { %13998 = vmatpush1.bf16.msra.mxu0 %v18949_v18  ;;  %25115 = vst [vmem:[#allocation165_spill] sm:$0xff] %v19018_v39  ;;  %v19026_v18 = vld [vmem:[%s16326_s5 + $0x350] sm:$0xff]  ;;  %v19039_v28 = vpack.c.bf16 %v25117_v3, %v25116_v36  ;;  %v19053_v3 = vld [vmem:[%s16326_s5 + $0x380] sm:$0xff]  ;;  %v19092_v36 = vld [vmem:[%s16326_s5 + $0x478] sm:$0xff] }
 0x3b2   : > { %14000 = vmatprep.subr.bf16.mxu0 %v18958_v32  ;;  %v19002_v32 = vld [vmem:[%s16326_s5 + $0x358] sm:$0xff]  ;;  %25129 = vst [vmem:[#allocation199_spill] sm:$0xff] %v19092_v36 }
 0x3b3   : > { %25118 = vst [vmem:[#allocation166_spill] sm:$0xff] %v19039_v28  ;;  %v25120_v30 = vand.u32 4294901760, %v19002_v32 }
 0x3b5   : > { %14002 = vmatpush1.bf16.msra.mxu0 %v18979_v46  ;;  %v19048_v13 = vpack.c.bf16 %v25120_v30, %v25119_v56  ;;  %v19056_v46 = vld [vmem:[%s16326_s5 + $0x3b0] sm:$0xff]  ;;  %v25122_v30 = vand.u32 4294901760, %v19023_v25  ;;  %v25123_v56 = vand.u32 4294901760, %v19026_v18 }
 0x3b6   : > { %14004 = vmatprep.subr.bf16.mxu0 %v18988_v19  ;;  %v19032_v19 = vld [vmem:[%s16326_s5 + $0x3b8] sm:$0xff] }
 0x3b7   : > { %25121 = vst [vmem:[#allocation237_spill] sm:$0xff] %v19048_v13  ;;  %v19069_v22 = vpack.c.bf16 %v25123_v56, %v25122_v30  ;;  %v25126_v33 = vand.u32 4294901760, %v19032_v19  ;;  %v19086_v30 = vld [vmem:[%s16326_s5 + $0x410] sm:$0xff]  ;;  %v19089_v56 = vld [vmem:[%s16326_s5 + $0x448] sm:$0xff] }
 0x3b8   : > { %25128 = vst [vmem:[#allocation194_spill] sm:$0xff] %v19089_v56 }
 0x3b9   : > { %14006 = vmatpush1.bf16.msra.mxu0 %v19009_v31  ;;  %25124 = vst [vmem:[#allocation198_spill] sm:$0xff] %v19069_v22  ;;  %v19078_v37 = vpack.c.bf16 %v25126_v33, %v25125_v59  ;;  %v25130_v31 = vand.u32 4294901760, %v18776_v51  ;;  %v25132_v33 = vand.u32 4294901760, %v18779_v4 }
 0x3ba   : > { %14008 = vmatprep.subr.bf16.mxu0 %v19018_v39  ;;  %v19062_v39 = vld [vmem:[%s16326_s5 + $0x418] sm:$0xff] }
 0x3bb   : > { %25127 = vst [vmem:[#allocation187_spill] sm:$0xff] %v19078_v37  ;;  %v19102_v59 = vsub.f32 %v18779_v4, %v25132_v33  ;;  %v25139_v4 = vand.u32 4294901760, %v19053_v3  ;;  %v19131_v33 = vsub.f32 %v18793_v15, %v25142_v45  ;;  %v19151_v15 = vsub.f32 %v18806_v9, %v25148_v20  ;;  %v19172_v20 = vld [vmem:[%s16326_s5 + $0x4d8] sm:$0xff] }
 0x3bc   : > { %v25150_v45 = vand.u32 4294901760, %v18809_v54  ;;  %25157 = vst [vmem:[#allocation222_spill] sm:$0xff] %v19172_v20  ;;  %v25158_v9 = vand.u32 4294901760, %v18835_v63 }
 0x3bd   : > { %14010 = vmatpush1.bf16.msra.mxu0 %v19039_v28  ;;  %25133 = vst [vmem:[#allocation206_spill] sm:$0xff] %v19102_v59  ;;  %v19107_v28 = vsub.f32 %v18784_v1, %v25134_v7  ;;  %25143 = vst [vmem:[#allocation31_spill] sm:$0xff] %v19131_v33  ;;  %v19143_v1 = vld [vmem:[%s16326_s5 + $0x440] sm:$0xff] }
 0x3be   : > { %14012 = vmatprep.subr.bf16.mxu0 %v19048_v13  ;;  %v19097_v13 = vsub.f32 %v18776_v51, %v25130_v31  ;;  %v19117_v51 = vsub.f32 %v18790_v8, %v25137_v11  ;;  %v25140_v31 = vand.u32 4294901760, %v19056_v46  ;;  %v25144_v11 = vand.u32 4294901760, %v19059_v0  ;;  %25149 = vst [vmem:[#allocation209_spill] sm:$0xff] %v19151_v15 }
 0x3bf   : > { %25135 = vst [vmem:[#allocation219_spill] sm:$0xff] %v19107_v28  ;;  %v25145_v8 = vand.u32 4294901760, %v19062_v39 }
 0x3c0   : > { %25131 = vst [vmem:[#allocation205_spill] sm:$0xff] %v19097_v13  ;;  %25138 = vst [vmem:[#allocation239_spill] sm:$0xff] %v19117_v51  ;;  %v19124_v7 = vpack.c.bf16 %v25140_v31, %v25139_v4  ;;  %v25154_v31 = vand.u32 4294901760, %v18815_v12 }
 0x3c1   : > { %14014 = vmatpush1.bf16.msra.mxu0 %v19069_v22  ;;  %v19138_v22 = vpack.c.bf16 %v25145_v8, %v25144_v11  ;;  %v25152_v11 = vand.u32 4294901760, %v18812_v41 }
 0x3c2   : > { %25141 = vst [vmem:[#allocation240_spill] sm:$0xff] %v19124_v7  ;;  %14016 = vmatprep.subr.bf16.mxu0 %v19078_v37  ;;  %v19156_v37 = vsub.f32 %v18809_v54, %v25150_v45  ;;  %v19166_v4 = vsub.f32 %v18815_v12, %v25154_v31  ;;  %v19177_v54 = vsub.f32 %v18835_v63, %v25158_v9  ;;  %v25160_v45 = vand.u32 4294901760, %v18838_v29 }
 0x3c3   : > { %25146 = vst [vmem:[#allocation114_spill] sm:$0xff] %v19138_v22  ;;  %v19161_v8 = vsub.f32 %v18812_v41, %v25152_v11  ;;  %v25161_v11 = vand.u32 4294901760, %v18841_v38  ;;  %v25162_v31 = vand.u32 4294901760, %v18844_v24  ;;  %v19197_v63 = vsub.f32 %v18867_v16, %v25163_v10 }
 0x3c4   : > { %25151 = vst [vmem:[#allocation208_spill] sm:$0xff] %v19156_v37  ;;  %25155 = vst [vmem:[#allocation211_spill] sm:$0xff] %v19166_v4  ;;  %v19182_v41 = vsub.f32 %v18838_v29, %v25160_v45  ;;  %v25164_v29 = vand.u32 4294901760, %v19083_v42  ;;  %v25165_v9 = vand.u32 4294901760, %v19086_v30  ;;  %v25168_v10 = vand.u32 4294901760, %v19089_v56  ;;  %v19223_v45 = vld [vmem:[%s16326_s5 + $0x4a0] sm:$0xff] }
 0x3c5   : > { %25153 = vst [vmem:[#allocation212_spill] sm:$0xff] %v19161_v8  ;;  %25159 = vst [vmem:[#allocation221_spill] sm:$0xff] %v19177_v54  ;;  %v19187_v12 = vsub.f32 %v18841_v38, %v25161_v11  ;;  %v19192_v21 = vsub.f32 %v18844_v24, %v25162_v31  ;;  %14018 = vmatpush1.bf16.msra.mxu0 %v19124_v7  ;;  %v25167_v11 = vand.u32 4294901760, %v18870_v52  ;;  %v25169_v16 = vand.u32 4294901760, %v19092_v36  ;;  %v19226_v24 = vld [vmem:[%s16326_s5 + $0x4d0] sm:$0xff]  ;;  %v19249_v36 = vld [vmem:[%s16326_s5 + $0x508] sm:$0xff] }
 0x3c6   : > { %v19204_v38 = vpack.c.bf16 %v25165_v9, %v25164_v29  ;;  %14020 = vmatprep.subr.bf16.mxu0 %v19138_v22  ;;  %25171 = vst [vmem:[#allocation44_spill] sm:$0xff] %v19226_v24  ;;  %v25176_v29 = vand.u32 4294901760, %v18902_v2  ;;  %25177 = vst [vmem:[#allocation45_spill] sm:$0xff] %v19249_v36 }
 0x3c7   : > { %v19211_v31 = vsub.f32 %v18870_v52, %v25167_v11  ;;  %v19218_v7 = vpack.c.bf16 %v25169_v16, %v25168_v10  ;;  %v19231_v52 = vsub.f32 %v18873_v57, %v25172_v47  ;;  %v25173_v11 = vand.u32 4294901760, %v18876_v26  ;;  %v19252_v47 = vld [vmem:[%s16326_s5 + $0x538] sm:$0xff] }
 0x3c8   : > { %25166 = vst [vmem:[#allocation229_spill] sm:$0xff] %v19204_v38  ;;  %v25175_v16 = vand.u32 4294901760, %v18899_v50  ;;  %v19246_v22 = vsub.f32 %v18902_v2, %v25176_v29  ;;  %25178 = vst [vmem:[#allocation46_spill] sm:$0xff] %v19252_v47  ;;  %v25179_v57 = vand.u32 4294901760, %v18905_v58  ;;  %v25184_v2 = vand.u32 4294901760, %v18934_v5 }
 0x3c9   : > { %25170 = vst [vmem:[#allocation228_spill] sm:$0xff] %v19218_v7  ;;  %v19236_v10 = vsub.f32 %v18876_v26, %v25173_v11  ;;  %v25181_v26 = vand.u32 4294901760, %v18908_v61  ;;  %14022 = vmatpush1.bf16.msra.mxu0 %v19204_v38  ;;  %v19329_v38 = vld [vmem:[%s16326_s5 + $0x568] sm:$0xff] }
 0x3ca   : > { %v19241_v9 = vsub.f32 %v18899_v50, %v25175_v16  ;;  %v19257_v56 = vsub.f32 %v18905_v58, %v25179_v57  ;;  %v25183_v50 = vand.u32 4294901760, %v18931_v53  ;;  %v19272_v29 = vsub.f32 %v18934_v5, %v25184_v2  ;;  %v19292_v2 = vld [vmem:[%s16326_s5 + $0x530] sm:$0xff]  ;;  %14024 = vmatprep.subr.bf16.mxu0 %v19218_v7  ;;  %v19332_v5 = vld [vmem:[%s16326_s5 + $0x598] sm:$0xff] }
 0x3cb   : > { %25174 = vst [vmem:[#allocation41_spill] sm:$0xff] %v19236_v10  ;;  %v19262_v11 = vsub.f32 %v18908_v61, %v25181_v26  ;;  %v19277_v58 = vsub.f32 %v18937_v62, %v25186_v34  ;;  %v25188_v61 = vand.u32 4294901760, %v19143_v1  ;;  %v25189_v57 = vand.u32 4294901760, %v19146_v6  ;;  %25192 = vst [vmem:[#allocation73_spill] sm:$0xff] %v19292_v2 }
 0x3cc   : > { %25180 = vst [vmem:[#allocation48_spill] sm:$0xff] %v19257_v56  ;;  %v19267_v16 = vsub.f32 %v18931_v53, %v25183_v50  ;;  %25185 = vst [vmem:[#allocation59_spill] sm:$0xff] %v19272_v29  ;;  %v19289_v50 = vld [vmem:[%s16326_s5 + $0x500] sm:$0xff]  ;;  %v25193_v34 = vand.u32 4294901760, %v18940_v14  ;;  %v25198_v6 = vand.u32 4294901760, %v18963_v40  ;;  %v25202_v7 = vand.u32 4294901760, %v18969_v44 }
 0x3cd   : > { %25182 = vst [vmem:[#allocation58_spill] sm:$0xff] %v19262_v11  ;;  %25187 = vst [vmem:[#allocation61_spill] sm:$0xff] %v19277_v58  ;;  %v19284_v53 = vpack.c.bf16 %v25189_v57, %v25188_v61  ;;  %v25195_v61 = vand.u32 4294901760, %v19169_v17  ;;  %v25196_v57 = vand.u32 4294901760, %v19172_v20  ;;  %v25210_v17 = vand.u32 4294901760, %v18999_v43 }
 0x3ce   : > { %25191 = vst [vmem:[#allocation72_spill] sm:$0xff] %v19289_v50  ;;  %v19297_v62 = vsub.f32 %v18940_v14, %v25193_v34  ;;  %v19311_v58 = vsub.f32 %v18963_v40, %v25198_v6  ;;  %v25200_v14 = vand.u32 4294901760, %v18966_v49  ;;  %v19321_v20 = vsub.f32 %v18969_v44, %v25202_v7  ;;  %25204 = vst [vmem:[#allocation89_spill] sm:$0xff] %v19332_v5 }
 0x3cf   : > { %25190 = vst [vmem:[#allocation62_spill] sm:$0xff] %v19284_v53  ;;  %v19304_v26 = vpack.c.bf16 %v25196_v57, %v25195_v61  ;;  %v25203_v61 = vand.u32 4294901760, %v18972_v48  ;;  %v25205_v40 = vand.u32 4294901760, %v18993_v27  ;;  %14026 = vmatpush1.bf16.msra.mxu0 %v19284_v53  ;;  %v25220_v7 = vand.u32 4294901760, %v19023_v25 }
 0x3d0   : > { %25194 = vst [vmem:[#allocation75_spill] sm:$0xff] %v19297_v62  ;;  %25199 = vst [vmem:[#allocation86_spill] sm:$0xff] %v19311_v58  ;;  %v19316_v34 = vsub.f32 %v18966_v49, %v25200_v14  ;;  %v25207_v49 = vand.u32 4294901760, %v18996_v23 }
 0x3d1   : > { %25197 = vst [vmem:[#allocation76_spill] sm:$0xff] %v19304_v26  ;;  %v19326_v57 = vsub.f32 %v18972_v48, %v25203_v61  ;;  %v19337_v6 = vsub.f32 %v18993_v27, %v25205_v40  ;;  %v19347_v48 = vld [vmem:[%s16326_s5 + $0x560] sm:$0xff]  ;;  %v19350_v61 = vld [vmem:[%s16326_s5 + $0x590] sm:$0xff]  ;;  %v19355_v27 = vsub.f32 %v18999_v43, %v25210_v17  ;;  %v25213_v40 = vand.u32 4294901760, %v19226_v24  ;;  %14028 = vmatprep.subr.bf16.mxu0 %v19304_v26 }
 0x3d2   : > { %25201 = vst [vmem:[#allocation87_spill] sm:$0xff] %v19316_v34  ;;  %v19342_v14 = vsub.f32 %v18996_v23, %v25207_v49  ;;  %25209 = vst [vmem:[#allocation101_spill] sm:$0xff] %v19350_v61  ;;  %v25212_v23 = vand.u32 4294901760, %v19223_v45  ;;  %v25217_v17 = vand.u32 4294901760, %v19249_v36  ;;  %v25218_v43 = vand.u32 4294901760, %v19252_v47 }
 0x3d3   : > { %25206 = vst [vmem:[#allocation90_spill] sm:$0xff] %v19337_v6  ;;  %25211 = vst [vmem:[#allocation103_spill] sm:$0xff] %v19355_v27  ;;  %v19383_v44 = vsub.f32 %v19023_v25, %v25220_v7  ;;  %v25224_v25 = vand.u32 4294901760, %v19289_v50  ;;  %v25225_v7 = vand.u32 4294901760, %v19292_v2  ;;  %v25227_v24 = vand.u32 4294901760, %v19097_v13 }
 0x3d4   : > { %25208 = vst [vmem:[#allocation100_spill] sm:$0xff] %v19342_v14  ;;  %v19362_v49 = vpack.c.bf16 %v25213_v40, %v25212_v23  ;;  %v25215_v14 = vand.u32 4294901760, %v19002_v32  ;;  %v19376_v53 = vpack.c.bf16 %v25218_v43, %v25217_v17  ;;  %v19393_v17 = vld [vmem:[%s16326_s5 + $0x5c8] sm:$0xff]  ;;  %v19396_v43 = vld [vmem:[%s16326_s5 + $0x5f8] sm:$0xff]  ;;  %v25222_v40 = vand.u32 4294901760, %v19029_v55 }
 0x3d5   : > { %v19407_v36 = vpack.c.bf16 %v25225_v7, %v25224_v25  ;;  %v25229_v50 = vand.u32 4294901760, %v19032_v19  ;;  %v25231_v26 = vand.u32 4294901760, %v19329_v38  ;;  %v25234_v25 = vand.u32 4294901760, %v19053_v3 }
 0x3d6   : > { %25214 = vst [vmem:[#allocation104_spill] sm:$0xff] %v19362_v49  ;;  %v19369_v6 = vsub.f32 %v19002_v32, %v25215_v14  ;;  %25219 = vst [vmem:[#allocation131_spill] sm:$0xff] %v19376_v53  ;;  %v25221_v32 = vand.u32 4294901760, %v19026_v18  ;;  %v19401_v23 = vsub.f32 %v19029_v55, %v25222_v40  ;;  %14030 = vmatpush1.bf16.msra.mxu0 %v19362_v49  ;;  %v25228_v40 = vand.u32 4294901760, %v19102_v59 }
 0x3d7   : > { %25226 = vst [vmem:[#allocation143_spill] sm:$0xff] %v19407_v36  ;;  %v3917_v55 = vsub.f32 %v19097_v13, %v25227_v24  ;;  %v19429_v47 = vsub.f32 %v19032_v19, %v25229_v50  ;;  %14032 = vmatprep.subr.bf16.mxu0 %v19376_v53  ;;  %v25232_v49 = vand.u32 4294901760, %v19332_v5  ;;  %v19443_v7 = vsub.f32 %v19053_v3, %v25234_v25 }
 0x3d8   : > { %25216 = vst [vmem:[#allocation115_spill] sm:$0xff] %v19369_v6  ;;  %v19388_v14 = vsub.f32 %v19026_v18, %v25221_v32  ;;  %25223 = vst [vmem:[#allocation132_spill] sm:$0xff] %v19401_v23  ;;  %v19410_v18 = vld [vmem:[%s16326_s5 + $0x5c0] sm:$0xff]  ;;  %v19413_v32 = vld [vmem:[%s16326_s5 + $0x5f0] sm:$0xff]  ;;  %v3929_v2 = vsub.f32 %v19102_v59, %v25228_v40  ;;  %v25235_v19 = vand.u32 4294901760, %v19347_v48  ;;  %v25236_v50 = vand.u32 4294901760, %v19350_v61 }
 0x3d9   : > { %25230 = vst [vmem:[#allocation47_spill] sm:$0xff] %v19429_v47  ;;  %v19436_v24 = vpack.c.bf16 %v25232_v49, %v25231_v26  ;;  %v25238_v49 = vand.u32 4294901760, %v19107_v28  ;;  %v25239_v40 = vand.u32 4294901760, %v19112_v35  ;;  %v25240_v59 = vand.u32 4294901760, %v19117_v51 }
 0x3da   : > { %v19449_v53 = vpack.c.bf16 %v25236_v50, %v25235_v19  ;;  %14034 = vmatpush1.bf16.msra.mxu0 %v19407_v36  ;;  %v3918_v19 = vand.u32 4294901760, %v3917_v55  ;;  %v3930_v50 = vand.u32 4294901760, %v3929_v2  ;;  %v25241_v61 = vand.u32 4294901760, %v19131_v33 }
 0x3db   : > { %25233 = vst [vmem:[#allocation57_spill] sm:$0xff] %v19436_v24  ;;  %v3923_v13 = vsub.f32 %v19107_v28, %v25238_v49  ;;  %v3935_v5 = vsub.f32 %v19112_v35, %v25239_v40  ;;  %v3941_v26 = vsub.f32 %v19117_v51, %v25240_v59  ;;  %v25242_v28 = vand.u32 4294901760, %v19056_v46  ;;  %14036 = vmatprep.subr.bf16.mxu0 %v19436_v24 }
 0x3dc   : > { %25237 = vst [vmem:[#allocation60_spill] sm:$0xff] %v19449_v53  ;;  %v3953_v49 = vsub.f32 %v19131_v33, %v25241_v61  ;;  %v25244_v25 = vand.u32 4294901760, %v19393_v17  ;;  %v25245_v55 = vand.u32 4294901760, %v19396_v43  ;;  %v25247_v36 = vand.u32 4294901760, %v19059_v0 }
 0x3dd   : > { %v19471_v40 = vsub.f32 %v19056_v46, %v25242_v28  ;;  %v25248_v46 = vand.u32 4294901760, %v19062_v39  ;;  %v25250_v3 = vand.u32 4294901760, %v19151_v15  ;;  %v25251_v51 = vand.u32 4294901760, %v19156_v37 }
 0x3de   : > { %v19478_v2 = vpack.c.bf16 %v25245_v55, %v25244_v25  ;;  %v19485_v61 = vsub.f32 %v19059_v0, %v25247_v36  ;;  %v3924_v25 = vand.u32 4294901760, %v3923_v13  ;;  %v3936_v55 = vand.u32 4294901760, %v3935_v5  ;;  %14038 = vmatpush1.bf16.msra.mxu0 %v19449_v53 }
 0x3df   : > { %25243 = vst [vmem:[#allocation71_spill] sm:$0xff] %v19471_v40  ;;  %v19490_v28 = vsub.f32 %v19062_v39, %v25248_v46  ;;  %v3947_v59 = vsub.f32 %v19151_v15, %v25250_v3  ;;  %v3959_v0 = vsub.f32 %v19156_v37, %v25251_v51  ;;  %v25252_v36 = vand.u32 4294901760, %v19410_v18 }
 0x3e0   : > { %25246 = vst [vmem:[#allocation74_spill] sm:$0xff] %v19478_v2  ;;  %v25253_v39 = vand.u32 4294901760, %v19413_v32  ;;  %v14043_v24 = vpack.c.bf16 %v3930_v50, %v3918_v19  ;;  %v3942_v33 = vand.u32 4294901760, %v3941_v26  ;;  %v3954_v13 = vand.u32 4294901760, %v3953_v49  ;;  %14040 = vmatprep.subr.bf16.mxu0 %v19478_v2 }
 0x3e1   : > { %25249 = vst [vmem:[#allocation85_spill] sm:$0xff] %v19490_v28  ;;  %v25255_v5 = vand.u32 4294901760, %v19161_v8  ;;  %v25256_v15 = vand.u32 4294901760, %v19166_v4  ;;  %v25259_v26 = vand.u32 4294901760, %v19086_v30  ;;  %v25260_v49 = vand.u32 4294901760, %v19177_v54 }
 0x3e2   : > { %v19505_v46 = vpack.c.bf16 %v25253_v39, %v25252_v36  ;;  %v25257_v36 = vand.u32 4294901760, %v19083_v42  ;;  %v14045_v53 = vpack.c.bf16 %v3936_v55, %v3924_v25  ;;  %v3948_v37 = vand.u32 4294901760, %v3947_v59 }
 0x3e3   : > { %v3965_v3 = vsub.f32 %v19161_v8, %v25255_v5  ;;  %v3977_v51 = vsub.f32 %v19166_v4, %v25256_v15  ;;  %v19524_v50 = vsub.f32 %v19086_v30, %v25259_v26  ;;  %v3971_v39 = vsub.f32 %v19177_v54, %v25260_v49 }
 0x3e4   : > { %25254 = vst [vmem:[#allocation88_spill] sm:$0xff] %v19505_v46  ;;  %v19519_v19 = vsub.f32 %v19083_v42, %v25257_v36  ;;  %v25261_v15 = vand.u32 4294901760, %v19182_v41  ;;  %v3960_v2 = vand.u32 4294901760, %v3959_v0  ;;  %v23608_v4 = vand.u32 4294901760, %v19197_v63  ;;  %14042 = vmatpush1.bf16.msra.mxu0 %v19505_v46 }
 0x3e5   : > { %v14047_v42 = vpack.c.bf16 %v3954_v13, %v3942_v33  ;;  %v23609_v36 = vand.u32 4294901760, %v19211_v31  ;;  %v23610_v30 = vand.u32 4294901760, %v19231_v52  ;;  %14044 = vmatprep.subr.bf16.mxu0 %v14043_v24  ;;  %v3966_v49 = vand.u32 4294901760, %v3965_v3  ;;  %v25268_v3 = vld [vmem:[#allocation199_spill] sm:$0xff] }
 0x3e6   : > { %25258 = vst [vmem:[#allocation99_spill] sm:$0xff] %v19519_v19  ;;  %v3983_v5 = vsub.f32 %v19182_v41, %v25261_v15  ;;  %v3978_v54 = vand.u32 4294901760, %v3977_v51  ;;  %v25262_v8 = vand.u32 4294901760, %v19187_v12  ;;  %v25263_v59 = vand.u32 4294901760, %v19192_v21  ;;  %v25264_v51 = vld [vmem:[#allocation97_spill] sm:$0xff] }
 0x3e7   : > { %v3972_v0 = vand.u32 4294901760, %v3971_v39  ;;  %3860 = vmatmul.mubr.f32.vlgmr.msra.gmra.mrb[16].mxu0 %v24974_v60  ;;  %v14049_v26 = vpack.c.bf16 %v3960_v2, %v3948_v37  ;;  %v3995_v24 = vsub.f32 %v19197_v63, %v23608_v4  ;;  %v4007_v39 = vsub.f32 %v19211_v31, %v23609_v36 }
 0x3e8   : > { %v3989_v25 = vsub.f32 %v19187_v12, %v25262_v8  ;;  %v4001_v55 = vsub.f32 %v19192_v21, %v25263_v59  ;;  %v3984_v15 = vand.u32 4294901760, %v3983_v5  ;;  %3870 = vmatprep.mubr.f32.mxu0 %v25264_v51  ;;  %14046 = vmatpush1.bf16.msra.mxu0 %v14045_v53  ;;  %v4013_v60 = vsub.f32 %v19231_v52, %v23610_v30  ;;  %v25266_v5 = vld [vmem:[#allocation194_spill] sm:$0xff] }
 0x3e9   : > { %v25265_v37 = vand.u32 4294901760, %v19236_v10  ;;  %v25267_v59 = vand.u32 4294901760, %v25266_v5  ;;  %14048 = vmatprep.subr.bf16.mxu0 %v14047_v42  ;;  %v14051_v51 = vpack.c.bf16 %v3978_v54, %v3966_v49  ;;  %v25269_v13 = vand.u32 4294901760, %v25268_v3 }
 0x3ea   : > { %v3990_v53 = vand.u32 4294901760, %v3989_v25  ;;  %v4002_v8 = vand.u32 4294901760, %v4001_v55  ;;  %v14053_v33 = vpack.c.bf16 %v3984_v15, %v3972_v0  ;;  %v25270_v30 = vand.u32 4294901760, %v19241_v9  ;;  %v25275_v15 = vld [vmem:[#allocation259_spill] sm:$0xff] }
 0x3eb   : > { %v4025_v2 = vsub.f32 %v19236_v10, %v25265_v37  ;;  %v19564_v4 = vsub.f32 %v25266_v5, %v25267_v59  ;;  %v19569_v36 = vsub.f32 %v25268_v3, %v25269_v13  ;;  %v25271_v37 = vand.u32 4294901760, %v19246_v22  ;;  %v25272_v5 = vld [vmem:[#allocation98_spill] sm:$0xff] }
 0x3ec   : > { %v4019_v46 = vsub.f32 %v19241_v9, %v25270_v30  ;;  %3876 = vmatmul.mubr.f32.gmra.mrb[18].mxu0 %v25272_v5  ;;  %v25273_v54 = vand.u32 4294901760, %v19257_v56  ;;  %v25274_v49 = vand.u32 4294901760, %v19262_v11  ;;  %v3996_v30 = vand.u32 4294901760, %v3995_v24  ;;  %v25278_v24 = vld [vmem:[#allocation117_spill] sm:$0xff] }
 0x3ed   : > { %v4031_v10 = vsub.f32 %v19246_v22, %v25271_v37  ;;  %3886 = vmatprep.mubr.f32.mxu0 %v25275_v15  ;;  %14050 = vmatpush1.bf16.msra.mxu0 %v14049_v26  ;;  %v4008_v13 = vand.u32 4294901760, %v4007_v39  ;;  %v4014_v3 = vand.u32 4294901760, %v4013_v60  ;;  %v4026_v59 = vand.u32 4294901760, %v4025_v2 }
 0x3ee   : > { %v4037_v42 = vsub.f32 %v19257_v56, %v25273_v54  ;;  %v4049_v25 = vsub.f32 %v19262_v11, %v25274_v49  ;;  %v25276_v37 = vand.u32 4294901760, %v19143_v1  ;;  %14052 = vmatprep.subr.bf16.mxu0 %v14051_v51  ;;  %v14055_v54 = vpack.c.bf16 %v4002_v8, %v3990_v53  ;;  %v25277_v56 = vld [vmem:[#allocation61_spill] sm:$0xff]  ;;  %v25281_v53 = vld [vmem:[#allocation142_spill] sm:$0xff] }
 0x3ef   : > { %v23620_v49 = vand.u32 4294901760, %v25277_v56  ;;  %v23619_v55 = vand.u32 4294901760, %v19297_v62  ;;  %v4020_v11 = vand.u32 4294901760, %v4019_v46  ;;  %v4032_v0 = vand.u32 4294901760, %v4031_v10  ;;  %v25283_v46 = vld [vmem:[#allocation118_spill] sm:$0xff] }
 0x3f0   : > { %v19590_v5 = vsub.f32 %v19143_v1, %v25276_v37  ;;  %v23626_v15 = vand.u32 4294901760, %v19311_v58  ;;  %3892 = vmatmul.mubr.f32.gmra.mrb[20].mxu0 %v25278_v24  ;;  %v4038_v39 = vand.u32 4294901760, %v4037_v42  ;;  %v4050_v60 = vand.u32 4294901760, %v4049_v25 }
 0x3f1   : > { %v25279_v2 = vand.u32 4294901760, %v19267_v16  ;;  %v25280_v8 = vand.u32 4294901760, %v19272_v29  ;;  %v25282_v37 = vand.u32 4294901760, %v25281_v53  ;;  %3902 = vmatprep.mubr.f32.mxu0 %v25283_v46  ;;  %14054 = vmatpush1.bf16.msra.mxu0 %v14053_v33  ;;  %v14057_v26 = vpack.c.bf16 %v4008_v13, %v3996_v30  ;;  %v25286_v33 = vld [vmem:[#allocation222_spill] sm:$0xff] }
 0x3f2   : > { %v14059_v24 = vpack.c.bf16 %v4026_v59, %v4014_v3  ;;  %14056 = vmatprep.subr.bf16.mxu0 %v14055_v54  ;;  %v4061_v42 = vsub.f32 %v25277_v56, %v23620_v49  ;;  %v4073_v25 = vsub.f32 %v19297_v62, %v23619_v55  ;;  %v25287_v30 = vand.u32 4294901760, %v25286_v33  ;;  %v25290_v55 = vld [vmem:[#allocation129_spill] sm:$0xff]  ;;  %v25292_v62 = vld [vmem:[#allocation90_spill] sm:$0xff] }
 0x3f3   : > { %v4043_v1 = vsub.f32 %v19267_v16, %v25279_v2  ;;  %v4055_v51 = vsub.f32 %v19272_v29, %v25280_v8  ;;  %v19606_v10 = vsub.f32 %v25281_v53, %v25282_v37  ;;  %v25284_v53 = vld [vmem:[#allocation218_spill] sm:$0xff]  ;;  %v4067_v3 = vsub.f32 %v19311_v58, %v23626_v15 }
 0x3f4   : > { %v25285_v37 = vand.u32 4294901760, %v25284_v53  ;;  %v19625_v13 = vsub.f32 %v25286_v33, %v25287_v30  ;;  %v25289_v59 = vand.u32 4294901760, %v19316_v34  ;;  %3908 = vmatmul.mubr.f32.gmra.mrb[22].mxu0 %v25290_v55  ;;  %v14061_v49 = vpack.c.bf16 %v4032_v0, %v4020_v11  ;;  %v25293_v30 = vld [vmem:[#allocation100_spill] sm:$0xff] }
 0x3f5   : > { %v14063_v8 = vpack.c.bf16 %v4050_v60, %v4038_v39  ;;  %v4044_v2 = vand.u32 4294901760, %v4043_v1  ;;  %14058 = vmatpush1.bf16.msra.mxu0 %v14057_v26  ;;  %v23629_v33 = vand.u32 4294901760, %v25292_v62  ;;  %v23630_v56 = vand.u32 4294901760, %v25293_v30 }
 0x3f6   : > { %v19620_v46 = vsub.f32 %v25284_v53, %v25285_v37  ;;  %25288 = vst [vmem:[#allocation102_spill] sm:$0xff] %v19625_v13  ;;  %v4079_v54 = vsub.f32 %v19316_v34, %v25289_v59  ;;  %v4056_v53 = vand.u32 4294901760, %v4055_v51  ;;  %v25291_v37 = vld [vmem:[#allocation63_spill] sm:$0xff]  ;;  %v23633_v15 = vand.u32 4294901760, %v19369_v6  ;;  %14060 = vmatprep.subr.bf16.mxu0 %v14059_v24 }
 0x3f7   : > { %4299 = vmatprep.mubr.f32.mxu0 %v25291_v37  ;;  %v4062_v58 = vand.u32 4294901760, %v4061_v42  ;;  %v4074_v59 = vand.u32 4294901760, %v4073_v25  ;;  %v25294_v55 = vand.u32 4294901760, %v19321_v20  ;;  %v25295_v0 = vand.u32 4294901760, %v19326_v57  ;;  %v25300_v25 = vld [vmem:[#allocation45_spill] sm:$0xff]  ;;  %v19676_v37 = vpop.f32.mrb[0].mxu0 }
 0x3f8   : > { %v4068_v39 = vand.u32 4294901760, %v4067_v3  ;;  %v4080_v60 = vand.u32 4294901760, %v4079_v54  ;;  %v25296_v29 = vand.u32 4294901760, %v19223_v45  ;;  %v14065_v42 = vpack.c.bf16 %v4056_v53, %v4044_v2  ;;  %25302 = vst [vmem:[#allocation113_spill] sm:$0xff] %v19676_v37 }
 0x3f9   : > { %v4085_v11 = vsub.f32 %v19321_v20, %v25294_v55  ;;  %v4097_v26 = vsub.f32 %v19326_v57, %v25295_v0  ;;  %14062 = vmatpush1.bf16.msra.mxu0 %v14061_v49  ;;  %v4091_v3 = vsub.f32 %v25292_v62, %v23629_v33  ;;  %v4103_v54 = vsub.f32 %v25293_v30, %v23630_v56 }
 0x3fa   : > { %v19650_v24 = vsub.f32 %v19223_v45, %v25296_v29  ;;  %v25297_v0 = vand.u32 4294901760, %v19355_v27  ;;  %v4121_v45 = vsub.f32 %v19369_v6, %v23633_v15  ;;  %v25298_v29 = vld [vmem:[#allocation44_spill] sm:$0xff]  ;;  %14064 = vmatprep.subr.bf16.mxu0 %v14063_v8  ;;  %v14067_v53 = vpack.c.bf16 %v4074_v59, %v4062_v58  ;;  %v19684_v8 = vpop.f32.mrb[1].mxu0 }
 0x3fb   : > { %v25299_v2 = vand.u32 4294901760, %v25298_v29  ;;  %v4086_v33 = vand.u32 4294901760, %v4085_v11  ;;  %v4098_v55 = vand.u32 4294901760, %v4097_v26  ;;  %v25301_v1 = vand.u32 4294901760, %v25300_v25  ;;  %25305 = vst [vmem:[#allocation116_spill] sm:$0xff] %v19684_v8 }
 0x3fc   : > { %v4109_v51 = vsub.f32 %v19355_v27, %v25297_v0  ;;  %v14069_v0 = vpack.c.bf16 %v4080_v60, %v4068_v39  ;;  %v25303_v27 = vand.u32 4294901760, %v19383_v44  ;;  %v25304_v6 = vand.u32 4294901760, %v19388_v14 }
 0x3fd   : > { %v19669_v49 = vsub.f32 %v25298_v29, %v25299_v2  ;;  %v19674_v56 = vsub.f32 %v25300_v25, %v25301_v1  ;;  %v25306_v58 = vand.u32 4294901760, %v19401_v23  ;;  %v25307_v11 = vand.u32 4294901760, %v19429_v47  ;;  %14066 = vmatpush1.bf16.msra.mxu0 %v14065_v42 }
 0x3fe   : > { %v4115_v15 = vsub.f32 %v19383_v44, %v25303_v27  ;;  %v4127_v29 = vsub.f32 %v19388_v14, %v25304_v6  ;;  %v4092_v27 = vand.u32 4294901760, %v4091_v3  ;;  %v4104_v1 = vand.u32 4294901760, %v4103_v54  ;;  %v25308_v6 = vld [vmem:[#allocation46_spill] sm:$0xff]  ;;  %14068 = vmatprep.subr.bf16.mxu0 %v14067_v53 }
 0x3ff   : > { %v4133_v59 = vsub.f32 %v19401_v23, %v25306_v58  ;;  %v4145_v26 = vsub.f32 %v19429_v47, %v25307_v11  ;;  %v4110_v25 = vand.u32 4294901760, %v4109_v51  ;;  %v4122_v2 = vand.u32 4294901760, %v4121_v45  ;;  %v19701_v47 = vpop.f32.mrb[2].mxu0 }
 0x400   : > { %v25309_v37 = vand.u32 4294901760, %v25308_v6  ;;  %v14071_v58 = vpack.c.bf16 %v4098_v55, %v4086_v33  ;;  %v23644_v23 = vand.u32 4294901760, %v19485_v61  ;;  %25311 = vst [vmem:[#allocation130_spill] sm:$0xff] %v19701_v47  ;;  %v4116_v39 = vand.u32 4294901760, %v4115_v15  ;;  %v19705_v3 = vpop.f32.mrb[3].mxu0 }
 0x401   : > { %v4128_v60 = vand.u32 4294901760, %v4127_v29  ;;  %25312 = vst [vmem:[#allocation141_spill] sm:$0xff] %v19705_v3  ;;  %v4134_v54 = vand.u32 4294901760, %v4133_v59  ;;  %v4146_v45 = vand.u32 4294901760, %v4145_v26  ;;  %v25314_v55 = vand.u32 4294901760, %v19471_v40  ;;  %v25318_v29 = vld [vmem:[#allocation73_spill] sm:$0xff]  ;;  %14070 = vmatpush1.bf16.msra.mxu0 %v14069_v0 }
 0x402   : > { %v19697_v8 = vsub.f32 %v25308_v6, %v25309_v37  ;;  %v25313_v37 = vand.u32 4294901760, %v19443_v7  ;;  %v25315_v6 = vld [vmem:[#allocation72_spill] sm:$0xff]  ;;  %v25319_v42 = vand.u32 4294901760, %v25318_v29  ;;  %v14073_v59 = vpack.c.bf16 %v4104_v1, %v4092_v27  ;;  %14072 = vmatprep.subr.bf16.mxu0 %v14071_v58  ;;  %v25324_v0 = vld [vmem:[#allocation89_spill] sm:$0xff] }
 0x403   : > { %v4151_v53 = vsub.f32 %v19471_v40, %v25314_v55  ;;  %v25316_v11 = vand.u32 4294901760, %v25315_v6  ;;  %v14075_v26 = vpack.c.bf16 %v4122_v2, %v4110_v25  ;;  %v25321_v55 = vand.u32 4294901760, %v19490_v28  ;;  %v19741_v25 = vpop.f32.mrb[4].mxu0 }
 0x404   : > { %25310 = vst [vmem:[#allocation127_spill] sm:$0xff] %v19697_v8  ;;  %v4139_v33 = vsub.f32 %v19443_v7, %v25313_v37  ;;  %v19721_v51 = vsub.f32 %v25318_v29, %v25319_v42  ;;  %v4157_v37 = vsub.f32 %v19485_v61, %v23644_v23  ;;  %v25322_v47 = vand.u32 4294901760, %v19329_v38  ;;  %25327 = vst [vmem:[#allocation170_spill] sm:$0xff] %v19741_v25  ;;  %v19749_v23 = vpop.f32.mrb[5].mxu0 }
 0x405   : > { %v19716_v15 = vsub.f32 %v25315_v6, %v25316_v11  ;;  %v4169_v3 = vsub.f32 %v19490_v28, %v25321_v55  ;;  %v25325_v27 = vand.u32 4294901760, %v25324_v0  ;;  %v25328_v2 = vand.u32 4294901760, %v19519_v19  ;;  %25330 = vst [vmem:[#allocation177_spill] sm:$0xff] %v19749_v23  ;;  %14074 = vmatpush1.bf16.msra.mxu0 %v14073_v59 }
 0x406   : > { %25320 = vst [vmem:[#allocation155_spill] sm:$0xff] %v19721_v51  ;;  %v19734_v42 = vsub.f32 %v19329_v38, %v25322_v47  ;;  %v25329_v29 = vand.u32 4294901760, %v19524_v50  ;;  %v14077_v6 = vpack.c.bf16 %v4128_v60, %v4116_v39  ;;  %v14079_v38 = vpack.c.bf16 %v4146_v45, %v4134_v54  ;;  %14076 = vmatprep.subr.bf16.mxu0 %v14075_v26  ;;  %v19761_v54 = vpop.f32.mrb[6].mxu0 }
 0x407   : > { %25317 = vst [vmem:[#allocation144_spill] sm:$0xff] %v19716_v15  ;;  %v19739_v1 = vsub.f32 %v25324_v0, %v25325_v27  ;;  %v4163_v58 = vsub.f32 %v19519_v19, %v25328_v2  ;;  %v4140_v47 = vand.u32 4294901760, %v4139_v33  ;;  %v4152_v11 = vand.u32 4294901760, %v4151_v53  ;;  %25333 = vst [vmem:[#allocation180_spill] sm:$0xff] %v19761_v54 }
 0x408   : > { %25323 = vst [vmem:[#allocation158_spill] sm:$0xff] %v19734_v42  ;;  %v4175_v55 = vsub.f32 %v19524_v50, %v25329_v29  ;;  %v23651_v0 = vand.u32 4294901760, %v19590_v5  ;;  %v23652_v27 = vand.u32 4294901760, %v19606_v10  ;;  %v23654_v25 = vand.u32 4294901760, %v19620_v46 }
 0x409   : > { %25326 = vst [vmem:[#allocation167_spill] sm:$0xff] %v19739_v1  ;;  %v4158_v2 = vand.u32 4294901760, %v4157_v37  ;;  %v4170_v19 = vand.u32 4294901760, %v4169_v3  ;;  %v25331_v29 = vand.u32 4294901760, %v19564_v4  ;;  %v25332_v39 = vand.u32 4294901760, %v19569_v36  ;;  %v19770_v37 = vpop.f32.mrb[7].mxu0  ;;  %14078 = vmatpush1.bf16.msra.mxu0 %v14077_v6 }
 0x40a   : > { %v4164_v45 = vand.u32 4294901760, %v4163_v58  ;;  %v4176_v33 = vand.u32 4294901760, %v4175_v55  ;;  %v25334_v26 = vand.u32 4294901760, %v19347_v48  ;;  %25336 = vst [vmem:[#allocation186_spill] sm:$0xff] %v19770_v37  ;;  %v4187_v58 = vsub.f32 %v19590_v5, %v23651_v0  ;;  %14080 = vmatprep.subr.bf16.mxu0 %v14079_v38 }
 0x40b   : > { %v4181_v23 = vsub.f32 %v19564_v4, %v25331_v29  ;;  %v4193_v60 = vsub.f32 %v19569_v36, %v25332_v39  ;;  %v14081_v29 = vpack.c.bf16 %v4152_v11, %v4140_v47  ;;  %v4199_v55 = vsub.f32 %v19606_v10, %v23652_v27  ;;  %v25338_v47 = vld [vmem:[#allocation101_spill] sm:$0xff] }
 0x40c   : > { %v19768_v3 = vsub.f32 %v19347_v48, %v25334_v26  ;;  %v4205_v48 = vsub.f32 %v19620_v46, %v23654_v25  ;;  %v25337_v26 = vand.u32 4294901760, %v19625_v13  ;;  %v25339_v28 = vand.u32 4294901760, %v25338_v47 }
 0x40d   : > { %v14083_v39 = vpack.c.bf16 %v4170_v19, %v4158_v2  ;;  %v4182_v0 = vand.u32 4294901760, %v4181_v23  ;;  %v4194_v59 = vand.u32 4294901760, %v4193_v60  ;;  %v25341_v53 = vand.u32 4294901760, %v19393_v17  ;;  %14082 = vmatpush1.bf16.msra.mxu0 %v14081_v29 }
 0x40e   : > { %25335 = vst [vmem:[#allocation185_spill] sm:$0xff] %v19768_v3  ;;  %v4217_v11 = vsub.f32 %v19625_v13, %v25337_v26  ;;  %v19789_v6 = vsub.f32 %v25338_v47, %v25339_v28  ;;  %v14085_v37 = vpack.c.bf16 %v4176_v33, %v4164_v45  ;;  %v25343_v25 = vand.u32 4294901760, %v19650_v24 }
 0x40f   : > { %v19794_v27 = vsub.f32 %v19393_v17, %v25341_v53  ;;  %v25344_v26 = vand.u32 4294901760, %v19669_v49  ;;  %v25345_v28 = vand.u32 4294901760, %v19674_v56  ;;  %v25346_v23 = vand.u32 4294901760, %v19697_v8  ;;  %14084 = vmatprep.subr.bf16.mxu0 %v14083_v39 }
 0x410   : > { %25340 = vst [vmem:[#allocation195_spill] sm:$0xff] %v19789_v6  ;;  %v4211_v54 = vsub.f32 %v19650_v24, %v25343_v25  ;;  %v4188_v60 = vand.u32 4294901760, %v4187_v58  ;;  %v4200_v45 = vand.u32 4294901760, %v4199_v55  ;;  %v4206_v25 = vand.u32 4294901760, %v4205_v48 }
 0x411   : > { %25342 = vst [vmem:[#allocation196_spill] sm:$0xff] %v19794_v27  ;;  %v4223_v13 = vsub.f32 %v19669_v49, %v25344_v26  ;;  %v4229_v19 = vsub.f32 %v19674_v56, %v25345_v28  ;;  %v4241_v38 = vsub.f32 %v19697_v8, %v25346_v23  ;;  %v4218_v33 = vand.u32 4294901760, %v4217_v11  ;;  %14086 = vmatpush1.bf16.msra.mxu0 %v14085_v37 }
 0x412   : > { %v25347_v53 = vand.u32 4294901760, %v19396_v43  ;;  %v14087_v26 = vpack.c.bf16 %v4194_v59, %v4182_v0  ;;  %v23658_v28 = vand.u32 4294901760, %v19734_v42  ;;  %v25349_v17 = vand.u32 4294901760, %v19410_v18 }
 0x413   : > { %v25351_v29 = vand.u32 4294901760, %v19413_v32  ;;  %v4212_v55 = vand.u32 4294901760, %v4211_v54  ;;  %v4224_v48 = vand.u32 4294901760, %v4223_v13  ;;  %v4242_v11 = vand.u32 4294901760, %v4241_v38 }
 0x414   : > { %v19813_v47 = vsub.f32 %v19396_v43, %v25347_v53  ;;  %v19820_v2 = vsub.f32 %v19410_v18, %v25349_v17  ;;  %v4230_v43 = vand.u32 4294901760, %v4229_v19  ;;  %v25353_v0 = vand.u32 4294901760, %v19716_v15  ;;  %14088 = vmatprep.subr.bf16.mxu0 %v14087_v26 }
 0x415   : > { %v19825_v58 = vsub.f32 %v19413_v32, %v25351_v29  ;;  %v25354_v39 = vand.u32 4294901760, %v19721_v51  ;;  %v14089_v18 = vpack.c.bf16 %v4200_v45, %v4188_v60  ;;  %v14091_v17 = vpack.c.bf16 %v4218_v33, %v4206_v25 }
 0x416   : > { %25348 = vst [vmem:[#allocation207_spill] sm:$0xff] %v19813_v47  ;;  %25350 = vst [vmem:[#allocation210_spill] sm:$0xff] %v19820_v2  ;;  %v4235_v59 = vsub.f32 %v19716_v15, %v25353_v0  ;;  %v23664_v23 = vand.u32 4294901760, %v19768_v3  ;;  %v23660_v32 = vand.u32 4294901760, %v19789_v6  ;;  %v4253_v13 = vsub.f32 %v19734_v42, %v23658_v28 }
 0x417   : > { %25352 = vst [vmem:[#allocation217_spill] sm:$0xff] %v19825_v58  ;;  %v4247_v53 = vsub.f32 %v19721_v51, %v25354_v39  ;;  %v25355_v54 = vand.u32 4294901760, %v19739_v1  ;;  %v23659_v38 = vand.u32 4294901760, %v19794_v27  ;;  %v23661_v29 = vand.u32 4294901760, %v19813_v47  ;;  %14090 = vmatpush1.bf16.msra.mxu0 %v14089_v18 }
 0x418   : > { %v14093_v37 = vpack.c.bf16 %v4224_v48, %v4212_v55  ;;  %v14095_v60 = vpack.c.bf16 %v4242_v11, %v4230_v43  ;;  %v4236_v45 = vand.u32 4294901760, %v4235_v59  ;;  %v4259_v33 = vsub.f32 %v19768_v3, %v23664_v23  ;;  %14092 = vmatprep.subr.bf16.mxu0 %v14091_v17  ;;  %v25374_v23 = vld [vmem:[#allocation77_spill] sm:$0xff] }
 0x419   : > { %v4265_v19 = vsub.f32 %v19739_v1, %v25355_v54  ;;  %v4248_v25 = vand.u32 4294901760, %v4247_v53  ;;  %v4271_v26 = vsub.f32 %v19789_v6, %v23660_v32  ;;  %v23662_v0 = vand.u32 4294901760, %v19820_v2 }
 0x41a   : > { %v23663_v39 = vand.u32 4294901760, %v19825_v58  ;;  %v4254_v54 = vand.u32 4294901760, %v4253_v13  ;;  %v4277_v55 = vsub.f32 %v19794_v27, %v23659_v38  ;;  %v4289_v48 = vsub.f32 %v19813_v47, %v23661_v29 }
 0x41b   : > { %v4266_v28 = vand.u32 4294901760, %v4265_v19  ;;  %v14097_v43 = vpack.c.bf16 %v4248_v25, %v4236_v45  ;;  %14094 = vmatpush1.bf16.msra.mxu0 %v14093_v37  ;;  %v4260_v11 = vand.u32 4294901760, %v4259_v33  ;;  %v4272_v59 = vand.u32 4294901760, %v4271_v26  ;;  %v25356_v25 = vld [vmem:[#allocation205_spill] sm:$0xff]  ;;  %v25357_v33 = vld [vmem:[#allocation206_spill] sm:$0xff] }
 0x41c   : > { %v4283_v53 = vsub.f32 %v19820_v2, %v23662_v0  ;;  %v4295_v18 = vsub.f32 %v19825_v58, %v23663_v39  ;;  %14096 = vmatprep.subr.bf16.mxu0 %v14095_v60  ;;  %v4278_v13 = vand.u32 4294901760, %v4277_v55  ;;  %v4290_v19 = vand.u32 4294901760, %v4289_v48  ;;  %v25358_v0 = vld [vmem:[#allocation219_spill] sm:$0xff]  ;;  %v25361_v55 = vld [vmem:[#allocation64_spill] sm:$0xff]  ;;  %v25362_v48 = vld [vmem:[#allocation241_spill] sm:$0xff] }
 0x41d   : > { %v14099_v17 = vpack.c.bf16 %v4266_v28, %v4254_v54  ;;  %v14101_v38 = vpack.c.bf16 %v4272_v59, %v4260_v11  ;;  %v14107_v26 = vpack.c.bf16 %v25357_v33, %v25356_v25  ;;  %v14109_v39 = vpack.c.bf16 %v19112_v35, %v25358_v0  ;;  %v25359_v28 = vld [vmem:[#allocation239_spill] sm:$0xff] }
 0x41e   : > { %v4284_v32 = vand.u32 4294901760, %v4283_v53  ;;  %v4296_v29 = vand.u32 4294901760, %v4295_v18  ;;  %v14103_v37 = vpack.c.bf16 %v4290_v19, %v4278_v13  ;;  %v25360_v60 = vld [vmem:[#allocation31_spill] sm:$0xff]  ;;  %v25367_v53 = vld [vmem:[#allocation242_spill] sm:$0xff]  ;;  %v25368_v18 = vld [vmem:[#allocation69_spill] sm:$0xff]  ;;  %v14119_v19 = vpack.c.bf16 %v19192_v21, %v19187_v12 }
 0x41f   : > { %14098 = vmatpush1.bf16.msra.mxu0 %v14097_v43  ;;  %v14111_v54 = vpack.c.bf16 %v25360_v60, %v25359_v28  ;;  %v25363_v43 = vld [vmem:[#allocation209_spill] sm:$0xff]  ;;  %v25366_v11 = vld [vmem:[#allocation211_spill] sm:$0xff] }
 0x420   : > { %14100 = vmatprep.subr.bf16.mxu0 %v14099_v17  ;;  %v14105_v45 = vpack.c.bf16 %v4296_v29, %v4284_v32  ;;  %v25365_v29 = vld [vmem:[#allocation212_spill] sm:$0xff]  ;;  %v25369_v17 = vld [vmem:[#allocation221_spill] sm:$0xff] }
 0x421   : > { %v14115_v59 = vpack.c.bf16 %v25366_v11, %v25365_v29  ;;  %v14117_v13 = vpack.c.bf16 %v19182_v41, %v25369_v17 }
 0x423   : > { %14102 = vmatpush1.bf16.msra.mxu0 %v14101_v38  ;;  %v25364_v38 = vld [vmem:[#allocation208_spill] sm:$0xff] }
 0x424   : > { %14104 = vmatprep.subr.bf16.mxu0 %v14103_v37  ;;  %v14113_v32 = vpack.c.bf16 %v25364_v38, %v25363_v43  ;;  %v25371_v37 = vld [vmem:[#allocation245_spill] sm:$0xff] }
 0x427   : > { %14106 = vmatpush1.bf16.msra.mxu0 %v14105_v45  ;;  %v14121_v45 = vpack.c.bf16 %v19211_v31, %v19197_v63 }
 0x428   : > { %14108 = vmatprep.subr.bf16.mxu0 %v14107_v26  ;;  %v25372_v26 = vld [vmem:[#allocation41_spill] sm:$0xff] }
 0x42a   : > { %4301 = vmatmul.mubr.f32.vlgmr.msra.gmra.mrb[16].mxu0 %v25361_v55 }
 0x42b   : > { %4307 = vmatprep.mubr.f32.mxu0 %v25362_v48  ;;  %14110 = vmatpush1.bf16.msra.mxu0 %v14109_v39  ;;  %v25370_v39 = vld [vmem:[#allocation70_spill] sm:$0xff]  ;;  %v25379_v48 = vld [vmem:[#allocation75_spill] sm:$0xff] }
 0x42c   : > { %14112 = vmatprep.subr.bf16.mxu0 %v14111_v54  ;;  %v14123_v54 = vpack.c.bf16 %v25372_v26, %v19231_v52 }
 0x42e   : > { %4309 = vmatmul.mubr.f32.gmra.mrb[18].mxu0 %v25367_v53 }
 0x42f   : > { %4315 = vmatprep.mubr.f32.mxu0 %v25368_v18  ;;  %14114 = vmatpush1.bf16.msra.mxu0 %v14113_v32  ;;  %v25373_v32 = vld [vmem:[#allocation246_spill] sm:$0xff] }
 0x430   : > { %14116 = vmatprep.subr.bf16.mxu0 %v14115_v59  ;;  %v14125_v59 = vpack.c.bf16 %v19246_v22, %v19241_v9  ;;  %v25376_v18 = vld [vmem:[#allocation58_spill] sm:$0xff] }
 0x432   : > { %4317 = vmatmul.mubr.f32.gmra.mrb[20].mxu0 %v25370_v39  ;;  %v25375_v39 = vld [vmem:[#allocation48_spill] sm:$0xff] }
 0x433   : > { %4323 = vmatprep.mubr.f32.mxu0 %v25371_v37  ;;  %14118 = vmatpush1.bf16.msra.mxu0 %v14117_v13  ;;  %v14127_v37 = vpack.c.bf16 %v25376_v18, %v25375_v39  ;;  %v25377_v13 = vld [vmem:[#allocation59_spill] sm:$0xff] }
 0x434   : > { %14120 = vmatprep.subr.bf16.mxu0 %v14119_v19  ;;  %v14129_v53 = vpack.c.bf16 %v25377_v13, %v19267_v16  ;;  %v25378_v19 = vld [vmem:[#allocation61_spill] sm:$0xff]  ;;  %v25382_v18 = vld [vmem:[#allocation115_spill] sm:$0xff] }
 0x435   : > { %v14131_v55 = vpack.c.bf16 %v25379_v48, %v25378_v19  ;;  %v25384_v48 = vld [vmem:[#allocation47_spill] sm:$0xff] }
 0x436   : > { %4325 = vmatmul.mubr.f32.gmra.mrb[22].mxu0 %v25373_v32  ;;  %v25380_v32 = vld [vmem:[#allocation86_spill] sm:$0xff] }
 0x437   : > { %14122 = vmatpush1.bf16.msra.mxu0 %v14121_v45  ;;  %4525 = vmatprep.mubr.f32.mxu0 %v25374_v23  ;;  %v14133_v45 = vpack.c.bf16 %v19316_v34, %v25380_v32  ;;  %v14135_v23 = vpack.c.bf16 %v19326_v57, %v19321_v20 }
 0x438   : > { %14124 = vmatprep.subr.bf16.mxu0 %v14123_v54  ;;  %v14137_v54 = vpack.c.bf16 %v25293_v30, %v25292_v62 }
 0x43b   : > { %14126 = vmatpush1.bf16.msra.mxu0 %v14125_v59  ;;  %v25381_v59 = vld [vmem:[#allocation103_spill] sm:$0xff] }
 0x43c   : > { %14128 = vmatprep.subr.bf16.mxu0 %v14127_v37  ;;  %v14139_v13 = vpack.c.bf16 %v25382_v18, %v25381_v59  ;;  %v14141_v37 = vpack.c.bf16 %v19388_v14, %v19383_v44 }
 0x43f   : > { %14130 = vmatpush1.bf16.msra.mxu0 %v14129_v53  ;;  %v25383_v53 = vld [vmem:[#allocation132_spill] sm:$0xff] }
 0x440   : > { %14132 = vmatprep.subr.bf16.mxu0 %v14131_v55  ;;  %v14143_v34 = vpack.c.bf16 %v25384_v48, %v25383_v53  ;;  %v14145_v55 = vpack.c.bf16 %v19471_v40, %v19443_v7 }
 0x443   : > { %14134 = vmatpush1.bf16.msra.mxu0 %v14133_v45  ;;  %v25385_v45 = vld [vmem:[#allocation85_spill] sm:$0xff] }
 0x444   : > { %14136 = vmatprep.subr.bf16.mxu0 %v14135_v23  ;;  %v14147_v30 = vpack.c.bf16 %v25385_v45, %v19485_v61  ;;  %v25386_v23 = vld [vmem:[#allocation99_spill] sm:$0xff] }
 0x445   : > { %v14149_v18 = vpack.c.bf16 %v19524_v50, %v25386_v23 }
 0x447   : > { %14138 = vmatpush1.bf16.msra.mxu0 %v14137_v54  ;;  %v14151_v54 = vpack.c.bf16 %v19569_v36, %v19564_v4 }
 0x448   : > { %14140 = vmatprep.subr.bf16.mxu0 %v14139_v13  ;;  %v14153_v13 = vpack.c.bf16 %v19606_v10, %v19590_v5 }
 0x44b   : > { %14142 = vmatpush1.bf16.msra.mxu0 %v14141_v37  ;;  %v25387_v37 = vld [vmem:[#allocation102_spill] sm:$0xff] }
 0x44c   : > { %14144 = vmatprep.subr.bf16.mxu0 %v14143_v34  ;;  %v14155_v40 = vpack.c.bf16 %v25387_v37, %v19620_v46  ;;  %v14157_v34 = vpack.c.bf16 %v19669_v49, %v19650_v24 }
 0x44f   : > { %14146 = vmatpush1.bf16.msra.mxu0 %v14145_v55  ;;  %v14159_v55 = vpack.c.bf16 %v19697_v8, %v19674_v56  ;;  %v25425_v8 = vld [vmem:[#allocation171_spill] sm:$0xff] }
 0x450   : > { %14148 = vmatprep.subr.bf16.mxu0 %v14147_v30  ;;  %v14161_v30 = vpack.c.bf16 %v19721_v51, %v19716_v15  ;;  %v25390_v51 = vld [vmem:[#allocation248_spill] sm:$0xff]  ;;  %v25424_v15 = vld [vmem:[#allocation237_spill] sm:$0xff] }
 0x453   : > { %14150 = vmatpush1.bf16.msra.mxu0 %v14149_v18  ;;  %v14163_v18 = vpack.c.bf16 %v19739_v1, %v19734_v42  ;;  %v25392_v1 = vld [vmem:[#allocation224_spill] sm:$0xff] }
 0x454   : > { %14152 = vmatprep.subr.bf16.mxu0 %v14151_v54  ;;  %v14165_v54 = vpack.c.bf16 %v19789_v6, %v19768_v3  ;;  %v25394_v6 = vld [vmem:[#allocation83_spill] sm:$0xff] }
 0x457   : > { %14154 = vmatpush1.bf16.msra.mxu0 %v14153_v13  ;;  %v14167_v13 = vpack.c.bf16 %v19813_v47, %v19794_v27  ;;  %v25396_v47 = vld [vmem:[#allocation125_spill] sm:$0xff]  ;;  %v25420_v27 = vld [vmem:[#allocation168_spill] sm:$0xff] }
 0x458   : > { %14156 = vmatprep.subr.bf16.mxu0 %v14155_v40  ;;  %v14169_v40 = vpack.c.bf16 %v19825_v58, %v19820_v2 }
 0x45b   : > { %14158 = vmatpush1.bf16.msra.mxu0 %v14157_v34  ;;  %v25388_v34 = vld [vmem:[#allocation178_spill] sm:$0xff] }
 0x45c   : > { %14160 = vmatprep.subr.bf16.mxu0 %v14159_v55  ;;  %v25389_v55 = vld [vmem:[#allocation78_spill] sm:$0xff] }
 0x45f   : > { %14162 = vmatpush1.bf16.msra.mxu0 %v14161_v30  ;;  %v25391_v30 = vld [vmem:[#allocation179_spill] sm:$0xff] }
 0x460   : > { %14164 = vmatprep.subr.bf16.mxu0 %v14163_v18  ;;  %v25393_v18 = vld [vmem:[#allocation249_spill] sm:$0xff] }
 0x463   : > { %14166 = vmatpush1.bf16.msra.mxu0 %v14165_v54  ;;  %v25395_v54 = vld [vmem:[#allocation226_spill] sm:$0xff] }
 0x464   : > { %14168 = vmatprep.subr.bf16.mxu0 %v14167_v13  ;;  %v25397_v13 = vld [vmem:[#allocation84_spill] sm:$0xff] }
 0x467   : > { %14170 = vmatpush1.bf16.msra.mxu0 %v14169_v40  ;;  %v25398_v40 = vld [vmem:[#allocation250_spill] sm:$0xff] }
 0x468   : > { %14172 = vmatprep.subr.bf16.mxu0 %v25388_v34  ;;  %v25399_v34 = vld [vmem:[#allocation126_spill] sm:$0xff] }
 0x46a   : > { %4528 = vmatmul.mubr.f32.vlgmr.msra.gmra.mrb[16].mxu0 %v25389_v55  ;;  %v25400_v55 = vld [vmem:[#allocation133_spill] sm:$0xff] }
 0x46b   : > { %4535 = vmatprep.mubr.f32.mxu0 %v25390_v51  ;;  %14174 = vmatpush1.bf16.msra.mxu0 %v25391_v30  ;;  %v25401_v51 = vld [vmem:[#allocation251_spill] sm:$0xff]  ;;  %v25402_v30 = vld [vmem:[#allocation134_spill] sm:$0xff] }
 0x46c   : > { %14176 = vmatprep.subr.bf16.mxu0 %v25392_v1  ;;  %v25403_v1 = vld [vmem:[#allocation243_spill] sm:$0xff] }
 0x46e   : > { %4538 = vmatmul.mubr.f32.gmra.mrb[18].mxu0 %v25393_v18  ;;  %v25404_v18 = vld [vmem:[#allocation139_spill] sm:$0xff] }
 0x46f   : > { %4545 = vmatprep.mubr.f32.mxu0 %v25394_v6  ;;  %14178 = vmatpush1.bf16.msra.mxu0 %v25395_v54  ;;  %v25405_v6 = vld [vmem:[#allocation140_spill] sm:$0xff]  ;;  %v25406_v54 = vld [vmem:[#allocation147_spill] sm:$0xff] }
 0x470   : > { %14180 = vmatprep.subr.bf16.mxu0 %v25396_v47 }
 0x472   : > { %4548 = vmatmul.mubr.f32.gmra.mrb[20].mxu0 %v25397_v13  ;;  %v25407_v13 = vld [vmem:[#allocation120_spill] sm:$0xff] }
 0x473   : > { %4555 = vmatprep.mubr.f32.mxu0 %v25398_v40  ;;  %14182 = vmatpush1.bf16.msra.mxu0 %v25399_v34  ;;  %v2832_v47 = vpop.f32.mrb[8].mxu0  ;;  %v25409_v34 = vld [vmem:[#allocation157_spill] sm:$0xff] }
 0x474   : > { %14184 = vmatprep.subr.bf16.mxu0 %v25400_v55  ;;  %v19955_v58 = vadd.f32 %v25407_v13, %v2832_v47  ;;  %v2834_v40 = vpop.f32.mrb[9].mxu0  ;;  %v25411_v55 = vld [vmem:[#allocation148_spill] sm:$0xff] }
 0x475   : > { %v19958_v2 = vadd.f32 %v25409_v34, %v2834_v40  ;;  %v25415_v13 = vld [vmem:[#allocation160_spill] sm:$0xff]  ;;  %v25417_v40 = vld [vmem:[#allocation154_spill] sm:$0xff] }
 0x476   : > { %4558 = vmatmul.mubr.f32.gmra.mrb[22].mxu0 %v25401_v51  ;;  %25408 = vst [vmem:[#allocation220_spill] sm:$0xff] %v19955_v58  ;;  %5348 = vrot.lane.b32.xlu1 %v19955_v58, %s15923_s26  ;;  %v5300_v51 = vsub.f32 0.0, %v19955_v58 }
 0x477   : > { %14186 = vmatpush1.bf16.msra.mxu0 %v25402_v30  ;;  %4695 = vmatprep.mubr.f32.mxu0 %v25403_v1  ;;  %25410 = vst [vmem:[#allocation225_spill] sm:$0xff] %v19958_v2  ;;  %v25412_v1 = vld [vmem:[#allocation153_spill] sm:$0xff] }
 0x478   : > { %14188 = vmatprep.subr.bf16.mxu0 %v25404_v18  ;;  %5316 = vrot.lane.b32.xlu0 %v5300_v51, %s15923_s26  ;;  %v25421_v51 = vld [vmem:[#allocation169_spill] sm:$0xff] }
 0x47b   : > { %14190 = vmatpush1.bf16.msra.mxu0 %v25405_v6  ;;  %v2840_v6 = vpop.f32.mrb[10].mxu0 }
 0x47c   : > { %14192 = vmatprep.subr.bf16.mxu0 %v25406_v54  ;;  %v25413_v54 = vld [vmem:[#allocation159_spill] sm:$0xff]  ;;  %v2842_v47 = vpop.f32.mrb[11].mxu0 }
 0x47d   : > { %v19966_v18 = vadd.f32 %v25413_v54, %v2840_v6  ;;  %v19970_v34 = vadd.f32 %v25415_v13, %v2842_v47  ;;  %v2848_v58 = vpop.f32.mrb[12].mxu0  ;;  %v25422_v13 = vld [vmem:[#allocation166_spill] sm:$0xff] }
 0x47e   : > { %v19978_v3 = vadd.f32 %v25420_v27, %v2848_v58  ;;  %v2850_v54 = vpop.f32.mrb[13].mxu0 }
 0x47f   : > { %14194 = vmatpush1.bf16.msra.mxu0 %v25411_v55  ;;  %25414 = vst [vmem:[#allocation227_spill] sm:$0xff] %v19966_v18  ;;  %25416 = vst [vmem:[#allocation223_spill] sm:$0xff] %v19970_v34  ;;  %v25418_v55 = vld [vmem:[#allocation113_spill] sm:$0xff]  ;;  %5350 = vrot.lane.b32.xlu1 %v19966_v18, %s15923_s26  ;;  %v5301_v6 = vsub.f32 0.0, %v19966_v18  ;;  %v19983_v47 = vadd.f32 %v25421_v51, %v2850_v54  ;;  %v25427_v54 = vld [vmem:[#allocation198_spill] sm:$0xff] }
 0x480   : > { %14196 = vmatprep.subr.bf16.mxu0 %v25412_v1  ;;  %v5195_v30 = vsub.f32 0.0, %v25418_v55  ;;  %v25419_v1 = vld [vmem:[#allocation165_spill] sm:$0xff]  ;;  %v25428_v51 = vld [vmem:[#allocation187_spill] sm:$0xff] }
 0x482   : > { %5211 = vrot.lane.b32.xlu0 %v5195_v30, %s15923_s26  ;;  %v25426_v30 = vld [vmem:[#allocation172_spill] sm:$0xff] }
 0x483   : > { %14198 = vmatpush1.bf16.msra.mxu0 %v25417_v40  ;;  %v25423_v40 = vld [vmem:[#allocation130_spill] sm:$0xff]  ;;  %5318 = vrot.lane.b32.xlu1 %v5301_v6, %s15923_s26  ;;  %v5302_v6 = vsub.f32 0.0, %v19958_v2 }
 0x484   : > { %14200 = vmatprep.subr.bf16.mxu0 %v25419_v1  ;;  %v5196_v42 = vsub.f32 0.0, %v25423_v40  ;;  %v2856_v1 = vpop.f32.mrb[14].mxu0 }
 0x485   : > { %v19990_v27 = vadd.f32 %v25425_v8, %v2856_v1  ;;  %v2858_v58 = vpop.f32.mrb[15].mxu0  ;;  %v25430_v8 = vld [vmem:[#allocation114_spill] sm:$0xff]  ;;  %v25432_v1 = vld [vmem:[#allocation116_spill] sm:$0xff] }
 0x486   : > { %5213 = vrot.lane.b32.xlu0 %v5196_v42, %s15923_s26  ;;  %v19994_v18 = vadd.f32 %v25426_v30, %v2858_v58  ;;  %v25431_v42 = vld [vmem:[#allocation229_spill] sm:$0xff]  ;;  %v5197_v58 = vsub.f32 0.0, %v25432_v1  ;;  %v25433_v30 = vld [vmem:[#allocation228_spill] sm:$0xff] }
 0x487   : > { %14202 = vmatpush1.bf16.msra.mxu0 %v25422_v13  ;;  %5243 = vrot.lane.b32.xlu1 %v25418_v55, %s15923_s26  ;;  %v25438_v13 = vld [vmem:[#allocation170_spill] sm:$0xff] }
 0x488   : > { %14204 = vmatprep.subr.bf16.mxu0 %v25424_v15  ;;  %v25429_v15 = vld [vmem:[#allocation240_spill] sm:$0xff] }
 0x48a   : > { %5320 = vrot.lane.b32.xlu0 %v5302_v6, %s15923_s26  ;;  %v25434_v6 = vld [vmem:[#allocation62_spill] sm:$0xff] }
 0x48b   : > { %14206 = vmatpush1.bf16.msra.mxu0 %v25427_v54  ;;  %5245 = vrot.lane.b32.xlu1 %v25423_v40, %s15923_s26  ;;  %v25437_v54 = vld [vmem:[#allocation104_spill] sm:$0xff] }
 0x48c   : > { %14208 = vmatprep.subr.bf16.mxu0 %v25428_v51 }
 0x48e   : > { %5352 = vrot.lane.b32.xlu0 %v19958_v2, %s15923_s26  ;;  %v5199_v2 = vsub.f32 0.0, %v25438_v13 }
 0x48f   : > { %14210 = vmatpush1.bf16.msra.mxu0 %v25429_v15  ;;  %5354 = vrot.lane.b32.xlu1 %v19970_v34, %s15923_s26  ;;  %v25435_v15 = vld [vmem:[#allocation141_spill] sm:$0xff] }
 0x490   : > { %14212 = vmatprep.subr.bf16.mxu0 %v25430_v8  ;;  %v5198_v51 = vsub.f32 0.0, %v25435_v15  ;;  %v25436_v8 = vld [vmem:[#allocation76_spill] sm:$0xff] }
 0x492   : > { %5215 = vrot.lane.b32.xlu0 %v5197_v58, %s15923_s26  ;;  %v25439_v58 = vld [vmem:[#allocation131_spill] sm:$0xff] }
 0x493   : > { %14214 = vmatpush1.bf16.msra.mxu0 %v25431_v42  ;;  %5247 = vrot.lane.b32.xlu1 %v25432_v1, %s15923_s26  ;;  %v5303_v42 = vsub.f32 0.0, %v19970_v34  ;;  %v25449_v34 = vld [vmem:[#allocation180_spill] sm:$0xff] }
 0x494   : > { %14216 = vmatprep.subr.bf16.mxu0 %v25433_v30  ;;  %v25447_v30 = vand.u32 4294901760, %v25358_v0  ;;  %v5305_v0 = vsub.f32 0.0, %v19990_v27 }
 0x496   : > { %5217 = vrot.lane.b32.xlu0 %v5198_v51, %s15923_s26  ;;  %v25442_v51 = vld [vmem:[#allocation60_spill] sm:$0xff] }
 0x497   : > { %14218 = vmatpush1.bf16.msra.mxu0 %v25434_v6  ;;  %5322 = vrot.lane.b32.xlu1 %v5303_v42, %s15923_s26  ;;  %v25440_v6 = vld [vmem:[#allocation143_spill] sm:$0xff]  ;;  %v25443_v42 = vld [vmem:[#allocation74_spill] sm:$0xff] }
 0x498   : > { %14220 = vmatprep.subr.bf16.mxu0 %v25436_v8  ;;  %v25441_v8 = vld [vmem:[#allocation57_spill] sm:$0xff] }
 0x49a   : > { %5219 = vrot.lane.b32.xlu0 %v5199_v2, %s15923_s26  ;;  %v25444_v2 = vand.u32 4294901760, %v25356_v25  ;;  %v25450_v25 = vand.u32 4294901760, %v25359_v28  ;;  %v5306_v28 = vsub.f32 0.0, %v19983_v47 }
 0x49b   : > { %14222 = vmatpush1.bf16.msra.mxu0 %v25437_v54  ;;  %5249 = vrot.lane.b32.xlu1 %v25435_v15, %s15923_s26 }
 0x49c   : > { %14224 = vmatprep.subr.bf16.mxu0 %v25439_v58  ;;  %v5304_v58 = vsub.f32 0.0, %v19978_v3 }
 0x49e   : > { %5356 = vrot.lane.b32.xlu0 %v19978_v3, %s15923_s26 }
 0x49f   : > { %14226 = vmatpush1.bf16.msra.mxu0 %v25440_v6  ;;  %5251 = vrot.lane.b32.xlu1 %v25438_v13, %s15923_s26  ;;  %v25445_v6 = vand.u32 4294901760, %v25357_v33  ;;  %v5200_v13 = vsub.f32 0.0, %v25449_v34  ;;  %v25451_v33 = vand.u32 4294901760, %v25360_v60  ;;  %v25456_v60 = vand.u32 4294901760, %v25365_v29 }
 0x4a0   : > { %14228 = vmatprep.subr.bf16.mxu0 %v25441_v8  ;;  %v25446_v8 = vld [vmem:[#allocation88_spill] sm:$0xff]  ;;  %v25462_v29 = vand.u32 4294901760, %v19187_v12  ;;  %v25470_v12 = vand.u32 4294901760, %v25372_v26  ;;  %v25477_v26 = vld [vmem:[#allocation58_spill] sm:$0xff] }
 0x4a1   : > { %v14235_v54 = vpack.c.bf16 %v25445_v6, %v25444_v2  ;;  %v14239_v6 = vpack.c.bf16 %v25451_v33, %v25450_v25  ;;  %v25452_v2 = vld [vmem:[#allocation244_spill] sm:$0xff] }
 0x4a2   : > { %5324 = vrot.lane.b32.xlu0 %v5304_v58, %s15923_s26  ;;  %v25453_v58 = vld [vmem:[#allocation255_spill] sm:$0xff]  ;;  %v25458_v25 = vld [vmem:[#allocation256_spill] sm:$0xff] }
 0x4a3   : > { %14230 = vmatpush1.bf16.msra.mxu0 %v25442_v51  ;;  %v25448_v51 = vand.u32 4294901760, %v19112_v35  ;;  %5358 = vrot.lane.b32.xlu1 %v19990_v27, %s15923_s26  ;;  %v25454_v35 = vand.u32 4294901760, %v25363_v43  ;;  %v25460_v43 = vand.u32 4294901760, %v25369_v17  ;;  %v25467_v17 = vand.u32 4294901760, %v19211_v31 }
 0x4a4   : > { %14232 = vmatprep.subr.bf16.mxu0 %v25443_v42  ;;  %v25473_v31 = vand.u32 4294901760, %v19241_v9  ;;  %v25479_v9 = vand.u32 4294901760, %v19267_v16  ;;  %v25488_v16 = vand.u32 4294901760, %v19321_v20  ;;  %v25497_v20 = vand.u32 4294901760, %v19388_v14 }
 0x4a5   : > { %v14237_v15 = vpack.c.bf16 %v25448_v51, %v25447_v30  ;;  %v25455_v30 = vand.u32 4294901760, %v25364_v38  ;;  %v25461_v38 = vand.u32 4294901760, %v19182_v41  ;;  %v25466_v41 = vand.u32 4294901760, %v19197_v63  ;;  %v25472_v63 = vld [vmem:[#allocation63_spill] sm:$0xff] }
 0x4a6   : > { %5221 = vrot.lane.b32.xlu0 %v5200_v13, %s15923_s26  ;;  %v25505_v14 = vand.u32 4294901760, %v25386_v23  ;;  %v25512_v23 = vand.u32 4294901760, %v25387_v37  ;;  %v25522_v37 = vld [vmem:[#allocation158_spill] sm:$0xff] }
 0x4a7   : > { %14234 = vmatpush1.bf16.msra.mxu0 %v25446_v8  ;;  %v14241_v51 = vpack.c.bf16 %v25455_v30, %v25454_v35  ;;  %5326 = vrot.lane.b32.xlu1 %v5305_v0, %s15923_s26  ;;  %v14245_v33 = vpack.c.bf16 %v25461_v38, %v25460_v43  ;;  %v25465_v0 = vld [vmem:[#allocation257_spill] sm:$0xff]  ;;  %v5307_v38 = vsub.f32 0.0, %v19994_v18 }
 0x4a8   : > { %14236 = vmatprep.subr.bf16.mxu0 %v14235_v54  ;;  %v25457_v54 = vand.u32 4294901760, %v25366_v11  ;;  %v25463_v11 = vand.u32 4294901760, %v19192_v21  ;;  %v25468_v35 = vld [vmem:[#allocation177_spill] sm:$0xff]  ;;  %v25469_v21 = vand.u32 4294901760, %v19231_v52  ;;  %v25476_v52 = vand.u32 4294901760, %v25375_v39 }
 0x4a9   : > { %v5201_v30 = vsub.f32 0.0, %v25468_v35 }
 0x4aa   : > { %4699 = vmatmul.mubr.f32.vlgmr.msra.gmra.mrb[16].mxu0 %v25452_v2  ;;  %v14243_v13 = vpack.c.bf16 %v25457_v54, %v25456_v60  ;;  %5328 = vrot.lane.b32.xlu0 %v5306_v28, %s15923_s26  ;;  %v25464_v2 = vld [vmem:[#allocation252_spill] sm:$0xff]  ;;  %v25471_v28 = vld [vmem:[#allocation258_spill] sm:$0xff]  ;;  %v25474_v60 = vand.u32 4294901760, %v19246_v22  ;;  %v25480_v22 = vld [vmem:[#allocation59_spill] sm:$0xff] }
 0x4ab   : > { %4707 = vmatprep.mubr.f32.mxu0 %v25453_v58  ;;  %14238 = vmatpush1.bf16.msra.mxu0 %v14237_v15  ;;  %v25459_v15 = vld [vmem:[#allocation247_spill] sm:$0xff]  ;;  %v14249_v58 = vpack.c.bf16 %v25467_v17, %v25466_v41 }
 0x4ac   : > { %14240 = vmatprep.subr.bf16.mxu0 %v14239_v6  ;;  %5253 = vrot.lane.b32.xlu1 %v25449_v34, %s15923_s26  ;;  %v14247_v6 = vpack.c.bf16 %v25463_v11, %v25462_v29  ;;  %v14253_v54 = vpack.c.bf16 %v25474_v60, %v25473_v31  ;;  %v25482_v11 = vand.u32 4294901760, %v25378_v19  ;;  %v25486_v41 = vld [vmem:[#allocation87_spill] sm:$0xff]  ;;  %v25490_v19 = vand.u32 4294901760, %v25292_v62 }
 0x4ad   : > { %v25487_v17 = vand.u32 4294901760, %v25486_v41  ;;  %v25494_v31 = vld [vmem:[#allocation115_spill] sm:$0xff]  ;;  %v25499_v62 = vand.u32 4294901760, %v25384_v48  ;;  %v25507_v48 = vand.u32 4294901760, %v19564_v4  ;;  %v25514_v4 = vand.u32 4294901760, %v19669_v49  ;;  %v25526_v49 = vld [vmem:[#allocation185_spill] sm:$0xff] }
 0x4ae   : > { %4711 = vmatmul.mubr.f32.gmra.mrb[18].mxu0 %v25458_v25  ;;  %5360 = vrot.lane.b32.xlu0 %v19983_v47, %s15923_s26  ;;  %v25495_v60 = vand.u32 4294901760, %v25494_v31 }
 0x4af   : > { %4719 = vmatprep.mubr.f32.mxu0 %v25459_v15  ;;  %14242 = vmatpush1.bf16.msra.mxu0 %v14241_v51  ;;  %v14251_v51 = vpack.c.bf16 %v25470_v12, %v25469_v21  ;;  %v25478_v15 = vand.u32 4294901760, %v25477_v26  ;;  %v25491_v12 = vld [vmem:[#allocation100_spill] sm:$0xff] }
 0x4b0   : > { %14244 = vmatprep.subr.bf16.mxu0 %v14243_v13  ;;  %5362 = vrot.lane.b32.xlu1 %v19994_v18, %s15923_s26  ;;  %v25475_v13 = vld [vmem:[#allocation186_spill] sm:$0xff] }
 0x4b1   : > { %v5202_v25 = vsub.f32 0.0, %v25475_v13  ;;  %v14255_v43 = vpack.c.bf16 %v25478_v15, %v25476_v52  ;;  %v25500_v15 = vand.u32 4294901760, %v19443_v7  ;;  %v25508_v7 = vand.u32 4294901760, %v19569_v36 }
 0x4b2   : > { %4723 = vmatmul.mubr.f32.gmra.mrb[20].mxu0 %v25464_v2  ;;  %5223 = vrot.lane.b32.xlu0 %v5201_v30, %s15923_s26  ;;  %v25489_v30 = vand.u32 4294901760, %v19326_v57  ;;  %v25498_v57 = vand.u32 4294901760, %v25383_v53  ;;  %v25506_v53 = vand.u32 4294901760, %v19524_v50  ;;  %v25513_v50 = vand.u32 4294901760, %v19650_v24 }
 0x4b3   : > { %4731 = vmatprep.mubr.f32.mxu0 %v25465_v0  ;;  %14246 = vmatpush1.bf16.msra.mxu0 %v14245_v33  ;;  %v25481_v33 = vand.u32 4294901760, %v25480_v22  ;;  %v25485_v0 = vand.u32 4294901760, %v25380_v32  ;;  %v25493_v32 = vand.u32 4294901760, %v25381_v59  ;;  %v25515_v36 = vand.u32 4294901760, %v19674_v56 }
 0x4b4   : > { %14248 = vmatprep.subr.bf16.mxu0 %v14247_v6  ;;  %5255 = vrot.lane.b32.xlu1 %v25468_v35, %s15923_s26  ;;  %v25483_v6 = vld [vmem:[#allocation75_spill] sm:$0xff]  ;;  %v14263_v21 = vpack.c.bf16 %v25489_v30, %v25488_v16  ;;  %v14271_v26 = vpack.c.bf16 %v25499_v62, %v25498_v57  ;;  %v25523_v30 = vand.u32 4294901760, %v25522_v37  ;;  %v25536_v57 = vld [vmem:[#allocation217_spill] sm:$0xff] }
 0x4b5   : > { %v14257_v29 = vpack.c.bf16 %v25481_v33, %v25479_v9  ;;  %v25484_v39 = vand.u32 4294901760, %v25483_v6  ;;  %v25503_v9 = vand.u32 4294901760, %v19485_v61  ;;  %v14277_v33 = vpack.c.bf16 %v25506_v53, %v25505_v14  ;;  %v25545_v14 = vld [vmem:[#allocation226_spill] sm:$0xff]  ;;  %v25546_v53 = vld [vmem:[#allocation125_spill] sm:$0xff] }
 0x4b6   : > { %4735 = vmatmul.mubr.f32.gmra.mrb[22].mxu0 %v25471_v28  ;;  %5225 = vrot.lane.b32.xlu0 %v5202_v25, %s15923_s26  ;;  %v25496_v25 = vand.u32 4294901760, %v19383_v44  ;;  %v25504_v44 = vand.u32 4294901760, %v25385_v45  ;;  %v25510_v61 = vand.u32 4294901760, %v19606_v10  ;;  %v25511_v45 = vand.u32 4294901760, %v19620_v46  ;;  %v25518_v10 = vld [vmem:[#allocation144_spill] sm:$0xff] }
 0x4b7   : > { %14250 = vmatpush1.bf16.msra.mxu0 %v14249_v58  ;;  %4998 = vmatprep.mubr.f32.mxu0 %v25472_v63  ;;  %v14259_v2 = vpack.c.bf16 %v25484_v39, %v25482_v11  ;;  %v14261_v58 = vpack.c.bf16 %v25487_v17, %v25485_v0  ;;  %v25509_v11 = vand.u32 4294901760, %v19590_v5  ;;  %v25516_v0 = vld [vmem:[#allocation127_spill] sm:$0xff]  ;;  %v25519_v17 = vand.u32 4294901760, %v25518_v10 }
 0x4b8   : > { %14252 = vmatprep.subr.bf16.mxu0 %v14251_v51  ;;  %5330 = vrot.lane.b32.xlu1 %v5307_v38, %s15923_s26  ;;  %v25492_v51 = vand.u32 4294901760, %v25491_v12  ;;  %v14269_v52 = vpack.c.bf16 %v25497_v20, %v25496_v25  ;;  %v14275_v22 = vpack.c.bf16 %v25504_v44, %v25503_v9  ;;  %v14283_v39 = vpack.c.bf16 %v25512_v23, %v25511_v45  ;;  %v25534_v20 = vld [vmem:[#allocation210_spill] sm:$0xff]  ;;  %v25542_v9 = vld [vmem:[#allocation224_spill] sm:$0xff]  ;;  %v25554_v10 = vld [vmem:[#allocation139_spill] sm:$0xff] }
 0x4b9   : > { %v14281_v6 = vpack.c.bf16 %v25510_v61, %v25509_v11  ;;  %v25517_v5 = vand.u32 4294901760, %v25516_v0  ;;  %v25527_v12 = vand.u32 4294901760, %v25526_v49  ;;  %v25537_v62 = vand.u32 4294901760, %v25536_v57  ;;  %v25543_v44 = vld [vmem:[#allocation242_spill] sm:$0xff]  ;;  %v20214_v45 = vld [vmem:[#allocation11] sm:$0xff]  ;;  %v25557_v49 = vld [vmem:[#allocation147_spill] sm:$0xff] }
 0x4ba   : > { %v14265_v28 = vpack.c.bf16 %v25492_v51, %v25490_v19  ;;  %v25528_v51 = vld [vmem:[#allocation195_spill] sm:$0xff]  ;;  %v25553_v0 = vld [vmem:[#allocation134_spill] sm:$0xff] }
 0x4bb   : > { %14254 = vmatpush1.bf16.msra.mxu0 %v14253_v54  ;;  %v14267_v54 = vpack.c.bf16 %v25495_v60, %v25493_v32  ;;  %v14287_v41 = vpack.c.bf16 %v25517_v5, %v25515_v36  ;;  %v25529_v56 = vand.u32 4294901760, %v25528_v51  ;;  %v25530_v32 = vld [vmem:[#allocation196_spill] sm:$0xff]  ;;  %v25532_v60 = vld [vmem:[#allocation207_spill] sm:$0xff] }
 0x4bc   : > { %14256 = vmatprep.subr.bf16.mxu0 %v14255_v43  ;;  %5257 = vrot.lane.b32.xlu1 %v25475_v13, %s15923_s26  ;;  %v25501_v43 = vld [vmem:[#allocation71_spill] sm:$0xff]  ;;  %v25531_v31 = vand.u32 4294901760, %v25530_v32  ;;  %v25558_v32 = vld [vmem:[#allocation148_spill] sm:$0xff] }
 0x4bd   : > { %v25502_v59 = vand.u32 4294901760, %v25501_v43  ;;  %v25539_v43 = vld [vmem:[#allocation64_spill] sm:$0xff]  ;;  %v20211_v11 = vld [vmem:[#allocation12] sm:$0xff] }
 0x4bf   : > { %14258 = vmatpush1.bf16.msra.mxu0 %v14257_v29  ;;  %v14273_v38 = vpack.c.bf16 %v25502_v59, %v25500_v15  ;;  %v14279_v29 = vpack.c.bf16 %v25508_v7, %v25507_v48  ;;  %v25538_v15 = vld [vmem:[#allocation178_spill] sm:$0xff]  ;;  %v25540_v59 = vld [vmem:[#allocation241_spill] sm:$0xff] }
 0x4c0   : > { %14260 = vmatprep.subr.bf16.mxu0 %v14259_v2  ;;  %v14285_v2 = vpack.c.bf16 %v25514_v4, %v25513_v50  ;;  %v25548_v7 = vld [vmem:[#allocation245_spill] sm:$0xff] }
 0x4c3   : > { %14262 = vmatpush1.bf16.msra.mxu0 %v14261_v58  ;;  %v25520_v58 = vld [vmem:[#allocation155_spill] sm:$0xff] }
 0x4c4   : > { %14264 = vmatprep.subr.bf16.mxu0 %v14263_v21  ;;  %v25521_v46 = vand.u32 4294901760, %v25520_v58  ;;  %v25524_v21 = vld [vmem:[#allocation167_spill] sm:$0xff] }
 0x4c5   : > { %v25525_v24 = vand.u32 4294901760, %v25524_v21  ;;  %v25556_v21 = vld [vmem:[#allocation227_spill] sm:$0xff] }
 0x4c6   : > { %v14289_v16 = vpack.c.bf16 %v25521_v46, %v25519_v17  ;;  %v20224_v17 = vld [vmem:[#allocation12 + $0x8] sm:$0xff] }
 0x4c7   : > { %14266 = vmatpush1.bf16.msra.mxu0 %v14265_v28  ;;  %v14291_v19 = vpack.c.bf16 %v25525_v24, %v25523_v30  ;;  %v14293_v28 = vpack.c.bf16 %v25529_v56, %v25527_v12  ;;  %v25555_v30 = vld [vmem:[#allocation140_spill] sm:$0xff] }
 0x4c8   : > { %14268 = vmatprep.subr.bf16.mxu0 %v14267_v54  ;;  %v25533_v54 = vand.u32 4294901760, %v25532_v60 }
 0x4ca   : > { %v14295_v25 = vpack.c.bf16 %v25533_v54, %v25531_v31  ;;  %v5276_v31 = vmul.f32 %v20214_v45, %v25418_v55 }
 0x4cb   : > { %14270 = vmatpush1.bf16.msra.mxu0 %v14269_v52  ;;  %v25535_v52 = vand.u32 4294901760, %v25534_v20  ;;  %v25559_v20 = vld [vmem:[#allocation153_spill] sm:$0xff] }
 0x4cc   : > { %14272 = vmatprep.subr.bf16.mxu0 %v14271_v26 }
 0x4cd   : > { %v14297_v26 = vpack.c.bf16 %v25537_v62, %v25535_v52 }
 0x4cf   : > { %14274 = vmatpush1.bf16.msra.mxu0 %v14273_v38  ;;  %v25541_v38 = vld [vmem:[#allocation179_spill] sm:$0xff] }
 0x4d0   : > { %14276 = vmatprep.subr.bf16.mxu0 %v14275_v22  ;;  %v25544_v22 = vld [vmem:[#allocation69_spill] sm:$0xff] }
 0x4d3   : > { %14278 = vmatpush1.bf16.msra.mxu0 %v14277_v33  ;;  %v25547_v33 = vld [vmem:[#allocation70_spill] sm:$0xff] }
 0x4d4   : > { %14280 = vmatprep.subr.bf16.mxu0 %v14279_v29  ;;  %v25549_v29 = vld [vmem:[#allocation126_spill] sm:$0xff] }
 0x4d7   : > { %14282 = vmatpush1.bf16.msra.mxu0 %v14281_v6  ;;  %v25550_v6 = vld [vmem:[#allocation133_spill] sm:$0xff] }
 0x4d8   : > { %14284 = vmatprep.subr.bf16.mxu0 %v14283_v39  ;;  %v25551_v39 = vld [vmem:[#allocation220_spill] sm:$0xff] }
 0x4d9   : > { %v5380_v50 = vmul.f32 %v25551_v39, %v20214_v45 }
 0x4db   : > { %14286 = vmatpush1.bf16.msra.mxu0 %v14285_v2  ;;  %v25552_v2 = vld [vmem:[#allocation246_spill] sm:$0xff] }
 0x4dc   : > { %14288 = vmatprep.subr.bf16.mxu0 %v14287_v41 }
 0x4df   : > { %14290 = vmatpush1.bf16.msra.mxu0 %v14289_v16  ;;  %v20226_v16 = vld [vmem:[#allocation11 + $0x8] sm:$0xff] }
 0x4e0   : > { %14292 = vmatprep.subr.bf16.mxu0 %v14291_v19  ;;  %v5381_v24 = vmul.f32 %v25556_v21, %v20226_v16  ;;  %v25564_v21 = vld [vmem:[#allocation237_spill] sm:$0xff] }
 0x4e3   : > { %14294 = vmatpush1.bf16.msra.mxu0 %v14293_v28 }
 0x4e4   : > { %14296 = vmatprep.subr.bf16.mxu0 %v14295_v25 }
 0x4e7   : > { %14298 = vmatpush1.bf16.msra.mxu0 %v14297_v26 }
 0x4e8   : > { %14300 = vmatprep.subr.bf16.mxu0 %v25538_v15  ;;  %v5349_v48 = vpop.permute.xlu1 %5348 }
 0x4ea   : > { %5000 = vmatmul.mubr.f32.vlgmr.msra.gmra.mrb[16].mxu0 %v25539_v43  ;;  %v5317_v61 = vpop.permute.xlu0 %5316 }
 0x4eb   : > { %5006 = vmatprep.mubr.f32.mxu0 %v25540_v59  ;;  %14302 = vmatpush1.bf16.msra.mxu0 %v25541_v38  ;;  %v5372_v23 = vsel %vm5267_vm0, %v5317_v61, %v5349_v48  ;;  %v5277_v38 = vmul.f32 %v20226_v16, %v25423_v40 }
 0x4ec   : > { %14304 = vmatprep.subr.bf16.mxu0 %v25542_v9  ;;  %v5388_v4 = vmul.f32 %v5372_v23, %v20211_v11  ;;  %v25562_v23 = vld [vmem:[#allocation225_spill] sm:$0xff] }
 0x4ed   : > { %v5382_v39 = vmul.f32 %v25562_v23, %v20214_v45 }
 0x4ee   : > { %5008 = vmatmul.mubr.f32.gmra.mrb[18].mxu0 %v25543_v44  ;;  %v5396_v5 = vadd.f32 %v5388_v4, %v5380_v50 }
 0x4ef   : > { %5014 = vmatprep.mubr.f32.mxu0 %v25544_v22  ;;  %14306 = vmatpush1.bf16.msra.mxu0 %v25545_v14  ;;  %v25560_v14 = vld [vmem:[#allocation154_spill] sm:$0xff] }
 0x4f0   : > { %14308 = vmatprep.subr.bf16.mxu0 %v25546_v53  ;;  %v5405_v58 = vand.u32 4294901760, %v5396_v5 }
 0x4f1   : > { %v5351_v36 = vpop.permute.xlu1 %5350 }
 0x4f2   : > { %5016 = vmatmul.mubr.f32.gmra.mrb[20].mxu0 %v25547_v33  ;;  %v5493_v12 = vsub.f32 %v5396_v5, %v5405_v58 }
 0x4f3   : > { %5022 = vmatprep.mubr.f32.mxu0 %v25548_v7  ;;  %14310 = vmatpush1.bf16.msra.mxu0 %v25549_v29  ;;  %v25561_v29 = vld [vmem:[#allocation165_spill] sm:$0xff] }
 0x4f4   : > { %14312 = vmatprep.subr.bf16.mxu0 %v25550_v6  ;;  %v5212_v41 = vpop.permute.xlu0 %5211  ;;  %v5494_v52 = vand.u32 4294901760, %v5493_v12 }
 0x4f5   : > { %v5319_v46 = vpop.permute.xlu1 %5318 }
 0x4f6   : > { %5024 = vmatmul.mubr.f32.gmra.mrb[22].mxu0 %v25552_v2  ;;  %v5373_v37 = vsel %vm5267_vm0, %v5319_v46, %v5351_v36  ;;  %v5495_v50 = vsub.f32 %v5493_v12, %v5494_v52 }
 0x4f7   : > { %14314 = vmatpush1.bf16.msra.mxu0 %v25553_v0  ;;  %5159 = vmatprep.mubr.f32.mxu0 %v25472_v63  ;;  %v5389_v19 = vmul.f32 %v5373_v37, %v20224_v17 }
 0x4f8   : > { %14316 = vmatprep.subr.bf16.mxu0 %v25554_v10  ;;  %v5214_v63 = vpop.permute.xlu0 %5213  ;;  %v25563_v10 = vld [vmem:[#allocation166_spill] sm:$0xff] }
 0x4f9   : > { %v5397_v51 = vadd.f32 %v5389_v19, %v5381_v24  ;;  %v5244_v56 = vpop.permute.xlu1 %5243  ;;  %v5496_v19 = vand.u32 4294901760, %v5495_v50  ;;  %v25570_v50 = vld [vmem:[#allocation229_spill] sm:$0xff] }
 0x4fa   : > { %v5268_v28 = vsel %vm5267_vm0, %v5212_v41, %v5244_v56  ;;  %v25565_v56 = vld [vmem:[#allocation198_spill] sm:$0xff] }
 0x4fb   : > { %14318 = vmatpush1.bf16.msra.mxu0 %v25555_v30  ;;  %v5408_v60 = vand.u32 4294901760, %v5397_v51  ;;  %v5284_v54 = vmul.f32 %v5268_v28, %v20211_v11 }
 0x4fc   : > { %14320 = vmatprep.subr.bf16.mxu0 %v25557_v49  ;;  %v5321_v25 = vpop.permute.xlu0 %5320 }
 0x4fd   : > { %v20240_v57 = vpack.c.bf16 %v5408_v60, %v5405_v58  ;;  %v5500_v62 = vsub.f32 %v5397_v51, %v5408_v60  ;;  %v5292_v26 = vadd.f32 %v5284_v54, %v5276_v31  ;;  %v5246_v15 = vpop.permute.xlu1 %5245 }
 0x4fe   : > { %v5269_v9 = vsel %vm5267_vm0, %v5214_v63, %v5246_v15  ;;  %v25567_v15 = vld [vmem:[#allocation240_spill] sm:$0xff] }
 0x4ff   : > { %14322 = vmatpush1.bf16.msra.mxu0 %v25558_v32  ;;  %v20246_v55 = vand.u32 4294901760, %v5292_v26  ;;  %v5285_v53 = vmul.f32 %v5269_v9, %v20224_v17  ;;  %14376 = vmatprep.subr.bf16.mxu1 %v20240_v57  ;;  %v5501_v61 = vand.u32 4294901760, %v5500_v62  ;;  %v20251_v6 = vpack.c.bf16 %v5500_v62, %v5493_v12 }
 0x500   : > { %14324 = vmatprep.subr.bf16.mxu0 %v25559_v20  ;;  %v5353_v48 = vpop.permute.xlu0 %5352  ;;  %14378 = vmatpush3.bf16.xpose.msra.mxu1 %v20240_v57  ;;  %v5278_v32 = vmul.f32 %v20214_v45, %v25432_v1  ;;  %v25566_v20 = vld [vmem:[#allocation187_spill] sm:$0xff] }
 0x501   : > { %v5374_v40 = vsel %vm5267_vm0, %v5321_v25, %v5353_v48  ;;  %v20258_v4 = vsub.f32 %v5292_v26, %v20246_v55  ;;  %v5293_v36 = vadd.f32 %v5285_v53, %v5277_v38  ;;  %v5355_v5 = vpop.permute.xlu1 %5354  ;;  %v14379_v41 = vpack.c.bf16 %v5501_v61, %v5494_v52  ;;  %v25568_v1 = vld [vmem:[#allocation223_spill] sm:$0xff] }
 0x502   : > { %v5390_v0 = vmul.f32 %v5374_v40, %v20211_v11  ;;  %v5502_v58 = vsub.f32 %v5500_v62, %v5501_v61  ;;  %v5383_v38 = vmul.f32 %v25568_v1, %v20226_v16  ;;  %v25575_v1 = vld [vmem:[#allocation76_spill] sm:$0xff] }
 0x503   : > { %14326 = vmatpush1.bf16.msra.mxu0 %v25560_v14  ;;  %v20262_v46 = vand.u32 4294901760, %v5293_v36  ;;  %14380 = vmatprep.subr.bf16.mxu1 %v14379_v41  ;;  %v5473_v24 = vand.u32 4294901760, %v20258_v4 }
 0x504   : > { %14328 = vmatprep.subr.bf16.mxu0 %v25561_v29  ;;  %v5398_v37 = vadd.f32 %v5390_v0, %v5382_v39  ;;  %v5216_v30 = vpop.permute.xlu0 %5215  ;;  %v5503_v63 = vand.u32 4294901760, %v5502_v58  ;;  %v25569_v29 = vld [vmem:[#allocation114_spill] sm:$0xff]  ;;  %v25572_v58 = vld [vmem:[#allocation228_spill] sm:$0xff] }
 0x505   : > { %v20267_v49 = vsub.f32 %v5293_v36, %v20262_v46  ;;  %12900 = vmatprep.mubr.f32.mxu1 %v5473_v24  ;;  %v5248_v12 = vpop.permute.xlu1 %5247  ;;  %v25571_v36 = vld [vmem:[#allocation141_spill] sm:$0xff] }
 0x506   : > { %v5270_v51 = vsel %vm5267_vm0, %v5216_v30, %v5248_v12  ;;  %v20273_v28 = vpack.c.bf16 %v5503_v63, %v5496_v19  ;;  %v5907_v60 = vand.u32 4294901760, %v5398_v37  ;;  %v5279_v0 = vmul.f32 %v20226_v16, %v25571_v36 }
 0x507   : > { %14330 = vmatpush1.bf16.msra.mxu0 %v25563_v10  ;;  %v5483_v31 = vand.u32 4294901760, %v20267_v49  ;;  %v5286_v54 = vmul.f32 %v5270_v51, %v20211_v11  ;;  %v25573_v51 = vld [vmem:[#allocation170_spill] sm:$0xff] }
 0x508   : > { %14332 = vmatprep.subr.bf16.mxu0 %v25564_v21  ;;  %v5218_v25 = vpop.permute.xlu0 %5217  ;;  %v5995_v9 = vsub.f32 %v5398_v37, %v5907_v60 }
 0x509   : > { %v5294_v52 = vadd.f32 %v5286_v54, %v5278_v32  ;;  %12901 = vmatmul.mubr.f32.vlgmr.msra.gmra.mrb[8].mxu1 %v5483_v31  ;;  %v5323_v62 = vpop.permute.xlu1 %5322  ;;  %v25574_v54 = vld [vmem:[#allocation62_spill] sm:$0xff] }
 0x50a   : > { %14382 = vmatpush3.bf16.xpose.msra.mxu1 %v14379_v41  ;;  %v5375_v26 = vsel %vm5267_vm0, %v5323_v62, %v5355_v5  ;;  %12907 = vmatprep.mubr.f32.mxu1 %v20246_v55  ;;  %v5996_v37 = vand.u32 4294901760, %v5995_v9 }
 0x50b   : > { %14334 = vmatpush1.bf16.msra.mxu0 %v25565_v56  ;;  %v20286_v14 = vand.u32 4294901760, %v5294_v52  ;;  %v5391_v53 = vmul.f32 %v5375_v26, %v20224_v17  ;;  %14384 = vmatprep.subr.bf16.mxu1 %v20240_v57  ;;  %v5280_v56 = vmul.f32 %v20214_v45, %v25573_v51  ;;  %v5384_v26 = vmul.f32 %v19978_v3, %v20214_v45  ;;  %v25576_v3 = vld [vmem:[#allocation104_spill] sm:$0xff] }
 0x50c   : > { %14336 = vmatprep.subr.bf16.mxu0 %v25566_v20  ;;  %v5220_v48 = vpop.permute.xlu0 %5219 }
 0x50d   : > { %v20293_v61 = vsub.f32 %v5294_v52, %v20286_v14  ;;  %v5399_v23 = vadd.f32 %v5391_v53, %v5383_v38  ;;  %v5250_v39 = vpop.permute.xlu1 %5249  ;;  %v5997_v52 = vsub.f32 %v5995_v9, %v5996_v37 }
 0x50e   : > { %v5271_v40 = vsel %vm5267_vm0, %v5218_v25, %v5250_v39 }
 0x50f   : > { %14338 = vmatpush1.bf16.msra.mxu0 %v25567_v15  ;;  %v5910_v5 = vand.u32 4294901760, %v5399_v23  ;;  %v5287_v41 = vmul.f32 %v5271_v40, %v20224_v17  ;;  %v5975_v30 = vand.u32 4294901760, %v20293_v61 }
 0x510   : > { %14340 = vmatprep.subr.bf16.mxu0 %v25569_v29  ;;  %v5357_v10 = vpop.permute.xlu0 %5356 }
 0x511   : > { %v20302_v21 = vpack.c.bf16 %v5910_v5, %v5907_v60  ;;  %v6002_v19 = vsub.f32 %v5399_v23, %v5910_v5  ;;  %v5295_v63 = vadd.f32 %v5287_v41, %v5279_v0  ;;  %12908 = vmatmul.mubr.f32.vlgmr.msra.gmra.mrb[8].mxu1 %v20262_v46  ;;  %v5252_v12 = vpop.permute.xlu1 %5251  ;;  %v5976_v38 = vsub.f32 %v20293_v61, %v5975_v30  ;;  %v25577_v5 = vld [vmem:[#allocation131_spill] sm:$0xff] }
 0x512   : > { %14386 = vmatpush3.bf16.xpose.msra.mxu1 %v20240_v57  ;;  %v5272_v32 = vsel %vm5267_vm0, %v5220_v48, %v5252_v12  ;;  %12914 = vmatprep.mubr.f32.mxu1 %v20246_v55  ;;  %v5998_v41 = vand.u32 4294901760, %v5997_v52  ;;  %v25579_v52 = vld [vmem:[#allocation57_spill] sm:$0xff] }
 0x513   : > { %14342 = vmatpush1.bf16.msra.mxu0 %v25570_v50  ;;  %v20310_v25 = vand.u32 4294901760, %v5295_v63  ;;  %v5288_v20 = vmul.f32 %v5272_v32, %v20211_v11  ;;  %14388 = vmatprep.subr.bf16.mxu1 %v20302_v21  ;;  %v6003_v62 = vand.u32 4294901760, %v6002_v19  ;;  %v20322_v53 = vpack.c.bf16 %v6002_v19, %v5995_v9 }
 0x514   : > { %14344 = vmatprep.subr.bf16.mxu0 %v25572_v58  ;;  %v5325_v60 = vpop.permute.xlu0 %5324  ;;  %v5977_v12 = vand.u32 4294901760, %v5976_v38 }
 0x515   : > { %v5376_v15 = vsel %vm5267_vm0, %v5325_v60, %v5357_v10  ;;  %v20325_v48 = vsub.f32 %v5295_v63, %v20310_v25  ;;  %v20327_v29 = vadd.f32 %v5288_v20, %v5280_v56  ;;  %v5359_v39 = vpop.permute.xlu1 %5358  ;;  %v6004_v40 = vsub.f32 %v6002_v19, %v6003_v62  ;;  %v25578_v56 = vld [vmem:[#allocation143_spill] sm:$0xff] }
 0x516   : > { %v5392_v23 = vmul.f32 %v5376_v15, %v20211_v11  ;;  %v20331_v50 = vpack.c.bf16 %v6003_v62, %v5996_v37  ;;  %v5385_v19 = vmul.f32 %v19990_v27, %v20226_v16 }
 0x517   : > { %14346 = vmatpush1.bf16.msra.mxu0 %v25574_v54  ;;  %v6005_v9 = vand.u32 4294901760, %v6004_v40  ;;  %v5985_v10 = vand.u32 4294901760, %v20325_v48 }
 0x518   : > { %14348 = vmatprep.subr.bf16.mxu0 %v25575_v1  ;;  %v5400_v36 = vadd.f32 %v5392_v23, %v5384_v26  ;;  %v5222_v0 = vpop.permute.xlu0 %5221  ;;  %v5281_v26 = vmul.f32 %v20226_v16, %v25449_v34  ;;  %v25580_v1 = vld [vmem:[#allocation60_spill] sm:$0xff] }
 0x519   : > { %12915 = vmatmul.mubr.f32.vlgmr.msra.gmra.mrb[8].mxu1 %v20262_v46  ;;  %v5327_v63 = vpop.permute.xlu1 %5326  ;;  %v14391_v51 = vpack.c.bf16 %v6005_v9, %v5998_v41  ;;  %v5986_v60 = vsub.f32 %v20325_v48, %v5985_v10 }
 0x51a   : > { %v6409_v58 = vand.u32 4294901760, %v5400_v36  ;;  %14390 = vmatpush3.bf16.xpose.msra.mxu1 %v20302_v21  ;;  %v5377_v37 = vsel %vm5267_vm0, %v5327_v63, %v5359_v39  ;;  %12921 = vmatprep.mubr.f32.mxu1 %v5977_v12 }
 0x51b   : > { %14350 = vmatpush1.bf16.msra.mxu0 %v25576_v3  ;;  %v5393_v54 = vmul.f32 %v5377_v37, %v20224_v17  ;;  %14392 = vmatprep.subr.bf16.mxu1 %v14391_v51  ;;  %v5987_v40 = vand.u32 4294901760, %v5986_v60 }
 0x51c   : > { %14352 = vmatprep.subr.bf16.mxu0 %v25577_v5  ;;  %v6497_v32 = vsub.f32 %v5400_v36, %v6409_v58  ;;  %v5329_v20 = vpop.permute.xlu0 %5328  ;;  %v5386_v36 = vmul.f32 %v19983_v47, %v20214_v45 }
 0x51d   : > { %v5401_v62 = vadd.f32 %v5393_v54, %v5385_v19 }
 0x51e   : > { %v5254_v27 = vpop.permute.xlu1 %5253  ;;  %v6498_v3 = vand.u32 4294901760, %v6497_v32 }
 0x51f   : > { %14354 = vmatpush1.bf16.msra.mxu0 %v25578_v56  ;;  %v5273_v15 = vsel %vm5267_vm0, %v5222_v0, %v5254_v27  ;;  %v6412_v38 = vand.u32 4294901760, %v5401_v62 }
 0x520   : > { %14356 = vmatprep.subr.bf16.mxu0 %v25579_v52  ;;  %v5289_v23 = vmul.f32 %v5273_v15, %v20224_v17  ;;  %v5361_v39 = vpop.permute.xlu0 %5360  ;;  %v6499_v47 = vsub.f32 %v6497_v32, %v6498_v3 }
 0x521   : > { %v5378_v5 = vsel %vm5267_vm0, %v5329_v20, %v5361_v39  ;;  %v20355_v41 = vpack.c.bf16 %v6412_v38, %v6409_v58  ;;  %v6504_v34 = vsub.f32 %v5401_v62, %v6412_v38  ;;  %12922 = vmatmul.mubr.f32.vlgmr.msra.gmra.mrb[10].mxu1 %v5987_v40 }
 0x522   : > { %v20357_v9 = vadd.f32 %v5289_v23, %v5281_v26  ;;  %v5394_v0 = vmul.f32 %v5378_v5, %v20211_v11  ;;  %v5363_v63 = vpop.permute.xlu1 %5362  ;;  %14394 = vmatpush3.bf16.xpose.msra.mxu1 %v14391_v51  ;;  %12928 = vmatprep.mubr.f32.mxu1 %v20286_v14  ;;  %v5282_v51 = vmul.f32 %v20214_v45, %v25468_v35 }
 0x523   : > { %14358 = vmatpush1.bf16.msra.mxu0 %v25580_v1  ;;  %14396 = vmatprep.subr.bf16.mxu1 %v20322_v53  ;;  %v20363_v19 = vpack.c.bf16 %v6504_v34, %v6497_v32  ;;  %v6500_v32 = vand.u32 4294901760, %v6499_v47  ;;  %v5484_v23 = vsub.f32 %v20267_v49, %v5483_v31 }
 0x524   : > { %14360 = vmatprep.subr.bf16.mxu0 %v25443_v42  ;;  %v5402_v12 = vadd.f32 %v5394_v0, %v5386_v36  ;;  %v6505_v42 = vand.u32 4294901760, %v6504_v34  ;;  %v5224_v58 = vpop.permute.xlu0 %5223 }
 0x526   : > { %v5256_v37 = vpop.permute.xlu1 %5255  ;;  %v6506_v56 = vsub.f32 %v6504_v34, %v6505_v42  ;;  %v20366_v54 = vpack.c.bf16 %v6505_v42, %v6498_v3  ;;  %v6911_v20 = vand.u32 4294901760, %v5402_v12 }
 0x527   : > { %14362 = vmatpush1.bf16.msra.mxu0 %v25446_v8  ;;  %v5274_v8 = vsel %vm5267_vm0, %v5224_v58, %v5256_v37 }
 0x528   : > { %14364 = vmatprep.subr.bf16.mxu0 %v20240_v57  ;;  %v5290_v60 = vmul.f32 %v5274_v8, %v20211_v11  ;;  %v6507_v52 = vand.u32 4294901760, %v6506_v56  ;;  %v6999_v11 = vsub.f32 %v5402_v12, %v6911_v20  ;;  %v5226_v45 = vpop.permute.xlu0 %5225 }
 0x529   : > { %12929 = vmatmul.mubr.f32.vlgmr.msra.gmra.mrb[10].mxu1 %v20310_v25 }
 0x52a   : > { %5161 = vmatmul.mubr.f32.vlgmr.msra.gmra.mrb[16].mxu0 %v25539_v43  ;;  %v20374_v62 = vadd.f32 %v5290_v60, %v5282_v51  ;;  %v5331_v27 = vpop.permute.xlu1 %5330  ;;  %v20377_v26 = vpack.c.bf16 %v6507_v52, %v6500_v32  ;;  %14398 = vmatpush3.bf16.xpose.msra.mxu1 %v20322_v53  ;;  %v5387_v43 = vmul.f32 %v19994_v18, %v20226_v16 }
 0x52b   : > { %5167 = vmatprep.mubr.f32.mxu0 %v25540_v59  ;;  %v5379_v35 = vsel %vm5267_vm0, %v5331_v27, %v5363_v63  ;;  %12935 = vmatprep.mubr.f32.mxu1 %v20293_v61  ;;  %v5474_v18 = vsub.f32 %v20258_v4, %v5473_v24  ;;  %v6475_v61 = vand.u32 4294901760, %v20327_v29 }
 0x52c   : > { %v5395_v59 = vmul.f32 %v5379_v35, %v20224_v17  ;;  %14400 = vmatprep.subr.bf16.mxu1 %v20302_v21 }
 0x52e   : > { %5169 = vmatmul.mubr.f32.gmra.mrb[18].mxu0 %v25543_v44  ;;  %v5403_v44 = vadd.f32 %v5395_v59, %v5387_v43  ;;  %v5258_v53 = vpop.permute.xlu1 %5257 }
 0x52f   : > { %5175 = vmatprep.mubr.f32.mxu0 %v25544_v22  ;;  %v5275_v15 = vsel %vm5267_vm0, %v5226_v45, %v5258_v53  ;;  %v5283_v22 = vmul.f32 %v20226_v16, %v25475_v13  ;;  %v5485_v16 = vand.u32 4294901760, %v5484_v23 }
 0x530   : > { %14366 = vmatpush3.bf16.xpose.msra.mxu0 %v20240_v57  ;;  %v6914_v1 = vand.u32 4294901760, %v5403_v44  ;;  %v5291_v38 = vmul.f32 %v5275_v15, %v20224_v17  ;;  %v7000_v57 = vand.u32 4294901760, %v6999_v11 }
 0x531   : > { %14368 = vmatprep.subr.bf16.mxu0 %v20273_v28  ;;  %12936 = vmatmul.mubr.f32.vlgmr.msra.gmra.mrb[10].mxu1 %v20325_v48 }
 0x532   : > { %5177 = vmatmul.mubr.f32.gmra.mrb[20].mxu0 %v25547_v33  ;;  %v20402_v39 = vpack.c.bf16 %v6914_v1, %v6911_v20  ;;  %v7006_v24 = vsub.f32 %v5403_v44, %v6914_v1  ;;  %v20404_v40 = vadd.f32 %v5291_v38, %v5283_v22  ;;  %v5475_v33 = vand.u32 4294901760, %v5474_v18  ;;  %14402 = vmatpush3.bf16.xpose.msra.mxu1 %v20302_v21 }
 0x533   : > { %5183 = vmatprep.mubr.f32.mxu0 %v25548_v7  ;;  %12942 = vmatprep.mubr.f32.mxu1 %v5975_v30  ;;  %v7001_v13 = vsub.f32 %v6999_v11, %v7000_v57 }
 0x534   : > { %v7007_v7 = vand.u32 4294901760, %v7006_v24  ;;  %v20411_v17 = vpack.c.bf16 %v7006_v24, %v6999_v11  ;;  %14404 = vmatprep.subr.bf16.mxu1 %v20331_v50 }
 0x536   : > { %5185 = vmatmul.mubr.f32.gmra.mrb[22].mxu0 %v25552_v2  ;;  %v7008_v31 = vsub.f32 %v7006_v24, %v7007_v7  ;;  %v20414_v3 = vpack.c.bf16 %v7007_v7, %v7000_v57  ;;  %v7002_v2 = vand.u32 4294901760, %v7001_v13 }
 0x537   : > { %12879 = vmatprep.mubr.f32.mxu0 %v5475_v33 }
 0x538   : > { %v7009_v36 = vand.u32 4294901760, %v7008_v31 }
 0x539   : > { %12943 = vmatmul.mubr.f32.vlgmr.msra.gmra.mrb[10].mxu1 %v5985_v10 }
 0x53a   : > { %12880 = vmatmul.mubr.f32.vlgmr.msra.gmra.mrb[24].mxu0 %v5485_v16  ;;  %v14439_v30 = vpack.c.bf16 %v7009_v36, %v7002_v2  ;;  %14406 = vmatpush3.bf16.xpose.msra.mxu1 %v20331_v50 }
 0x53b   : > { %14370 = vmatpush3.bf16.xpose.msra.mxu0 %v20273_v28  ;;  %12886 = vmatprep.mubr.f32.mxu0 %v20246_v55  ;;  %v6476_v28 = vsub.f32 %v20327_v29, %v6475_v61  ;;  %v6485_v55 = vand.u32 4294901760, %v20357_v9 }
 0x53c   : > { %14372 = vmatprep.subr.bf16.mxu0 %v20251_v6  ;;  %12949 = vmatprep.mubr.f32.mxu1 %v20286_v14 }
 0x53d   : > { %14408 = vmatprep.subr.bf16.mxu1 %v20302_v21  ;;  %v6477_v5 = vand.u32 4294901760, %v6476_v28  ;;  %v6486_v48 = vsub.f32 %v20357_v9, %v6485_v55 }
 0x53f   : > { %v6478_v29 = vsub.f32 %v6476_v28, %v6477_v5 }
 0x541   : > { %12950 = vmatmul.mubr.f32.vlgmr.msra.gmra.mrb[10].mxu1 %v20310_v25  ;;  %v6479_v50 = vand.u32 4294901760, %v6478_v29 }
 0x542   : > { %12887 = vmatmul.mubr.f32.vlgmr.msra.gmra.mrb[24].mxu0 %v20262_v46  ;;  %14410 = vmatpush3.bf16.xpose.msra.mxu1 %v20302_v21  ;;  %v6487_v46 = vand.u32 4294901760, %v6486_v48  ;;  %v6987_v21 = vand.u32 4294901760, %v20404_v40 }
 0x543   : > { %14374 = vmatpush3.bf16.xpose.msra.mxu0 %v20251_v6  ;;  %12893 = vmatprep.mubr.f32.mxu0 %v20258_v4 }
 0x544   : > { %12956 = vmatprep.mubr.f32.mxu1 %v20286_v14  ;;  %14412 = vmatprep.subr.bf16.mxu1 %v20355_v41  ;;  %v6488_v6 = vsub.f32 %v6486_v48, %v6487_v46  ;;  %v6988_v10 = vsub.f32 %v20404_v40, %v6987_v21 }
 0x546   : > { %v6489_v4 = vand.u32 4294901760, %v6488_v6  ;;  %v6989_v9 = vand.u32 4294901760, %v6988_v10 }
 0x548   : > { %v6990_v63 = vsub.f32 %v6988_v10, %v6989_v9 }
 0x549   : > { %12957 = vmatmul.mubr.f32.vlgmr.msra.gmra.mrb[10].mxu1 %v20310_v25 }
 0x54a   : > { %12894 = vmatmul.mubr.f32.vlgmr.msra.gmra.mrb[24].mxu0 %v20267_v49  ;;  %14414 = vmatpush3.bf16.xpose.msra.mxu1 %v20355_v41  ;;  %v6977_v49 = vand.u32 4294901760, %v20374_v62  ;;  %v6991_v12 = vand.u32 4294901760, %v6990_v63 }
 0x54b   : > { %12963 = vmatprep.mubr.f32.mxu1 %v6479_v50  ;;  %14416 = vmatprep.subr.bf16.mxu1 %v20377_v26 }
 0x54c   : > { %v6978_v14 = vsub.f32 %v20374_v62, %v6977_v49 }
 0x54e   : > { %v6979_v25 = vand.u32 4294901760, %v6978_v14 }
 0x550   : > { %v6980_v34 = vsub.f32 %v6978_v14, %v6979_v25 }
 0x551   : > { %12964 = vmatmul.mubr.f32.vlgmr.msra.gmra.mrb[12].mxu1 %v6489_v4 }
 0x552   : > { %14418 = vmatpush3.bf16.xpose.msra.mxu1 %v20377_v26  ;;  %12970 = vmatprep.mubr.f32.mxu1 %v6475_v61  ;;  %v6981_v0 = vand.u32 4294901760, %v6980_v34 }
 0x553   : > { %14420 = vmatprep.subr.bf16.mxu1 %v20363_v19 }
 0x559   : > { %12971 = vmatmul.mubr.f32.vlgmr.msra.gmra.mrb[12].mxu1 %v6485_v55 }
 0x55a   : > { %14422 = vmatpush3.bf16.xpose.msra.mxu1 %v20363_v19  ;;  %12977 = vmatprep.mubr.f32.mxu1 %v6476_v28 }
 0x55b   : > { %14424 = vmatprep.subr.bf16.mxu1 %v20355_v41 }
 0x561   : > { %12978 = vmatmul.mubr.f32.vlgmr.msra.gmra.mrb[12].mxu1 %v6486_v48 }
 0x562   : > { %14426 = vmatpush3.bf16.xpose.msra.mxu1 %v20355_v41  ;;  %12984 = vmatprep.mubr.f32.mxu1 %v6477_v5 }
 0x563   : > { %14428 = vmatprep.subr.bf16.mxu1 %v20366_v54 }
 0x569   : > { %12985 = vmatmul.mubr.f32.vlgmr.msra.gmra.mrb[12].mxu1 %v6487_v46 }
 0x56a   : > { %14430 = vmatpush3.bf16.xpose.msra.mxu1 %v20366_v54  ;;  %12991 = vmatprep.mubr.f32.mxu1 %v6475_v61 }
 0x56b   : > { %14432 = vmatprep.subr.bf16.mxu1 %v20355_v41 }
 0x571   : > { %12992 = vmatmul.mubr.f32.vlgmr.msra.gmra.mrb[12].mxu1 %v6485_v55 }
 0x572   : > { %14434 = vmatpush3.bf16.xpose.msra.mxu1 %v20355_v41  ;;  %12998 = vmatprep.mubr.f32.mxu1 %v6475_v61 }
 0x573   : > { %14436 = vmatprep.subr.bf16.mxu1 %v20402_v39 }
 0x579   : > { %12999 = vmatmul.mubr.f32.vlgmr.msra.gmra.mrb[12].mxu1 %v6485_v55 }
 0x57a   : > { %14438 = vmatpush3.bf16.xpose.msra.mxu1 %v20402_v39  ;;  %13005 = vmatprep.mubr.f32.mxu1 %v6981_v0 }
 0x57b   : > { %14440 = vmatprep.subr.bf16.mxu1 %v14439_v30 }
 0x581   : > { %13006 = vmatmul.mubr.f32.vlgmr.msra.gmra.mrb[14].mxu1 %v6991_v12 }
 0x582   : > { %14442 = vmatpush3.bf16.xpose.msra.mxu1 %v14439_v30  ;;  %13012 = vmatprep.mubr.f32.mxu1 %v6977_v49 }
 0x583   : > { %14444 = vmatprep.subr.bf16.mxu1 %v20411_v17 }
 0x589   : > { %13013 = vmatmul.mubr.f32.vlgmr.msra.gmra.mrb[14].mxu1 %v6987_v21 }
 0x58a   : > { %14446 = vmatpush3.bf16.xpose.msra.mxu1 %v20411_v17  ;;  %13019 = vmatprep.mubr.f32.mxu1 %v6978_v14 }
 0x58b   : > { %14448 = vmatprep.subr.bf16.mxu1 %v20402_v39 }
 0x591   : > { %13020 = vmatmul.mubr.f32.vlgmr.msra.gmra.mrb[14].mxu1 %v6988_v10 }
 0x592   : > { %14450 = vmatpush3.bf16.xpose.msra.mxu1 %v20402_v39  ;;  %13026 = vmatprep.mubr.f32.mxu1 %v6979_v25 }
 0x593   : > { %14452 = vmatprep.subr.bf16.mxu1 %v20414_v3 }
 0x599   : > { %13027 = vmatmul.mubr.f32.vlgmr.msra.gmra.mrb[14].mxu1 %v6989_v9 }
 0x59a   : > { %14454 = vmatpush3.bf16.xpose.msra.mxu1 %v20414_v3  ;;  %13033 = vmatprep.mubr.f32.mxu1 %v6977_v49 }
 0x59b   : > { %14456 = vmatprep.subr.bf16.mxu1 %v20402_v39 }
 0x5a1   : > { %13034 = vmatmul.mubr.f32.vlgmr.msra.gmra.mrb[14].mxu1 %v6987_v21 }
 0x5a2   : > { %14458 = vmatpush3.bf16.xpose.msra.mxu1 %v20402_v39  ;;  %13040 = vmatprep.mubr.f32.mxu1 %v6977_v49 }
 0x5a9   : > { %13041 = vmatmul.mubr.f32.vlgmr.msra.gmra.mrb[14].mxu1 %v6987_v21 }
 0x5ec   : > { %v20462_v41 = vpop.f32.mrb[8].mxu1 }
 0x5ed   : > { %v20464_v47 = vpop.f32.mrb[9].mxu1 }
 0x5fd   : > { %v5162_v42 = vpop.f32.mrb[16].mxu0 }
 0x5fe   : > { %v7500_v19 = vand.u32 4294901760, %v5162_v42  ;;  %v5164_v58 = vpop.f32.mrb[17].mxu0 }
 0x5ff   : > { %v8008_v37 = vand.u32 4294901760, %v5164_v58 }
 0x600   : > { %v7588_v56 = vsub.f32 %v5162_v42, %v7500_v19 }
 0x601   : > { %v8096_v54 = vsub.f32 %v5164_v58, %v8008_v37  ;;  %v5170_v51 = vpop.f32.mrb[18].mxu0 }
 0x602   : > { %v7589_v8 = vand.u32 4294901760, %v7588_v56  ;;  %v7503_v20 = vand.u32 4294901760, %v5170_v51  ;;  %v5172_v60 = vpop.f32.mrb[19].mxu0 }
 0x603   : > { %v8097_v32 = vand.u32 4294901760, %v8096_v54  ;;  %v8011_v52 = vand.u32 4294901760, %v5172_v60 }
 0x604   : > { %v20466_v62 = vpack.c.bf16 %v7503_v20, %v7500_v19  ;;  %v7595_v27 = vsub.f32 %v5170_v51, %v7503_v20  ;;  %v7590_v11 = vsub.f32 %v7588_v56, %v7589_v8 }
 0x605   : > { %v20468_v26 = vpack.c.bf16 %v8011_v52, %v8008_v37  ;;  %v8103_v35 = vsub.f32 %v5172_v60, %v8011_v52  ;;  %v5178_v43 = vpop.f32.mrb[20].mxu0  ;;  %v8098_v18 = vsub.f32 %v8096_v54, %v8097_v32 }
 0x606   : > { %v7596_v59 = vand.u32 4294901760, %v7595_v27  ;;  %v8516_v45 = vand.u32 4294901760, %v5178_v43  ;;  %v5180_v44 = vpop.f32.mrb[21].mxu0  ;;  %14460 = vmatprep.subr.bf16.mxu1 %v20466_v62  ;;  %v20471_v53 = vpack.c.bf16 %v7595_v27, %v7588_v56  ;;  %v7591_v16 = vand.u32 4294901760, %v7590_v11 }
 0x607   : > { %v8104_v15 = vand.u32 4294901760, %v8103_v35  ;;  %v9024_v22 = vand.u32 4294901760, %v5180_v44  ;;  %14462 = vmatpush3.bf16.msra.mxu1 %v20466_v62  ;;  %v20474_v1 = vpack.c.bf16 %v8103_v35, %v8096_v54  ;;  %v8099_v36 = vand.u32 4294901760, %v8098_v18 }
 0x608   : > { %v7597_v38 = vsub.f32 %v7595_v27, %v7596_v59  ;;  %v8604_v57 = vsub.f32 %v5178_v43, %v8516_v45  ;;  %v20476_v23 = vpack.c.bf16 %v7596_v59, %v7589_v8 }
 0x609   : > { %v8105_v39 = vsub.f32 %v8103_v35, %v8104_v15  ;;  %v9112_v24 = vsub.f32 %v5180_v44, %v9024_v22  ;;  %v5186_v40 = vpop.f32.mrb[22].mxu0  ;;  %v20478_v33 = vpack.c.bf16 %v8104_v15, %v8097_v32 }
 0x60a   : > { %v8605_v13 = vand.u32 4294901760, %v8604_v57  ;;  %v8519_v7 = vand.u32 4294901760, %v5186_v40  ;;  %v5188_v17 = vpop.f32.mrb[23].mxu0  ;;  %v7598_v31 = vand.u32 4294901760, %v7597_v38 }
 0x60b   : > { %v9113_v3 = vand.u32 4294901760, %v9112_v24  ;;  %v9027_v2 = vand.u32 4294901760, %v5188_v17  ;;  %v8106_v61 = vand.u32 4294901760, %v8105_v39 }
 0x60c   : > { %v20480_v30 = vpack.c.bf16 %v8519_v7, %v8516_v45  ;;  %v8611_v28 = vsub.f32 %v5186_v40, %v8519_v7  ;;  %v20482_v55 = vpack.c.bf16 %v7598_v31, %v7591_v16  ;;  %v8606_v46 = vsub.f32 %v8604_v57, %v8605_v13 }
 0x60d   : > { %v20484_v5 = vpack.c.bf16 %v9027_v2, %v9024_v22  ;;  %v9119_v48 = vsub.f32 %v5188_v17, %v9027_v2  ;;  %v20486_v29 = vpack.c.bf16 %v8106_v61, %v8099_v36  ;;  %v9114_v4 = vsub.f32 %v9112_v24, %v9113_v3 }
 0x60e   : > { %v8612_v50 = vand.u32 4294901760, %v8611_v28  ;;  %14464 = vmatprep.subr.bf16.mxu1 %v20482_v55  ;;  %v20489_v6 = vpack.c.bf16 %v8611_v28, %v8604_v57  ;;  %v8607_v9 = vand.u32 4294901760, %v8606_v46 }
 0x60f   : > { %v9120_v49 = vand.u32 4294901760, %v9119_v48  ;;  %v20491_v14 = vpack.c.bf16 %v9119_v48, %v9112_v24  ;;  %v9115_v63 = vand.u32 4294901760, %v9114_v4 }
 0x610   : > { %v8613_v21 = vsub.f32 %v8611_v28, %v8612_v50  ;;  %v20493_v25 = vpack.c.bf16 %v8612_v50, %v8605_v13 }
 0x611   : > { %v9121_v10 = vsub.f32 %v9119_v48, %v9120_v49  ;;  %v20495_v34 = vpack.c.bf16 %v9120_v49, %v9113_v3 }
 0x612   : > { %v8614_v0 = vand.u32 4294901760, %v8613_v21 }
 0x613   : > { %v9122_v12 = vand.u32 4294901760, %v9121_v10 }
 0x614   : > { %v20497_v42 = vpack.c.bf16 %v8614_v0, %v8607_v9 }
 0x615   : > { %v20499_v19 = vpack.c.bf16 %v9122_v12, %v9115_v63 }
 0x61c   : > { %v12958_v51 = vpop.f32.mrb[10].mxu1 }
 0x61d   : > { %v12895_v58 = vpop.f32.mrb[24].mxu0  ;;  %v6398_v20 = vpop.f32.mrb[11].mxu1  ;;  %v7422_v52 = vsel %vm7412_vm1, %v12958_v51, -inf }
 0x61e   : > { %v15139_v37 = vadd.f32 %v20462_v41, %v12895_v58  ;;  %v5650_v56 = vpop.f32.mrb[25].mxu0  ;;  %v7419_v32 = vsel %vm7412_vm1, %v6398_v20, -inf }
 0x61f   : > { %v15140_v54 = vadd.f32 %v20464_v47, %v5650_v56 }
 0x620   : > { %v7416_v8 = vsel %vm7412_vm1, %v15139_v37, -inf }
 0x621   : > { %7417 = vmax.xlane.f32.xlu1 %v7416_v8  ;;  %v7413_v60 = vsel %vm7412_vm1, %v15140_v54, -inf }
 0x622   : > { %7414 = vmax.xlane.f32.xlu0 %v7413_v60 }
 0x626   : > { %7420 = vmax.xlane.f32.xlu0 %v7419_v32 }
 0x62a   : > { %7423 = vmax.xlane.f32.xlu0 %v7422_v52 }
 0x64c   : > { %v20507_v27 = vpop.f32.mrb[12].mxu1 }
 0x64d   : > { %v20509_v41 = vpop.f32.mrb[13].mxu1  ;;  %v7428_v47 = vsel %vm7412_vm1, %v20507_v27, -inf }
 0x64e   : > { %7429 = vmax.xlane.f32.xlu1 %v7428_v47  ;;  %v7425_v35 = vsel %vm7412_vm1, %v20509_v41, -inf }
 0x64f   : > { %7426 = vmax.xlane.f32.xlu0 %v7425_v35 }
 0x67c   : > { %v20515_v43 = vpop.f32.mrb[14].mxu1 }
 0x67d   : > { %v20517_v11 = vpop.f32.mrb[15].mxu1  ;;  %v7434_v59 = vsel %vm7412_vm1, %v20515_v43, -inf }
 0x67e   : > { %7435 = vmax.xlane.f32.xlu1 %v7434_v59  ;;  %v7431_v45 = vsel %vm7412_vm1, %v20517_v11, -inf }
 0x67f   : > { %7432 = vmax.xlane.f32.xlu0 %v7431_v45 }
 0x6ae   : > { %v7418_v44 = vpop.xlane.xlu1 %7417 }
 0x6af   : > { %v7438_v18 = vsub.f32 %v15139_v37, %v7418_v44  ;;  %v7415_v15 = vpop.xlane.xlu0 %7414 }
 0x6b0   : > { %v7437_v22 = vsub.f32 %v15140_v54, %v7415_v15 }
 0x6b1   : > { %v7447_v38 = vmul.f32 1.442695, %v7438_v18 }
 0x6b2   : > { %v7445_v57 = vmul.f32 1.442695, %v7437_v22 }
 0x6b3   : > { %15508 = vpow2.f32 %v7447_v38  ;;  %v7421_v39 = vpop.xlane.xlu0 %7420 }
 0x6b4   : > { %15510 = vpow2.f32 %v7445_v57  ;;  %v7439_v24 = vsub.f32 %v6398_v20, %v7421_v39 }
 0x6b6   : > { %v7449_v40 = vmul.f32 1.442695, %v7439_v24 }
 0x6b7   : > { %v7424_v13 = vpop.xlane.xlu0 %7423 }
 0x6b8   : > { %15512 = vpow2.f32 %v7449_v40  ;;  %v7440_v7 = vsub.f32 %v12958_v51, %v7424_v13 }
 0x6ba   : > { %v7451_v17 = vmul.f32 1.442695, %v7440_v7 }
 0x6bc   : > { %15514 = vpow2.f32 %v7451_v17 }
 0x6bd   : > { %v15509_v16 = vpop.eup %15508 }
 0x6be   : > { %v15511_v31 = vpop.eup %15510  ;;  %v7497_v3 = vsel %vm7412_vm1, %v15509_v16, 0  ;;  %v7464_v49 = vsel %vm7412_vm1, %v15509_v16, 0.0 }
 0x6bf   : > { %v20524_v2 = vand.u32 4294901760, %v7497_v3  ;;  %v7461_v36 = vsel %vm7412_vm1, %v15511_v31, 0.0  ;;  %v7494_v61 = vsel %vm7412_vm1, %v15511_v31, 0 }
 0x6c0   : > { %7462 = vadd.xlane.f32.xlu1 %v7461_v36  ;;  %v7566_v28 = vand.u32 4294901760, %v7494_v61 }
 0x6c1   : > { %v7577_v48 = vsub.f32 %v7497_v3, %v20524_v2 }
 0x6c2   : > { %v15513_v46 = vpop.eup %15512  ;;  %v7567_v50 = vsub.f32 %v7494_v61, %v7566_v28 }
 0x6c3   : > { %v7467_v4 = vsel %vm7412_vm1, %v15513_v46, 0.0  ;;  %v7578_v21 = vand.u32 4294901760, %v7577_v48  ;;  %v8002_v54 = vsel %vm7412_vm1, %v15513_v46, 0  ;;  %v20596_v46 = vld [vmem:[%s16328_s19] sm:$0xff] }
 0x6c4   : > { %7468 = vadd.xlane.f32.xlu0 %v7467_v4  ;;  %7465 = vadd.xlane.f32.xlu1 %v7464_v49  ;;  %v7568_v10 = vand.u32 4294901760, %v7567_v50  ;;  %v20604_v4 = vld [vmem:[%s16328_s19 + $0x28] sm:$0xff]  ;;  %v20607_v49 = vld [vmem:[%s16328_s19 + $0x38] sm:$0xff] }
 0x6c5   : > { %v7579_v9 = vsub.f32 %v7577_v48, %v7578_v21 }
 0x6c6   : > { %v15515_v0 = vpop.eup %15514  ;;  %v7569_v63 = vsub.f32 %v7567_v50, %v7568_v10 }
 0x6c7   : > { %v7470_v12 = vsel %vm7412_vm1, %v15515_v0, 0.0  ;;  %v7580_v37 = vand.u32 4294901760, %v7579_v9  ;;  %v8005_v20 = vsel %vm7412_vm1, %v15515_v0, 0  ;;  %v23699_v9 = vand.u32 4294901760, %v20607_v49 }
 0x6c8   : > { %7471 = vadd.xlane.f32.xlu0 %v7470_v12  ;;  %v7570_v58 = vand.u32 4294901760, %v7569_v63  ;;  %v20546_v52 = vand.u32 4294901760, %v8005_v20 }
 0x6ca   : > { %13047 = vmatprep.mubr.f32.mxu1 %v7570_v58  ;;  %v20632_v58 = vsub.f32 %v20607_v49, %v23699_v9 }
 0x6cb   : > { %13048 = vmatmul.mubr.f32.vlgmr.msra.gmra.mrb[16].mxu1 %v7580_v37 }
 0x6cc   : > { %14466 = vmatpush3.bf16.msra.mxu1 %v20482_v55  ;;  %13054 = vmatprep.mubr.f32.mxu1 %v7566_v28  ;;  %25584 = vst [vmem:[#allocation38_spill] sm:$0xff] %v20632_v58  ;;  %v21031_v58 = vld [vmem:[%s16328_s19 + $0x198] sm:$0xff] }
 0x6cd   : > { %14468 = vmatprep.subr.bf16.mxu1 %v20471_v53  ;;  %25637 = vst [vmem:[#allocation54_spill] sm:$0xff] %v21031_v58 }
 0x6d3   : > { %13055 = vmatmul.mubr.f32.vlgmr.msra.gmra.mrb[16].mxu1 %v20524_v2 }
 0x6d4   : > { %14470 = vmatpush3.bf16.msra.mxu1 %v20471_v53  ;;  %13061 = vmatprep.mubr.f32.mxu1 %v7567_v50  ;;  %v20543_v53 = vand.u32 4294901760, %v8002_v54  ;;  %v23702_v50 = vand.u32 4294901760, %v20596_v46 }
 0x6d5   : > { %14472 = vmatprep.subr.bf16.mxu1 %v20466_v62 }
 0x6db   : > { %13062 = vmatmul.mubr.f32.vlgmr.msra.gmra.mrb[16].mxu1 %v7577_v48  ;;  %v7430_v56 = vpop.xlane.xlu1 %7429 }
 0x6dc   : > { %14474 = vmatpush3.bf16.msra.mxu1 %v20466_v62  ;;  %13068 = vmatprep.mubr.f32.mxu1 %v7568_v10  ;;  %v7442_v55 = vsub.f32 %v20507_v27, %v7430_v56  ;;  %v7427_v51 = vpop.xlane.xlu0 %7426  ;;  %v8075_v27 = vsub.f32 %v8002_v54, %v20543_v53  ;;  %v20615_v10 = vsub.f32 %v20596_v46, %v23702_v50  ;;  %v20837_v50 = vld [vmem:[%s16328_s19 + $0xf8] sm:$0xff] }
 0x6dd   : > { %14476 = vmatprep.subr.bf16.mxu1 %v20476_v23  ;;  %v7441_v8 = vsub.f32 %v20509_v41, %v7427_v51  ;;  %v8085_v41 = vsub.f32 %v8005_v20, %v20546_v52 }
 0x6de   : > { %v7455_v60 = vmul.f32 1.442695, %v7442_v55  ;;  %v8076_v47 = vand.u32 4294901760, %v8075_v27  ;;  %25581 = vst [vmem:[#allocation232_spill] sm:$0xff] %v20615_v10 }
 0x6df   : > { %v7453_v32 = vmul.f32 1.442695, %v7441_v8 }
 0x6e0   : > { %v8077_v35 = vsub.f32 %v8075_v27, %v8076_v47 }
 0x6e1   : > { %15516 = vpow2.f32 %v7453_v32 }
 0x6e2   : > { %15518 = vpow2.f32 %v7455_v60  ;;  %v8078_v15 = vand.u32 4294901760, %v8077_v35  ;;  %v20661_v60 = vld [vmem:[%s16328_s19 + $0x30] sm:$0xff] }
 0x6e3   : > { %13069 = vmatmul.mubr.f32.vlgmr.msra.gmra.mrb[16].mxu1 %v7578_v21  ;;  %v23700_v21 = vand.u32 4294901760, %v20604_v4 }
 0x6e4   : > { %14478 = vmatpush3.bf16.msra.mxu1 %v20476_v23  ;;  %13075 = vmatprep.mubr.f32.mxu1 %v7566_v28  ;;  %v8086_v23 = vand.u32 4294901760, %v8085_v41 }
 0x6e5   : > { %14480 = vmatprep.subr.bf16.mxu1 %v20466_v62  ;;  %v20627_v12 = vsub.f32 %v20604_v4, %v23700_v21  ;;  %v20857_v21 = vld [vmem:[%s16328_s19 + $0x108] sm:$0xff] }
 0x6e6   : > { %v8087_v18 = vsub.f32 %v8085_v41, %v8086_v23 }
 0x6e7   : > { %25583 = vst [vmem:[#allocation29_spill] sm:$0xff] %v20627_v12 }
 0x6eb   : > { %13076 = vmatmul.mubr.f32.vlgmr.msra.gmra.mrb[16].mxu1 %v20524_v2  ;;  %v15517_v59 = vpop.eup %15516 }
 0x6ec   : > { %14482 = vmatpush3.bf16.msra.mxu1 %v20466_v62  ;;  %13082 = vmatprep.mubr.f32.mxu1 %v7566_v28  ;;  %v7473_v45 = vsel %vm7412_vm1, %v15517_v59, 0.0  ;;  %v15519_v44 = vpop.eup %15518  ;;  %v8088_v62 = vand.u32 4294901760, %v8087_v18  ;;  %v8510_v38 = vsel %vm7412_vm1, %v15517_v59, 0  ;;  %v20695_v18 = vld [vmem:[%s16328_s19 + $0x78] sm:$0xff] }
 0x6ed   : > { %14484 = vmatprep.subr.bf16.mxu1 %v20468_v26  ;;  %7474 = vadd.xlane.f32.xlu1 %v7473_v45  ;;  %v7476_v22 = vsel %vm7412_vm1, %v15519_v44, 0.0  ;;  %v20569_v57 = vand.u32 4294901760, %v8510_v38  ;;  %v20689_v45 = vld [vmem:[%s16328_s19 + $0x50] sm:$0xff] }
 0x6ef   : > { %v8583_v7 = vsub.f32 %v8510_v38, %v20569_v57 }
 0x6f1   : > { %7477 = vadd.xlane.f32.xlu1 %v7476_v22  ;;  %v8584_v3 = vand.u32 4294901760, %v8583_v7  ;;  %v20702_v22 = vld [vmem:[%s16328_s19 + $0x70] sm:$0xff] }
 0x6f3   : > { %13083 = vmatmul.mubr.f32.vlgmr.msra.gmra.mrb[16].mxu1 %v20524_v2 }
 0x6f4   : > { %14486 = vmatpush3.bf16.msra.mxu1 %v20468_v26  ;;  %13089 = vmatprep.mubr.f32.mxu1 %v8078_v15  ;;  %v20699_v15 = vld [vmem:[%s16328_s19 + $0x60] sm:$0xff] }
 0x6f5   : > { %14488 = vmatprep.subr.bf16.mxu1 %v20486_v29 }
 0x6f7   : > { %13090 = vmatmul.mubr.f32.vlgmr.msra.gmra.mrb[18].mxu1 %v8088_v62 }
 0x6f8   : > { %14490 = vmatpush3.bf16.msra.mxu1 %v20486_v29  ;;  %13096 = vmatprep.mubr.f32.mxu1 %v20543_v53  ;;  %v8513_v29 = vsel %vm7412_vm1, %v15519_v44, 0  ;;  %v20692_v44 = vld [vmem:[%s16328_s19 + $0x68] sm:$0xff] }
 0x6f9   : > { %14492 = vmatprep.subr.bf16.mxu1 %v20474_v1  ;;  %v20574_v40 = vand.u32 4294901760, %v8513_v29 }
 0x6fb   : > { %v8593_v31 = vsub.f32 %v8513_v29, %v20574_v40 }
 0x6ff   : > { %13097 = vmatmul.mubr.f32.vlgmr.msra.gmra.mrb[18].mxu1 %v20546_v52 }
 0x700   : > { %14494 = vmatpush3.bf16.msra.mxu1 %v20474_v1  ;;  %13103 = vmatprep.mubr.f32.mxu1 %v8075_v27 }
 0x701   : > { %14496 = vmatprep.subr.bf16.mxu1 %v20468_v26 }
 0x707   : > { %13104 = vmatmul.mubr.f32.vlgmr.msra.gmra.mrb[18].mxu1 %v8085_v41  ;;  %v20669_v41 = vld [vmem:[%s16328_s19 + $0x48] sm:$0xff] }
 0x708   : > { %14498 = vmatpush3.bf16.msra.mxu1 %v20468_v26  ;;  %13110 = vmatprep.mubr.f32.mxu1 %v8076_v47  ;;  %v20672_v47 = vld [vmem:[%s16328_s19 + $0x58] sm:$0xff]  ;;  %v23695_v38 = vand.u32 4294901760, %v20669_v41 }
 0x709   : > { %14500 = vmatprep.subr.bf16.mxu1 %v20478_v33  ;;  %v23693_v29 = vand.u32 4294901760, %v20672_v47 }
 0x70b   : > { %v7436_v39 = vpop.xlane.xlu1 %7435 }
 0x70c   : > { %v7444_v1 = vsub.f32 %v20515_v43, %v7436_v39  ;;  %v7433_v24 = vpop.xlane.xlu0 %7432  ;;  %v8585_v43 = vsub.f32 %v8583_v7, %v8584_v3  ;;  %v20711_v39 = vld [vmem:[%s16328_s19 + $0x98] sm:$0xff] }
 0x70d   : > { %v7443_v13 = vsub.f32 %v20517_v11, %v7433_v24  ;;  %v23690_v24 = vand.u32 4294901760, %v20689_v45 }
 0x70e   : > { %v7459_v17 = vmul.f32 1.442695, %v7444_v1  ;;  %v8586_v2 = vand.u32 4294901760, %v8585_v43  ;;  %v20732_v43 = vsub.f32 %v20669_v41, %v23695_v38 }
 0x70f   : > { %13111 = vmatmul.mubr.f32.vlgmr.msra.gmra.mrb[18].mxu1 %v8086_v23  ;;  %v7457_v16 = vmul.f32 1.442695, %v7443_v13  ;;  %v20675_v23 = vld [vmem:[%s16328_s19 + $0x40] sm:$0xff]  ;;  %v23688_v13 = vand.u32 4294901760, %v20695_v18 }
 0x710   : > { %14502 = vmatpush3.bf16.msra.mxu1 %v20478_v33  ;;  %13117 = vmatprep.mubr.f32.mxu1 %v20543_v53  ;;  %v8594_v33 = vand.u32 4294901760, %v8593_v31  ;;  %v23691_v1 = vand.u32 4294901760, %v20675_v23  ;;  %25587 = vst [vmem:[#allocation43_spill] sm:$0xff] %v20732_v43  ;;  %v21011_v43 = vld [vmem:[%s16328_s19 + $0x170] sm:$0xff] }
 0x711   : > { %14504 = vmatprep.subr.bf16.mxu1 %v20468_v26  ;;  %15520 = vpow2.f32 %v7457_v16  ;;  %v23686_v16 = vand.u32 4294901760, %v20702_v22  ;;  %v23760_v12 = vand.u32 4294901760, %v21011_v43 }
 0x712   : > { %15522 = vpow2.f32 %v7459_v17  ;;  %v8595_v11 = vsub.f32 %v8593_v31, %v8594_v33  ;;  %v23685_v17 = vand.u32 4294901760, %v20699_v15 }
 0x717   : > { %13118 = vmatmul.mubr.f32.vlgmr.msra.gmra.mrb[18].mxu1 %v20546_v52 }
 0x718   : > { %14506 = vmatpush3.bf16.msra.mxu1 %v20468_v26  ;;  %13124 = vmatprep.mubr.f32.mxu1 %v20543_v53  ;;  %v8596_v26 = vand.u32 4294901760, %v8595_v11  ;;  %v20658_v53 = vld [vmem:[%s16328_s19 + $0x20] sm:$0xff]  ;;  %v20737_v11 = vsub.f32 %v20672_v47, %v23693_v29 }
 0x719   : > { %14508 = vmatprep.subr.bf16.mxu1 %v20480_v30  ;;  %v23698_v32 = vand.u32 4294901760, %v20658_v53  ;;  %v25656_v10 = vand.u32 4294901760, %v20658_v53 }
 0x71a   : > { %25588 = vst [vmem:[#allocation253_spill] sm:$0xff] %v20737_v11 }
 0x71b   : > { %v15521_v36 = vpop.eup %15520  ;;  %v20681_v35 = vsub.f32 %v20658_v53, %v23698_v32  ;;  %v21145_v53 = vld [vmem:[%s16328_s19 + $0x1c0] sm:$0xff] }
 0x71c   : > { %v7479_v61 = vsel %vm7412_vm1, %v15521_v36, 0.0  ;;  %v15523_v28 = vpop.eup %15522  ;;  %v9018_v0 = vsel %vm7412_vm1, %v15521_v36, 0  ;;  %v20749_v36 = vsub.f32 %v20689_v45, %v23690_v24 }
 0x71d   : > { %7480 = vadd.xlane.f32.xlu0 %v7479_v61  ;;  %v7482_v48 = vsel %vm7412_vm1, %v15523_v28, 0.0  ;;  %v9021_v37 = vsel %vm7412_vm1, %v15523_v28, 0  ;;  %v20635_v56 = vand.u32 4294901760, %v9018_v0  ;;  %25585 = vst [vmem:[#allocation39_spill] sm:$0xff] %v20681_v35  ;;  %v20759_v28 = vsub.f32 %v20695_v18, %v23688_v13  ;;  %v20803_v13 = vld [vmem:[%s16328_s19 + $0xd8] sm:$0xff] }
 0x71e   : > { %v20639_v54 = vand.u32 4294901760, %v9021_v37  ;;  %25590 = vst [vmem:[#allocation52_spill] sm:$0xff] %v20749_v36  ;;  %v23714_v9 = vand.u32 4294901760, %v20803_v13  ;;  %v20953_v36 = vld [vmem:[%s16328_s19 + $0x140] sm:$0xff] }
 0x71f   : > { %13125 = vmatmul.mubr.f32.vlgmr.msra.gmra.mrb[18].mxu1 %v20546_v52  ;;  %v20643_v55 = vsub.f32 %v9018_v0, %v20635_v56  ;;  %v23696_v52 = vand.u32 4294901760, %v20661_v60  ;;  %25592 = vst [vmem:[#allocation56_spill] sm:$0xff] %v20759_v28  ;;  %v20770_v0 = vld [vmem:[%s16328_s19 + $0xb8] sm:$0xff] }
 0x720   : > { %14510 = vmatpush3.bf16.msra.mxu1 %v20480_v30  ;;  %13131 = vmatprep.mubr.f32.mxu1 %v8586_v2  ;;  %v20646_v51 = vsub.f32 %v9021_v37, %v20639_v54  ;;  %v20742_v2 = vsub.f32 %v20675_v23, %v23691_v1  ;;  %v20775_v37 = vsub.f32 %v20702_v22, %v23686_v16 }
 0x721   : > { %14512 = vmatprep.subr.bf16.mxu1 %v20497_v42  ;;  %7483 = vadd.xlane.f32.xlu0 %v7482_v48  ;;  %v23706_v8 = vand.u32 4294901760, %v20643_v55  ;;  %v20686_v59 = vsub.f32 %v20661_v60, %v23696_v52  ;;  %v20767_v48 = vld [vmem:[%s16328_s19 + $0xa8] sm:$0xff]  ;;  %v20819_v52 = vld [vmem:[%s16328_s19 + $0xd0] sm:$0xff] }
 0x722   : > { %25589 = vst [vmem:[#allocation51_spill] sm:$0xff] %v20742_v2  ;;  %25594 = vst [vmem:[#allocation92_spill] sm:$0xff] %v20775_v37  ;;  %v23703_v1 = vand.u32 4294901760, %v20767_v48  ;;  %v20976_v2 = vld [vmem:[%s16328_s19 + $0x168] sm:$0xff] }
 0x723   : > { %13132 = vmatmul.mubr.f32.vlgmr.msra.gmra.mrb[20].mxu1 %v8596_v26  ;;  %v9093_v20 = vsub.f32 %v20643_v55, %v23706_v8  ;;  %25586 = vst [vmem:[#allocation42_spill] sm:$0xff] %v20686_v59  ;;  %v20764_v26 = vsub.f32 %v20699_v15, %v23685_v17  ;;  %v20790_v17 = vld [vmem:[%s16328_s19 + $0xc8] sm:$0xff]  ;;  %v20854_v8 = vld [vmem:[%s16328_s19 + $0xf0] sm:$0xff] }
 0x724   : > { %14514 = vmatpush3.bf16.msra.mxu1 %v20497_v42  ;;  %13138 = vmatprep.mubr.f32.mxu1 %v20569_v57  ;;  %v20600_v42 = vld [vmem:[%s16328_s19 + $0x10] sm:$0xff]  ;;  %v23712_v38 = vand.u32 4294901760, %v20790_v17  ;;  %v21014_v59 = vld [vmem:[%s16328_s19 + $0x188] sm:$0xff] }
 0x725   : > { %14516 = vmatprep.subr.bf16.mxu1 %v20489_v6  ;;  %v9094_v27 = vand.u32 4294901760, %v9093_v20  ;;  %25593 = vst [vmem:[#allocation91_spill] sm:$0xff] %v20764_v26  ;;  %25633 = vst [vmem:[#allocation49_spill] sm:$0xff] %v21014_v59 }
 0x72b   : > { %13139 = vmatmul.mubr.f32.vlgmr.msra.gmra.mrb[20].mxu1 %v20574_v40 }
 0x72c   : > { %14518 = vmatpush3.bf16.msra.mxu1 %v20489_v6  ;;  %13145 = vmatprep.mubr.f32.mxu1 %v8583_v7  ;;  %v23701_v6 = vand.u32 4294901760, %v20600_v42  ;;  %v20718_v7 = vld [vmem:[%s16328_s19 + $0x80] sm:$0xff] }
 0x72d   : > { %14520 = vmatprep.subr.bf16.mxu1 %v20480_v30 }
 0x72e   : > { %v20622_v63 = vsub.f32 %v20600_v42, %v23701_v6  ;;  %v20834_v6 = vld [vmem:[%s16328_s19 + $0xe8] sm:$0xff] }
 0x730   : > { %25582 = vst [vmem:[#allocation234_spill] sm:$0xff] %v20622_v63 }
 0x733   : > { %13146 = vmatmul.mubr.f32.vlgmr.msra.gmra.mrb[20].mxu1 %v8593_v31 }
 0x734   : > { %14522 = vmatpush3.bf16.msra.mxu1 %v20480_v30  ;;  %13152 = vmatprep.mubr.f32.mxu1 %v8584_v3  ;;  %v23692_v3 = vand.u32 4294901760, %v20711_v39 }
 0x735   : > { %14524 = vmatprep.subr.bf16.mxu1 %v20493_v25 }
 0x736   : > { %v20795_v16 = vsub.f32 %v20711_v39, %v23692_v3  ;;  %v23704_v3 = vand.u32 4294901760, %v20770_v0 }
 0x738   : > { %25596 = vst [vmem:[#allocation105_spill] sm:$0xff] %v20795_v16  ;;  %v20829_v32 = vsub.f32 %v20770_v0, %v23704_v3  ;;  %v20918_v16 = vld [vmem:[%s16328_s19 + $0x130] sm:$0xff] }
 0x73a   : > { %25600 = vst [vmem:[#allocation111_spill] sm:$0xff] %v20829_v32  ;;  %v20878_v32 = vld [vmem:[%s16328_s19 + $0x118] sm:$0xff] }
 0x73b   : > { %13153 = vmatmul.mubr.f32.vlgmr.msra.gmra.mrb[20].mxu1 %v8594_v33  ;;  %v20725_v33 = vld [vmem:[%s16328_s19 + $0x90] sm:$0xff]  ;;  %v25618_v26 = vand.u32 4294901760, %v20878_v32 }
 0x73c   : > { %14526 = vmatpush3.bf16.msra.mxu1 %v20493_v25  ;;  %13159 = vmatprep.mubr.f32.mxu1 %v20569_v57  ;;  %v23705_v25 = vand.u32 4294901760, %v20646_v51 }
 0x73d   : > { %14528 = vmatprep.subr.bf16.mxu1 %v20480_v30  ;;  %v20941_v28 = vsub.f32 %v20878_v32, %v25618_v26 }
 0x73f   : > { %25619 = vst [vmem:[#allocation34_spill] sm:$0xff] %v20941_v28  ;;  %v20973_v28 = vld [vmem:[%s16328_s19 + $0x150] sm:$0xff] }
 0x743   : > { %13160 = vmatmul.mubr.f32.vlgmr.msra.gmra.mrb[20].mxu1 %v20574_v40 }
 0x744   : > { %14530 = vmatpush3.bf16.msra.mxu1 %v20480_v30  ;;  %13166 = vmatprep.mubr.f32.mxu1 %v20569_v57  ;;  %v9103_v30 = vsub.f32 %v20646_v51, %v23705_v25  ;;  %v20708_v57 = vld [vmem:[%s16328_s19 + $0x88] sm:$0xff]  ;;  %v20851_v25 = vld [vmem:[%s16328_s19 + $0xe0] sm:$0xff] }
 0x745   : > { %14532 = vmatprep.subr.bf16.mxu1 %v20484_v5  ;;  %v23687_v31 = vand.u32 4294901760, %v20708_v57 }
 0x746   : > { %v9104_v62 = vand.u32 4294901760, %v9103_v30  ;;  %v23697_v30 = vand.u32 4294901760, %v20725_v33 }
 0x747   : > { %v20780_v20 = vsub.f32 %v20708_v57, %v23687_v31 }
 0x748   : > { %v20811_v24 = vsub.f32 %v20725_v33, %v23697_v30  ;;  %v20824_v30 = vsub.f32 %v20767_v48, %v23703_v1 }
 0x749   : > { %25595 = vst [vmem:[#allocation128_spill] sm:$0xff] %v20780_v20  ;;  %v25612_v20 = vand.u32 4294901760, %v20851_v25 }
 0x74a   : > { %25598 = vst [vmem:[#allocation145_spill] sm:$0xff] %v20811_v24  ;;  %25599 = vst [vmem:[#allocation146_spill] sm:$0xff] %v20824_v30  ;;  %v20892_v30 = vld [vmem:[%s16328_s19 + $0x100] sm:$0xff]  ;;  %v20895_v24 = vld [vmem:[%s16328_s19 + $0x110] sm:$0xff] }
 0x74b   : > { %13167 = vmatmul.mubr.f32.vlgmr.msra.gmra.mrb[20].mxu1 %v20574_v40  ;;  %v23689_v40 = vand.u32 4294901760, %v20692_v44  ;;  %v20923_v37 = vsub.f32 %v20851_v25, %v25612_v20  ;;  %v23736_v20 = vand.u32 4294901760, %v20892_v30 }
 0x74c   : > { %14534 = vmatpush3.bf16.msra.mxu1 %v20484_v5  ;;  %13173 = vmatprep.mubr.f32.mxu1 %v9094_v27  ;;  %v20784_v27 = vld [vmem:[%s16328_s19 + $0xa0] sm:$0xff] }
 0x74d   : > { %14536 = vmatprep.subr.bf16.mxu1 %v20499_v19  ;;  %v20754_v61 = vsub.f32 %v20692_v44, %v23689_v40  ;;  %v20806_v40 = vld [vmem:[%s16328_s19 + $0xc0] sm:$0xff]  ;;  %v23707_v29 = vand.u32 4294901760, %v20784_v27  ;;  %25613 = vst [vmem:[#allocation32_spill] sm:$0xff] %v20923_v37  ;;  %v23737_v37 = vand.u32 4294901760, %v20895_v24  ;;  %v20959_v26 = vsub.f32 %v20892_v30, %v23736_v20 }
 0x74e   : > { %v25624_v20 = vand.u32 4294901760, %v20643_v55 }
 0x74f   : > { %13174 = vmatmul.mubr.f32.vlgmr.msra.gmra.mrb[22].mxu1 %v9104_v62  ;;  %25591 = vst [vmem:[#allocation55_spill] sm:$0xff] %v20754_v61  ;;  %v20787_v62 = vld [vmem:[%s16328_s19 + $0xb0] sm:$0xff]  ;;  %v20843_v1 = vsub.f32 %v20784_v27, %v23707_v29  ;;  %v20864_v29 = vsub.f32 %v20790_v17, %v23712_v38  ;;  %v20898_v38 = vld [vmem:[%s16328_s19 + $0x128] sm:$0xff]  ;;  %25620 = vst [vmem:[#allocation35_spill] sm:$0xff] %v20959_v26 }
 0x750   : > { %14538 = vmatpush3.bf16.msra.mxu1 %v20499_v19  ;;  %13180 = vmatprep.mubr.f32.mxu1 %v20635_v56  ;;  %v23694_v19 = vand.u32 4294901760, %v20718_v7  ;;  %v20991_v61 = vld [vmem:[%s16328_s19 + $0x160] sm:$0xff] }
 0x751   : > { %14540 = vmatprep.subr.bf16.mxu1 %v20491_v14  ;;  %25601 = vst [vmem:[#allocation112_spill] sm:$0xff] %v20843_v1  ;;  %25603 = vst [vmem:[#allocation230_spill] sm:$0xff] %v20864_v29  ;;  %v25605_v1 = vand.u32 4294901760, %v20806_v40  ;;  %v25608_v29 = vand.u32 4294901760, %v20834_v6 }
 0x752   : > { %v20800_v31 = vsub.f32 %v20718_v7, %v23694_v19  ;;  %v23708_v19 = vand.u32 4294901760, %v20787_v62 }
 0x754   : > { %25597 = vst [vmem:[#allocation106_spill] sm:$0xff] %v20800_v31  ;;  %v20848_v3 = vsub.f32 %v20787_v62, %v23708_v19  ;;  %v20869_v19 = vsub.f32 %v20803_v13, %v23714_v9  ;;  %v20903_v31 = vsub.f32 %v20834_v6, %v25608_v29  ;;  %v25614_v29 = vand.u32 4294901760, %v20854_v8 }
 0x756   : > { %25602 = vst [vmem:[#allocation156_spill] sm:$0xff] %v20848_v3  ;;  %25604 = vst [vmem:[#allocation119_spill] sm:$0xff] %v20869_v19  ;;  %v23720_v3 = vand.u32 4294901760, %v20819_v52 }
 0x757   : > { %13181 = vmatmul.mubr.f32.vlgmr.msra.gmra.mrb[22].mxu1 %v20639_v54  ;;  %25609 = vst [vmem:[#allocation236_spill] sm:$0xff] %v20903_v31  ;;  %v20928_v31 = vsub.f32 %v20854_v8, %v25614_v29  ;;  %v20964_v29 = vsub.f32 %v20895_v24, %v23737_v37 }
 0x758   : > { %14542 = vmatpush3.bf16.msra.mxu1 %v20491_v14  ;;  %13187 = vmatprep.mubr.f32.mxu1 %v20643_v55  ;;  %v20875_v14 = vsub.f32 %v20806_v40, %v25605_v1  ;;  %v20886_v9 = vsub.f32 %v20819_v52, %v23720_v3  ;;  %v25610_v3 = vand.u32 4294901760, %v20837_v50  ;;  %v25629_v55 = vand.u32 4294901760, %v20918_v16 }
 0x759   : > { %14544 = vmatprep.subr.bf16.mxu1 %v20484_v5  ;;  %25615 = vst [vmem:[#allocation238_spill] sm:$0xff] %v20928_v31  ;;  %v20947_v31 = vld [vmem:[%s16328_s19 + $0x158] sm:$0xff]  ;;  %25621 = vst [vmem:[#allocation36_spill] sm:$0xff] %v20964_v29 }
 0x75a   : > { %25606 = vst [vmem:[#allocation233_spill] sm:$0xff] %v20875_v14  ;;  %25607 = vst [vmem:[#allocation235_spill] sm:$0xff] %v20886_v9  ;;  %v20908_v19 = vsub.f32 %v20837_v50, %v25610_v3  ;;  %v20912_v14 = vld [vmem:[%s16328_s19 + $0x138] sm:$0xff]  ;;  %v20915_v9 = vld [vmem:[%s16328_s19 + $0x120] sm:$0xff]  ;;  %v25616_v3 = vand.u32 4294901760, %v20857_v21 }
 0x75b   : > { %v25625_v37 = vand.u32 4294901760, %v20912_v14  ;;  %v25627_v26 = vand.u32 4294901760, %v20915_v9 }
 0x75c   : > { %25611 = vst [vmem:[#allocation30_spill] sm:$0xff] %v20908_v19  ;;  %v20933_v1 = vsub.f32 %v20857_v21, %v25616_v3  ;;  %v20936_v19 = vld [vmem:[%s16328_s19 + $0x148] sm:$0xff]  ;;  %v25622_v3 = vand.u32 4294901760, %v20898_v38 }
 0x75d   : > { %v20984_v29 = vsub.f32 %v20912_v14, %v25625_v37  ;;  %v20997_v11 = vsub.f32 %v20915_v9, %v25627_v26  ;;  %v25631_v37 = vand.u32 4294901760, %v20936_v19  ;;  %v25634_v26 = vand.u32 4294901760, %v20947_v31 }
 0x75e   : > { %25617 = vst [vmem:[#allocation33_spill] sm:$0xff] %v20933_v1  ;;  %v20969_v1 = vsub.f32 %v20898_v38, %v25622_v3 }
 0x75f   : > { %13188 = vmatmul.mubr.f32.vlgmr.msra.gmra.mrb[22].mxu1 %v20646_v51  ;;  %25626 = vst [vmem:[#allocation37_spill] sm:$0xff] %v20984_v29  ;;  %25628 = vst [vmem:[#allocation40_spill] sm:$0xff] %v20997_v11  ;;  %v21007_v3 = vsub.f32 %v20936_v19, %v25631_v37  ;;  %v23752_v29 = vand.u32 4294901760, %v20953_v36  ;;  %v21019_v11 = vsub.f32 %v20947_v31, %v25634_v26 }
 0x760   : > { %25623 = vst [vmem:[#allocation197_spill] sm:$0xff] %v20969_v1  ;;  %14546 = vmatpush3.bf16.msra.mxu1 %v20484_v5  ;;  %13194 = vmatprep.mubr.f32.mxu1 %v25624_v20  ;;  %v20988_v1 = vld [vmem:[%s16328_s19 + $0x178] sm:$0xff]  ;;  %v21002_v20 = vsub.f32 %v20918_v16, %v25629_v55  ;;  %v23755_v55 = vand.u32 4294901760, %v20973_v28 }
 0x761   : > { %14548 = vmatprep.subr.bf16.mxu1 %v20495_v34  ;;  %25632 = vst [vmem:[#allocation193_spill] sm:$0xff] %v21007_v3  ;;  %25635 = vst [vmem:[#allocation50_spill] sm:$0xff] %v21019_v11  ;;  %v21026_v37 = vsub.f32 %v20953_v36, %v23752_v29  ;;  %v23758_v3 = vand.u32 4294901760, %v20988_v1  ;;  %v23762_v29 = vand.u32 4294901760, %v21031_v58 }
 0x762   : > { %25630 = vst [vmem:[#allocation188_spill] sm:$0xff] %v21002_v20  ;;  %v23757_v20 = vand.u32 4294901760, %v20976_v2  ;;  %v21036_v26 = vsub.f32 %v20973_v28, %v23755_v55  ;;  %v21056_v55 = vld [vmem:[%s16328_s19 + $0x8] sm:$0xff] }
 0x763   : > { %25636 = vst [vmem:[#allocation53_spill] sm:$0xff] %v21026_v37  ;;  %v21048_v35 = vsub.f32 %v20988_v1, %v23758_v3  ;;  %v25641_v37 = vand.u32 4294901760, %v20991_v61  ;;  %v25645_v3 = vand.u32 4294901760, %v21014_v59 }
 0x764   : > { %25638 = vst [vmem:[#allocation200_spill] sm:$0xff] %v21036_v26  ;;  %v21041_v11 = vsub.f32 %v20976_v2, %v23757_v20  ;;  %v21059_v26 = vld [vmem:[%s16328_s19 + $0x18] sm:$0xff]  ;;  %v21064_v20 = vsub.f32 %v21011_v43, %v23760_v12  ;;  %v21079_v12 = vsub.f32 %v21031_v58, %v23762_v29  ;;  %v21101_v29 = vld [vmem:[%s16328_s19 + $0x1a8] sm:$0xff]  ;;  %v25657_v58 = vand.u32 4294901760, %v20661_v60  ;;  %v21148_v60 = vld [vmem:[%s16328_s19 + $0x1d0] sm:$0xff] }
 0x765   : > { %25640 = vst [vmem:[#allocation66_spill] sm:$0xff] %v21048_v35  ;;  %v21053_v63 = vsub.f32 %v20991_v61, %v25641_v37  ;;  %25643 = vst [vmem:[#allocation67_spill] sm:$0xff] %v21059_v26  ;;  %v21070_v35 = vsub.f32 %v21014_v59, %v25645_v3  ;;  %v25647_v37 = vand.u32 4294901760, %v20646_v51  ;;  %v23765_v3 = vand.u32 4294901760, %v21056_v55 }
 0x766   : > { %25639 = vst [vmem:[#allocation65_spill] sm:$0xff] %v21041_v11  ;;  %25644 = vst [vmem:[#allocation68_spill] sm:$0xff] %v21064_v20  ;;  %v21128_v59 = vpack.c.bf16 %v25657_v58, %v25656_v10 }
 0x767   : > { %25642 = vst [vmem:[#allocation254_spill] sm:$0xff] %v21053_v63  ;;  %25646 = vst [vmem:[#allocation79_spill] sm:$0xff] %v21070_v35  ;;  %13195 = vmatmul.mubr.f32.vlgmr.msra.gmra.mrb[22].mxu1 %v25647_v37  ;;  %v23764_v35 = vand.u32 4294901760, %v21059_v26  ;;  %v21098_v37 = vld [vmem:[%s16328_s19 + $0x190] sm:$0xff]  ;;  %v25654_v63 = vand.u32 4294901760, %v20607_v49 }
 0x768   : > { %14550 = vmatpush3.bf16.msra.mxu1 %v20495_v34  ;;  %13201 = vmatprep.mubr.f32.mxu1 %v20635_v56  ;;  %25648 = vst [vmem:[#allocation80_spill] sm:$0xff] %v21079_v12  ;;  %v21095_v34 = vld [vmem:[%s16328_s19 + $0x180] sm:$0xff]  ;;  %v21104_v12 = vld [vmem:[%s16328_s19 + $0x1b8] sm:$0xff]  ;;  %25658 = vst [vmem:[#allocation94_spill] sm:$0xff] %v21128_v59 }
 0x769   : > { %14552 = vmatprep.subr.bf16.mxu1 %v20484_v5  ;;  %v21088_v51 = vpack.c.bf16 %v23764_v35, %v23765_v3  ;;  %v21107_v35 = vld [vmem:[%s16328_s19 + $0x1a0] sm:$0xff]  ;;  %v21110_v3 = vld [vmem:[%s16328_s19 + $0x1b0] sm:$0xff]  ;;  %v23776_v26 = vand.u32 4294901760, %v21095_v34 }
 0x76a   : > { %v23785_v49 = vand.u32 4294901760, %v21107_v35  ;;  %v25664_v10 = vand.u32 4294901760, %v21110_v3 }
 0x76b   : > { %25649 = vst [vmem:[#allocation81_spill] sm:$0xff] %v21088_v51 }
 0x76c   : > { %v21182_v58 = vsub.f32 %v21110_v3, %v25664_v10 }
 0x76e   : > { %25665 = vst [vmem:[#allocation110_spill] sm:$0xff] %v21182_v58 }
 0x76f   : > { %13202 = vmatmul.mubr.f32.vlgmr.msra.gmra.mrb[22].mxu1 %v20639_v54 }
 0x770   : > { %14554 = vmatpush3.bf16.msra.mxu1 %v20484_v5  ;;  %13208 = vmatprep.mubr.f32.mxu1 %v20635_v56  ;;  %v25650_v5 = vand.u32 4294901760, %v20596_v46  ;;  %v25651_v56 = vand.u32 4294901760, %v20600_v42  ;;  %v23777_v46 = vand.u32 4294901760, %v21098_v37  ;;  %v23781_v42 = vand.u32 4294901760, %v21101_v29 }
 0x771   : > { %14556 = vmatprep.subr.bf16.mxu1 %v21088_v51  ;;  %v25653_v51 = vand.u32 4294901760, %v20604_v4  ;;  %v21138_v4 = vld [vmem:[%s16328_s19 + $0x1d8] sm:$0xff] }
 0x772   : > { %v21116_v20 = vpack.c.bf16 %v25651_v56, %v25650_v5  ;;  %v23782_v5 = vand.u32 4294901760, %v21104_v12  ;;  %v21135_v56 = vld [vmem:[%s16328_s19 + $0x1c8] sm:$0xff]  ;;  %v25671_v10 = vand.u32 4294901760, %v21138_v4 }
 0x773   : > { %v21122_v11 = vpack.c.bf16 %v25654_v63, %v25653_v51  ;;  %v21154_v51 = vsub.f32 %v21095_v34, %v23776_v26  ;;  %v21159_v63 = vsub.f32 %v21098_v37, %v23777_v46  ;;  %v21177_v46 = vsub.f32 %v21107_v35, %v23785_v49 }
 0x774   : > { %25652 = vst [vmem:[#allocation82_spill] sm:$0xff] %v21116_v20  ;;  %v21172_v26 = vsub.f32 %v21104_v12, %v23782_v5  ;;  %v25666_v5 = vand.u32 4294901760, %v20669_v41  ;;  %v25669_v49 = vand.u32 4294901760, %v21135_v56  ;;  %v21208_v58 = vsub.f32 %v21138_v4, %v25671_v10 }
 0x775   : > { %25655 = vst [vmem:[#allocation93_spill] sm:$0xff] %v21122_v11  ;;  %25659 = vst [vmem:[#allocation95_spill] sm:$0xff] %v21154_v51  ;;  %v21211_v51 = vld [vmem:[%s16328_s19 + $0x1f0] sm:$0xff]  ;;  %v25682_v10 = vand.u32 4294901760, %v20692_v44  ;;  %v25690_v44 = vand.u32 4294901760, %v20702_v22  ;;  %v25699_v22 = vand.u32 4294901760, %v20770_v0 }
 0x776   : > { %25660 = vst [vmem:[#allocation96_spill] sm:$0xff] %v21159_v63  ;;  %25662 = vst [vmem:[#allocation108_spill] sm:$0xff] %v21172_v26  ;;  %v21188_v63 = vld [vmem:[%s16328_s19 + $0x1f8] sm:$0xff]  ;;  %v25667_v26 = vand.u32 4294901760, %v20672_v47  ;;  %v25675_v47 = vand.u32 4294901760, %v21148_v60  ;;  %v25708_v0 = vand.u32 4294901760, %v20819_v52 }
 0x777   : > { %13209 = vmatmul.mubr.f32.vlgmr.msra.gmra.mrb[22].mxu1 %v20639_v54  ;;  %v21167_v54 = vsub.f32 %v21101_v29, %v23781_v42  ;;  %25663 = vst [vmem:[#allocation109_spill] sm:$0xff] %v21177_v46  ;;  %v21191_v42 = vld [vmem:[%s16328_s19 + $0x1e0] sm:$0xff]  ;;  %v21203_v46 = vsub.f32 %v21135_v56, %v25669_v49  ;;  %25672 = vst [vmem:[#allocation123_spill] sm:$0xff] %v21208_v58  ;;  %v23796_v49 = vand.u32 4294901760, %v21188_v63  ;;  %v25677_v58 = vand.u32 4294901760, %v20675_v23 }
 0x778   : > { %14558 = vmatpush1.bf16.msra.mxu1 %v21116_v20  ;;  %v21185_v20 = vld [vmem:[%s16328_s19 + $0x1e8] sm:$0xff]  ;;  %v25683_v23 = vand.u32 4294901760, %v20695_v18  ;;  %v25692_v18 = vand.u32 4294901760, %v20708_v57  ;;  %v25701_v57 = vand.u32 4294901760, %v20784_v27  ;;  %v25710_v27 = vand.u32 4294901760, %v20834_v6 }
 0x779   : > { %25661 = vst [vmem:[#allocation107_spill] sm:$0xff] %v21167_v54  ;;  %14560 = vmatprep.subr.bf16.mxu1 %v21122_v11  ;;  %v21198_v54 = vpack.c.bf16 %v25667_v26, %v25666_v5  ;;  %25670 = vst [vmem:[#allocation122_spill] sm:$0xff] %v21203_v46  ;;  %v25673_v11 = vand.u32 4294901760, %v21145_v53  ;;  %v21221_v26 = vsub.f32 %v21148_v60, %v25675_v47  ;;  %v23795_v5 = vand.u32 4294901760, %v21185_v20 }
 0x77a   : > { %v21249_v46 = vpack.c.bf16 %v25683_v23, %v25682_v10  ;;  %v25693_v10 = vand.u32 4294901760, %v20711_v39  ;;  %v25702_v39 = vand.u32 4294901760, %v20787_v62  ;;  %v25711_v62 = vand.u32 4294901760, %v20837_v50 }
 0x77b   : > { %25668 = vst [vmem:[#allocation121_spill] sm:$0xff] %v21198_v54  ;;  %v21216_v41 = vsub.f32 %v21145_v53, %v25673_v11  ;;  %25676 = vst [vmem:[#allocation135_spill] sm:$0xff] %v21221_v26  ;;  %v25678_v11 = vand.u32 4294901760, %v20689_v45  ;;  %v21237_v47 = vsub.f32 %v21185_v20, %v23795_v5  ;;  %v21242_v26 = vsub.f32 %v21188_v63, %v23796_v49 }
 0x77c   : > { %14562 = vmatpush1.bf16.msra.mxu1 %v21128_v59  ;;  %25684 = vst [vmem:[#allocation149_spill] sm:$0xff] %v21249_v46  ;;  %v25685_v45 = vand.u32 4294901760, %v21191_v42  ;;  %v25689_v49 = vand.u32 4294901760, %v20699_v15  ;;  %v21273_v23 = vpack.c.bf16 %v25693_v10, %v25692_v18  ;;  %v25698_v15 = vand.u32 4294901760, %v20767_v48  ;;  %v25816_v59 = vld [vmem:[#allocation233_spill] sm:$0xff] }
 0x77d   : > { %25674 = vst [vmem:[#allocation124_spill] sm:$0xff] %v21216_v41  ;;  %v21232_v41 = vpack.c.bf16 %v25678_v11, %v25677_v58  ;;  %25680 = vst [vmem:[#allocation137_spill] sm:$0xff] %v21237_v47  ;;  %14564 = vmatprep.subr.bf16.mxu1 %v21198_v54  ;;  %v25687_v11 = vand.u32 4294901760, %v21211_v51  ;;  %v25707_v48 = vand.u32 4294901760, %v20806_v40  ;;  %v25716_v52 = vand.u32 4294901760, %v20857_v21 }
 0x77e   : > { %25681 = vst [vmem:[#allocation138_spill] sm:$0xff] %v21242_v26  ;;  %v21254_v58 = vsub.f32 %v21191_v42, %v25685_v45  ;;  %v21266_v54 = vpack.c.bf16 %v25690_v44, %v25689_v49  ;;  %25694 = vst [vmem:[#allocation161_spill] sm:$0xff] %v21273_v23  ;;  %v25695_v45 = vand.u32 4294901760, %v20718_v7  ;;  %v21287_v49 = vpack.c.bf16 %v25699_v22, %v25698_v15 }
 0x77f   : > { %25679 = vst [vmem:[#allocation136_spill] sm:$0xff] %v21232_v41  ;;  %v21259_v5 = vsub.f32 %v21211_v51, %v25687_v11  ;;  %v25696_v11 = vand.u32 4294901760, %v20725_v33  ;;  %v21294_v44 = vpack.c.bf16 %v25702_v39, %v25701_v57  ;;  %v25704_v7 = vand.u32 4294901760, %v20790_v17 }
 0x780   : > { %25686 = vst [vmem:[#allocation150_spill] sm:$0xff] %v21254_v58  ;;  %14566 = vmatpush1.bf16.msra.mxu1 %v21232_v41  ;;  %25691 = vst [vmem:[#allocation152_spill] sm:$0xff] %v21266_v54  ;;  %v25705_v33 = vand.u32 4294901760, %v20803_v13  ;;  %v21308_v10 = vpack.c.bf16 %v25708_v0, %v25707_v48  ;;  %v25713_v13 = vand.u32 4294901760, %v20851_v25  ;;  %v25714_v17 = vand.u32 4294901760, %v20854_v8 }
 0x781   : > { %25688 = vst [vmem:[#allocation151_spill] sm:$0xff] %v21259_v5  ;;  %14568 = vmatprep.subr.bf16.mxu1 %v21249_v46  ;;  %v21280_v41 = vpack.c.bf16 %v25696_v11, %v25695_v45  ;;  %25700 = vst [vmem:[#allocation163_spill] sm:$0xff] %v21287_v49  ;;  %v21315_v45 = vpack.c.bf16 %v25711_v62, %v25710_v27  ;;  %v25717_v40 = vand.u32 4294901760, %v20878_v32  ;;  %v25719_v50 = vand.u32 4294901760, %v20892_v30  ;;  %v25741_v27 = vld [vmem:[#allocation67_spill] sm:$0xff] }
 0x782   : > { %25703 = vst [vmem:[#allocation164_spill] sm:$0xff] %v21294_v44  ;;  %v21301_v18 = vpack.c.bf16 %v25705_v33, %v25704_v7  ;;  %25709 = vst [vmem:[#allocation174_spill] sm:$0xff] %v21308_v10  ;;  %v21322_v11 = vpack.c.bf16 %v25714_v17, %v25713_v13  ;;  %v25720_v6 = vand.u32 4294901760, %v20895_v24  ;;  %v25722_v8 = vand.u32 4294901760, %v20898_v38  ;;  %v25745_v17 = vld [vmem:[#allocation54_spill] sm:$0xff] }
 0x783   : > { %25697 = vst [vmem:[#allocation162_spill] sm:$0xff] %v21280_v41  ;;  %25712 = vst [vmem:[#allocation175_spill] sm:$0xff] %v21315_v45  ;;  %v21329_v15 = vpack.c.bf16 %v25717_v40, %v25716_v52  ;;  %v25723_v25 = vand.u32 4294901760, %v20912_v14  ;;  %v25725_v21 = vand.u32 4294901760, %v20915_v9  ;;  %v25726_v32 = vand.u32 4294901760, %v20918_v16 }
 0x784   : > { %14570 = vmatpush1.bf16.msra.mxu1 %v21266_v54  ;;  %25706 = vst [vmem:[#allocation173_spill] sm:$0xff] %v21301_v18  ;;  %25715 = vst [vmem:[#allocation176_spill] sm:$0xff] %v21322_v11  ;;  %v21336_v22 = vpack.c.bf16 %v25720_v6, %v25719_v50  ;;  %v25728_v24 = vand.u32 4294901760, %v20936_v19  ;;  %v25729_v30 = vand.u32 4294901760, %v20947_v31  ;;  %v25731_v38 = vand.u32 4294901760, %v20953_v36 }
 0x785   : > { %14572 = vmatprep.subr.bf16.mxu1 %v21273_v23  ;;  %25718 = vst [vmem:[#allocation181_spill] sm:$0xff] %v21329_v15  ;;  %v21343_v57 = vpack.c.bf16 %v25723_v25, %v25722_v8  ;;  %v21350_v39 = vpack.c.bf16 %v25726_v32, %v25725_v21  ;;  %v25732_v14 = vand.u32 4294901760, %v20973_v28  ;;  %v25734_v9 = vand.u32 4294901760, %v20976_v2  ;;  %v25815_v23 = vld [vmem:[#allocation119_spill] sm:$0xff] }
 0x786   : > { %25721 = vst [vmem:[#allocation182_spill] sm:$0xff] %v21336_v22  ;;  %v21357_v7 = vpack.c.bf16 %v25729_v30, %v25728_v24  ;;  %v25735_v16 = vand.u32 4294901760, %v20988_v1  ;;  %v25737_v31 = vand.u32 4294901760, %v20991_v61  ;;  %v25738_v19 = vand.u32 4294901760, %v21011_v43  ;;  %v25743_v1 = vld [vmem:[#allocation49_spill] sm:$0xff] }
 0x787   : > { %25724 = vst [vmem:[#allocation183_spill] sm:$0xff] %v21343_v57  ;;  %25727 = vst [vmem:[#allocation184_spill] sm:$0xff] %v21350_v39  ;;  %v21364_v33 = vpack.c.bf16 %v25732_v14, %v25731_v38  ;;  %v25740_v36 = vand.u32 4294901760, %v21056_v55  ;;  %v25742_v62 = vand.u32 4294901760, %v25741_v27  ;;  %v25744_v13 = vand.u32 4294901760, %v25743_v1 }
 0x788   : > { %14574 = vmatpush1.bf16.msra.mxu1 %v21280_v41  ;;  %25730 = vst [vmem:[#allocation189_spill] sm:$0xff] %v21357_v7  ;;  %v21371_v48 = vpack.c.bf16 %v25735_v16, %v25734_v9  ;;  %v21378_v0 = vpack.c.bf16 %v25738_v19, %v25737_v31  ;;  %v25746_v61 = vand.u32 4294901760, %v25745_v17  ;;  %v25748_v43 = vand.u32 4294901760, %v21095_v34  ;;  %v25769_v17 = vld [vmem:[#allocation232_spill] sm:$0xff] }
 0x789   : > { %14576 = vmatprep.subr.bf16.mxu1 %v21287_v49  ;;  %25733 = vst [vmem:[#allocation190_spill] sm:$0xff] %v21364_v33  ;;  %v21383_v28 = vsub.f32 %v21056_v55, %v25740_v36  ;;  %v21388_v2 = vsub.f32 %v25741_v27, %v25742_v62  ;;  %v25749_v55 = vand.u32 4294901760, %v21098_v37  ;;  %v25751_v50 = vand.u32 4294901760, %v21101_v29  ;;  %v7463_v27 = vpop.xlane.xlu1 %7462  ;;  %v7469_v62 = vpop.xlane.xlu0 %7468 }
 0x78a   : > { %25736 = vst [vmem:[#allocation191_spill] sm:$0xff] %v21371_v48  ;;  %25739 = vst [vmem:[#allocation192_spill] sm:$0xff] %v21378_v0  ;;  %v21395_v52 = vpack.c.bf16 %v25746_v61, %v25744_v13  ;;  %v25752_v6 = vand.u32 4294901760, %v21104_v12  ;;  %v25754_v34 = vand.u32 4294901760, %v21107_v35  ;;  %v25755_v37 = vand.u32 4294901760, %v21110_v3 }
 0x78b   : > { %v21402_v40 = vpack.c.bf16 %v25749_v55, %v25748_v43  ;;  %v23804_v25 = vand.u32 4294901760, %v21383_v28  ;;  %v23803_v21 = vand.u32 4294901760, %v21388_v2  ;;  %v25757_v29 = vand.u32 4294901760, %v21135_v56  ;;  %v25770_v55 = vld [vmem:[#allocation234_spill] sm:$0xff] }
 0x78c   : > { %14578 = vmatpush1.bf16.msra.mxu1 %v21294_v44  ;;  %25747 = vst [vmem:[#allocation201_spill] sm:$0xff] %v21395_v52  ;;  %v21409_v8 = vpack.c.bf16 %v25752_v6, %v25751_v50  ;;  %v21418_v32 = vpack.c.bf16 %v25755_v37, %v25754_v34  ;;  %v25758_v12 = vand.u32 4294901760, %v21138_v4  ;;  %v25760_v3 = vand.u32 4294901760, %v21145_v53 }
 0x78d   : > { %14580 = vmatprep.subr.bf16.mxu1 %v21301_v18  ;;  %25750 = vst [vmem:[#allocation202_spill] sm:$0xff] %v21402_v40  ;;  %v9793_v30 = vsub.f32 %v21383_v28, %v23804_v25  ;;  %v9805_v35 = vsub.f32 %v21388_v2, %v23803_v21  ;;  %v25761_v38 = vand.u32 4294901760, %v21148_v60  ;;  %v25763_v56 = vand.u32 4294901760, %v21185_v20  ;;  %v7466_v1 = vpop.xlane.xlu1 %7465  ;;  %v7472_v13 = vpop.xlane.xlu0 %7471  ;;  %v25780_v21 = vld [vmem:[#allocation253_spill] sm:$0xff] }
 0x78e   : > { %25753 = vst [vmem:[#allocation203_spill] sm:$0xff] %v21409_v8  ;;  %25756 = vst [vmem:[#allocation204_spill] sm:$0xff] %v21418_v32  ;;  %v21425_v24 = vpack.c.bf16 %v25758_v12, %v25757_v29  ;;  %v25764_v4 = vand.u32 4294901760, %v21188_v63  ;;  %v25766_v19 = vand.u32 4294901760, %v21191_v42  ;;  %v25767_v53 = vand.u32 4294901760, %v21211_v51  ;;  %v25772_v29 = vld [vmem:[#allocation29_spill] sm:$0xff] }
 0x78f   : > { %v21438_v14 = vpack.c.bf16 %v25761_v38, %v25760_v3  ;;  %v9794_v16 = vand.u32 4294901760, %v9793_v30  ;;  %v9806_v31 = vand.u32 4294901760, %v9805_v35  ;;  %15524 = vrcp.f32 %v7463_v27  ;;  %v25773_v30 = vld [vmem:[#allocation38_spill] sm:$0xff] }
 0x790   : > { %14582 = vmatpush1.bf16.msra.mxu1 %v21308_v10  ;;  %25759 = vst [vmem:[#allocation213_spill] sm:$0xff] %v21425_v24  ;;  %v21445_v9 = vpack.c.bf16 %v25764_v4, %v25763_v56  ;;  %v21452_v36 = vpack.c.bf16 %v25767_v53, %v25766_v19  ;;  %15526 = vrcp.f32 %v7466_v1  ;;  %v23802_v61 = vand.u32 4294901760, %v25769_v17  ;;  %v25774_v4 = vld [vmem:[#allocation39_spill] sm:$0xff]  ;;  %v25804_v10 = vld [vmem:[#allocation146_spill] sm:$0xff] }
 0x791   : > { %14584 = vmatprep.subr.bf16.mxu1 %v21315_v45  ;;  %25762 = vst [vmem:[#allocation214_spill] sm:$0xff] %v21438_v14  ;;  %v14619_v60 = vpack.c.bf16 %v9806_v31, %v9794_v16  ;;  %15528 = vrcp.f32 %v7472_v13  ;;  %v23801_v50 = vand.u32 4294901760, %v25770_v55  ;;  %v23806_v12 = vand.u32 4294901760, %v25772_v29  ;;  %v25775_v31 = vld [vmem:[#allocation42_spill] sm:$0xff] }
 0x792   : > { %25765 = vst [vmem:[#allocation215_spill] sm:$0xff] %v21445_v9  ;;  %25768 = vst [vmem:[#allocation216_spill] sm:$0xff] %v21452_v36  ;;  %15530 = vrcp.f32 %v7469_v62  ;;  %v9799_v37 = vsub.f32 %v25769_v17, %v23802_v61  ;;  %v23805_v35 = vand.u32 4294901760, %v25773_v30  ;;  %v23811_v16 = vand.u32 4294901760, %v25774_v4 }
 0x793   : > { %v9811_v56 = vsub.f32 %v25770_v55, %v23801_v50  ;;  %v9817_v13 = vsub.f32 %v25772_v29, %v23806_v12  ;;  %v25779_v50 = vld [vmem:[#allocation43_spill] sm:$0xff]  ;;  %v23870_v54 = vand.u32 4294901760, %v25815_v23 }
 0x794   : > { %14586 = vmatpush1.bf16.msra.mxu1 %v21322_v11  ;;  %v9800_v1 = vand.u32 4294901760, %v9799_v37  ;;  %v9823_v37 = vsub.f32 %v25774_v4, %v23811_v16 }
 0x795   : > { %14588 = vmatprep.subr.bf16.mxu1 %v21329_v15 }
 0x798   : > { %14590 = vmatpush1.bf16.msra.mxu1 %v21336_v22 }
 0x799   : > { %14592 = vmatprep.subr.bf16.mxu1 %v21343_v57  ;;  %v15525_v42 = vpop.eup %15524  ;;  %v25796_v57 = vld [vmem:[#allocation128_spill] sm:$0xff] }
 0x79a   : > { %v15527_v43 = vpop.eup %15526 }
 0x79b   : > { %v15529_v3 = vpop.eup %15528 }
 0x79c   : > { %14594 = vmatpush1.bf16.msra.mxu1 %v21350_v39  ;;  %v15531_v53 = vpop.eup %15530  ;;  %v25801_v39 = vld [vmem:[#allocation106_spill] sm:$0xff] }
 0x79d   : > { %14596 = vmatprep.subr.bf16.mxu1 %v21357_v7  ;;  %v23853_v22 = vand.u32 4294901760, %v25801_v39 }
 0x7a0   : > { %14598 = vmatpush1.bf16.msra.mxu1 %v21364_v33  ;;  %v25794_v33 = vld [vmem:[#allocation91_spill] sm:$0xff] }
 0x7a1   : > { %14600 = vmatprep.subr.bf16.mxu1 %v21371_v48  ;;  %v25803_v45 = vand.u32 4294901760, %v25794_v33 }
 0x7a4   : > { %14602 = vmatpush1.bf16.msra.mxu1 %v21378_v0  ;;  %v25795_v0 = vld [vmem:[#allocation92_spill] sm:$0xff] }
 0x7a5   : > { %14604 = vmatprep.subr.bf16.mxu1 %v21395_v52  ;;  %v25791_v52 = vld [vmem:[#allocation56_spill] sm:$0xff] }
 0x7a8   : > { %14606 = vmatpush1.bf16.msra.mxu1 %v21402_v40  ;;  %v25802_v40 = vld [vmem:[#allocation145_spill] sm:$0xff] }
 0x7a9   : > { %14608 = vmatprep.subr.bf16.mxu1 %v21409_v8 }
 0x7ac   : > { %14610 = vmatpush1.bf16.msra.mxu1 %v21418_v32 }
 0x7ad   : > { %14612 = vmatprep.subr.bf16.mxu1 %v21425_v24 }
 0x7b0   : > { %14614 = vmatpush1.bf16.msra.mxu1 %v21438_v14  ;;  %v25786_v14 = vand.u32 4294901760, %v25779_v50 }
 0x7b1   : > { %14616 = vmatprep.subr.bf16.mxu1 %v21445_v9 }
 0x7b4   : > { %14618 = vmatpush1.bf16.msra.mxu1 %v21452_v36  ;;  %v25785_v36 = vld [vmem:[#allocation52_spill] sm:$0xff] }
 0x7b5   : > { %14620 = vmatprep.subr.bf16.mxu1 %v14619_v60 }
 0x7c6   : > { %v13084_v20 = vpop.f32.mrb[16].mxu1 }
 0x7c7   : > { %v7991_v63 = vpop.f32.mrb[17].mxu1  ;;  %v9526_v6 = vmul.f32 %v15527_v43, %v13084_v20 }
 0x7c8   : > { %v9525_v51 = vmul.f32 %v15525_v42, %v7991_v63  ;;  %v9829_v42 = vsub.f32 %v25773_v30, %v23805_v35 }
 0x7c9   : > { %v21470_v60 = vand.u32 4294901760, %v9526_v6 }
 0x7ca   : > { %v21458_v34 = vand.u32 4294901760, %v9525_v51  ;;  %v9830_v61 = vand.u32 4294901760, %v9829_v42  ;;  %v9824_v42 = vand.u32 4294901760, %v9823_v37  ;;  %v25793_v37 = vand.u32 4294901760, %v25785_v36 }
 0x7cb   : > { %25776 = vst [vmem:[#allocation194_spill] sm:$0xff] %v21470_v60  ;;  %v21495_v35 = vsub.f32 %v9526_v6, %v21470_v60  ;;  %v25787_v6 = vand.u32 4294901760, %v25780_v21 }
 0x7cc   : > { %25771 = vst [vmem:[#allocation97_spill] sm:$0xff] %v21458_v34  ;;  %v21473_v20 = vsub.f32 %v9525_v51, %v21458_v34  ;;  %v25781_v51 = vld [vmem:[#allocation51_spill] sm:$0xff] }
 0x7cd   : > { %25783 = vst [vmem:[#allocation259_spill] sm:$0xff] %v21495_v35  ;;  %v9853_v12 = vsub.f32 %v25780_v21, %v25787_v6 }
 0x7ce   : > { %25777 = vst [vmem:[#allocation199_spill] sm:$0xff] %v21473_v20  ;;  %v25789_v9 = vand.u32 4294901760, %v21473_v20 }
 0x7cf   : > { %v9854_v48 = vand.u32 4294901760, %v9853_v12 }
 0x7d0   : > { %v9734_v16 = vsub.f32 %v21473_v20, %v25789_v9 }
 0x7d2   : > { %v9735_v11 = vand.u32 4294901760, %v9734_v16 }
 0x7f2   : > { %v13126_v38 = vpop.f32.mrb[18].mxu1 }
 0x7f3   : > { %v9528_v63 = vmul.f32 %v15529_v3, %v13126_v38  ;;  %v8499_v27 = vpop.f32.mrb[19].mxu1  ;;  %v9812_v38 = vand.u32 4294901760, %v9811_v56  ;;  %v9818_v56 = vand.u32 4294901760, %v9817_v13 }
 0x7f4   : > { %v9527_v62 = vmul.f32 %v15531_v53, %v8499_v27  ;;  %v25782_v53 = vand.u32 4294901760, %v25775_v31 }
 0x7f5   : > { %v21481_v43 = vand.u32 4294901760, %v9528_v63  ;;  %v14621_v13 = vpack.c.bf16 %v9812_v38, %v9800_v1  ;;  %v14623_v38 = vpack.c.bf16 %v9830_v61, %v9818_v56 }
 0x7f6   : > { %v21486_v3 = vand.u32 4294901760, %v9527_v62  ;;  %v9835_v27 = vsub.f32 %v25775_v31, %v25782_v53  ;;  %v9841_v53 = vsub.f32 %v25779_v50, %v25786_v14  ;;  %v25790_v14 = vld [vmem:[#allocation55_spill] sm:$0xff] }
 0x7f7   : > { %25778 = vst [vmem:[#allocation98_spill] sm:$0xff] %v21481_v43  ;;  %v21499_v25 = vsub.f32 %v9528_v63, %v21481_v43  ;;  %v25788_v63 = vand.u32 4294901760, %v25781_v51  ;;  %v25799_v56 = vand.u32 4294901760, %v25790_v14 }
 0x7f8   : > { %v21502_v19 = vsub.f32 %v9527_v62, %v21486_v3  ;;  %v9836_v32 = vand.u32 4294901760, %v9835_v27  ;;  %v9859_v27 = vsub.f32 %v25785_v36, %v25793_v37  ;;  %v9842_v9 = vand.u32 4294901760, %v9841_v53 }
 0x7f9   : > { %25784 = vst [vmem:[#allocation117_spill] sm:$0xff] %v21499_v25  ;;  %v9847_v24 = vsub.f32 %v25781_v51, %v25788_v63  ;;  %v25792_v63 = vand.u32 4294901760, %v21499_v25  ;;  %v9865_v53 = vsub.f32 %v25790_v14, %v25799_v56  ;;  %v25805_v56 = vld [vmem:[#allocation111_spill] sm:$0xff] }
 0x7fa   : > { %v23838_v62 = vand.u32 4294901760, %v21502_v19  ;;  %v9860_v37 = vand.u32 4294901760, %v9859_v27  ;;  %v14625_v16 = vpack.c.bf16 %v9836_v32, %v9824_v42  ;;  %v25807_v27 = vand.u32 4294901760, %v25796_v57 }
 0x7fb   : > { %v9744_v1 = vsub.f32 %v21499_v25, %v25792_v63  ;;  %v9848_v8 = vand.u32 4294901760, %v9847_v24  ;;  %v25798_v63 = vand.u32 4294901760, %v21495_v35  ;;  %v25800_v24 = vand.u32 4294901760, %v25791_v52 }
 0x7fc   : > { %v9728_v6 = vsub.f32 %v21502_v19, %v23838_v62  ;;  %v25797_v62 = vld [vmem:[#allocation105_spill] sm:$0xff]  ;;  %v9866_v18 = vand.u32 4294901760, %v9865_v53 }
 0x7fd   : > { %v9750_v61 = vsub.f32 %v21495_v35, %v25798_v63  ;;  %v9877_v12 = vsub.f32 %v25791_v52, %v25800_v24  ;;  %v9871_v63 = vsub.f32 %v25794_v33, %v25803_v45  ;;  %v9889_v24 = vsub.f32 %v25796_v57, %v25807_v27 }
 0x7fe   : > { %v9729_v7 = vand.u32 4294901760, %v9728_v6  ;;  %v9745_v6 = vand.u32 4294901760, %v9744_v1  ;;  %v14627_v45 = vpack.c.bf16 %v9854_v48, %v9842_v9  ;;  %v14629_v44 = vpack.c.bf16 %v9860_v37, %v9848_v8  ;;  %v25813_v8 = vld [vmem:[#allocation156_spill] sm:$0xff] }
 0x7ff   : > { %v9751_v42 = vand.u32 4294901760, %v9750_v61  ;;  %v9878_v15 = vand.u32 4294901760, %v9877_v12  ;;  %v25810_v27 = vand.u32 4294901760, %v25804_v10  ;;  %v25811_v61 = vand.u32 4294901760, %v25805_v56 }
 0x800   : > { %9730 = vmatprep.mubr.f32.mxu1 %v9729_v7  ;;  %v25806_v7 = vand.u32 4294901760, %v25795_v0  ;;  %v23872_v53 = vand.u32 4294901760, %v25813_v8  ;;  %v9872_v12 = vand.u32 4294901760, %v9871_v63  ;;  %v23875_v35 = vand.u32 4294901760, %v25816_v59 }
 0x801   : > { %9736 = vmatmul.mubr.f32.vlgmr.msra.gmra.mrb[24].mxu1 %v9735_v11  ;;  %v25808_v11 = vand.u32 4294901760, %v25797_v62  ;;  %v9913_v49 = vsub.f32 %v25804_v10, %v25810_v27  ;;  %v9925_v48 = vsub.f32 %v25805_v56, %v25811_v61  ;;  %v25817_v61 = vld [vmem:[#allocation235_spill] sm:$0xff] }
 0x802   : > { %9746 = vmatprep.mubr.f32.mxu1 %v9745_v6  ;;  %14622 = vmatpush1.bf16.msra.mxu1 %v14621_v13  ;;  %v9883_v1 = vsub.f32 %v25795_v0, %v25806_v7  ;;  %v9895_v13 = vsub.f32 %v25801_v39, %v23853_v22  ;;  %v25809_v6 = vand.u32 4294901760, %v25802_v40  ;;  %v23877_v25 = vand.u32 4294901760, %v25817_v61 }
 0x803   : > { %v9901_v32 = vsub.f32 %v25797_v62, %v25808_v11  ;;  %14624 = vmatprep.subr.bf16.mxu1 %v14623_v38  ;;  %v25812_v38 = vld [vmem:[#allocation112_spill] sm:$0xff]  ;;  %v9890_v11 = vand.u32 4294901760, %v9889_v24  ;;  %v9914_v9 = vand.u32 4294901760, %v9913_v49  ;;  %v9926_v20 = vand.u32 4294901760, %v9925_v48 }
 0x804   : > { %v9907_v7 = vsub.f32 %v25802_v40, %v25809_v6  ;;  %v9884_v37 = vand.u32 4294901760, %v9883_v1  ;;  %v14631_v6 = vpack.c.bf16 %v9878_v15, %v9866_v18  ;;  %v9896_v27 = vand.u32 4294901760, %v9895_v13  ;;  %v25820_v13 = vld [vmem:[#allocation30_spill] sm:$0xff] }
 0x805   : > { %9752 = vmatmul.mubr.f32.gmra.mrb[26].mxu1 %v9751_v42  ;;  %v9902_v22 = vand.u32 4294901760, %v9901_v32  ;;  %v25814_v42 = vld [vmem:[#allocation230_spill] sm:$0xff]  ;;  %v9931_v18 = vsub.f32 %v25813_v8, %v23872_v53  ;;  %v9949_v49 = vsub.f32 %v25815_v23, %v23870_v54  ;;  %v25819_v32 = vld [vmem:[#allocation236_spill] sm:$0xff]  ;;  %v9943_v48 = vsub.f32 %v25816_v59, %v23875_v35  ;;  %v25823_v53 = vld [vmem:[#allocation33_spill] sm:$0xff] }
 0x806   : > { %14626 = vmatpush1.bf16.msra.mxu1 %v14625_v16  ;;  %v23871_v41 = vand.u32 4294901760, %v25814_v42  ;;  %v9908_v46 = vand.u32 4294901760, %v9907_v7  ;;  %v25818_v16 = vand.u32 4294901760, %v25812_v38  ;;  %v14633_v15 = vpack.c.bf16 %v9884_v37, %v9872_v12  ;;  %v25822_v54 = vld [vmem:[#allocation238_spill] sm:$0xff] }
 0x807   : > { %14628 = vmatprep.subr.bf16.mxu1 %v14627_v45  ;;  %v14635_v1 = vpack.c.bf16 %v9902_v22, %v9890_v11  ;;  %v14639_v12 = vpack.c.bf16 %v9926_v20, %v9914_v9  ;;  %v9932_v11 = vand.u32 4294901760, %v9931_v18  ;;  %v25824_v7 = vld [vmem:[#allocation34_spill] sm:$0xff]  ;;  %v9950_v35 = vand.u32 4294901760, %v9949_v49 }
 0x808   : > { %v9919_v63 = vsub.f32 %v25812_v38, %v25818_v16  ;;  %v9937_v24 = vsub.f32 %v25814_v42, %v23871_v41  ;;  %v14637_v22 = vpack.c.bf16 %v9908_v46, %v9896_v27  ;;  %v25825_v59 = vand.u32 4294901760, %v25819_v32  ;;  %v25829_v16 = vld [vmem:[#allocation197_spill] sm:$0xff] }
 0x809   : > { %v25826_v46 = vand.u32 4294901760, %v25820_v13  ;;  %v9944_v9 = vand.u32 4294901760, %v9943_v48  ;;  %v25833_v48 = vand.u32 4294901760, %v25823_v53  ;;  %v25834_v41 = vand.u32 4294901760, %v25824_v7 }
 0x80a   : > { %14630 = vmatpush1.bf16.msra.mxu1 %v14629_v44  ;;  %v9955_v44 = vsub.f32 %v25817_v61, %v23877_v25  ;;  %v9920_v37 = vand.u32 4294901760, %v9919_v63  ;;  %v9938_v42 = vand.u32 4294901760, %v9937_v24  ;;  %v9961_v25 = vsub.f32 %v25819_v32, %v25825_v59  ;;  %v25827_v63 = vld [vmem:[#allocation35_spill] sm:$0xff]  ;;  %v25842_v61 = vld [vmem:[#allocation53_spill] sm:$0xff] }
 0x80b   : > { %14632 = vmatprep.subr.bf16.mxu1 %v14631_v6  ;;  %v25821_v6 = vld [vmem:[#allocation32_spill] sm:$0xff]  ;;  %v9973_v20 = vsub.f32 %v25820_v13, %v25826_v46  ;;  %v23882_v18 = vand.u32 4294901760, %v25827_v63  ;;  %v25832_v32 = vand.u32 4294901760, %v25822_v54  ;;  %v23897_v8 = vand.u32 4294901760, %v25842_v61 }
 0x80c   : > { %v9956_v27 = vand.u32 4294901760, %v9955_v44  ;;  %v14641_v45 = vpack.c.bf16 %v9932_v11, %v9920_v37  ;;  %v25831_v49 = vand.u32 4294901760, %v25821_v6  ;;  %v9985_v44 = vsub.f32 %v25823_v53, %v25833_v48 }
 0x80d   : > { %v9979_v46 = vsub.f32 %v25822_v54, %v25832_v32  ;;  %v9997_v37 = vsub.f32 %v25824_v7, %v25834_v41  ;;  %v14643_v11 = vpack.c.bf16 %v9950_v35, %v9938_v42  ;;  %v9962_v24 = vand.u32 4294901760, %v9961_v25  ;;  %v25838_v35 = vld [vmem:[#allocation40_spill] sm:$0xff]  ;;  %v25841_v7 = vld [vmem:[#allocation50_spill] sm:$0xff] }
 0x80e   : > { %14634 = vmatpush1.bf16.msra.mxu1 %v14633_v15  ;;  %v25828_v15 = vld [vmem:[#allocation36_spill] sm:$0xff]  ;;  %v9967_v59 = vsub.f32 %v25821_v6, %v25831_v49  ;;  %v14645_v23 = vpack.c.bf16 %v9956_v27, %v9944_v9  ;;  %v9991_v49 = vsub.f32 %v25827_v63, %v23882_v18  ;;  %v25836_v54 = vand.u32 4294901760, %v25829_v16 }
 0x80f   : > { %14636 = vmatprep.subr.bf16.mxu1 %v14635_v1  ;;  %v25830_v1 = vld [vmem:[#allocation37_spill] sm:$0xff]  ;;  %v25835_v6 = vand.u32 4294901760, %v25828_v15  ;;  %v25839_v42 = vld [vmem:[#allocation188_spill] sm:$0xff]  ;;  %v9980_v9 = vand.u32 4294901760, %v9979_v46  ;;  %v9986_v27 = vand.u32 4294901760, %v9985_v44  ;;  %v9998_v18 = vand.u32 4294901760, %v9997_v37 }
 0x810   : > { %v10009_v48 = vsub.f32 %v25829_v16, %v25836_v54  ;;  %v25837_v53 = vand.u32 4294901760, %v25830_v1  ;;  %v23892_v13 = vand.u32 4294901760, %v25841_v7  ;;  %v9992_v54 = vand.u32 4294901760, %v9991_v49  ;;  %v25854_v49 = vld [vmem:[#allocation96_spill] sm:$0xff] }
 0x811   : > { %v10003_v32 = vsub.f32 %v25828_v15, %v25835_v6  ;;  %v25840_v6 = vld [vmem:[#allocation193_spill] sm:$0xff]  ;;  %v14651_v44 = vpack.c.bf16 %v9998_v18, %v9986_v27 }
 0x812   : > { %14638 = vmatpush1.bf16.msra.mxu1 %v14637_v22  ;;  %v9974_v22 = vand.u32 4294901760, %v9973_v20  ;;  %v10021_v41 = vsub.f32 %v25830_v1, %v25837_v53  ;;  %v9968_v20 = vand.u32 4294901760, %v9967_v59  ;;  %v23893_v15 = vand.u32 4294901760, %v25840_v6  ;;  %v25843_v53 = vld [vmem:[#allocation200_spill] sm:$0xff] }
 0x813   : > { %14640 = vmatprep.subr.bf16.mxu1 %v14639_v12  ;;  %v23894_v12 = vand.u32 4294901760, %v25839_v42  ;;  %v10004_v16 = vand.u32 4294901760, %v10003_v32  ;;  %v23899_v1 = vand.u32 4294901760, %v25843_v53  ;;  %v10010_v25 = vand.u32 4294901760, %v10009_v48  ;;  %v25846_v32 = vld [vmem:[#allocation66_spill] sm:$0xff]  ;;  %v25849_v48 = vld [vmem:[#allocation79_spill] sm:$0xff] }
 0x814   : > { %v14647_v63 = vpack.c.bf16 %v9974_v22, %v9962_v24  ;;  %v10022_v38 = vand.u32 4294901760, %v10021_v41  ;;  %v14649_v46 = vpack.c.bf16 %v9980_v9, %v9968_v20  ;;  %v10033_v37 = vsub.f32 %v25840_v6, %v23893_v15  ;;  %v25845_v22 = vld [vmem:[#allocation65_spill] sm:$0xff]  ;;  %v25848_v15 = vld [vmem:[#allocation68_spill] sm:$0xff] }
 0x815   : > { %v10027_v24 = vsub.f32 %v25839_v42, %v23894_v12  ;;  %v10039_v41 = vsub.f32 %v25842_v61, %v23897_v8 }
 0x816   : > { %14642 = vmatpush1.bf16.msra.mxu1 %v14641_v45  ;;  %v25844_v45 = vand.u32 4294901760, %v25838_v35  ;;  %v14655_v18 = vpack.c.bf16 %v10022_v38, %v10010_v25  ;;  %v10034_v61 = vand.u32 4294901760, %v10033_v37  ;;  %v25851_v38 = vand.u32 4294901760, %v25845_v22 }
 0x817   : > { %14644 = vmatprep.subr.bf16.mxu1 %v14643_v11  ;;  %v10045_v11 = vsub.f32 %v25841_v7, %v23892_v13  ;;  %v10028_v9 = vand.u32 4294901760, %v10027_v24  ;;  %v25850_v7 = vld [vmem:[#allocation80_spill] sm:$0xff]  ;;  %v25852_v25 = vand.u32 4294901760, %v25846_v32 }
 0x818   : > { %v10015_v59 = vsub.f32 %v25838_v35, %v25844_v45  ;;  %v25847_v45 = vld [vmem:[#allocation254_spill] sm:$0xff]  ;;  %v25860_v13 = vand.u32 4294901760, %v25850_v7 }
 0x81a   : > { %14646 = vmatpush1.bf16.msra.mxu1 %v14645_v23  ;;  %v10051_v23 = vsub.f32 %v25843_v53, %v23899_v1  ;;  %v10016_v20 = vand.u32 4294901760, %v10015_v59  ;;  %v10046_v1 = vand.u32 4294901760, %v10045_v11  ;;  %v10040_v59 = vand.u32 4294901760, %v10039_v41  ;;  %v25855_v53 = vld [vmem:[#allocation107_spill] sm:$0xff] }
 0x81b   : > { %14648 = vmatprep.subr.bf16.mxu1 %v14647_v63  ;;  %v14653_v63 = vpack.c.bf16 %v10004_v16, %v9992_v54  ;;  %v10057_v16 = vsub.f32 %v25845_v22, %v25851_v38  ;;  %v10069_v54 = vsub.f32 %v25846_v32, %v25852_v25  ;;  %v25857_v11 = vand.u32 4294901760, %v25847_v45 }
 0x81c   : > { %v10052_v24 = vand.u32 4294901760, %v10051_v23  ;;  %v14657_v6 = vpack.c.bf16 %v10028_v9, %v10016_v20  ;;  %v25858_v22 = vand.u32 4294901760, %v25848_v15  ;;  %v25859_v41 = vand.u32 4294901760, %v25849_v48 }
 0x81d   : > { %v10063_v38 = vsub.f32 %v25847_v45, %v25857_v11  ;;  %v10093_v20 = vsub.f32 %v25850_v7, %v25860_v13  ;;  %v14659_v9 = vpack.c.bf16 %v10046_v1, %v10034_v61  ;;  %v10058_v37 = vand.u32 4294901760, %v10057_v16  ;;  %v25864_v61 = vld [vmem:[#allocation109_spill] sm:$0xff]  ;;  %v25867_v7 = vld [vmem:[#allocation123_spill] sm:$0xff] }
 0x81e   : > { %v21662_v27 = vpop.f32.mrb[20].mxu1  ;;  %14650 = vmatpush1.bf16.msra.mxu1 %v14649_v46  ;;  %v25853_v46 = vld [vmem:[#allocation95_spill] sm:$0xff]  ;;  %v10075_v25 = vsub.f32 %v25848_v15, %v25858_v22  ;;  %v10081_v23 = vsub.f32 %v25849_v48, %v25859_v41  ;;  %v14661_v42 = vpack.c.bf16 %v10052_v24, %v10040_v59  ;;  %v25861_v45 = vand.u32 4294901760, %v25854_v49 }
 0x81f   : > { %v21668_v8 = vpop.f32.mrb[21].mxu1  ;;  %14652 = vmatprep.subr.bf16.mxu1 %v14651_v44  ;;  %v23906_v12 = vand.u32 4294901760, %v25853_v46  ;;  %v25856_v44 = vld [vmem:[#allocation108_spill] sm:$0xff]  ;;  %v25862_v15 = vand.u32 4294901760, %v25855_v53  ;;  %v23923_v1 = vand.u32 4294901760, %v25864_v61  ;;  %v23914_v32 = vand.u32 4294901760, %v25867_v7 }
 0x820   : > { %v10099_v22 = vsub.f32 %v25854_v49, %v25861_v45  ;;  %v25863_v48 = vand.u32 4294901760, %v25856_v44  ;;  %v10076_v59 = vand.u32 4294901760, %v10075_v25  ;;  %v10082_v24 = vand.u32 4294901760, %v10081_v23  ;;  %v25866_v45 = vld [vmem:[#allocation122_spill] sm:$0xff] }
 0x821   : > { %v10087_v11 = vsub.f32 %v25853_v46, %v23906_v12  ;;  %v10105_v41 = vsub.f32 %v25855_v53, %v25862_v15  ;;  %v10094_v12 = vand.u32 4294901760, %v10093_v20  ;;  %v23915_v49 = vand.u32 4294901760, %v25866_v45  ;;  %v25869_v20 = vld [vmem:[#allocation135_spill] sm:$0xff] }
 0x822   : > { %14654 = vmatpush1.bf16.msra.mxu1 %v14653_v63  ;;  %v10070_v63 = vand.u32 4294901760, %v10069_v54  ;;  %v10117_v13 = vsub.f32 %v25856_v44, %v25863_v48  ;;  %v10064_v54 = vand.u32 4294901760, %v10063_v38  ;;  %v10100_v53 = vand.u32 4294901760, %v10099_v22 }
 0x823   : > { %14656 = vmatprep.subr.bf16.mxu1 %v14655_v18  ;;  %v25865_v18 = vld [vmem:[#allocation110_spill] sm:$0xff]  ;;  %v10088_v15 = vand.u32 4294901760, %v10087_v11  ;;  %v10106_v35 = vand.u32 4294901760, %v10105_v41  ;;  %v10111_v48 = vsub.f32 %v25864_v61, %v23923_v1  ;;  %v14667_v25 = vpack.c.bf16 %v10094_v12, %v10082_v24 }
 0x824   : > { %v23916_v16 = vand.u32 4294901760, %v25865_v18  ;;  %v14663_v46 = vpack.c.bf16 %v10070_v63, %v10058_v37  ;;  %v10118_v56 = vand.u32 4294901760, %v10117_v13  ;;  %v14665_v38 = vpack.c.bf16 %v10076_v59, %v10064_v54  ;;  %v25868_v37 = vld [vmem:[#allocation124_spill] sm:$0xff]  ;;  %v25882_v1 = vld [vmem:[#allocation30_spill] sm:$0xff] }
 0x825   : > { %v23922_v23 = vand.u32 4294901760, %v25868_v37  ;;  %v10129_v63 = vsub.f32 %v25866_v45, %v23915_v49  ;;  %v10141_v11 = vsub.f32 %v25867_v7, %v23914_v32  ;;  %v23917_v22 = vand.u32 4294901760, %v21237_v47 }
 0x826   : > { %14658 = vmatpush1.bf16.msra.mxu1 %v14657_v6  ;;  %v10123_v6 = vsub.f32 %v25865_v18, %v23916_v16  ;;  %v23919_v41 = vand.u32 4294901760, %v21242_v26  ;;  %v14671_v13 = vpack.c.bf16 %v10118_v56, %v10106_v35  ;;  %v10112_v12 = vand.u32 4294901760, %v10111_v48 }
 0x827   : > { %14660 = vmatprep.subr.bf16.mxu1 %v14659_v9  ;;  %v23918_v9 = vand.u32 4294901760, %v25869_v20  ;;  %v23921_v24 = vand.u32 4294901760, %v21254_v58  ;;  %v23920_v32 = vand.u32 4294901760, %v21259_v5  ;;  %v10130_v49 = vand.u32 4294901760, %v10129_v63 }
 0x828   : > { %v10124_v54 = vand.u32 4294901760, %v10123_v6  ;;  %v10142_v16 = vand.u32 4294901760, %v10141_v11  ;;  %v10153_v56 = vsub.f32 %v21237_v47, %v23917_v22  ;;  %v10165_v35 = vsub.f32 %v21242_v26, %v23919_v41 }
 0x829   : > { %v10147_v59 = vsub.f32 %v25869_v20, %v23918_v9  ;;  %v10159_v6 = vsub.f32 %v21254_v58, %v23921_v24 }
 0x82a   : > { %14662 = vmatpush1.bf16.msra.mxu1 %v14661_v42  ;;  %v14669_v42 = vpack.c.bf16 %v10100_v53, %v10088_v15  ;;  %v14673_v53 = vpack.c.bf16 %v10124_v54, %v10112_v12  ;;  %v14675_v63 = vpack.c.bf16 %v10142_v16, %v10130_v49  ;;  %v10154_v11 = vand.u32 4294901760, %v10153_v56 }
 0x82b   : > { %14664 = vmatprep.subr.bf16.mxu1 %v14663_v46  ;;  %v10135_v46 = vsub.f32 %v25868_v37, %v23922_v23  ;;  %v10148_v48 = vand.u32 4294901760, %v10147_v59  ;;  %v10166_v22 = vand.u32 4294901760, %v10165_v35  ;;  %v10160_v41 = vand.u32 4294901760, %v10159_v6  ;;  %v25881_v23 = vld [vmem:[#allocation236_spill] sm:$0xff] }
 0x82d   : > { %v10136_v15 = vand.u32 4294901760, %v10135_v46  ;;  %v14679_v54 = vpack.c.bf16 %v10166_v22, %v10154_v11 }
 0x82e   : > { %14666 = vmatpush1.bf16.msra.mxu1 %v14665_v38  ;;  %v10171_v38 = vsub.f32 %v21259_v5, %v23920_v32  ;;  %v14683_v32 = vpack.c.bf16 %v21388_v2, %v21383_v28 }
 0x82f   : > { %14668 = vmatprep.subr.bf16.mxu1 %v14667_v25  ;;  %v7475_v25 = vpop.xlane.xlu1 %7474  ;;  %v14677_v9 = vpack.c.bf16 %v10148_v48, %v10136_v15 }
 0x830   : > { %v10172_v12 = vand.u32 4294901760, %v10171_v38  ;;  %15532 = vrcp.f32 %v7475_v25 }
 0x832   : > { %14670 = vmatpush1.bf16.msra.mxu1 %v14669_v42  ;;  %v7481_v42 = vpop.xlane.xlu0 %7480  ;;  %v14681_v59 = vpack.c.bf16 %v10172_v12, %v10160_v41 }
 0x833   : > { %14672 = vmatprep.subr.bf16.mxu1 %v14671_v13  ;;  %v7478_v46 = vpop.xlane.xlu1 %7477 }
 0x834   : > { %15534 = vrcp.f32 %v7478_v46 }
 0x836   : > { %14674 = vmatpush1.bf16.msra.mxu1 %v14673_v53  ;;  %v7484_v13 = vpop.xlane.xlu0 %7483 }
 0x837   : > { %14676 = vmatprep.subr.bf16.mxu1 %v14675_v63  ;;  %15536 = vrcp.f32 %v7484_v13 }
 0x838   : > { %15538 = vrcp.f32 %v7481_v42 }
 0x83a   : > { %14678 = vmatpush1.bf16.msra.mxu1 %v14677_v9  ;;  %v15533_v49 = vpop.eup %15532 }
 0x83b   : > { %14680 = vmatprep.subr.bf16.mxu1 %v14679_v54  ;;  %v9529_v16 = vmul.f32 %v15533_v49, %v21668_v8 }
 0x83d   : > { %v21748_v35 = vand.u32 4294901760, %v9529_v16 }
 0x83e   : > { %14682 = vmatpush1.bf16.msra.mxu1 %v14681_v59  ;;  %v15535_v56 = vpop.eup %15534 }
 0x83f   : > { %14684 = vmatprep.subr.bf16.mxu1 %v14683_v32  ;;  %v9530_v22 = vmul.f32 %v15535_v56, %v21662_v27  ;;  %25870 = vst [vmem:[#allocation142_spill] sm:$0xff] %v21748_v35  ;;  %v21753_v48 = vsub.f32 %v9529_v16, %v21748_v35 }
 0x841   : > { %v15537_v9 = vpop.eup %15536  ;;  %v21750_v15 = vand.u32 4294901760, %v9530_v22  ;;  %v23926_v11 = vand.u32 4294901760, %v21753_v48 }
 0x842   : > { %v15539_v53 = vpop.eup %15538 }
 0x843   : > { %25871 = vst [vmem:[#allocation118_spill] sm:$0xff] %v21750_v15  ;;  %v21760_v8 = vsub.f32 %v9530_v22, %v21750_v15  ;;  %v9766_v46 = vsub.f32 %v21753_v48, %v23926_v11 }
 0x845   : > { %v23924_v59 = vand.u32 4294901760, %v21760_v8  ;;  %v9767_v56 = vand.u32 4294901760, %v9766_v46  ;;  %v14693_v46 = vpack.c.bf16 %v25785_v36, %v25781_v51 }
 0x847   : > { %v9782_v22 = vsub.f32 %v21760_v8, %v23924_v59  ;;  %v14711_v59 = vpack.c.bf16 %v25882_v1, %v25881_v23  ;;  %v25894_v1 = vld [vmem:[#allocation50_spill] sm:$0xff] }
 0x84a   : > { %v13210_v41 = vpop.f32.mrb[22].mxu1 }
 0x84b   : > { %v9532_v6 = vmul.f32 %v15537_v9, %v13210_v41  ;;  %v9515_v32 = vpop.f32.mrb[23].mxu1  ;;  %v9783_v41 = vand.u32 4294901760, %v9782_v22  ;;  %v25874_v22 = vld [vmem:[#allocation111_spill] sm:$0xff] }
 0x84c   : > { %v9531_v38 = vmul.f32 %v15539_v53, %v9515_v32  ;;  %v14685_v53 = vpack.c.bf16 %v25770_v55, %v25769_v17  ;;  %v14689_v32 = vpack.c.bf16 %v25775_v31, %v25774_v4 }
 0x84d   : > { %v21755_v25 = vand.u32 4294901760, %v9532_v6 }
 0x84e   : > { %v21757_v63 = vand.u32 4294901760, %v9531_v38 }
 0x84f   : > { %25872 = vst [vmem:[#allocation218_spill] sm:$0xff] %v21755_v25  ;;  %v21763_v27 = vsub.f32 %v9532_v6, %v21755_v25  ;;  %v14687_v6 = vpack.c.bf16 %v25773_v30, %v25772_v29 }
 0x850   : > { %25873 = vst [vmem:[#allocation222_spill] sm:$0xff] %v21757_v63  ;;  %v21767_v12 = vsub.f32 %v9531_v38, %v21757_v63  ;;  %v14691_v38 = vpack.c.bf16 %v25780_v21, %v25779_v50 }
 0x851   : > { %v23925_v42 = vand.u32 4294901760, %v21763_v27 }
 0x852   : > { %v23927_v54 = vand.u32 4294901760, %v21767_v12 }
 0x853   : > { %v9776_v49 = vsub.f32 %v21763_v27, %v23925_v42  ;;  %v25884_v42 = vld [vmem:[#allocation238_spill] sm:$0xff] }
 0x854   : > { %v9760_v13 = vsub.f32 %v21767_v12, %v23927_v54  ;;  %v25886_v54 = vld [vmem:[#allocation34_spill] sm:$0xff] }
 0x855   : > { %v9777_v9 = vand.u32 4294901760, %v9776_v49  ;;  %v14697_v49 = vpack.c.bf16 %v25795_v0, %v25794_v33 }
 0x856   : > { %v9761_v16 = vand.u32 4294901760, %v9760_v13  ;;  %v14695_v13 = vpack.c.bf16 %v25791_v52, %v25790_v14 }
 0x858   : > { %9762 = vmatprep.mubr.f32.mxu1 %v9761_v16  ;;  %v14699_v16 = vpack.c.bf16 %v25797_v62, %v25796_v57 }
 0x859   : > { %9768 = vmatmul.mubr.f32.gmra.mrb[28].mxu1 %v9767_v56  ;;  %v14701_v56 = vpack.c.bf16 %v25802_v40, %v25801_v39 }
 0x85a   : > { %9778 = vmatprep.mubr.f32.mxu1 %v9777_v9  ;;  %v14703_v9 = vpack.c.bf16 %v25874_v22, %v25804_v10 }
 0x85d   : > { %9784 = vmatmul.mubr.f32.gmra.mrb[30].mxu1 %v9783_v41  ;;  %v25875_v41 = vld [vmem:[#allocation112_spill] sm:$0xff] }
 0x85e   : > { %10175 = vmatprep.mubr.f32.mxu1 %v21486_v3 }
 0x861   : > { %10177 = vmatmul.mubr.f32.vlgmr.msra.gmra.mrb[24].mxu1 %v21458_v34 }
 0x862   : > { %14686 = vmatpush1.bf16.msra.mxu1 %v14685_v53  ;;  %10183 = vmatprep.mubr.f32.mxu1 %v21481_v43  ;;  %v25876_v53 = vld [vmem:[#allocation156_spill] sm:$0xff] }
 0x863   : > { %14688 = vmatprep.subr.bf16.mxu1 %v14687_v6  ;;  %v14705_v6 = vpack.c.bf16 %v25876_v53, %v25875_v41  ;;  %v25892_v43 = vld [vmem:[#allocation188_spill] sm:$0xff] }
 0x865   : > { %10185 = vmatmul.mubr.f32.gmra.mrb[26].mxu1 %v21470_v60 }
 0x866   : > { %14690 = vmatpush1.bf16.msra.mxu1 %v14689_v32  ;;  %10191 = vmatprep.mubr.f32.mxu1 %v21757_v63  ;;  %v25877_v32 = vld [vmem:[#allocation230_spill] sm:$0xff]  ;;  %v25890_v63 = vld [vmem:[#allocation37_spill] sm:$0xff] }
 0x867   : > { %14692 = vmatprep.subr.bf16.mxu1 %v14691_v38  ;;  %v25878_v38 = vld [vmem:[#allocation119_spill] sm:$0xff] }
 0x869   : > { %10193 = vmatmul.mubr.f32.gmra.mrb[28].mxu1 %v21748_v35 }
 0x86a   : > { %14694 = vmatpush1.bf16.msra.mxu1 %v14693_v46  ;;  %10199 = vmatprep.mubr.f32.mxu1 %v21755_v25  ;;  %v14707_v46 = vpack.c.bf16 %v25878_v38, %v25877_v32  ;;  %v25888_v25 = vld [vmem:[#allocation36_spill] sm:$0xff] }
 0x86b   : > { %14696 = vmatprep.subr.bf16.mxu1 %v14695_v13  ;;  %v25879_v13 = vld [vmem:[#allocation233_spill] sm:$0xff] }
 0x86d   : > { %10201 = vmatmul.mubr.f32.gmra.mrb[30].mxu1 %v21750_v15 }
 0x86e   : > { %14698 = vmatpush1.bf16.msra.mxu1 %v14697_v49  ;;  %10401 = vmatprep.mubr.f32.mxu1 %v21502_v19  ;;  %v25880_v49 = vld [vmem:[#allocation235_spill] sm:$0xff] }
 0x86f   : > { %14700 = vmatprep.subr.bf16.mxu1 %v14699_v16  ;;  %v14709_v24 = vpack.c.bf16 %v25880_v49, %v25879_v13  ;;  %v25883_v16 = vld [vmem:[#allocation32_spill] sm:$0xff] }
 0x870   : > { %v14713_v11 = vpack.c.bf16 %v25884_v42, %v25883_v16  ;;  %v25896_v16 = vld [vmem:[#allocation200_spill] sm:$0xff] }
 0x872   : > { %14702 = vmatpush1.bf16.msra.mxu1 %v14701_v56  ;;  %v25885_v56 = vld [vmem:[#allocation33_spill] sm:$0xff] }
 0x873   : > { %14704 = vmatprep.subr.bf16.mxu1 %v14703_v9  ;;  %v14715_v15 = vpack.c.bf16 %v25886_v54, %v25885_v56  ;;  %v25887_v9 = vld [vmem:[#allocation35_spill] sm:$0xff]  ;;  %v25898_v56 = vld [vmem:[#allocation66_spill] sm:$0xff] }
 0x874   : > { %v14717_v35 = vpack.c.bf16 %v25888_v25, %v25887_v9  ;;  %v25900_v9 = vld [vmem:[#allocation68_spill] sm:$0xff] }
 0x876   : > { %14706 = vmatpush1.bf16.msra.mxu1 %v14705_v6  ;;  %v25889_v6 = vld [vmem:[#allocation197_spill] sm:$0xff] }
 0x877   : > { %14708 = vmatprep.subr.bf16.mxu1 %v14707_v46  ;;  %v14719_v60 = vpack.c.bf16 %v25890_v63, %v25889_v6  ;;  %v25891_v46 = vld [vmem:[#allocation40_spill] sm:$0xff] }
 0x878   : > { %v14721_v34 = vpack.c.bf16 %v25892_v43, %v25891_v46  ;;  %v25902_v6 = vld [vmem:[#allocation80_spill] sm:$0xff] }
 0x879   : > { %v25904_v46 = vld [vmem:[#allocation96_spill] sm:$0xff] }
 0x87a   : > { %14710 = vmatpush1.bf16.msra.mxu1 %v14709_v24  ;;  %v25893_v24 = vld [vmem:[#allocation193_spill] sm:$0xff] }
 0x87b   : > { %14712 = vmatprep.subr.bf16.mxu1 %v14711_v59  ;;  %v14723_v42 = vpack.c.bf16 %v25894_v1, %v25893_v24  ;;  %v25895_v59 = vld [vmem:[#allocation53_spill] sm:$0xff] }
 0x87c   : > { %v14725_v54 = vpack.c.bf16 %v25896_v16, %v25895_v59 }
 0x87e   : > { %14714 = vmatpush1.bf16.msra.mxu1 %v14713_v11  ;;  %v25897_v11 = vld [vmem:[#allocation65_spill] sm:$0xff] }
 0x87f   : > { %14716 = vmatprep.subr.bf16.mxu1 %v14715_v15  ;;  %v14727_v25 = vpack.c.bf16 %v25898_v56, %v25897_v11  ;;  %v25899_v15 = vld [vmem:[#allocation254_spill] sm:$0xff] }
 0x880   : > { %v14729_v63 = vpack.c.bf16 %v25900_v9, %v25899_v15 }
 0x882   : > { %14718 = vmatpush1.bf16.msra.mxu1 %v14717_v35  ;;  %v25901_v35 = vld [vmem:[#allocation79_spill] sm:$0xff] }
 0x883   : > { %14720 = vmatprep.subr.bf16.mxu1 %v14719_v60  ;;  %v14731_v43 = vpack.c.bf16 %v25902_v6, %v25901_v35  ;;  %v25903_v60 = vld [vmem:[#allocation95_spill] sm:$0xff] }
 0x884   : > { %v14733_v1 = vpack.c.bf16 %v25904_v46, %v25903_v60 }
 0x886   : > { %14722 = vmatpush1.bf16.msra.mxu1 %v14721_v34  ;;  %v25905_v34 = vld [vmem:[#allocation107_spill] sm:$0xff] }
 0x887   : > { %14724 = vmatprep.subr.bf16.mxu1 %v14723_v42  ;;  %v14735_v16 = vpack.c.bf16 %v25856_v44, %v25905_v34  ;;  %v14737_v42 = vpack.c.bf16 %v25865_v18, %v25864_v61  ;;  %v25908_v18 = vld [vmem:[#allocation117_spill] sm:$0xff] }
 0x88a   : > { %14726 = vmatpush1.bf16.msra.mxu1 %v14725_v54  ;;  %v14739_v54 = vpack.c.bf16 %v25867_v7, %v25866_v45  ;;  %v25910_v7 = vld [vmem:[#allocation93_spill] sm:$0xff] }
 0x88b   : > { %14728 = vmatprep.subr.bf16.mxu1 %v14727_v25  ;;  %v14741_v25 = vpack.c.bf16 %v25869_v20, %v25868_v37 }
 0x88e   : > { %14730 = vmatpush1.bf16.msra.mxu1 %v14729_v63  ;;  %v14743_v63 = vpack.c.bf16 %v21242_v26, %v21237_v47  ;;  %v25913_v26 = vld [vmem:[#allocation121_spill] sm:$0xff]  ;;  %v25925_v47 = vld [vmem:[#allocation176_spill] sm:$0xff] }
 0x88f   : > { %14732 = vmatprep.subr.bf16.mxu1 %v14731_v43  ;;  %v14745_v43 = vpack.c.bf16 %v21259_v5, %v21254_v58  ;;  %v25921_v5 = vld [vmem:[#allocation164_spill] sm:$0xff]  ;;  %v25922_v58 = vld [vmem:[#allocation173_spill] sm:$0xff] }
 0x892   : > { %14734 = vmatpush1.bf16.msra.mxu1 %v14733_v1  ;;  %v25906_v1 = vld [vmem:[#allocation81_spill] sm:$0xff] }
 0x893   : > { %14736 = vmatprep.subr.bf16.mxu1 %v14735_v16  ;;  %v25907_v16 = vld [vmem:[#allocation199_spill] sm:$0xff] }
 0x896   : > { %14738 = vmatpush1.bf16.msra.mxu1 %v14737_v42  ;;  %v25909_v42 = vld [vmem:[#allocation82_spill] sm:$0xff] }
 0x897   : > { %14740 = vmatprep.subr.bf16.mxu1 %v14739_v54  ;;  %v25911_v54 = vld [vmem:[#allocation259_spill] sm:$0xff] }
 0x89a   : > { %14742 = vmatpush1.bf16.msra.mxu1 %v14741_v25  ;;  %v25912_v25 = vld [vmem:[#allocation94_spill] sm:$0xff] }
 0x89b   : > { %14744 = vmatprep.subr.bf16.mxu1 %v14743_v63  ;;  %v25914_v63 = vld [vmem:[#allocation136_spill] sm:$0xff] }
 0x89e   : > { %14746 = vmatpush1.bf16.msra.mxu1 %v14745_v43  ;;  %v25915_v43 = vld [vmem:[#allocation149_spill] sm:$0xff] }
 0x89f   : > { %14748 = vmatprep.subr.bf16.mxu1 %v25906_v1  ;;  %v25918_v1 = vld [vmem:[#allocation161_spill] sm:$0xff] }
 0x8a1   : > { %10404 = vmatmul.mubr.f32.vlgmr.msra.gmra.mrb[24].mxu1 %v25907_v16 }
 0x8a2   : > { %10411 = vmatprep.mubr.f32.mxu1 %v25908_v18  ;;  %14750 = vmatpush1.bf16.msra.mxu1 %v25909_v42  ;;  %v25916_v42 = vld [vmem:[#allocation152_spill] sm:$0xff] }
 0x8a3   : > { %14752 = vmatprep.subr.bf16.mxu1 %v25910_v7  ;;  %v25917_v7 = vand.u32 4294901760, %v21502_v19  ;;  %v25927_v19 = vld [vmem:[#allocation182_spill] sm:$0xff] }
 0x8a5   : > { %10414 = vmatmul.mubr.f32.gmra.mrb[26].mxu1 %v25911_v54 }
 0x8a6   : > { %10421 = vmatprep.mubr.f32.mxu1 %v21767_v12  ;;  %14754 = vmatpush1.bf16.msra.mxu1 %v25912_v25  ;;  %v25919_v25 = vld [vmem:[#allocation162_spill] sm:$0xff] }
 0x8a7   : > { %14756 = vmatprep.subr.bf16.mxu1 %v25913_v26  ;;  %v25920_v26 = vld [vmem:[#allocation163_spill] sm:$0xff] }
 0x8a9   : > { %10424 = vmatmul.mubr.f32.gmra.mrb[28].mxu1 %v21753_v48 }
 0x8aa   : > { %10431 = vmatprep.mubr.f32.mxu1 %v21763_v27  ;;  %14758 = vmatpush1.bf16.msra.mxu1 %v25914_v63  ;;  %v25923_v63 = vld [vmem:[#allocation174_spill] sm:$0xff] }
 0x8ab   : > { %14760 = vmatprep.subr.bf16.mxu1 %v25915_v43  ;;  %v25924_v43 = vld [vmem:[#allocation175_spill] sm:$0xff] }
 0x8ad   : > { %10434 = vmatmul.mubr.f32.gmra.mrb[30].mxu1 %v21760_v8 }
 0x8ae   : > { %14762 = vmatpush1.bf16.msra.mxu1 %v25916_v42  ;;  %10571 = vmatprep.mubr.f32.mxu1 %v25917_v7  ;;  %v25926_v42 = vld [vmem:[#allocation181_spill] sm:$0xff]  ;;  %v25928_v7 = vld [vmem:[#allocation183_spill] sm:$0xff] }
 0x8af   : > { %14764 = vmatprep.subr.bf16.mxu1 %v25918_v1  ;;  %v25929_v1 = vld [vmem:[#allocation184_spill] sm:$0xff] }
 0x8b2   : > { %14766 = vmatpush1.bf16.msra.mxu1 %v25919_v25  ;;  %v25930_v25 = vld [vmem:[#allocation189_spill] sm:$0xff] }
 0x8b3   : > { %14768 = vmatprep.subr.bf16.mxu1 %v25920_v26  ;;  %v25931_v26 = vld [vmem:[#allocation190_spill] sm:$0xff] }
 0x8b6   : > { %14770 = vmatpush1.bf16.msra.mxu1 %v25921_v5  ;;  %v25932_v5 = vld [vmem:[#allocation191_spill] sm:$0xff] }
 0x8b7   : > { %14772 = vmatprep.subr.bf16.mxu1 %v25922_v58  ;;  %v25933_v58 = vld [vmem:[#allocation192_spill] sm:$0xff] }
 0x8ba   : > { %14774 = vmatpush1.bf16.msra.mxu1 %v25923_v63  ;;  %v25934_v63 = vld [vmem:[#allocation201_spill] sm:$0xff] }
 0x8bb   : > { %14776 = vmatprep.subr.bf16.mxu1 %v25924_v43  ;;  %v25935_v43 = vld [vmem:[#allocation202_spill] sm:$0xff] }
 0x8be   : > { %14778 = vmatpush1.bf16.msra.mxu1 %v25925_v47  ;;  %v25936_v47 = vld [vmem:[#allocation203_spill] sm:$0xff] }
 0x8bf   : > { %14780 = vmatprep.subr.bf16.mxu1 %v25926_v42  ;;  %v25937_v42 = vld [vmem:[#allocation204_spill] sm:$0xff] }
 0x8c2   : > { %14782 = vmatpush1.bf16.msra.mxu1 %v25927_v19  ;;  %v25938_v19 = vld [vmem:[#allocation213_spill] sm:$0xff] }
 0x8c3   : > { %14784 = vmatprep.subr.bf16.mxu1 %v25928_v7  ;;  %v25939_v7 = vld [vmem:[#allocation214_spill] sm:$0xff] }
 0x8c6   : > { %14786 = vmatpush1.bf16.msra.mxu1 %v25929_v1  ;;  %v25940_v1 = vld [vmem:[#allocation215_spill] sm:$0xff] }
 0x8c7   : > { %14788 = vmatprep.subr.bf16.mxu1 %v25930_v25 }
 0x8ca   : > { %14790 = vmatpush1.bf16.msra.mxu1 %v25931_v26  ;;  %v25941_v26 = vand.u32 4294901760, %v21383_v28  ;;  %v25949_v28 = vand.u32 4294901760, %v25908_v18 }
 0x8cb   : > { %14792 = vmatprep.subr.bf16.mxu1 %v25932_v5  ;;  %v25942_v5 = vand.u32 4294901760, %v21388_v2 }
 0x8cd   : > { %v14811_v25 = vpack.c.bf16 %v25942_v5, %v25941_v26  ;;  %v25950_v26 = vand.u32 4294901760, %v25774_v4  ;;  %v25951_v5 = vand.u32 4294901760, %v25775_v31  ;;  %v25957_v4 = vand.u32 4294901760, %v25785_v36 }
 0x8ce   : > { %14794 = vmatpush1.bf16.msra.mxu1 %v25933_v58  ;;  %v25943_v58 = vld [vmem:[#allocation216_spill] sm:$0xff]  ;;  %v25958_v31 = vand.u32 4294901760, %v25790_v14  ;;  %v25964_v36 = vand.u32 4294901760, %v25796_v57  ;;  %v25965_v14 = vand.u32 4294901760, %v25797_v62  ;;  %v25971_v62 = vand.u32 4294901760, %v25875_v41 }
 0x8cf   : > { %14796 = vmatprep.subr.bf16.mxu1 %v25934_v63  ;;  %v25944_v63 = vand.u32 4294901760, %v25769_v17  ;;  %v14817_v2 = vpack.c.bf16 %v25951_v5, %v25950_v26  ;;  %v25952_v17 = vand.u32 4294901760, %v25779_v50  ;;  %v25959_v50 = vand.u32 4294901760, %v25791_v52  ;;  %v25978_v26 = vld [vmem:[#allocation30_spill] sm:$0xff] }
 0x8d0   : > { %v25966_v52 = vand.u32 4294901760, %v21760_v8  ;;  %v25972_v8 = vand.u32 4294901760, %v25876_v53  ;;  %v25979_v41 = vand.u32 4294901760, %v25978_v26  ;;  %v25980_v53 = vld [vmem:[#allocation32_spill] sm:$0xff]  ;;  %v26017_v26 = vld [vmem:[#allocation110_spill] sm:$0xff] }
 0x8d2   : > { %14798 = vmatpush1.bf16.msra.mxu1 %v25935_v43  ;;  %v25945_v43 = vand.u32 4294901760, %v25770_v55  ;;  %v25953_v55 = vand.u32 4294901760, %v25780_v21  ;;  %v25960_v21 = vand.u32 4294901760, %v21753_v48  ;;  %v25967_v48 = vand.u32 4294901760, %v25801_v39 }
 0x8d3   : > { %14800 = vmatprep.subr.bf16.mxu1 %v25936_v47  ;;  %v25974_v39 = vand.u32 4294901760, %v25878_v38  ;;  %v25984_v38 = vld [vmem:[#allocation33_spill] sm:$0xff] }
 0x8d4   : > { %v14813_v47 = vpack.c.bf16 %v25945_v43, %v25944_v63  ;;  %v25970_v63 = vand.u32 4294901760, %v25874_v22  ;;  %v14833_v43 = vpack.c.bf16 %v25972_v8, %v25971_v62  ;;  %v25977_v22 = vand.u32 4294901760, %v25881_v23 }
 0x8d5   : > { %v26006_v62 = vand.u32 4294901760, %v25897_v11  ;;  %v26007_v8 = vand.u32 4294901760, %v25898_v56  ;;  %v26013_v11 = vand.u32 4294901760, %v25904_v46  ;;  %v26014_v56 = vand.u32 4294901760, %v25905_v34 }
 0x8d6   : > { %14802 = vmatpush1.bf16.msra.mxu1 %v25937_v42  ;;  %v25946_v42 = vand.u32 4294901760, %v25772_v29  ;;  %v14819_v29 = vpack.c.bf16 %v25953_v55, %v25952_v17  ;;  %v14839_v5 = vpack.c.bf16 %v25979_v41, %v25977_v22  ;;  %v25982_v17 = vld [vmem:[#allocation238_spill] sm:$0xff]  ;;  %v26022_v46 = vand.u32 4294901760, %v25868_v37  ;;  %v26033_v37 = vld [vmem:[#allocation97_spill] sm:$0xff] }
 0x8d7   : > { %14804 = vmatprep.subr.bf16.mxu1 %v25938_v19  ;;  %v25947_v19 = vand.u32 4294901760, %v25773_v30  ;;  %v25954_v30 = vand.u32 4294901760, %v25911_v54  ;;  %v26023_v34 = vand.u32 4294901760, %v25869_v20  ;;  %v26034_v20 = vld [vmem:[#allocation98_spill] sm:$0xff] }
 0x8da   : > { %14806 = vmatpush1.bf16.msra.mxu1 %v25939_v7  ;;  %v14815_v7 = vpack.c.bf16 %v25947_v19, %v25946_v42  ;;  %v25961_v42 = vand.u32 4294901760, %v21763_v27  ;;  %v25968_v27 = vand.u32 4294901760, %v25802_v40  ;;  %v25973_v19 = vand.u32 4294901760, %v25877_v32 }
 0x8db   : > { %14808 = vmatprep.subr.bf16.mxu1 %v25940_v1  ;;  %v25948_v1 = vand.u32 4294901760, %v25907_v16  ;;  %v14823_v16 = vpack.c.bf16 %v25959_v50, %v25958_v31  ;;  %v25975_v40 = vand.u32 4294901760, %v25879_v13  ;;  %v25983_v32 = vand.u32 4294901760, %v25982_v17  ;;  %v25992_v31 = vld [vmem:[#allocation197_spill] sm:$0xff] }
 0x8dc   : > { %v25993_v50 = vand.u32 4294901760, %v25992_v31  ;;  %v26040_v31 = vld [vmem:[#allocation121_spill] sm:$0xff] }
 0x8de   : > { %14810 = vmatpush1.bf16.msra.mxu1 %v25943_v58 }
 0x8df   : > { %14812 = vmatprep.subr.bf16.mxu1 %v14811_v25  ;;  %v14827_v25 = vpack.c.bf16 %v25965_v14, %v25964_v36 }
 0x8e1   : > { %10575 = vmatmul.mubr.f32.vlgmr.msra.gmra.mrb[24].mxu1 %v25948_v1  ;;  %v25955_v1 = vand.u32 4294901760, %v21767_v12  ;;  %v25962_v12 = vand.u32 4294901760, %v25794_v33  ;;  %v14829_v33 = vpack.c.bf16 %v25968_v27, %v25967_v48 }
 0x8e2   : > { %10583 = vmatprep.mubr.f32.mxu1 %v25949_v28  ;;  %14814 = vmatpush1.bf16.msra.mxu1 %v14813_v47  ;;  %v25956_v47 = vand.u32 4294901760, %v25781_v51  ;;  %v25963_v51 = vand.u32 4294901760, %v25795_v0  ;;  %v25969_v0 = vand.u32 4294901760, %v25804_v10  ;;  %v25976_v10 = vand.u32 4294901760, %v25880_v49  ;;  %v25988_v49 = vld [vmem:[#allocation35_spill] sm:$0xff] }
 0x8e3   : > { %14816 = vmatprep.subr.bf16.mxu1 %v14815_v7  ;;  %v14835_v7 = vpack.c.bf16 %v25974_v39, %v25973_v19  ;;  %v26008_v19 = vand.u32 4294901760, %v25899_v15  ;;  %v26015_v15 = vand.u32 4294901760, %v25856_v44  ;;  %v26024_v44 = vld [vmem:[#allocation137_spill] sm:$0xff] }
 0x8e4   : > { %v14821_v18 = vpack.c.bf16 %v25957_v4, %v25956_v47  ;;  %v14825_v54 = vpack.c.bf16 %v25963_v51, %v25962_v12  ;;  %v14831_v57 = vpack.c.bf16 %v25970_v63, %v25969_v0  ;;  %v14837_v28 = vpack.c.bf16 %v25976_v10, %v25975_v40  ;;  %v25990_v4 = vld [vmem:[#allocation36_spill] sm:$0xff] }
 0x8e5   : > { %10587 = vmatmul.mubr.f32.gmra.mrb[26].mxu1 %v25954_v30  ;;  %v25986_v30 = vld [vmem:[#allocation34_spill] sm:$0xff]  ;;  %v25989_v47 = vand.u32 4294901760, %v25988_v49  ;;  %v25991_v23 = vand.u32 4294901760, %v25990_v4  ;;  %v25996_v12 = vld [vmem:[#allocation40_spill] sm:$0xff]  ;;  %v26012_v10 = vand.u32 4294901760, %v25903_v60  ;;  %v14863_v22 = vpack.c.bf16 %v26015_v15, %v26014_v56 }
 0x8e6   : > { %10595 = vmatprep.mubr.f32.mxu1 %v25955_v1  ;;  %14818 = vmatpush1.bf16.msra.mxu1 %v14817_v2  ;;  %v25981_v2 = vand.u32 4294901760, %v25980_v53  ;;  %v25987_v13 = vand.u32 4294901760, %v25986_v30  ;;  %v25997_v51 = vand.u32 4294901760, %v25996_v12  ;;  %v26004_v0 = vld [vmem:[#allocation200_spill] sm:$0xff]  ;;  %v26025_v17 = vand.u32 4294901760, %v26024_v44  ;;  %v26030_v30 = vld [vmem:[#allocation151_spill] sm:$0xff] }
 0x8e7   : > { %14820 = vmatprep.subr.bf16.mxu1 %v14819_v29  ;;  %v25985_v29 = vand.u32 4294901760, %v25984_v38  ;;  %v26005_v63 = vand.u32 4294901760, %v26004_v0  ;;  %v26028_v38 = vld [vmem:[#allocation150_spill] sm:$0xff]  ;;  %v26055_v0 = vld [vmem:[#allocation181_spill] sm:$0xff]  ;;  %v15548_v56 = vld [vmem:[#allocation2] sm:$0xff] }
 0x8e8   : > { %v14841_v55 = vpack.c.bf16 %v25983_v32, %v25981_v2  ;;  %v14869_v2 = vpack.c.bf16 %v26023_v34, %v26022_v46  ;;  %v26026_v32 = vld [vmem:[#allocation138_spill] sm:$0xff]  ;;  %v15552_v46 = vld [vmem:[#allocation2 + $0x20] sm:$0xff]  ;;  %v15553_v44 = vld [vmem:[#allocation2 + $0x28] sm:$0xff] }
 0x8e9   : > { %10599 = vmatmul.mubr.f32.gmra.mrb[28].mxu1 %v25960_v21  ;;  %v14843_v1 = vpack.c.bf16 %v25987_v13, %v25985_v29  ;;  %v26029_v29 = vand.u32 4294901760, %v26028_v38  ;;  %v26035_v49 = vld [vmem:[#allocation82_spill] sm:$0xff] }
 0x8ea   : > { %10607 = vmatprep.mubr.f32.mxu1 %v25961_v42  ;;  %14822 = vmatpush1.bf16.msra.mxu1 %v14821_v18  ;;  %v14845_v18 = vpack.c.bf16 %v25991_v23, %v25989_v47  ;;  %v26036_v47 = vld [vmem:[#allocation93_spill] sm:$0xff]  ;;  %v26037_v4 = vld [vmem:[#allocation194_spill] sm:$0xff] }
 0x8eb   : > { %14824 = vmatprep.subr.bf16.mxu1 %v14823_v16  ;;  %v25994_v16 = vld [vmem:[#allocation37_spill] sm:$0xff]  ;;  %v26038_v23 = vld [vmem:[#allocation222_spill] sm:$0xff] }
 0x8ec   : > { %v25995_v21 = vand.u32 4294901760, %v25994_v16  ;;  %v26042_v16 = vld [vmem:[#allocation218_spill] sm:$0xff] }
 0x8ed   : > { %10611 = vmatmul.mubr.f32.gmra.mrb[30].mxu1 %v25966_v52  ;;  %v26001_v52 = vld [vmem:[#allocation50_spill] sm:$0xff] }
 0x8ee   : > { %14826 = vmatpush1.bf16.msra.mxu1 %v14825_v54  ;;  %10874 = vmatprep.mubr.f32.mxu1 %v21486_v3  ;;  %v14847_v42 = vpack.c.bf16 %v25995_v21, %v25993_v50  ;;  %v25998_v54 = vld [vmem:[#allocation188_spill] sm:$0xff]  ;;  %v26002_v48 = vand.u32 4294901760, %v26001_v52  ;;  %v26041_v50 = vld [vmem:[#allocation142_spill] sm:$0xff]  ;;  %v26051_v52 = vld [vmem:[#allocation173_spill] sm:$0xff] }
 0x8ef   : > { %14828 = vmatprep.subr.bf16.mxu1 %v14827_v25  ;;  %v25999_v36 = vand.u32 4294901760, %v25998_v54  ;;  %v26000_v25 = vand.u32 4294901760, %v25893_v24  ;;  %v26009_v24 = vand.u32 4294901760, %v25900_v9  ;;  %v26016_v9 = vand.u32 4294901760, %v25864_v61  ;;  %v26043_v21 = vld [vmem:[#allocation136_spill] sm:$0xff]  ;;  %v26045_v12 = vld [vmem:[#allocation118_spill] sm:$0xff] }
 0x8f0   : > { %v26027_v61 = vand.u32 4294901760, %v26026_v32  ;;  %v26047_v54 = vld [vmem:[#allocation161_spill] sm:$0xff] }
 0x8f1   : > { %v14849_v14 = vpack.c.bf16 %v25999_v36, %v25997_v51  ;;  %v14851_v27 = vpack.c.bf16 %v26002_v48, %v26000_v25  ;;  %v14857_v39 = vpack.c.bf16 %v26009_v24, %v26008_v19  ;;  %v26046_v51 = vld [vmem:[#allocation152_spill] sm:$0xff]  ;;  %v26048_v36 = vld [vmem:[#allocation162_spill] sm:$0xff]  ;;  %v26063_v24 = vld [vmem:[#allocation201_spill] sm:$0xff] }
 0x8f2   : > { %14830 = vmatpush1.bf16.msra.mxu1 %v14829_v33  ;;  %v26003_v33 = vand.u32 4294901760, %v25895_v59  ;;  %v26011_v59 = vand.u32 4294901760, %v25902_v6  ;;  %v26019_v6 = vand.u32 4294901760, %v25866_v45  ;;  %v26031_v45 = vand.u32 4294901760, %v26030_v30  ;;  %v26050_v25 = vld [vmem:[#allocation164_spill] sm:$0xff]  ;;  %v26052_v48 = vld [vmem:[#allocation174_spill] sm:$0xff] }
 0x8f3   : > { %14832 = vmatprep.subr.bf16.mxu1 %v14831_v57  ;;  %v26062_v19 = vld [vmem:[#allocation192_spill] sm:$0xff] }
 0x8f4   : > { %v14853_v57 = vpack.c.bf16 %v26005_v63, %v26003_v33  ;;  %v14873_v13 = vpack.c.bf16 %v26031_v45, %v26029_v29  ;;  %v26054_v33 = vld [vmem:[#allocation176_spill] sm:$0xff]  ;;  %v26056_v63 = vld [vmem:[#allocation182_spill] sm:$0xff]  ;;  %v15555_v29 = vld [vmem:[#allocation2 + $0x38] sm:$0xff] }
 0x8f6   : > { %14834 = vmatpush1.bf16.msra.mxu1 %v14833_v43  ;;  %v14855_v43 = vpack.c.bf16 %v26007_v8, %v26006_v62  ;;  %v26059_v62 = vld [vmem:[#allocation189_spill] sm:$0xff]  ;;  %v26060_v8 = vld [vmem:[#allocation190_spill] sm:$0xff] }
 0x8f7   : > { %14836 = vmatprep.subr.bf16.mxu1 %v14835_v7  ;;  %v26010_v7 = vand.u32 4294901760, %v25901_v35  ;;  %v26018_v35 = vand.u32 4294901760, %v26017_v26 }
 0x8f9   : > { %v14859_v40 = vpack.c.bf16 %v26011_v59, %v26010_v7  ;;  %v14865_v41 = vpack.c.bf16 %v26018_v35, %v26016_v9  ;;  %v26065_v7 = vld [vmem:[#allocation203_spill] sm:$0xff]  ;;  %v26066_v59 = vld [vmem:[#allocation204_spill] sm:$0xff]  ;;  %v15550_v35 = vld [vmem:[#allocation2 + $0x10] sm:$0xff] }
 0x8fa   : > { %14838 = vmatpush1.bf16.msra.mxu1 %v14837_v28  ;;  %v14861_v28 = vpack.c.bf16 %v26013_v11, %v26012_v10  ;;  %v26068_v10 = vld [vmem:[#allocation214_spill] sm:$0xff]  ;;  %v26069_v11 = vld [vmem:[#allocation215_spill] sm:$0xff] }
 0x8fb   : > { %14840 = vmatprep.subr.bf16.mxu1 %v14839_v5  ;;  %v26020_v5 = vld [vmem:[#allocation123_spill] sm:$0xff] }
 0x8fc   : > { %v26021_v60 = vand.u32 4294901760, %v26020_v5  ;;  %v15551_v5 = vld [vmem:[#allocation2 + $0x18] sm:$0xff] }
 0x8fe   : > { %14842 = vmatpush1.bf16.msra.mxu1 %v14841_v55  ;;  %v14867_v53 = vpack.c.bf16 %v26021_v60, %v26019_v6  ;;  %v14871_v55 = vpack.c.bf16 %v26027_v61, %v26025_v17  ;;  %v15554_v61 = vld [vmem:[#allocation2 + $0x30] sm:$0xff] }
 0x8ff   : > { %14844 = vmatprep.subr.bf16.mxu1 %v14843_v1  ;;  %v26032_v1 = vld [vmem:[#allocation81_spill] sm:$0xff] }
 0x902   : > { %14846 = vmatpush1.bf16.msra.mxu1 %v14845_v18  ;;  %v26039_v18 = vld [vmem:[#allocation94_spill] sm:$0xff] }
 0x903   : > { %14848 = vmatprep.subr.bf16.mxu1 %v14847_v42  ;;  %v26044_v42 = vld [vmem:[#allocation149_spill] sm:$0xff] }
 0x906   : > { %14850 = vmatpush1.bf16.msra.mxu1 %v14849_v14  ;;  %v26049_v14 = vld [vmem:[#allocation163_spill] sm:$0xff] }
 0x907   : > { %14852 = vmatprep.subr.bf16.mxu1 %v14851_v27  ;;  %v26053_v27 = vld [vmem:[#allocation175_spill] sm:$0xff] }
 0x90a   : > { %14854 = vmatpush1.bf16.msra.mxu1 %v14853_v57  ;;  %v26058_v57 = vld [vmem:[#allocation184_spill] sm:$0xff] }
 0x90b   : > { %14856 = vmatprep.subr.bf16.mxu1 %v14855_v43  ;;  %v26061_v43 = vld [vmem:[#allocation191_spill] sm:$0xff] }
 0x90e   : > { %14858 = vmatpush1.bf16.msra.mxu1 %v14857_v39  ;;  %v26064_v39 = vld [vmem:[#allocation202_spill] sm:$0xff] }
 0x90f   : > { %14860 = vmatprep.subr.bf16.mxu1 %v14859_v40  ;;  %v26067_v40 = vld [vmem:[#allocation213_spill] sm:$0xff] }
 0x912   : > { %14862 = vmatpush1.bf16.msra.mxu1 %v14861_v28 }
 0x913   : > { %14864 = vmatprep.subr.bf16.mxu1 %v14863_v22 }
 0x916   : > { %14866 = vmatpush1.bf16.msra.mxu1 %v14865_v41 }
 0x917   : > { %14868 = vmatprep.subr.bf16.mxu1 %v14867_v53 }
 0x91a   : > { %14870 = vmatpush1.bf16.msra.mxu1 %v14869_v2 }
 0x91b   : > { %14872 = vmatprep.subr.bf16.mxu1 %v14871_v55 }
 0x91e   : > { %14874 = vmatpush1.bf16.msra.mxu1 %v14873_v13 }
 0x91f   : > { %14876 = vmatprep.subr.bf16.mxu1 %v26032_v1 }
 0x921   : > { %10876 = vmatmul.mubr.f32.vlgmr.msra.gmra.mrb[24].mxu1 %v26033_v37 }
 0x922   : > { %10882 = vmatprep.mubr.f32.mxu1 %v26034_v20  ;;  %14878 = vmatpush1.bf16.msra.mxu1 %v26035_v49 }
 0x923   : > { %14880 = vmatprep.subr.bf16.mxu1 %v26036_v47 }
 0x925   : > { %10884 = vmatmul.mubr.f32.gmra.mrb[26].mxu1 %v26037_v4 }
 0x926   : > { %10890 = vmatprep.mubr.f32.mxu1 %v26038_v23  ;;  %14882 = vmatpush1.bf16.msra.mxu1 %v26039_v18 }
 0x927   : > { %14884 = vmatprep.subr.bf16.mxu1 %v26040_v31 }
 0x929   : > { %10892 = vmatmul.mubr.f32.gmra.mrb[28].mxu1 %v26041_v50 }
 0x92a   : > { %10898 = vmatprep.mubr.f32.mxu1 %v26042_v16  ;;  %14886 = vmatpush1.bf16.msra.mxu1 %v26043_v21 }
 0x92b   : > { %14888 = vmatprep.subr.bf16.mxu1 %v26044_v42 }
 0x92d   : > { %10900 = vmatmul.mubr.f32.gmra.mrb[30].mxu1 %v26045_v12 }
 0x92e   : > { %14890 = vmatpush1.bf16.msra.mxu1 %v26046_v51  ;;  %11035 = vmatprep.mubr.f32.mxu1 %v21486_v3  ;;  %v26057_v3 = vld [vmem:[#allocation183_spill] sm:$0xff] }
 0x92f   : > { %14892 = vmatprep.subr.bf16.mxu1 %v26047_v54 }
 0x932   : > { %14894 = vmatpush1.bf16.msra.mxu1 %v26048_v36 }
 0x933   : > { %14896 = vmatprep.subr.bf16.mxu1 %v26049_v14 }
 0x936   : > { %14898 = vmatpush1.bf16.msra.mxu1 %v26050_v25 }
 0x937   : > { %14900 = vmatprep.subr.bf16.mxu1 %v26051_v52 }
 0x93a   : > { %14902 = vmatpush1.bf16.msra.mxu1 %v26052_v48 }
 0x93b   : > { %14904 = vmatprep.subr.bf16.mxu1 %v26053_v27 }
 0x93e   : > { %14906 = vmatpush1.bf16.msra.mxu1 %v26054_v33 }
 0x93f   : > { %14908 = vmatprep.subr.bf16.mxu1 %v26055_v0 }
 0x942   : > { %14910 = vmatpush1.bf16.msra.mxu1 %v26056_v63 }
 0x943   : > { %14912 = vmatprep.subr.bf16.mxu1 %v26057_v3 }
 0x946   : > { %14914 = vmatpush1.bf16.msra.mxu1 %v26058_v57 }
 0x947   : > { %14916 = vmatprep.subr.bf16.mxu1 %v26059_v62 }
 0x94a   : > { %14918 = vmatpush1.bf16.msra.mxu1 %v26060_v8 }
 0x94b   : > { %14920 = vmatprep.subr.bf16.mxu1 %v26061_v43 }
 0x94e   : > { %14922 = vmatpush1.bf16.msra.mxu1 %v26062_v19 }
 0x94f   : > { %14924 = vmatprep.subr.bf16.mxu1 %v26063_v24 }
 0x952   : > { %14926 = vmatpush1.bf16.msra.mxu1 %v26064_v39 }
 0x953   : > { %14928 = vmatprep.subr.bf16.mxu1 %v26065_v7 }
 0x956   : > { %14930 = vmatpush1.bf16.msra.mxu1 %v26066_v59 }
 0x957   : > { %14932 = vmatprep.subr.bf16.mxu1 %v26067_v40 }
 0x95a   : > { %14934 = vmatpush1.bf16.msra.mxu1 %v26068_v10 }
 0x95b   : > { %14936 = vmatprep.subr.bf16.mxu1 %v26069_v11 }
 0x95e   : > { %14938 = vmatpush1.bf16.msra.mxu1 %v25943_v58  ;;  %v15549_v58 = vld [vmem:[#allocation2 + $0x8] sm:$0xff] }
 0x961   : > { %11037 = vmatmul.mubr.f32.vlgmr.msra.gmra.mrb[24].mxu1 %v26033_v37 }
 0x962   : > { %11043 = vmatprep.mubr.f32.mxu1 %v26034_v20 }
 0x965   : > { %11045 = vmatmul.mubr.f32.gmra.mrb[26].mxu1 %v26037_v4 }
 0x966   : > { %11051 = vmatprep.mubr.f32.mxu1 %v26038_v23 }
 0x969   : > { %11053 = vmatmul.mubr.f32.gmra.mrb[28].mxu1 %v26041_v50 }
 0x96a   : > { %11059 = vmatprep.mubr.f32.mxu1 %v26042_v16 }
 0x96d   : > { %11061 = vmatmul.mubr.f32.gmra.mrb[30].mxu1 %v26045_v12 }
 0xa34   : > { %v11038_v28 = vpop.f32.mrb[24].mxu1 }
 0xa35   : > { %v22086_v15 = vadd.f32 %v15548_v56, %v11038_v28  ;;  %v11040_v22 = vpop.f32.mrb[25].mxu1 }
 0xa36   : > { %v22088_v9 = vadd.f32 %v15549_v58, %v11040_v22 }
 0xa37   : > { %11075 = vst [vmem:[#allocation2] sm:$0xff] %v22086_v15 }
 0xa38   : > { %11076 = vst [vmem:[#allocation2 + $0x8] sm:$0xff] %v22088_v9  ;;  %v11046_v26 = vpop.f32.mrb[26].mxu1 }
 0xa39   : > { %v22092_v41 = vadd.f32 %v15550_v35, %v11046_v26  ;;  %v11048_v6 = vpop.f32.mrb[27].mxu1 }
 0xa3a   : > { %v22094_v60 = vadd.f32 %v15551_v5, %v11048_v6 }
 0xa3b   : > { %11077 = vst [vmem:[#allocation2 + $0x10] sm:$0xff] %v22092_v41 }
 0xa3c   : > { %11078 = vst [vmem:[#allocation2 + $0x18] sm:$0xff] %v22094_v60  ;;  %v11054_v53 = vpop.f32.mrb[28].mxu1 }
 0xa3d   : > { %v22098_v34 = vadd.f32 %v15552_v46, %v11054_v53  ;;  %v11056_v2 = vpop.f32.mrb[29].mxu1 }
 0xa3e   : > { %v22100_v17 = vadd.f32 %v15553_v44, %v11056_v2  ;;  %11086 = sbr.rel (%p12411_p9) target bundleno = 3102 (0xc1e), region = 100 }
 0xa3f   : > { %11079 = vst [vmem:[#allocation2 + $0x20] sm:$0xff] %v22098_v34 }
 0xa40   : > { %11080 = vst [vmem:[#allocation2 + $0x28] sm:$0xff] %v22100_v17  ;;  %v11062_v32 = vpop.f32.mrb[30].mxu1 }
 0xa41   : > { %v22104_v55 = vadd.f32 %v15554_v61, %v11062_v32  ;;  %v11064_v38 = vpop.f32.mrb[31].mxu1 }
 0xa42   : > { %v22106_v30 = vadd.f32 %v15555_v29, %v11064_v38 }
 0xa43   : > { %26070 = vst [vmem:[#allocation129_spill] sm:$0xff] %v22104_v55  ;;  %11081 = vst [vmem:[#allocation2 + $0x30] sm:$0xff] %v22104_v55 }
 0xa44   : > { %26071 = vst [vmem:[#allocation90_spill] sm:$0xff] %v22106_v30  ;;  %11082 = vst [vmem:[#allocation2 + $0x38] sm:$0xff] %v22106_v30 }
 0xa45   : > { %v11088_v45 = vmul.f32 %v22086_v15, %v22086_v15  ;;  %v11089_v13 = vmul.f32 %v22088_v9, %v22088_v9  ;;  %v11090_v1 = vmul.f32 %v22092_v41, %v22092_v41  ;;  %v11091_v37 = vmul.f32 %v22094_v60, %v22094_v60  ;;  %v22119_v20 = vld [vmem:[#allocation15 + $0x80] sm:$0xff]  ;;  %v11168_v49 = vld [vmem:[#allocation15 + $0x88] sm:$0xff]  ;;  %v22133_v16 = vld [vmem:[#allocation15 + $0x90] sm:$0xff] }
 0xa46   : > { %v22121_v47 = vld [vmem:[#allocation15] sm:$0xff]  ;;  %v11092_v4 = vmul.f32 %v22098_v34, %v22098_v34  ;;  %v11093_v23 = vmul.f32 %v22100_v17, %v22100_v17  ;;  %v11094_v18 = vmul.f32 %v22104_v55, %v22104_v55  ;;  %v11095_v31 = vmul.f32 %v22106_v30, %v22106_v30  ;;  %v22131_v50 = vld [vmem:[#allocation15 + $0x8] sm:$0xff]  ;;  %v22135_v21 = vld [vmem:[#allocation15 + $0x98] sm:$0xff] }
 0xa47   : > { %v11096_v42 = vadd.f32 %v11089_v13, %v11088_v45  ;;  %v11099_v12 = vadd.f32 %v11091_v37, %v11090_v1  ;;  %v11239_v51 = vand.u32 4294901760, %v22119_v20  ;;  %v11242_v54 = vand.u32 4294901760, %v11168_v49  ;;  %v22138_v36 = vld [vmem:[#allocation15 + $0x10] sm:$0xff]  ;;  %v22140_v14 = vld [vmem:[#allocation15 + $0x18] sm:$0xff]  ;;  %v22205_v32 = vld [vmem:[#allocation15 + $0xa0] sm:$0xff] }
 0xa48   : > { %v11102_v25 = vadd.f32 %v11093_v23, %v11092_v4  ;;  %v11105_v52 = vadd.f32 %v11095_v31, %v11094_v18  ;;  %v11191_v48 = vand.u32 4294901760, %v22121_v47  ;;  %v11194_v27 = vand.u32 4294901760, %v22131_v50  ;;  %v22213_v13 = vld [vmem:[#allocation15 + $0xa8] sm:$0xff]  ;;  %v22215_v1 = vld [vmem:[#allocation15 + $0x20] sm:$0xff]  ;;  %v22221_v23 = vld [vmem:[#allocation15 + $0xb0] sm:$0xff] }
 0xa49   : > { %11097 = vadd.xlane.f32.xlu0 %v11096_v42  ;;  %v22145_v33 = vsub.f32 %v22119_v20, %v11239_v51  ;;  %v22147_v0 = vsub.f32 %v11168_v49, %v11242_v54  ;;  %v11245_v63 = vand.u32 4294901760, %v22133_v16  ;;  %v11248_v3 = vand.u32 4294901760, %v22135_v21  ;;  %v22219_v4 = vld [vmem:[#allocation15 + $0x28] sm:$0xff] }
 0xa4a   : > { %11103 = vadd.xlane.f32.xlu1 %v11102_v25  ;;  %v22152_v57 = vsub.f32 %v22121_v47, %v11191_v48  ;;  %v22155_v62 = vsub.f32 %v22131_v50, %v11194_v27  ;;  %v11197_v8 = vand.u32 4294901760, %v22138_v36  ;;  %v11200_v43 = vand.u32 4294901760, %v22140_v14  ;;  %v22226_v25 = vld [vmem:[#allocation15 + $0x30] sm:$0xff] }
 0xa4b   : > { %v23963_v19 = vand.u32 4294901760, %v22145_v33  ;;  %v23962_v24 = vand.u32 4294901760, %v22147_v0  ;;  %v22164_v39 = vsub.f32 %v22133_v16, %v11245_v63  ;;  %v22169_v7 = vsub.f32 %v22135_v21, %v11248_v3 }
 0xa4c   : > { %v23961_v59 = vand.u32 4294901760, %v22152_v57  ;;  %v23960_v40 = vand.u32 4294901760, %v22155_v62  ;;  %v22176_v10 = vsub.f32 %v22138_v36, %v11197_v8  ;;  %v22181_v11 = vsub.f32 %v22140_v14, %v11200_v43 }
 0xa4d   : > { %11100 = vadd.xlane.f32.xlu0 %v11099_v12  ;;  %v11463_v28 = vsub.f32 %v22145_v33, %v23963_v19  ;;  %v11470_v56 = vsub.f32 %v22147_v0, %v23962_v24  ;;  %v23959_v22 = vand.u32 4294901760, %v22164_v39  ;;  %v23958_v58 = vand.u32 4294901760, %v22169_v7  ;;  %v22224_v12 = vld [vmem:[#allocation15 + $0xb8] sm:$0xff]  ;;  %v22399_v24 = vld [vmem:[#allocation15 + $0xe8] sm:$0xff] }
 0xa4e   : > { %11106 = vadd.xlane.f32.xlu1 %v11105_v52  ;;  %v11351_v26 = vsub.f32 %v22152_v57, %v23961_v59  ;;  %v11358_v35 = vsub.f32 %v22155_v62, %v23960_v40  ;;  %v23955_v6 = vand.u32 4294901760, %v22176_v10  ;;  %v23953_v5 = vand.u32 4294901760, %v22181_v11 }
 0xa4f   : > { %v11464_v53 = vand.u32 4294901760, %v11463_v28  ;;  %v11471_v46 = vand.u32 4294901760, %v11470_v56  ;;  %v11477_v2 = vsub.f32 %v22164_v39, %v23959_v22  ;;  %v11484_v44 = vsub.f32 %v22169_v7, %v23958_v58 }
 0xa50   : > { %v11352_v61 = vand.u32 4294901760, %v11351_v26  ;;  %v11359_v38 = vand.u32 4294901760, %v11358_v35  ;;  %v11365_v29 = vsub.f32 %v22176_v10, %v23955_v6  ;;  %v11372_v45 = vsub.f32 %v22181_v11, %v23953_v5 }
 0xa51   : > { %v14971_v37 = vpack.c.bf16 %v11471_v46, %v11464_v53  ;;  %v11478_v20 = vand.u32 4294901760, %v11477_v2  ;;  %v11485_v49 = vand.u32 4294901760, %v11484_v44  ;;  %v22217_v47 = vpack.c.bf16 %v11242_v54, %v11239_v51  ;;  %v22246_v2 = vld [vmem:[#allocation15 + $0x38] sm:$0xff] }
 0xa52   : > { %v14973_v18 = vpack.c.bf16 %v11359_v38, %v11352_v61  ;;  %v11366_v31 = vand.u32 4294901760, %v11365_v29  ;;  %v11373_v50 = vand.u32 4294901760, %v11372_v45  ;;  %v11251_v42 = vand.u32 4294901760, %v22205_v32 }
 0xa53   : > { %14972 = vmatprep.subr.bf16.mxu1 %v14971_v37  ;;  %v14975_v52 = vpack.c.bf16 %v11485_v49, %v11478_v20  ;;  %14940 = vmatprep.subr.bf16.mxu0 %v22217_v47  ;;  %v11254_v51 = vand.u32 4294901760, %v22213_v13  ;;  %v22230_v54 = vpack.c.bf16 %v11194_v27, %v11191_v48  ;;  %v11203_v28 = vand.u32 4294901760, %v22215_v1 }
 0xa54   : > { %14974 = vmatpush3.bf16.msra.mxu1 %v14973_v18  ;;  %v14977_v56 = vpack.c.bf16 %v11373_v50, %v11366_v31  ;;  %v22234_v26 = vsub.f32 %v22205_v32, %v11251_v42  ;;  %v11206_v35 = vand.u32 4294901760, %v22219_v4  ;;  %v11257_v53 = vand.u32 4294901760, %v22221_v23  ;;  %v22304_v31 = vld [vmem:[#allocation15 + $0xc0] sm:$0xff] }
 0xa55   : > { %26072 = vst [vmem:[#allocation260_spill] sm:$0xff] %v22230_v54  ;;  %14976 = vmatprep.subr.bf16.mxu1 %v14975_v52  ;;  %v22239_v46 = vsub.f32 %v22213_v13, %v11254_v51  ;;  %14942 = vmatpush3.bf16.msra.mxu0 %v22230_v54  ;;  %v22243_v48 = vsub.f32 %v22215_v1, %v11203_v28  ;;  %v11260_v27 = vand.u32 4294901760, %v22224_v12  ;;  %v11209_v44 = vand.u32 4294901760, %v22226_v25 }
 0xa56   : > { %v23952_v32 = vand.u32 4294901760, %v22234_v26  ;;  %v22251_v61 = vsub.f32 %v22219_v4, %v11206_v35  ;;  %v22257_v38 = vpack.c.bf16 %v11248_v3, %v11245_v63  ;;  %v22262_v29 = vsub.f32 %v22221_v23, %v11257_v53 }
 0xa57   : > { %v23950_v45 = vand.u32 4294901760, %v22239_v46  ;;  %v23949_v13 = vand.u32 4294901760, %v22243_v48  ;;  %v22267_v1 = vsub.f32 %v22224_v12, %v11260_v27  ;;  %v22273_v16 = vpack.c.bf16 %v11200_v43, %v11197_v8 }
 0xa58   : > { %26073 = vst [vmem:[#allocation261_spill] sm:$0xff] %v22257_v38  ;;  %14978 = vmatpush3.bf16.msra.mxu1 %v14977_v56  ;;  %v11491_v21 = vsub.f32 %v22234_v26, %v23952_v32  ;;  %v23948_v63 = vand.u32 4294901760, %v22251_v61  ;;  %14944 = vmatprep.subr.bf16.mxu0 %v22257_v38  ;;  %v23951_v3 = vand.u32 4294901760, %v22262_v29  ;;  %v11212_v37 = vand.u32 4294901760, %v22246_v2 }
 0xa59   : > { %26074 = vst [vmem:[#allocation262_spill] sm:$0xff] %v22273_v16  ;;  %v11498_v36 = vsub.f32 %v22239_v46, %v23950_v45  ;;  %v11379_v14 = vsub.f32 %v22243_v48, %v23949_v13  ;;  %v23954_v8 = vand.u32 4294901760, %v22267_v1  ;;  %14946 = vmatpush3.bf16.msra.mxu0 %v22273_v16  ;;  %v22293_v43 = vsub.f32 %v22226_v25, %v11209_v44 }
 0xa5a   : > { %v11492_v20 = vand.u32 4294901760, %v11491_v21  ;;  %v11386_v49 = vsub.f32 %v22251_v61, %v23948_v63  ;;  %v11505_v4 = vsub.f32 %v22262_v29, %v23951_v3  ;;  %v22302_v18 = vsub.f32 %v22246_v2, %v11212_v37  ;;  %v22310_v21 = vld [vmem:[#allocation15 + $0xc8] sm:$0xff]  ;;  %v22315_v2 = vld [vmem:[#allocation15 + $0x40] sm:$0xff] }
 0xa5b   : > { %v11499_v50 = vand.u32 4294901760, %v11498_v36  ;;  %v11380_v12 = vand.u32 4294901760, %v11379_v14  ;;  %v11512_v52 = vsub.f32 %v22267_v1, %v23954_v8  ;;  %v23956_v56 = vand.u32 4294901760, %v22293_v43  ;;  %v22321_v8 = vld [vmem:[#allocation15 + $0x48] sm:$0xff] }
 0xa5c   : > { %v11387_v63 = vand.u32 4294901760, %v11386_v49  ;;  %v11506_v13 = vand.u32 4294901760, %v11505_v4  ;;  %v23957_v45 = vand.u32 4294901760, %v22302_v18  ;;  %v22313_v3 = vpack.c.bf16 %v11254_v51, %v11251_v42  ;;  %v22332_v4 = vld [vmem:[#allocation15 + $0xd8] sm:$0xff] }
 0xa5d   : > { %v14979_v32 = vpack.c.bf16 %v11499_v50, %v11492_v20  ;;  %v11513_v5 = vand.u32 4294901760, %v11512_v52  ;;  %v11393_v36 = vsub.f32 %v22293_v43, %v23956_v56  ;;  %v11263_v14 = vand.u32 4294901760, %v22304_v31  ;;  %v22330_v20 = vld [vmem:[#allocation15 + $0xd0] sm:$0xff] }
 0xa5e   : > { %26075 = vst [vmem:[#allocation263_spill] sm:$0xff] %v22313_v3  ;;  %v14981_v6 = vpack.c.bf16 %v11387_v63, %v11380_v12  ;;  %v11400_v49 = vsub.f32 %v22302_v18, %v23957_v45  ;;  %14948 = vmatprep.subr.bf16.mxu0 %v22313_v3  ;;  %v11266_v42 = vand.u32 4294901760, %v22310_v21  ;;  %v22328_v51 = vpack.c.bf16 %v11206_v35, %v11203_v28  ;;  %v11164_v3 = vld [vmem:[#allocation15 + $0x68] sm:$0xff] }
 0xa5f   : > { %14980 = vmatprep.subr.bf16.mxu1 %v14979_v32  ;;  %v14983_v50 = vpack.c.bf16 %v11513_v5, %v11506_v13  ;;  %v11394_v52 = vand.u32 4294901760, %v11393_v36  ;;  %v22335_v56 = vsub.f32 %v22304_v31, %v11263_v14  ;;  %v11215_v63 = vand.u32 4294901760, %v22315_v2  ;;  %v22353_v31 = vld [vmem:[#allocation15 + $0x50] sm:$0xff] }
 0xa60   : > { %26076 = vst [vmem:[#allocation264_spill] sm:$0xff] %v22328_v51  ;;  %14982 = vmatpush3.bf16.msra.mxu1 %v14981_v6  ;;  %v11401_v12 = vand.u32 4294901760, %v11400_v49  ;;  %v22339_v45 = vsub.f32 %v22310_v21, %v11266_v42  ;;  %14950 = vmatpush3.bf16.msra.mxu0 %v22328_v51  ;;  %v11218_v28 = vand.u32 4294901760, %v22321_v8  ;;  %v22345_v35 = vpack.c.bf16 %v11260_v27, %v11257_v53  ;;  %v22355_v21 = vld [vmem:[#allocation15 + $0x58] sm:$0xff] }
 0xa61   : > { %14984 = vmatprep.subr.bf16.mxu1 %v14983_v50  ;;  %v23967_v5 = vand.u32 4294901760, %v22335_v56  ;;  %v22349_v32 = vsub.f32 %v22315_v2, %v11215_v63  ;;  %v11269_v6 = vand.u32 4294901760, %v22330_v20  ;;  %v11272_v13 = vand.u32 4294901760, %v22332_v4 }
 0xa62   : > { %26077 = vst [vmem:[#allocation265_spill] sm:$0xff] %v22345_v35  ;;  %v14985_v36 = vpack.c.bf16 %v11401_v12, %v11394_v52  ;;  %v23966_v49 = vand.u32 4294901760, %v22339_v45  ;;  %v22359_v23 = vsub.f32 %v22321_v8, %v11218_v28  ;;  %14952 = vmatprep.subr.bf16.mxu0 %v22345_v35  ;;  %v22364_v53 = vpack.c.bf16 %v11212_v37, %v11209_v44 }
 0xa63   : > { %v11519_v27 = vsub.f32 %v22335_v56, %v23967_v5  ;;  %v23964_v2 = vand.u32 4294901760, %v22349_v32  ;;  %v22371_v50 = vsub.f32 %v22330_v20, %v11269_v6  ;;  %v22374_v52 = vsub.f32 %v22332_v4, %v11272_v13 }
 0xa64   : > { %26078 = vst [vmem:[#allocation266_spill] sm:$0xff] %v22364_v53  ;;  %14986 = vmatpush3.bf16.msra.mxu1 %v14985_v36  ;;  %v11526_v8 = vsub.f32 %v22339_v45, %v23966_v49  ;;  %v23965_v25 = vand.u32 4294901760, %v22359_v23  ;;  %14954 = vmatpush3.bf16.msra.mxu0 %v22364_v53  ;;  %v11221_v44 = vand.u32 4294901760, %v22353_v31  ;;  %v11224_v37 = vand.u32 4294901760, %v22355_v21  ;;  %v22411_v53 = vld [vmem:[#allocation15 + $0x60] sm:$0xff] }
 0xa65   : > { %v11520_v12 = vand.u32 4294901760, %v11519_v27  ;;  %v11407_v20 = vsub.f32 %v22349_v32, %v23964_v2  ;;  %v23972_v4 = vand.u32 4294901760, %v22371_v50  ;;  %v23977_v36 = vand.u32 4294901760, %v22374_v52  ;;  %v22397_v27 = vld [vmem:[#allocation15 + $0xe0] sm:$0xff] }
 0xa66   : > { %v11527_v58 = vand.u32 4294901760, %v11526_v8  ;;  %v11414_v22 = vsub.f32 %v22359_v23, %v23965_v25  ;;  %v22392_v40 = vsub.f32 %v22353_v31, %v11221_v44  ;;  %v22395_v59 = vsub.f32 %v22355_v21, %v11224_v37 }
 0xa67   : > { %v11408_v19 = vand.u32 4294901760, %v11407_v20  ;;  %v11533_v2 = vsub.f32 %v22371_v50, %v23972_v4  ;;  %v11540_v8 = vsub.f32 %v22374_v52, %v23977_v36  ;;  %v22407_v25 = vpack.c.bf16 %v11266_v42, %v11263_v14 }
 0xa68   : > { %v14987_v31 = vpack.c.bf16 %v11527_v58, %v11520_v12  ;;  %v11415_v49 = vand.u32 4294901760, %v11414_v22  ;;  %v23978_v21 = vand.u32 4294901760, %v22392_v40  ;;  %v23981_v5 = vand.u32 4294901760, %v22395_v59 }
 0xa69   : > { %26079 = vst [vmem:[#allocation267_spill] sm:$0xff] %v22407_v25  ;;  %v11534_v35 = vand.u32 4294901760, %v11533_v2  ;;  %v11541_v20 = vand.u32 4294901760, %v11540_v8  ;;  %14956 = vmatprep.subr.bf16.mxu0 %v22407_v25  ;;  %v11275_v4 = vand.u32 4294901760, %v22397_v27  ;;  %v11278_v51 = vand.u32 4294901760, %v22399_v24  ;;  %v11181_v2 = vld [vmem:[#allocation15 + $0xf0] sm:$0xff] }
 0xa6a   : > { %14988 = vmatprep.subr.bf16.mxu1 %v14987_v31  ;;  %v14989_v14 = vpack.c.bf16 %v11415_v49, %v11408_v19  ;;  %v11421_v22 = vsub.f32 %v22392_v40, %v23978_v21  ;;  %v11428_v58 = vsub.f32 %v22395_v59, %v23981_v5  ;;  %v22422_v42 = vpack.c.bf16 %v11218_v28, %v11215_v63  ;;  %v11182_v49 = vld [vmem:[#allocation15 + $0xf8] sm:$0xff] }
 0xa6b   : > { %v14991_v12 = vpack.c.bf16 %v11541_v20, %v11534_v35  ;;  %v22425_v8 = vsub.f32 %v22397_v27, %v11275_v4  ;;  %v22428_v36 = vsub.f32 %v22399_v24, %v11278_v51  ;;  %v11227_v19 = vand.u32 4294901760, %v22411_v53  ;;  %v11165_v27 = vld [vmem:[#allocation15 + $0x70] sm:$0xff]  ;;  %v11166_v20 = vld [vmem:[#allocation15 + $0x78] sm:$0xff] }
 0xa6c   : > { %26080 = vst [vmem:[#allocation268_spill] sm:$0xff] %v22422_v42  ;;  %14990 = vmatpush3.bf16.msra.mxu1 %v14989_v14  ;;  %v11422_v31 = vand.u32 4294901760, %v11421_v22  ;;  %v11429_v21 = vand.u32 4294901760, %v11428_v58  ;;  %14958 = vmatpush3.bf16.msra.mxu0 %v22422_v42  ;;  %v11230_v25 = vand.u32 4294901760, %v11164_v3  ;;  %v22432_v5 = vpack.c.bf16 %v11272_v13, %v11269_v6 }
 0xa6d   : > { %14992 = vmatprep.subr.bf16.mxu1 %v14991_v12  ;;  %v23986_v63 = vand.u32 4294901760, %v22425_v8  ;;  %v23987_v28 = vand.u32 4294901760, %v22428_v36  ;;  %v22437_v35 = vsub.f32 %v22411_v53, %v11227_v19  ;;  %v11281_v24 = vand.u32 4294901760, %v11181_v2 }
 0xa6e   : > { %26081 = vst [vmem:[#allocation269_spill] sm:$0xff] %v22432_v5  ;;  %v14993_v16 = vpack.c.bf16 %v11429_v21, %v11422_v31  ;;  %v22439_v14 = vsub.f32 %v11164_v3, %v11230_v25  ;;  %14960 = vmatprep.subr.bf16.mxu0 %v22432_v5  ;;  %v11284_v22 = vand.u32 4294901760, %v11182_v49  ;;  %v22442_v58 = vpack.c.bf16 %v11224_v37, %v11221_v44 }
 0xa6f   : > { %v11547_v6 = vsub.f32 %v22425_v8, %v23986_v63  ;;  %v11554_v13 = vsub.f32 %v22428_v36, %v23987_v28  ;;  %v23996_v53 = vand.u32 4294901760, %v22437_v35  ;;  %v22451_v12 = vsub.f32 %v11181_v2, %v11281_v24 }
 0xa70   : > { %26082 = vst [vmem:[#allocation270_spill] sm:$0xff] %v22442_v58  ;;  %14994 = vmatpush3.bf16.msra.mxu1 %v14993_v16  ;;  %v23999_v3 = vand.u32 4294901760, %v22439_v14  ;;  %v22454_v21 = vsub.f32 %v11182_v49, %v11284_v22  ;;  %14962 = vmatpush3.bf16.msra.mxu0 %v22442_v58  ;;  %v11233_v44 = vand.u32 4294901760, %v11165_v27  ;;  %v11236_v37 = vand.u32 4294901760, %v11166_v20 }
 0xa71   : > { %v11548_v31 = vand.u32 4294901760, %v11547_v6  ;;  %v11555_v5 = vand.u32 4294901760, %v11554_v13  ;;  %v11435_v63 = vsub.f32 %v22437_v35, %v23996_v53  ;;  %v11560_v28 = vand.u32 4294901760, %v22451_v12 }
 0xa72   : > { %v11442_v16 = vsub.f32 %v22439_v14, %v23999_v3  ;;  %v11567_v2 = vand.u32 4294901760, %v22454_v21  ;;  %v22465_v49 = vsub.f32 %v11165_v27, %v11233_v44  ;;  %v22467_v42 = vsub.f32 %v11166_v20, %v11236_v37 }
 0xa73   : > { %v14995_v58 = vpack.c.bf16 %v11555_v5, %v11548_v31  ;;  %v11436_v38 = vand.u32 4294901760, %v11435_v63  ;;  %v11561_v6 = vsub.f32 %v22451_v12, %v11560_v28  ;;  %v22470_v13 = vpack.c.bf16 %v11278_v51, %v11275_v4 }
 0xa74   : > { %v11443_v54 = vand.u32 4294901760, %v11442_v16  ;;  %v11568_v53 = vsub.f32 %v22454_v21, %v11567_v2  ;;  %v11448_v30 = vand.u32 4294901760, %v22465_v49  ;;  %v11455_v55 = vand.u32 4294901760, %v22467_v42 }
 0xa75   : > { %14996 = vmatprep.subr.bf16.mxu1 %v14995_v58  ;;  %v11562_v3 = vand.u32 4294901760, %v11561_v6  ;;  %14964 = vmatprep.subr.bf16.mxu0 %v22470_v13  ;;  %v22476_v27 = vpack.c.bf16 %v11230_v25, %v11227_v19  ;;  %v22481_v4 = vpack.c.bf16 %v11284_v22, %v11281_v24  ;;  %v22483_v31 = vpack.c.bf16 %v11236_v37, %v11233_v44 }
 0xa76   : > { %v14997_v20 = vpack.c.bf16 %v11443_v54, %v11436_v38  ;;  %v11569_v5 = vand.u32 4294901760, %v11568_v53  ;;  %v11449_v63 = vsub.f32 %v22465_v49, %v11448_v30  ;;  %v11456_v51 = vsub.f32 %v22467_v42, %v11455_v55 }
 0xa77   : > { %14966 = vmatpush3.bf16.msra.mxu0 %v22476_v27  ;;  %v15003_v58 = vpack.c.bf16 %v22147_v0, %v22145_v33  ;;  %v26090_v6 = vand.u32 4294901760, %v22374_v52  ;;  %v26093_v37 = vand.u32 4294901760, %v22395_v59 }
 0xa78   : > { %14998 = vmatpush3.bf16.msra.mxu1 %v14997_v20  ;;  %v14999_v25 = vpack.c.bf16 %v11569_v5, %v11562_v3  ;;  %v11450_v54 = vand.u32 4294901760, %v11449_v63  ;;  %v11457_v38 = vand.u32 4294901760, %v11456_v51  ;;  %14968 = vmatprep.subr.bf16.mxu0 %v22481_v4  ;;  %v26086_v63 = vand.u32 4294901760, %v22349_v32 }
 0xa79   : > { %v26087_v20 = vand.u32 4294901760, %v22359_v23 }
 0xa7a   : > { %15000 = vmatprep.subr.bf16.mxu1 %v14999_v25  ;;  %v15001_v22 = vpack.c.bf16 %v11457_v38, %v11450_v54  ;;  %v26083_v38 = vand.u32 4294901760, %v22335_v56  ;;  %v26092_v54 = vand.u32 4294901760, %v22392_v40 }
 0xa7b   : > { %14970 = vmatpush3.bf16.msra.mxu0 %v22483_v31  ;;  %v22530_v51 = vpack.c.bf16 %v26087_v20, %v26086_v63  ;;  %v26098_v20 = vand.u32 4294901760, %v22437_v35  ;;  %v26099_v63 = vand.u32 4294901760, %v22439_v14 }
 0xa7c   : > { %15002 = vmatpush3.bf16.msra.mxu1 %v15001_v22  ;;  %15004 = vmatprep.subr.bf16.mxu0 %v15003_v58  ;;  %v26084_v22 = vand.u32 4294901760, %v22339_v45  ;;  %v26089_v58 = vand.u32 4294901760, %v22371_v50  ;;  %v22542_v44 = vpack.c.bf16 %v26093_v37, %v26092_v54 }
 0xa7d   : > { %15036 = vmatprep.subr.bf16.mxu1 %v22217_v47  ;;  %26088 = vst [vmem:[#allocation272_spill] sm:$0xff] %v22530_v51  ;;  %v22554_v53 = vpack.c.bf16 %v26099_v63, %v26098_v20 }
 0xa7e   : > { %v22524_v5 = vpack.c.bf16 %v26084_v22, %v26083_v38  ;;  %v22536_v25 = vpack.c.bf16 %v26090_v6, %v26089_v58  ;;  %26094 = vst [vmem:[#allocation274_spill] sm:$0xff] %v22542_v44  ;;  %v26095_v38 = vand.u32 4294901760, %v22425_v8  ;;  %v26096_v22 = vand.u32 4294901760, %v22428_v36 }
 0xa7f   : > { %26100 = vst [vmem:[#allocation276_spill] sm:$0xff] %v22554_v53  ;;  %v22556_v6 = vpack.c.bf16 %v11567_v2, %v11560_v28  ;;  %v22558_v58 = vpack.c.bf16 %v11455_v55, %v11448_v30  ;;  %v26103_v2 = vld [vmem:[#allocation231_spill] sm:$0xff] }
 0xa80   : > { %26085 = vst [vmem:[#allocation271_spill] sm:$0xff] %v22524_v5  ;;  %26091 = vst [vmem:[#allocation273_spill] sm:$0xff] %v22536_v25  ;;  %v22548_v3 = vpack.c.bf16 %v26096_v22, %v26095_v38  ;;  %v26104_v55 = vsub.s32 1, %v26103_v2  ;;  %v26105_v63 = vsub.s32 0, %v26103_v2  ;;  %v26107_v2 = vld [vmem:[#allocation90_spill] sm:$0xff] }
 0xa81   : > { %26101 = vst [vmem:[#allocation277_spill] sm:$0xff] %v22556_v6  ;;  %26102 = vst [vmem:[#allocation278_spill] sm:$0xff] %v22558_v58 }
 0xa82   : > { %26097 = vst [vmem:[#allocation275_spill] sm:$0xff] %v22548_v3  ;;  %v11087_v3 = vld [vmem:[#allocation14] sm:$0x3] }
 0xa83   : > { %v11140_v30 = vrot.slane %v11087_v3, %v26104_v55 }
 0xad6   : > { %v11098_v24 = vpop.xlane.xlu0 %11097 }
 0xad7   : > { %v11108_v19 = vmax.f32 %v11098_v24, 1e-24  ;;  %v11104_v37 = vpop.xlane.xlu1 %11103 }
 0xad8   : > { %v11110_v54 = vmax.f32 %v11104_v37, 1e-24 }
 0xad9   : > { %15556 = vrsqrt.f32 %v11108_v19  ;;  %v11136_v19 = vrot.slane %v11087_v3, %v26105_v63 }
 0xada   : > { %v11101_v16 = vpop.xlane.xlu0 %11100  ;;  %15558 = vrsqrt.f32 %v11110_v54 }
 0xadb   : > { %v11109_v44 = vmax.f32 %v11101_v16, 1e-24  ;;  %v11107_v38 = vpop.xlane.xlu1 %11106 }
 0xadc   : > { %v11111_v22 = vmax.f32 %v11107_v38, 1e-24 }
 0xadd   : > { %15560 = vrsqrt.f32 %v11109_v44 }
 0xade   : > { %15562 = vrsqrt.f32 %v11111_v22 }
 0xae3   : > { %v15557_v25 = vpop.eup %15556 }
 0xae4   : > { %v15559_v20 = vpop.eup %15558  ;;  %v11117_v28 = vmul.f32 %v15557_v25, %v22088_v9  ;;  %v11116_v24 = vmul.f32 %v15557_v25, %v22086_v15  ;;  %v26106_v15 = vld [vmem:[#allocation129_spill] sm:$0xff] }
 0xae5   : > { %v11121_v37 = vmul.f32 %v15559_v20, %v22100_v17  ;;  %v11120_v16 = vmul.f32 %v15559_v20, %v22098_v34 }
 0xae6   : > { %v11125_v54 = vmul.f32 16.0, %v11117_v28  ;;  %v11124_v44 = vmul.f32 16.0, %v11116_v24 }
 0xae7   : > { %v15561_v38 = vpop.eup %15560  ;;  %v11129_v22 = vmul.f32 16.0, %v11121_v37  ;;  %v11128_v58 = vmul.f32 16.0, %v11120_v16 }
 0xae8   : > { %v15563_v6 = vpop.eup %15562  ;;  %v11118_v9 = vmul.f32 %v15561_v38, %v22092_v41  ;;  %v11119_v53 = vmul.f32 %v15561_v38, %v22094_v60  ;;  %v11144_v55 = vmul.f32 %v11140_v30, %v11125_v54  ;;  %v11143_v51 = vmul.f32 %v11136_v19, %v11124_v44 }
 0xae9   : > { %v11122_v25 = vmul.f32 %v15563_v6, %v26106_v15  ;;  %v11123_v3 = vmul.f32 %v15563_v6, %v26107_v2  ;;  %v11148_v63 = vmul.f32 %v11140_v30, %v11129_v22  ;;  %v11147_v17 = vmul.f32 %v11136_v19, %v11128_v58  ;;  %v26115_v2 = vld [vmem:[#allocation261_spill] sm:$0xff] }
 0xaea   : > { %v22572_v5 = vand.u32 4294901760, %v11144_v55  ;;  %v22574_v34 = vand.u32 4294901760, %v11143_v51  ;;  %v11127_v20 = vmul.f32 16.0, %v11119_v53  ;;  %v11126_v28 = vmul.f32 16.0, %v11118_v9  ;;  %v26112_v9 = vld [vmem:[#allocation260_spill] sm:$0xff] }
 0xaeb   : > { %v22576_v24 = vand.u32 4294901760, %v11148_v63  ;;  %v22578_v37 = vand.u32 4294901760, %v11147_v17  ;;  %v11131_v41 = vmul.f32 16.0, %v11123_v3  ;;  %v11130_v60 = vmul.f32 16.0, %v11122_v25 }
 0xaec   : > { %26108 = vst [vmem:[#allocation279_spill] sm:$0xff] %v22572_v5  ;;  %26109 = vst [vmem:[#allocation280_spill] sm:$0xff] %v22574_v34  ;;  %11572 = vmatprep.mubr.f32.mxu1 %v22572_v5  ;;  %v11146_v16 = vmul.f32 %v11140_v30, %v11127_v20  ;;  %v11145_v54 = vmul.f32 %v11136_v19, %v11126_v28  ;;  %v22582_v6 = vsub.f32 %v11144_v55, %v22572_v5 }
 0xaed   : > { %26110 = vst [vmem:[#allocation281_spill] sm:$0xff] %v22576_v24  ;;  %26111 = vst [vmem:[#allocation282_spill] sm:$0xff] %v22578_v37  ;;  %v22585_v58 = vsub.f32 %v11143_v51, %v22574_v34  ;;  %11574 = vmatmul.mubr.f32.vlgmr.msra.gmra.mrb[0].mxu1 %v22574_v34  ;;  %v11150_v53 = vmul.f32 %v11140_v30, %v11131_v41  ;;  %v11149_v44 = vmul.f32 %v11136_v19, %v11130_v60  ;;  %v26118_v34 = vld [vmem:[#allocation262_spill] sm:$0xff] }
 0xaee   : > { %v22589_v38 = vsub.f32 %v11148_v63, %v22576_v24  ;;  %v22592_v22 = vsub.f32 %v11147_v17, %v22578_v37  ;;  %15038 = vmatpush3.bf16.msra.mxu1 %v26112_v9  ;;  %v22595_v15 = vand.u32 4294901760, %v11146_v16  ;;  %v22597_v25 = vand.u32 4294901760, %v11145_v54 }
 0xaef   : > { %v11288_v55 = vand.u32 4294901760, %v22582_v6  ;;  %v24004_v51 = vand.u32 4294901760, %v22585_v58  ;;  %15040 = vmatprep.subr.bf16.mxu1 %v26115_v2  ;;  %v22602_v30 = vand.u32 4294901760, %v11150_v53  ;;  %v22604_v19 = vand.u32 4294901760, %v11149_v44 }
 0xaf0   : > { %26113 = vst [vmem:[#allocation260_spill] sm:$0xff] %v22595_v15  ;;  %26114 = vst [vmem:[#allocation283_spill] sm:$0xff] %v22597_v25  ;;  %11579 = vmatprep.mubr.f32.mxu1 %v22595_v15  ;;  %v22613_v20 = vsub.f32 %v11146_v16, %v22595_v15  ;;  %v22616_v28 = vsub.f32 %v11145_v54, %v22597_v25  ;;  %v26119_v15 = vld [vmem:[#allocation263_spill] sm:$0xff]  ;;  %v26120_v41 = vand.u32 4294901760, %v22589_v38 }
 0xaf1   : > { %26116 = vst [vmem:[#allocation261_spill] sm:$0xff] %v22602_v30  ;;  %v11289_v63 = vsub.f32 %v22582_v6, %v11288_v55  ;;  %v11295_v17 = vsub.f32 %v22585_v58, %v24004_v51  ;;  %11581 = vmatmul.mubr.f32.gmra.mrb[2].mxu1 %v22597_v25  ;;  %v22621_v60 = vsub.f32 %v11150_v53, %v22602_v30 }
 0xaf2   : > { %26117 = vst [vmem:[#allocation284_spill] sm:$0xff] %v22616_v28  ;;  %v22624_v3 = vsub.f32 %v11149_v44, %v22604_v19  ;;  %15042 = vmatpush3.bf16.msra.mxu1 %v26118_v34  ;;  %11586 = vmatprep.mubr.f32.mxu1 %v22576_v24  ;;  %v11303_v51 = vand.u32 4294901760, %v22613_v20  ;;  %v11309_v54 = vand.u32 4294901760, %v22616_v28  ;;  %v11319_v53 = vsub.f32 %v22589_v38, %v26120_v41  ;;  %v26123_v41 = vld [vmem:[#allocation264_spill] sm:$0xff] }
 0xaf3   : > { %v11290_v5 = vand.u32 4294901760, %v11289_v63  ;;  %v11296_v16 = vand.u32 4294901760, %v11295_v17  ;;  %15044 = vmatprep.subr.bf16.mxu1 %v26119_v15  ;;  %v26121_v17 = vand.u32 4294901760, %v22592_v22  ;;  %v26122_v34 = vpack.c.bf16 %v22155_v62, %v22152_v57  ;;  %v26126_v15 = vld [vmem:[#allocation265_spill] sm:$0xff] }
 0xaf4   : > { %v11304_v44 = vsub.f32 %v22613_v20, %v11303_v51  ;;  %v11310_v63 = vsub.f32 %v22616_v28, %v11309_v54  ;;  %v26125_v28 = vand.u32 4294901760, %v22621_v60 }
 0xaf5   : > { %11291 = vmatprep.mubr.f32.mxu0 %v11290_v5  ;;  %11588 = vmatmul.mubr.f32.gmra.mrb[4].mxu1 %v22578_v37  ;;  %v11325_v24 = vsub.f32 %v22592_v22, %v26121_v17  ;;  %v11320_v37 = vand.u32 4294901760, %v11319_v53  ;;  %v26129_v53 = vld [vmem:[#allocation266_spill] sm:$0xff] }
 0xaf6   : > { %11297 = vmatmul.mubr.f32.vlgmr.msra.gmra.mrb[0].mxu0 %v11296_v16  ;;  %15046 = vmatpush3.bf16.msra.mxu1 %v26123_v41  ;;  %v11305_v5 = vand.u32 4294901760, %v11304_v44  ;;  %v11311_v25 = vand.u32 4294901760, %v11310_v63  ;;  %v26124_v16 = vpack.c.bf16 %v22169_v7, %v22164_v39  ;;  %v11334_v17 = vsub.f32 %v22621_v60, %v26125_v28 }
 0xaf7   : > { %15006 = vmatpush3.bf16.msra.mxu0 %v26122_v34  ;;  %11593 = vmatprep.mubr.f32.mxu1 %v22602_v30  ;;  %v11326_v34 = vand.u32 4294901760, %v11325_v24  ;;  %v26127_v44 = vand.u32 4294901760, %v22624_v3  ;;  %v26128_v30 = vpack.c.bf16 %v22181_v11, %v22176_v10 }
 0xaf8   : > { %15008 = vmatprep.subr.bf16.mxu0 %v26124_v16  ;;  %11306 = vmatprep.mubr.f32.mxu0 %v11305_v5  ;;  %v11335_v28 = vand.u32 4294901760, %v11334_v17  ;;  %v26130_v5 = vpack.c.bf16 %v22239_v46, %v22234_v26  ;;  %v26132_v16 = vpack.c.bf16 %v22251_v61, %v22243_v48  ;;  %v26137_v17 = vld [vmem:[#allocation270_spill] sm:$0xff] }
 0xaf9   : > { %15048 = vmatprep.subr.bf16.mxu1 %v26126_v15  ;;  %11595 = vmatmul.mubr.f32.gmra.mrb[6].mxu1 %v22604_v19  ;;  %v11340_v63 = vsub.f32 %v22624_v3, %v26127_v44  ;;  %v26133_v44 = vld [vmem:[#allocation268_spill] sm:$0xff] }
 0xafa   : > { %11312 = vmatmul.mubr.f32.gmra.mrb[2].mxu0 %v11311_v25  ;;  %15050 = vmatpush3.bf16.msra.mxu1 %v26129_v53  ;;  %v26131_v25 = vld [vmem:[#allocation267_spill] sm:$0xff] }
 0xafb   : > { %15010 = vmatpush3.bf16.msra.mxu0 %v26128_v30  ;;  %11864 = vmatprep.mubr.f32.mxu1 %v11288_v55  ;;  %v11341_v24 = vand.u32 4294901760, %v11340_v63  ;;  %v26134_v55 = vpack.c.bf16 %v22267_v1, %v22262_v29  ;;  %v26136_v30 = vpack.c.bf16 %v22302_v18, %v22293_v43  ;;  %v26139_v63 = vpack.c.bf16 %v22359_v23, %v22349_v32 }
 0xafc   : > { %11321 = vmatprep.mubr.f32.mxu0 %v11320_v37  ;;  %15012 = vmatprep.subr.bf16.mxu0 %v26130_v5  ;;  %v26135_v37 = vld [vmem:[#allocation269_spill] sm:$0xff]  ;;  %v26144_v32 = vpack.c.bf16 %v22439_v14, %v22437_v35  ;;  %v26147_v23 = vand.u32 4294901760, %v22147_v0  ;;  %v26153_v0 = vld [vmem:[#allocation263_spill] sm:$0xff]  ;;  %v26154_v14 = vand.u32 4294901760, %v22164_v39 }
 0xafd   : > { %15052 = vmatprep.subr.bf16.mxu1 %v26131_v25  ;;  %v26182_v5 = vld [vmem:[#allocation281_spill] sm:$0xff] }
 0xafe   : > { %11327 = vmatmul.mubr.f32.gmra.mrb[4].mxu0 %v11326_v34  ;;  %15054 = vmatpush3.bf16.msra.mxu1 %v26133_v44  ;;  %v26138_v34 = vpack.c.bf16 %v22339_v45, %v22335_v56  ;;  %v26142_v45 = vpack.c.bf16 %v22428_v36, %v22425_v8  ;;  %v26143_v56 = vand.u32 4294901760, %v22585_v58  ;;  %v26150_v36 = vld [vmem:[#allocation262_spill] sm:$0xff]  ;;  %v26151_v8 = vand.u32 4294901760, %v22152_v57 }
 0xaff   : > { %15014 = vmatpush3.bf16.msra.mxu0 %v26132_v16  ;;  %11336 = vmatprep.mubr.f32.mxu0 %v11335_v28  ;;  %v26140_v28 = vpack.c.bf16 %v22374_v52, %v22371_v50  ;;  %v26149_v52 = vand.u32 4294901760, %v22589_v38  ;;  %v26158_v57 = vand.u32 4294901760, %v22176_v10  ;;  %v26165_v10 = vand.u32 4294901760, %v22243_v48 }
 0xb00   : > { %15016 = vmatprep.subr.bf16.mxu0 %v26134_v55  ;;  %15056 = vmatprep.subr.bf16.mxu1 %v26135_v37  ;;  %v26169_v48 = vand.u32 4294901760, %v22293_v43  ;;  %v26173_v43 = vld [vmem:[#allocation273_spill] sm:$0xff] }
 0xb02   : > { %11342 = vmatmul.mubr.f32.gmra.mrb[6].mxu0 %v11341_v24  ;;  %15058 = vmatpush3.bf16.msra.mxu1 %v26137_v17 }
 0xb03   : > { %15018 = vmatpush3.bf16.msra.mxu0 %v26136_v30  ;;  %11730 = vmatprep.mubr.f32.mxu0 %v22582_v6  ;;  %v26141_v6 = vpack.c.bf16 %v22395_v59, %v22392_v40  ;;  %v26145_v59 = vpack.c.bf16 %v22454_v21, %v22451_v12  ;;  %v26146_v40 = vand.u32 4294901760, %v22145_v33  ;;  %v26152_v33 = vand.u32 4294901760, %v22155_v62 }
 0xb04   : > { %15020 = vmatprep.subr.bf16.mxu0 %v26138_v34  ;;  %15060 = vmatprep.subr.bf16.mxu1 %v22470_v13  ;;  %v26155_v12 = vand.u32 4294901760, %v22169_v7  ;;  %v26159_v62 = vand.u32 4294901760, %v22181_v11  ;;  %v26160_v7 = vand.u32 4294901760, %v22234_v26  ;;  %v26166_v11 = vand.u32 4294901760, %v22251_v61  ;;  %v12412_v34 = vld [vmem:[#allocation17] ss:$0 sm:$0xff] }
 0xb05   : > { %v15067_v50 = vpack.c.bf16 %v26147_v23, %v26146_v40  ;;  %v15069_v35 = vpack.c.bf16 %v26152_v33, %v26151_v8  ;;  %v26170_v61 = vand.u32 4294901760, %v22302_v18  ;;  %v26174_v18 = vld [vmem:[#allocation274_spill] sm:$0xff] }
 0xb06   : > { %15062 = vmatpush3.bf16.msra.mxu1 %v22476_v27  ;;  %v15071_v21 = vpack.c.bf16 %v26155_v12, %v26154_v14  ;;  %v15073_v39 = vpack.c.bf16 %v26159_v62, %v26158_v57  ;;  %v15077_v26 = vpack.c.bf16 %v26166_v11, %v26165_v10 }
 0xb07   : > { %15022 = vmatpush3.bf16.msra.mxu0 %v26139_v63  ;;  %15064 = vmatprep.subr.bf16.mxu1 %v22481_v4 }
 0xb08   : > { %15024 = vmatprep.subr.bf16.mxu0 %v26140_v28 }
 0xb0a   : > { %15066 = vmatpush3.bf16.msra.mxu1 %v22483_v31 }
 0xb0b   : > { %15026 = vmatpush3.bf16.msra.mxu0 %v26141_v6  ;;  %15100 = vmatprep.subr.bf16.mxu1 %v22217_v47  ;;  %v26148_v47 = vpack.c.bf16 %v22467_v42, %v22465_v49  ;;  %v26156_v42 = vand.u32 4294901760, %v22592_v22  ;;  %v26157_v49 = vand.u32 4294901760, %v22621_v60 }
 0xb0c   : > { %15028 = vmatprep.subr.bf16.mxu0 %v26142_v45 }
 0xb0d   : > { %11868 = vmatmul.mubr.f32.vlgmr.msra.gmra.mrb[8].mxu1 %v26143_v56 }
 0xb0e   : > { %11875 = vmatprep.mubr.f32.mxu1 %v11303_v51  ;;  %15102 = vmatpush3.bf16.msra.mxu1 %v26112_v9  ;;  %v26162_v51 = vld [vmem:[#allocation284_spill] sm:$0xff] }
 0xb0f   : > { %15030 = vmatpush3.bf16.msra.mxu0 %v26144_v32  ;;  %15104 = vmatprep.subr.bf16.mxu1 %v26115_v2  ;;  %v26163_v2 = vand.u32 4294901760, %v22624_v3 }
 0xb10   : > { %15032 = vmatprep.subr.bf16.mxu0 %v26145_v59 }
 0xb11   : > { %11879 = vmatmul.mubr.f32.gmra.mrb[10].mxu1 %v11309_v54 }
 0xb12   : > { %11886 = vmatprep.mubr.f32.mxu1 %v26149_v52  ;;  %15106 = vmatpush3.bf16.msra.mxu1 %v26150_v36 }
 0xb13   : > { %15034 = vmatpush3.bf16.msra.mxu0 %v26148_v47  ;;  %15108 = vmatprep.subr.bf16.mxu1 %v26153_v0 }
 0xb14   : > { %15068 = vmatprep.subr.bf16.mxu0 %v15067_v50 }
 0xb15   : > { %11890 = vmatmul.mubr.f32.gmra.mrb[12].mxu1 %v26156_v42 }
 0xb16   : > { %11733 = vmatmul.mubr.f32.vlgmr.msra.gmra.mrb[8].mxu0 %v22585_v58  ;;  %11897 = vmatprep.mubr.f32.mxu1 %v26157_v49  ;;  %v26161_v58 = vand.u32 4294901760, %v22239_v46  ;;  %v26167_v46 = vand.u32 4294901760, %v22262_v29  ;;  %v26171_v29 = vld [vmem:[#allocation271_spill] sm:$0xff] }
 0xb17   : > { %11739 = vmatprep.mubr.f32.mxu0 %v22613_v20  ;;  %15070 = vmatpush3.bf16.msra.mxu0 %v15069_v35  ;;  %v26164_v20 = vld [vmem:[#allocation279_spill] sm:$0xff] }
 0xb18   : > { %15110 = vmatpush3.bf16.msra.mxu1 %v26123_v41  ;;  %15072 = vmatprep.subr.bf16.mxu0 %v15071_v21  ;;  %v15075_v9 = vpack.c.bf16 %v26161_v58, %v26160_v7  ;;  %v26178_v41 = vld [vmem:[#allocation260_spill] sm:$0xff] }
 0xb19   : > { %15112 = vmatprep.subr.bf16.mxu1 %v26126_v15  ;;  %11901 = vmatmul.mubr.f32.gmra.mrb[14].mxu1 %v26163_v2  ;;  %v26168_v15 = vand.u32 4294901760, %v22267_v1  ;;  %v26172_v1 = vld [vmem:[#allocation272_spill] sm:$0xff] }
 0xb1a   : > { %11742 = vmatmul.mubr.f32.gmra.mrb[10].mxu0 %v26162_v51  ;;  %12192 = vmatprep.mubr.f32.mxu1 %v26164_v20 }
 0xb1b   : > { %11748 = vmatprep.mubr.f32.mxu0 %v22589_v38  ;;  %15074 = vmatpush3.bf16.msra.mxu0 %v15073_v39  ;;  %v15079_v54 = vpack.c.bf16 %v26168_v15, %v26167_v46  ;;  %v15081_v38 = vpack.c.bf16 %v26170_v61, %v26169_v48 }
 0xb1c   : > { %15114 = vmatpush3.bf16.msra.mxu1 %v26129_v53  ;;  %15076 = vmatprep.subr.bf16.mxu0 %v15075_v9  ;;  %v26180_v53 = vld [vmem:[#allocation283_spill] sm:$0xff] }
 0xb1d   : > { %15116 = vmatprep.subr.bf16.mxu1 %v26131_v25 }
 0xb1e   : > { %11751 = vmatmul.mubr.f32.gmra.mrb[12].mxu0 %v22592_v22  ;;  %v26175_v22 = vld [vmem:[#allocation275_spill] sm:$0xff] }
 0xb1f   : > { %11757 = vmatprep.mubr.f32.mxu0 %v22621_v60  ;;  %15078 = vmatpush3.bf16.msra.mxu0 %v15077_v26  ;;  %v26177_v60 = vld [vmem:[#allocation276_spill] sm:$0xff] }
 0xb20   : > { %15118 = vmatpush3.bf16.msra.mxu1 %v26133_v44  ;;  %15080 = vmatprep.subr.bf16.mxu0 %v15079_v54 }
 0xb21   : > { %15120 = vmatprep.subr.bf16.mxu1 %v26135_v37 }
 0xb22   : > { %11760 = vmatmul.mubr.f32.gmra.mrb[14].mxu0 %v22624_v3  ;;  %v26176_v3 = vld [vmem:[#allocation280_spill] sm:$0xff] }
 0xb23   : > { %12067 = vmatprep.mubr.f32.mxu0 %v26164_v20  ;;  %15082 = vmatpush3.bf16.msra.mxu0 %v15081_v38 }
 0xb24   : > { %15122 = vmatpush3.bf16.msra.mxu1 %v26137_v17  ;;  %15084 = vmatprep.subr.bf16.mxu0 %v26171_v29 }
 0xb25   : > { %15124 = vmatprep.subr.bf16.mxu1 %v22470_v13  ;;  %v26179_v13 = vld [vmem:[#allocation277_spill] sm:$0xff] }
 0xb27   : > { %15086 = vmatpush3.bf16.msra.mxu0 %v26172_v1 }
 0xb28   : > { %15126 = vmatpush3.bf16.msra.mxu1 %v22476_v27  ;;  %15088 = vmatprep.subr.bf16.mxu0 %v26173_v43  ;;  %v26181_v27 = vld [vmem:[#allocation278_spill] sm:$0xff] }
 0xb29   : > { %15128 = vmatprep.subr.bf16.mxu1 %v22481_v4  ;;  %v26183_v4 = vld [vmem:[#allocation282_spill] sm:$0xff] }
 0xb2b   : > { %15090 = vmatpush3.bf16.msra.mxu0 %v26174_v18 }
 0xb2c   : > { %15130 = vmatpush3.bf16.msra.mxu1 %v22483_v31  ;;  %15092 = vmatprep.subr.bf16.mxu0 %v26175_v22  ;;  %v26184_v31 = vld [vmem:[#allocation261_spill] sm:$0xff] }
 0xb2f   : > { %12194 = vmatmul.mubr.f32.vlgmr.msra.gmra.mrb[16].mxu1 %v26176_v3  ;;  %15094 = vmatpush3.bf16.msra.mxu0 %v26177_v60 }
 0xb30   : > { %12199 = vmatprep.mubr.f32.mxu1 %v26178_v41  ;;  %15096 = vmatprep.subr.bf16.mxu0 %v26179_v13 }
 0xb33   : > { %12201 = vmatmul.mubr.f32.gmra.mrb[18].mxu1 %v26180_v53  ;;  %15098 = vmatpush3.bf16.msra.mxu0 %v26181_v27 }
 0xb34   : > { %12206 = vmatprep.mubr.f32.mxu1 %v26182_v5 }
 0xb36   : > { %12069 = vmatmul.mubr.f32.vlgmr.msra.gmra.mrb[16].mxu0 %v26176_v3 }
 0xb37   : > { %12208 = vmatmul.mubr.f32.gmra.mrb[20].mxu1 %v26183_v4  ;;  %12074 = vmatprep.mubr.f32.mxu0 %v26178_v41 }
 0xb38   : > { %12213 = vmatprep.mubr.f32.mxu1 %v26184_v31 }
 0xb3a   : > { %12076 = vmatmul.mubr.f32.gmra.mrb[18].mxu0 %v26180_v53 }
 0xb3b   : > { %12215 = vmatmul.mubr.f32.gmra.mrb[22].mxu1 %v22604_v19  ;;  %12081 = vmatprep.mubr.f32.mxu0 %v26182_v5 }
 0xb3e   : > { %12083 = vmatmul.mubr.f32.gmra.mrb[20].mxu0 %v26183_v4 }
 0xb3f   : > { %12088 = vmatprep.mubr.f32.mxu0 %v26184_v31 }
 0xb42   : > { %12090 = vmatmul.mubr.f32.gmra.mrb[22].mxu0 %v22604_v19 }
 0xbc0   : > { %v12687_v25 = vpop.f32.mrb[0].mxu1 }
 0xbc1   : > { %v12688_v24 = vpop.f32.mrb[1].mxu1 }
 0xbc2   : > { %v12689_v16 = vadd.f32 %v12688_v24, %v12687_v25 }
 0xbc4   : > { %v12690_v44 = vpop.f32.mrb[2].mxu1 }
 0xbc5   : > { %v12691_v55 = vpop.f32.mrb[3].mxu1 }
 0xbc6   : > { %v12692_v37 = vadd.f32 %v12691_v55, %v12690_v44 }
 0xbc8   : > { %v12693_v17 = vpop.f32.mrb[4].mxu1 }
 0xbc9   : > { %v12643_v30 = vpop.f32.mrb[0].mxu0  ;;  %v12694_v28 = vpop.f32.mrb[5].mxu1 }
 0xbca   : > { %v12644_v63 = vpop.f32.mrb[1].mxu0  ;;  %v12695_v45 = vadd.f32 %v12694_v28, %v12693_v17 }
 0xbcb   : > { %v12645_v6 = vadd.f32 %v12644_v63, %v12643_v30 }
 0xbcc   : > { %v12696_v59 = vpop.f32.mrb[6].mxu1 }
 0xbcd   : > { %v11299_v56 = vadd.f32 %v12645_v6, %v12412_v34  ;;  %v12646_v32 = vpop.f32.mrb[2].mxu0  ;;  %v12697_v23 = vpop.f32.mrb[7].mxu1 }
 0xbce   : > { %v12647_v40 = vpop.f32.mrb[3].mxu0  ;;  %v12698_v19 = vadd.f32 %v12697_v23, %v12696_v59 }
 0xbcf   : > { %v12648_v50 = vadd.f32 %v12647_v40, %v12646_v32  ;;  %v11576_v47 = vadd.f32 %v12689_v16, %v11299_v56 }
 0xbd1   : > { %v11314_v52 = vadd.f32 %v12648_v50, %v12412_v34  ;;  %v12649_v36 = vpop.f32.mrb[4].mxu0 }
 0xbd2   : > { %v12650_v8 = vpop.f32.mrb[5].mxu0 }
 0xbd3   : > { %v11583_v33 = vadd.f32 %v12692_v37, %v11314_v52  ;;  %v12651_v35 = vadd.f32 %v12650_v8, %v12649_v36 }
 0xbd5   : > { %v11329_v0 = vadd.f32 %v12651_v35, %v12412_v34  ;;  %v12652_v14 = vpop.f32.mrb[6].mxu0 }
 0xbd6   : > { %v12653_v12 = vpop.f32.mrb[7].mxu0 }
 0xbd7   : > { %v11590_v21 = vadd.f32 %v12695_v45, %v11329_v0  ;;  %v12654_v42 = vadd.f32 %v12653_v12, %v12652_v14 }
 0xbd9   : > { %v11344_v49 = vadd.f32 %v12654_v42, %v12412_v34 }
 0xbdb   : > { %v11597_v57 = vadd.f32 %v12698_v19, %v11344_v49 }
 0xbe0   : > { %v12775_v62 = vpop.f32.mrb[8].mxu1 }
 0xbe1   : > { %v12776_v39 = vpop.f32.mrb[9].mxu1 }
 0xbe2   : > { %v12777_v7 = vadd.f32 %v12776_v39, %v12775_v62 }
 0xbe4   : > { %v12778_v58 = vpop.f32.mrb[10].mxu1 }
 0xbe5   : > { %v12779_v9 = vpop.f32.mrb[11].mxu1 }
 0xbe6   : > { %v12780_v51 = vadd.f32 %v12779_v9, %v12778_v58 }
 0xbe8   : > { %v12781_v20 = vpop.f32.mrb[12].mxu1 }
 0xbe9   : > { %v12731_v2 = vpop.f32.mrb[8].mxu0  ;;  %v12782_v11 = vpop.f32.mrb[13].mxu1 }
 0xbea   : > { %v12732_v10 = vpop.f32.mrb[9].mxu0  ;;  %v12783_v46 = vadd.f32 %v12782_v11, %v12781_v20 }
 0xbeb   : > { %v12733_v26 = vadd.f32 %v12732_v10, %v12731_v2 }
 0xbec   : > { %v12784_v48 = vpop.f32.mrb[14].mxu1 }
 0xbed   : > { %v11735_v15 = vadd.f32 %v12733_v26, %v11576_v47  ;;  %v12734_v54 = vpop.f32.mrb[10].mxu0  ;;  %v12785_v38 = vpop.f32.mrb[15].mxu1 }
 0xbee   : > { %v12735_v61 = vpop.f32.mrb[11].mxu0  ;;  %v12786_v1 = vadd.f32 %v12785_v38, %v12784_v48 }
 0xbef   : > { %v12736_v29 = vadd.f32 %v12735_v61, %v12734_v54  ;;  %v11870_v43 = vadd.f32 %v12777_v7, %v11735_v15 }
 0xbf1   : > { %v11744_v18 = vadd.f32 %v12736_v29, %v11583_v33  ;;  %v12737_v22 = vpop.f32.mrb[12].mxu0 }
 0xbf2   : > { %v12738_v3 = vpop.f32.mrb[13].mxu0 }
 0xbf3   : > { %v12739_v60 = vadd.f32 %v12738_v3, %v12737_v22  ;;  %v11881_v41 = vadd.f32 %v12780_v51, %v11744_v18 }
 0xbf5   : > { %v11753_v13 = vadd.f32 %v12739_v60, %v11590_v21  ;;  %v12740_v53 = vpop.f32.mrb[14].mxu0 }
 0xbf6   : > { %v12741_v27 = vpop.f32.mrb[15].mxu0 }
 0xbf7   : > { %v12742_v5 = vadd.f32 %v12741_v27, %v12740_v53  ;;  %v11892_v4 = vadd.f32 %v12783_v46, %v11753_v13 }
 0xbf9   : > { %v11762_v31 = vadd.f32 %v12742_v5, %v11597_v57 }
 0xbfb   : > { %v11903_v25 = vadd.f32 %v12786_v1, %v11762_v31 }
 0xc02   : > { %v12863_v24 = vpop.f32.mrb[16].mxu1 }
 0xc03   : > { %v12864_v16 = vpop.f32.mrb[17].mxu1 }
 0xc04   : > { %v12865_v44 = vadd.f32 %v12864_v16, %v12863_v24 }
 0xc06   : > { %v12866_v55 = vpop.f32.mrb[18].mxu1 }
 0xc07   : > { %v12867_v37 = vpop.f32.mrb[19].mxu1 }
 0xc08   : > { %v12868_v30 = vadd.f32 %v12867_v37, %v12866_v55 }
 0xc09   : > { %v12819_v17 = vpop.f32.mrb[16].mxu0 }
 0xc0a   : > { %v12869_v34 = vpop.f32.mrb[20].mxu1  ;;  %v12820_v63 = vpop.f32.mrb[17].mxu0 }
 0xc0b   : > { %v12870_v28 = vpop.f32.mrb[21].mxu1  ;;  %v12821_v6 = vadd.f32 %v12820_v63, %v12819_v17 }
 0xc0c   : > { %v12871_v45 = vadd.f32 %v12870_v28, %v12869_v34 }
 0xc0d   : > { %v12071_v56 = vadd.f32 %v12821_v6, %v11870_v43  ;;  %v12822_v32 = vpop.f32.mrb[18].mxu0 }
 0xc0e   : > { %v12872_v59 = vpop.f32.mrb[22].mxu1  ;;  %v12823_v40 = vpop.f32.mrb[19].mxu0 }
 0xc0f   : > { %v12873_v23 = vpop.f32.mrb[23].mxu1  ;;  %v12196_v50 = vadd.f32 %v12865_v44, %v12071_v56  ;;  %v12824_v19 = vadd.f32 %v12823_v40, %v12822_v32 }
 0xc10   : > { %v12874_v47 = vadd.f32 %v12873_v23, %v12872_v59 }
 0xc11   : > { %12220 = vst [vmem:[#allocation18] sm:$0xff] %v12196_v50  ;;  %v12078_v52 = vadd.f32 %v12824_v19, %v11881_v41  ;;  %v12825_v36 = vpop.f32.mrb[20].mxu0 }
 0xc12   : > { %v12826_v8 = vpop.f32.mrb[21].mxu0 }
 0xc13   : > { %v12203_v33 = vadd.f32 %v12868_v30, %v12078_v52  ;;  %v12827_v35 = vadd.f32 %v12826_v8, %v12825_v36 }
 0xc15   : > { %12221 = vst [vmem:[#allocation18 + $0x8] sm:$0xff] %v12203_v33  ;;  %v12085_v0 = vadd.f32 %v12827_v35, %v11892_v4  ;;  %v12828_v14 = vpop.f32.mrb[22].mxu0 }
 0xc16   : > { %v12829_v12 = vpop.f32.mrb[23].mxu0 }
 0xc17   : > { %v12210_v21 = vadd.f32 %v12871_v45, %v12085_v0  ;;  %v12830_v42 = vadd.f32 %v12829_v12, %v12828_v14 }
 0xc19   : > { %12222 = vst [vmem:[#allocation18 + $0x10] sm:$0xff] %v12210_v21  ;;  %v12092_v49 = vadd.f32 %v12830_v42, %v11903_v25 }
 0xc1b   : > { %v12217_v57 = vadd.f32 %v12874_v47, %v12092_v49 }
 0xc1d   : > { %12223 = vst [vmem:[#allocation18 + $0x18] sm:$0xff] %v12217_v57 }
 0xc1e PF: > { %p15450_p7 = scmp.eq.s32.totalorder %s15998_s15, 1  ;;  %s15924_s11 = smov [#allocation18]  }
 0xc1f   : > { %s12230_s1 = sshll.u32 %s15924_s11, 4  ;;  %s12231_s1 = int_to_ptr.vmem [resolvable:$true] %s12230_s1 }
 0xc20   : > { %s15822_s18 = scalar_lea.vmem %s12231_s1, 512  ;;  %p15829_p11 = scmp.lt.s32.totalorder %s12231_s1, %s12231_s1 }
 0xc21   : > { %p15823_p3 = scmp.ne.s32.totalorder %s12231_s1, %s15822_s18  ;;  %p15830_p13 = scmp.lt.s32.totalorder %s15822_s18, %s15822_s18 }
 0xc23   : > { %p15824_p10 = pnand %p15823_p3, %p15450_p7  ;;  %p15831_p6 = por %p15830_p13, %p15829_p11 }
 0xc25   : > { %p15825_p0 = pneg %p15824_p10 }
 0xc27   : > { %p15832_p2 = pnand %p15831_p6, %p15825_p0 }
 0xc29   : > { %15835 = shalt.err (!%p15832_p2)
}
 0xc2a   : > { %s26185_s25 = sld [smem:[#allocation289_spill]] }
 0xc30   : > { %s15836_s29 = scalar_lea.hbm %s26185_s25, 512 }
 0xc31   : > { %p15837_p5 = scmp.ne.s32.totalorder %s26185_s25, %s15836_s29  ;;  %p15842_p8 = scmp.lt.u32.totalorder %s15836_s29, %s26185_s25 }
 0xc33   : > { %p15838_p4 = pnand %p15837_p5, %p15450_p7 }
 0xc35   : > { %p15839_p1 = pneg %p15838_p4 }
 0xc37   : > { %p15844_p12 = pnand %p15842_p8, %p15839_p1 }
 0xc39   : > { %15847 = shalt.err (!%p15844_p12)
}
 0xc3a   : > { %s15925_s20 = smov 128   ;;  %s15926_s30 = smov 8  }
 0xc3b   : > { %15405 = dma.vmem_to_hbm [thread:$0]  (%p15450_p7), %s12231_s1, 512, %s26185_s25, [#allocation5], %s15925_s20, %s15925_s20, %s15926_s30  }
 0xc3c   : > { %15889 = dma.done.wait (%p15450_p7), [#allocation5], 512  }
 0xc3d   : > { %15891 = vsyncadd (%p15450_p7), [#allocation5], 4294966784 }
 0xc3e PF: > { %s26186_s12 = sld [smem:[#allocation27_spill]]  ;;  %s26187_s4 = sld [smem:[#allocation26_spill]] }
 0xc3f   : > { %s26188_s11 = sld [smem:[#allocation28_spill]]  ;;  %s26189_s30 = smov %s15898_s10 }
 0xc44   : > { %p26_p9 = scmp.ge.s32.totalorder %s26186_s12, 4   ;;  %s26190_s10 = smov %s26187_s4 }
 0xc46   :  { %28 = sbr.rel (!%p26_p9) target bundleno = 15 (0xf), region = 150 }
 0xc4d   :  { %12246 = vsyncpa [#allocation4], 1 }
 0xc4e   :  { %12248 = vsyncpa [#allocation4 + $0x1], 1 }
 0xc4f   :  { %12249 = vsyncpa [#allocation7], 1 }
 0xc50   :  { %12251 = vsyncpa [#allocation7 + $0x1], 1 }
 0xc51   :  { %12252 = vsyncpa [#allocation10], 1 }
 0xc52   :  { %12254 = vsyncpa [#allocation10 + $0x1], 1 }
 0xc53   :  { %12255 = vsyncpa [#allocation13], 1 }
 0xc54   :  { %12256 = vsyncpa [#allocation16], 1 }
 0xc55   :  { %12257 = vsyncpa [#allocation5], 1 }
 0xc56   :  { %12259 = vsyncpa [#allocation5 + $0x1], 1 }

</bundles_post_ra>
